<compile_context>
chip_gen: v5e
topology: v5e:2x2
jax: 0.10.0
libtpu: 0.0.40
codegen_flags: <defaults>
</compile_context>

<pallas_src>
import functools
import math

import numpy as np
import jax
import jax.numpy as jnp
from jax.experimental import pallas as pl
from jax.experimental.pallas import tpu as pltpu

# ---------------- small, architecture-faithful config ----------------
VOCAB = 128
D_MODEL = 64
N_HEADS = 4
D_HEAD = 16            # N_HEADS * D_HEAD == D_MODEL
D_FF = 128
N_ENC_LAYERS = 2
N_DEC_LAYERS = 2
REL_BUCKETS = 8
REL_MAX_DIST = 16
EPS = 1e-6
NEG_INF = -1e9
PAD_ID = 0             # pad token == decoder_start_token_id (T5 convention)


# ============================== fused Pallas kernel ==============================
def _fused_t5_kernel(
    enc_ids_ref, dec_ids_ref, labels_ref, enc_mask_ref,
    embed_ref, enc_pos_ref, dec_pos_ref,
    e_ln1_ref, e_wq_ref, e_wk_ref, e_wv_ref, e_wo_ref,
    e_ln2_ref, e_wffi_ref, e_wffo_ref, e_fln_ref,
    d_ln1_ref, d_wq_ref, d_wk_ref, d_wv_ref, d_so_ref,
    d_ln2_ref, d_cq_ref, d_ck_ref, d_cv_ref, d_co_ref,
    d_ln3_ref, d_wffi_ref, d_wffo_ref, d_fln_ref,
    lm_head_ref,
    logits_ref, loss_ref,
):
    f32, bf16 = jnp.float32, jnp.bfloat16
    B, Se = enc_mask_ref.shape
    Sd = dec_ids_ref.shape[0] // B
    D, H, Dh = D_MODEL, N_HEADS, D_HEAD

    def rmsnorm(x, w):                      # x: [N, D] f32, w: [1, D] f32  (T5 LayerNorm)
        var = jnp.mean(x * x, axis=-1, keepdims=True)
        return x * jax.lax.rsqrt(var + EPS) * w

    def mm(x, w):                           # weights already bf16; f32 accumulation on MXU
        return jnp.dot(x.astype(bf16), w, preferred_element_type=f32)

    def softmax(sc):
        m = jnp.max(sc, axis=-1, keepdims=True)
        p = jnp.exp(sc - m)
        return p * pl.reciprocal(jnp.sum(p, axis=-1, keepdims=True), approx=True)

    def split_heads(x, b, seq):
        # [b*seq, D] (bf16) -> [H*b, seq, Dh]  head-major merged batch dim, n = h*b + b_idx.
        parts = [x[:, h * Dh:(h + 1) * Dh].reshape(b, seq, Dh) for h in range(H)]
        return jnp.concatenate(parts, axis=0)

    def attention(qh, kh, vh, wo, bias, b, sq):
        # qh: [H*b, sq, Dh], kh/vh: [H*b, sk, Dh], bias additive [H*b, {1,sq}, sk].
        # T5 does NOT scale scores by 1/sqrt(d_head).  One einsum / softmax / einsum for
        # ALL heads and batches (merged batch dim).
        sc = jnp.einsum('nqd,nkd->nqk', qh, kh, preferred_element_type=f32) + bias
        p = softmax(sc).astype(bf16)
        ctx = jnp.einsum('nqk,nkd->nqd', p, vh, preferred_element_type=f32)
        ctx = ctx.reshape(H, b, sq, Dh)
        # concat(ctx_h) @ Wo == sum_h ctx_h @ Wo[h*Dh:(h+1)*Dh, :]   (sublane-aligned row slices)
        out = mm(ctx[0].reshape(b * sq, Dh), wo[0:Dh, :])
        for h in range(1, H):
            out = out + mm(ctx[h].reshape(b * sq, Dh), wo[h * Dh:(h + 1) * Dh, :])
        return out

    def embed_lookup(ids_ref, n_tok):
        ids = ids_ref[...]                                           # [n_tok, 1] int32
        iota = jax.lax.broadcasted_iota(jnp.int32, (n_tok, VOCAB), 1)
        onehot = (iota == ids).astype(bf16)                          # exact in bf16
        return jnp.dot(onehot, embed_ref[...], preferred_element_type=f32)

    # ---- additive biases, expanded ONCE (head-major merged batch dim) ----
    mask_bias = (1.0 - enc_mask_ref[...]) * NEG_INF                  # [B, Se]
    enc_bias = (enc_pos_ref[...][:, None, :, :]                      # [H,1,Se,Se]
                + mask_bias[None, :, None, :]).reshape(H * B, Se, Se)
    dec_bias = jnp.broadcast_to(dec_pos_ref[...][:, None, :, :],
                                (H, B, Sd, Sd)).reshape(H * B, Sd, Sd)
    cross_bias = jnp.broadcast_to(mask_bias[None, :, None, :],
                                  (H, B, 1, Se)).reshape(H * B, 1, Se)

    # ----------------------------- encoder -----------------------------
    x = embed_lookup(enc_ids_ref, B * Se)                            # [B*Se, D] f32
    for l in range(N_ENC_LAYERS):
        hb = rmsnorm(x, e_ln1_ref[l]).astype(bf16)
        qh = split_heads(mm(hb, e_wq_ref[l]).astype(bf16), B, Se)
        kh = split_heads(mm(hb, e_wk_ref[l]).astype(bf16), B, Se)
        vh = split_heads(mm(hb, e_wv_ref[l]).astype(bf16), B, Se)
        x = x + attention(qh, kh, vh, e_wo_ref[l], enc_bias, B, Se)
        hb = rmsnorm(x, e_ln2_ref[l]).astype(bf16)
        ff = mm(hb, e_wffi_ref[l])                                   # [B*Se, 2*D_FF]
        g = jax.nn.gelu(ff[:, :D_FF]) * ff[:, D_FF:]                 # 128-aligned split
        x = x + mm(g, e_wffo_ref[l])
    enc_out = rmsnorm(x, e_fln_ref[...])

    # ----------------------------- decoder -----------------------------
    y = embed_lookup(dec_ids_ref, B * Sd)
    enc_out_b = enc_out.astype(bf16)
    # hoisted cross-attention K/V projections (+ head split), out of the layer loop
    cross_kv = []
    for l in range(N_DEC_LAYERS):
        kh_c = split_heads(mm(enc_out_b, d_ck_ref[l]).astype(bf16), B, Se)
        vh_c = split_heads(mm(enc_out_b, d_cv_ref[l]).astype(bf16), B, Se)
        cross_kv.append((kh_c, vh_c))

    for l in range(N_DEC_LAYERS):
        hb = rmsnorm(y, d_ln1_ref[l]).astype(bf16)
        qh = split_heads(mm(hb, d_wq_ref[l]).astype(bf16), B, Sd)
        kh = split_heads(mm(hb, d_wk_ref[l]).astype(bf16), B, Sd)
        vh = split_heads(mm(hb, d_wv_ref[l]).astype(bf16), B, Sd)
        y = y + attention(qh, kh, vh, d_so_ref[l], dec_bias, B, Sd)
        hb = rmsnorm(y, d_ln2_ref[l]).astype(bf16)
        qh = split_heads(mm(hb, d_cq_ref[l]).astype(bf16), B, Sd)
        kh_c, vh_c = cross_kv[l]
        y = y + attention(qh, kh_c, vh_c, d_co_ref[l], cross_bias, B, Sd)
        hb = rmsnorm(y, d_ln3_ref[l]).astype(bf16)
        ff = mm(hb, d_wffi_ref[l])
        g = jax.nn.gelu(ff[:, :D_FF]) * ff[:, D_FF:]
        y = y + mm(g, d_wffo_ref[l])
    dec_out = rmsnorm(y, d_fln_ref[...])

    # flan-T5 has an untied lm_head (no d_model**-0.5 rescale). Logits are [B*Sd, 128]: lane-dense.
    logits = mm(dec_out, lm_head_ref[...])
    logits_ref[...] = logits

    # masked token-mean cross-entropy (labels == -100 ignored)
    labels = labels_ref[...]                                         # [B*Sd, 1] int32
    m = jnp.max(logits, axis=-1, keepdims=True)
    z = logits - m
    lse = jnp.log(jnp.sum(jnp.exp(z), axis=-1, keepdims=True))
    iota = jax.lax.broadcasted_iota(jnp.int32, (B * Sd, VOCAB), 1)
    onehot = (iota == labels).astype(f32)
    nll = lse - jnp.sum(z * onehot, axis=-1, keepdims=True)          # [B*Sd, 1]
    valid = (labels != -100).astype(f32)
    loss_ref[...] = (jnp.sum(nll * valid, axis=0, keepdims=True)
                     / jnp.maximum(jnp.sum(valid, axis=0, keepdims=True), 1.0))


# ============================== host-side glue ==============================
@functools.lru_cache(maxsize=None)
def _rel_bucket_matrix(sq, sk, bidirectional):
    """Relative-position bucket indices, pure numpy -> trace-time constant."""
    ctx = np.arange(sq)[:, None]
    mem = np.arange(sk)[None, :]
    rel = mem - ctx
    num_buckets = REL_BUCKETS
    buckets = np.zeros_like(rel)
    if bidirectional:
        num_buckets //= 2
        buckets = buckets + (rel > 0).astype(np.int64) * num_buckets
        rel = np.abs(rel)
    else:
        rel = -np.minimum(rel, 0)
    max_exact = num_buckets // 2
    is_small = rel < max_exact
    rp = np.maximum(rel, 1).astype(np.float32)
    large = max_exact + (np.log(rp / max_exact)
                         / math.log(REL_MAX_DIST / max_exact)
                         * (num_buckets - max_exact)).astype(np.int64)
    large = np.minimum(large, num_buckets - 1)
    return (buckets + np.where(is_small, rel, large)).astype(np.int32)


@functools.lru_cache(maxsize=None)
def _causal_bias(s):
    m = np.where(np.tril(np.ones((s, s), bool)), 0.0, NEG_INF).astype(np.float32)
    return m[None]                                        # [1, s, s]


def rel_pos_bias(sq, sk, table, bidirectional):
    buckets = _rel_bucket_matrix(sq, sk, bidirectional)   # numpy constant [sq, sk]
    return table[buckets].transpose(2, 0, 1)              # [H, sq, sk]


def shift_right(labels):
    dec = jnp.roll(labels, 1, axis=-1)
    dec = dec.at[:, 0].set(PAD_ID)
    return jnp.where(dec == -100, PAD_ID, dec)


def forward(params, input_ids, attention_mask=None, labels=None):
    """Mirrors T5ForConditionalGeneration.forward(input_ids, attention_mask, labels)."""
    B, S_enc = input_ids.shape
    if attention_mask is None:
        attention_mask = jnp.ones((B, S_enc), jnp.int32)
    dec_ids = shift_right(labels)
    S_dec = dec_ids.shape[1]

    # tiny bias tables (bucket matrices are trace-time constants; only the gather runs per call)
    enc_pos = rel_pos_bias(S_enc, S_enc, params['enc_rel_bias'], bidirectional=True)
    dec_pos = rel_pos_bias(S_dec, S_dec, params['dec_rel_bias'], bidirectional=False) \
        + _causal_bias(S_dec)

    logits2d, loss_arr = pl.pallas_call(
        _fused_t5_kernel,
        out_shape=(jax.ShapeDtypeStruct((B * S_dec, VOCAB), jnp.float32),
                   jax.ShapeDtypeStruct((1, 1), jnp.float32)),
        compiler_params=pltpu.CompilerParams(vmem_limit_bytes=32 * 1024 * 1024),
    )(
        input_ids.reshape(B * S_enc, 1).astype(jnp.int32),
        dec_ids.reshape(B * S_dec, 1).astype(jnp.int32),
        labels.reshape(B * S_dec, 1).astype(jnp.int32),
        attention_mask.astype(jnp.float32),
        params['embed'], enc_pos, dec_pos,
        params['enc_ln1'], params['enc_wq'], params['enc_wk'], params['enc_wv'],
        params['enc_wo'], params['enc_ln2'], params['enc_wff_in'], params['enc_wff_out'],
        params['enc_final_ln'],
        params['dec_ln1'], params['dec_wq'], params['dec_wk'], params['dec_wv'],
        params['dec_so'], params['dec_ln2'], params['dec_cq'], params['dec_ck'],
        params['dec_cv'], params['dec_co'], params['dec_ln3'],
        params['dec_wff_in'], params['dec_wff_out'], params['dec_final_ln'],
        params['lm_head'],
    )
    logits = logits2d.reshape(B, S_dec, VOCAB)
    loss = loss_arr[0, 0]
    return loss, logits


# TODO(synk): .generate() (beam search / sampling / no-repeat-ngram) is decode-time control
#             flow, not a forward-pass kernel; it is not translated here.
def init_params(key):
    ks = iter(jax.random.split(key, 32))

    def w(shape, dtype=jnp.bfloat16):        # weights pre-cast to bf16 (halves DMA, no in-kernel casts)
        return (jax.random.normal(next(ks), shape, jnp.float32) * 0.02).astype(dtype)

    Le, Ld = N_ENC_LAYERS, N_DEC_LAYERS
    D = D_MODEL
    ones = lambda *s: jnp.ones(s, jnp.float32)
    return {
        'embed': w((VOCAB, D)),
        'lm_head': w((D, VOCAB)),
        'enc_rel_bias': w((REL_BUCKETS, N_HEADS), jnp.float32),
        'dec_rel_bias': w((REL_BUCKETS, N_HEADS), jnp.float32),
        'enc_final_ln': ones(1, D),
        'dec_final_ln': ones(1, D),
        # encoder layer stacks (leading dim = layer index); separate Q/K/V avoids
        # lane-misaligned splits of a fused [D,3D] projection output.
        'enc_ln1': ones(Le, 1, D),
        'enc_wq': w((Le, D, D)), 'enc_wk': w((Le, D, D)), 'enc_wv': w((Le, D, D)),
        'enc_wo': w((Le, D, D)),
        'enc_ln2': ones(Le, 1, D),
        'enc_wff_in': w((Le, D, 2 * D_FF)),             # wi0|wi1 (gated-GELU), 128-aligned split
        'enc_wff_out': w((Le, D_FF, D)),
        # decoder layer stacks
        'dec_ln1': ones(Ld, 1, D),
        'dec_wq': w((Ld, D, D)), 'dec_wk': w((Ld, D, D)), 'dec_wv': w((Ld, D, D)),
        'dec_so': w((Ld, D, D)),
        'dec_ln2': ones(Ld, 1, D),
        'dec_cq': w((Ld, D, D)), 'dec_ck': w((Ld, D, D)), 'dec_cv': w((Ld, D, D)),
        'dec_co': w((Ld, D, D)),
        'dec_ln3': ones(Ld, 1, D),
        'dec_wff_in': w((Ld, D, 2 * D_FF)),
        'dec_wff_out': w((Ld, D_FF, D)),
    }


if __name__ == "__main__":
    key = jax.random.PRNGKey(0)
    pkey, ikey, lkey = jax.random.split(key, 3)
    params = init_params(pkey)

    B, S = 2, 8
    input_ids = jax.random.randint(ikey, (B, S), 1, VOCAB, dtype=jnp.int32)
    attention_mask = jnp.ones((B, S), jnp.int32).at[1, -1].set(0)  # one padded position
    labels = jax.random.randint(lkey, (B, S), 1, VOCAB, dtype=jnp.int32)

    fwd = jax.jit(forward)
    loss, logits = fwd(params, input_ids, attention_mask, labels)
    jax.block_until_ready((loss, logits))

    assert logits.shape == (B, S, VOCAB)
    assert bool(jnp.isfinite(loss)) and bool(jnp.all(jnp.isfinite(logits)))
    print("KERNEL_OK")
</pallas_src>

<mosaic_0001>
module attributes {stable_mosaic.version = 11 : i64} {
  func.func @_fused_t5_kernel(%arg0: memref<16x1xi32, #tpu.memory_space<vmem>>, %arg1: memref<16x1xi32, #tpu.memory_space<vmem>>, %arg2: memref<16x1xi32, #tpu.memory_space<vmem>>, %arg3: memref<2x8xf32, #tpu.memory_space<vmem>>, %arg4: memref<128x64xbf16, #tpu.memory_space<vmem>>, %arg5: memref<4x8x8xf32, #tpu.memory_space<vmem>>, %arg6: memref<4x8x8xf32, #tpu.memory_space<vmem>>, %arg7: memref<2x1x64xf32, #tpu.memory_space<vmem>>, %arg8: memref<2x64x64xbf16, #tpu.memory_space<vmem>>, %arg9: memref<2x64x64xbf16, #tpu.memory_space<vmem>>, %arg10: memref<2x64x64xbf16, #tpu.memory_space<vmem>>, %arg11: memref<2x64x64xbf16, #tpu.memory_space<vmem>>, %arg12: memref<2x1x64xf32, #tpu.memory_space<vmem>>, %arg13: memref<2x64x256xbf16, #tpu.memory_space<vmem>>, %arg14: memref<2x128x64xbf16, #tpu.memory_space<vmem>>, %arg15: memref<1x64xf32, #tpu.memory_space<vmem>>, %arg16: memref<2x1x64xf32, #tpu.memory_space<vmem>>, %arg17: memref<2x64x64xbf16, #tpu.memory_space<vmem>>, %arg18: memref<2x64x64xbf16, #tpu.memory_space<vmem>>, %arg19: memref<2x64x64xbf16, #tpu.memory_space<vmem>>, %arg20: memref<2x64x64xbf16, #tpu.memory_space<vmem>>, %arg21: memref<2x1x64xf32, #tpu.memory_space<vmem>>, %arg22: memref<2x64x64xbf16, #tpu.memory_space<vmem>>, %arg23: memref<2x64x64xbf16, #tpu.memory_space<vmem>>, %arg24: memref<2x64x64xbf16, #tpu.memory_space<vmem>>, %arg25: memref<2x64x64xbf16, #tpu.memory_space<vmem>>, %arg26: memref<2x1x64xf32, #tpu.memory_space<vmem>>, %arg27: memref<2x64x256xbf16, #tpu.memory_space<vmem>>, %arg28: memref<2x128x64xbf16, #tpu.memory_space<vmem>>, %arg29: memref<1x64xf32, #tpu.memory_space<vmem>>, %arg30: memref<64x128xbf16, #tpu.memory_space<vmem>>, %arg31: memref<16x128xf32, #tpu.memory_space<vmem>>, %arg32: memref<1x1xf32, #tpu.memory_space<vmem>>) attributes {dimension_semantics = [], scalar_prefetch = 0 : i64, scratch_operands = 0 : i64, tpu.core_type = #tpu.core_type<tc>} {
    %c0 = arith.constant 0 : index
    %c0_0 = arith.constant 0 : index
    %0 = vector.load %arg3[%c0, %c0_0] : memref<2x8xf32, #tpu.memory_space<vmem>>, vector<2x8xf32>
    %cst = arith.constant 1.000000e+00 : f32
    %1 = vector.broadcast %cst : f32 to vector<2x8xf32>
    %2 = arith.subf %1, %0 : vector<2x8xf32>
    %cst_1 = arith.constant -1.000000e+09 : f32
    %3 = vector.broadcast %cst_1 : f32 to vector<2x8xf32>
    %4 = arith.mulf %2, %3 : vector<2x8xf32>
    %c0_2 = arith.constant 0 : index
    %c0_3 = arith.constant 0 : index
    %c0_4 = arith.constant 0 : index
    %5 = vector.load %arg5[%c0_2, %c0_3, %c0_4] : memref<4x8x8xf32, #tpu.memory_space<vmem>>, vector<4x8x8xf32>
    %6 = vector.shape_cast %5 : vector<4x8x8xf32> to vector<4x1x8x8xf32>
    %7 = vector.shape_cast %4 : vector<2x8xf32> to vector<1x2x1x8xf32>
    %8 = vector.broadcast %6 : vector<4x1x8x8xf32> to vector<4x2x8x8xf32>
    %9 = vector.broadcast %7 : vector<1x2x1x8xf32> to vector<4x2x8x8xf32>
    %10 = arith.addf %8, %9 : vector<4x2x8x8xf32>
    %11 = vector.shape_cast %10 : vector<4x2x8x8xf32> to vector<8x8x8xf32>
    %c0_5 = arith.constant 0 : index
    %c0_6 = arith.constant 0 : index
    %c0_7 = arith.constant 0 : index
    %12 = vector.load %arg6[%c0_5, %c0_6, %c0_7] : memref<4x8x8xf32, #tpu.memory_space<vmem>>, vector<4x8x8xf32>
    %13 = vector.shape_cast %12 : vector<4x8x8xf32> to vector<4x1x8x8xf32>
    %14 = vector.shape_cast %13 : vector<4x1x8x8xf32> to vector<4x1x8x8xf32>
    %15 = vector.broadcast %14 : vector<4x1x8x8xf32> to vector<4x2x8x8xf32>
    %16 = vector.shape_cast %15 : vector<4x2x8x8xf32> to vector<8x8x8xf32>
    %17 = vector.shape_cast %4 : vector<2x8xf32> to vector<1x2x1x8xf32>
    %18 = vector.shape_cast %17 : vector<1x2x1x8xf32> to vector<1x2x1x8xf32>
    %19 = vector.broadcast %18 : vector<1x2x1x8xf32> to vector<4x2x1x8xf32>
    %20 = vector.shape_cast %19 : vector<4x2x1x8xf32> to vector<8x1x8xf32>
    %c0_8 = arith.constant 0 : index
    %c0_9 = arith.constant 0 : index
    %21 = vector.load %arg0[%c0_8, %c0_9] : memref<16x1xi32, #tpu.memory_space<vmem>>, vector<16x1xi32>
    %22 = tpu.iota {dimensions = array<i32: 1>} : vector<16x128xi32>
    %23 = vector.broadcast %21 : vector<16x1xi32> to vector<16x128xi32>
    %24 = arith.cmpi eq, %22, %23 : vector<16x128xi32>
    %25 = arith.extui %24 : vector<16x128xi1> to vector<16x128xi32>
    %26 = arith.sitofp %25 : vector<16x128xi32> to vector<16x128xf32>
    %27 = arith.truncf %26 : vector<16x128xf32> to vector<16x128xbf16>
    %c0_10 = arith.constant 0 : index
    %c0_11 = arith.constant 0 : index
    %28 = vector.load %arg4[%c0_10, %c0_11] : memref<128x64xbf16, #tpu.memory_space<vmem>>, vector<128x64xbf16>
    %cst_12 = arith.constant dense<0.000000e+00> : vector<16x64xf32>
    %29 = tpu.matmul %27, %28, %cst_12 {dimension_numbers = #tpu.dot_dimension_numbers<[1], [0], [0], [1], [0, 0, 1, 1], [], []>} : vector<16x128xbf16>, vector<128x64xbf16>, vector<16x64xf32> -> vector<16x64xf32>
    %c0_13 = arith.constant 0 : index
    %c0_14 = arith.constant 0 : index
    %c0_15 = arith.constant 0 : index
    %30 = vector.load %arg7[%c0_13, %c0_14, %c0_15] : memref<2x1x64xf32, #tpu.memory_space<vmem>>, vector<1x1x64xf32>
    %31 = vector.shape_cast %30 : vector<1x1x64xf32> to vector<1x64xf32>
    %32 = arith.mulf %29, %29 : vector<16x64xf32>
    %cst_16 = arith.constant dense<0.000000e+00> : vector<16xf32>
    %33 = vector.multi_reduction <add>, %32, %cst_16 [1] : vector<16x64xf32> to vector<16xf32>
    %34 = vector.shape_cast %33 : vector<16xf32> to vector<16x1xf32>
    %cst_17 = arith.constant 6.400000e+01 : f32
    %35 = vector.broadcast %cst_17 : f32 to vector<16x1xf32>
    %36 = arith.divf %34, %35 : vector<16x1xf32>
    %cst_18 = arith.constant 9.99999997E-7 : f32
    %37 = vector.broadcast %cst_18 : f32 to vector<16x1xf32>
    %38 = arith.addf %36, %37 : vector<16x1xf32>
    %39 = math.rsqrt %38 : vector<16x1xf32>
    %40 = vector.broadcast %39 : vector<16x1xf32> to vector<16x64xf32>
    %41 = arith.mulf %29, %40 : vector<16x64xf32>
    %42 = vector.broadcast %31 : vector<1x64xf32> to vector<16x64xf32>
    %43 = arith.mulf %41, %42 : vector<16x64xf32>
    %44 = arith.truncf %43 : vector<16x64xf32> to vector<16x64xbf16>
    %c0_19 = arith.constant 0 : index
    %c0_20 = arith.constant 0 : index
    %c0_21 = arith.constant 0 : index
    %45 = vector.load %arg8[%c0_19, %c0_20, %c0_21] : memref<2x64x64xbf16, #tpu.memory_space<vmem>>, vector<1x64x64xbf16>
    %46 = vector.shape_cast %45 : vector<1x64x64xbf16> to vector<64x64xbf16>
    %cst_22 = arith.constant dense<0.000000e+00> : vector<16x64xf32>
    %47 = tpu.matmul %44, %46, %cst_22 {dimension_numbers = #tpu.dot_dimension_numbers<[1], [0], [0], [1], [0, 0, 1, 1], [], []>} : vector<16x64xbf16>, vector<64x64xbf16>, vector<16x64xf32> -> vector<16x64xf32>
    %48 = arith.truncf %47 : vector<16x64xf32> to vector<16x64xbf16>
    %49 = vector.extract_strided_slice %48 {offsets = [0, 0], sizes = [16, 16], strides = [1, 1]} : vector<16x64xbf16> to vector<16x16xbf16>
    %50 = vector.shape_cast %49 : vector<16x16xbf16> to vector<2x8x16xbf16>
    %51 = vector.extract_strided_slice %48 {offsets = [0, 16], sizes = [16, 16], strides = [1, 1]} : vector<16x64xbf16> to vector<16x16xbf16>
    %52 = vector.shape_cast %51 : vector<16x16xbf16> to vector<2x8x16xbf16>
    %53 = vector.extract_strided_slice %48 {offsets = [0, 32], sizes = [16, 16], strides = [1, 1]} : vector<16x64xbf16> to vector<16x16xbf16>
    %54 = vector.shape_cast %53 : vector<16x16xbf16> to vector<2x8x16xbf16>
    %55 = vector.extract_strided_slice %48 {offsets = [0, 48], sizes = [16, 16], strides = [1, 1]} : vector<16x64xbf16> to vector<16x16xbf16>
    %56 = vector.shape_cast %55 : vector<16x16xbf16> to vector<2x8x16xbf16>
    %57 = tpu.concatenate %50, %52, %54, %56 in 0 : vector<2x8x16xbf16>, vector<2x8x16xbf16>, vector<2x8x16xbf16>, vector<2x8x16xbf16> -> vector<8x8x16xbf16>
    %c0_23 = arith.constant 0 : index
    %c0_24 = arith.constant 0 : index
    %c0_25 = arith.constant 0 : index
    %58 = vector.load %arg9[%c0_23, %c0_24, %c0_25] : memref<2x64x64xbf16, #tpu.memory_space<vmem>>, vector<1x64x64xbf16>
    %59 = vector.shape_cast %58 : vector<1x64x64xbf16> to vector<64x64xbf16>
    %cst_26 = arith.constant dense<0.000000e+00> : vector<16x64xf32>
    %60 = tpu.matmul %44, %59, %cst_26 {dimension_numbers = #tpu.dot_dimension_numbers<[1], [0], [0], [1], [0, 0, 1, 1], [], []>} : vector<16x64xbf16>, vector<64x64xbf16>, vector<16x64xf32> -> vector<16x64xf32>
    %61 = arith.truncf %60 : vector<16x64xf32> to vector<16x64xbf16>
    %62 = vector.extract_strided_slice %61 {offsets = [0, 0], sizes = [16, 16], strides = [1, 1]} : vector<16x64xbf16> to vector<16x16xbf16>
    %63 = vector.shape_cast %62 : vector<16x16xbf16> to vector<2x8x16xbf16>
    %64 = vector.extract_strided_slice %61 {offsets = [0, 16], sizes = [16, 16], strides = [1, 1]} : vector<16x64xbf16> to vector<16x16xbf16>
    %65 = vector.shape_cast %64 : vector<16x16xbf16> to vector<2x8x16xbf16>
    %66 = vector.extract_strided_slice %61 {offsets = [0, 32], sizes = [16, 16], strides = [1, 1]} : vector<16x64xbf16> to vector<16x16xbf16>
    %67 = vector.shape_cast %66 : vector<16x16xbf16> to vector<2x8x16xbf16>
    %68 = vector.extract_strided_slice %61 {offsets = [0, 48], sizes = [16, 16], strides = [1, 1]} : vector<16x64xbf16> to vector<16x16xbf16>
    %69 = vector.shape_cast %68 : vector<16x16xbf16> to vector<2x8x16xbf16>
    %70 = tpu.concatenate %63, %65, %67, %69 in 0 : vector<2x8x16xbf16>, vector<2x8x16xbf16>, vector<2x8x16xbf16>, vector<2x8x16xbf16> -> vector<8x8x16xbf16>
    %c0_27 = arith.constant 0 : index
    %c0_28 = arith.constant 0 : index
    %c0_29 = arith.constant 0 : index
    %71 = vector.load %arg10[%c0_27, %c0_28, %c0_29] : memref<2x64x64xbf16, #tpu.memory_space<vmem>>, vector<1x64x64xbf16>
    %72 = vector.shape_cast %71 : vector<1x64x64xbf16> to vector<64x64xbf16>
    %cst_30 = arith.constant dense<0.000000e+00> : vector<16x64xf32>
    %73 = tpu.matmul %44, %72, %cst_30 {dimension_numbers = #tpu.dot_dimension_numbers<[1], [0], [0], [1], [0, 0, 1, 1], [], []>} : vector<16x64xbf16>, vector<64x64xbf16>, vector<16x64xf32> -> vector<16x64xf32>
    %74 = arith.truncf %73 : vector<16x64xf32> to vector<16x64xbf16>
    %75 = vector.extract_strided_slice %74 {offsets = [0, 0], sizes = [16, 16], strides = [1, 1]} : vector<16x64xbf16> to vector<16x16xbf16>
    %76 = vector.shape_cast %75 : vector<16x16xbf16> to vector<2x8x16xbf16>
    %77 = vector.extract_strided_slice %74 {offsets = [0, 16], sizes = [16, 16], strides = [1, 1]} : vector<16x64xbf16> to vector<16x16xbf16>
    %78 = vector.shape_cast %77 : vector<16x16xbf16> to vector<2x8x16xbf16>
    %79 = vector.extract_strided_slice %74 {offsets = [0, 32], sizes = [16, 16], strides = [1, 1]} : vector<16x64xbf16> to vector<16x16xbf16>
    %80 = vector.shape_cast %79 : vector<16x16xbf16> to vector<2x8x16xbf16>
    %81 = vector.extract_strided_slice %74 {offsets = [0, 48], sizes = [16, 16], strides = [1, 1]} : vector<16x64xbf16> to vector<16x16xbf16>
    %82 = vector.shape_cast %81 : vector<16x16xbf16> to vector<2x8x16xbf16>
    %83 = tpu.concatenate %76, %78, %80, %82 in 0 : vector<2x8x16xbf16>, vector<2x8x16xbf16>, vector<2x8x16xbf16>, vector<2x8x16xbf16> -> vector<8x8x16xbf16>
    %c0_31 = arith.constant 0 : index
    %c0_32 = arith.constant 0 : index
    %c0_33 = arith.constant 0 : index
    %84 = vector.load %arg11[%c0_31, %c0_32, %c0_33] : memref<2x64x64xbf16, #tpu.memory_space<vmem>>, vector<1x64x64xbf16>
    %85 = vector.shape_cast %84 : vector<1x64x64xbf16> to vector<64x64xbf16>
    "tpu.trace_start"() <{level = 10 : i32, message = "nqd,nkd->nqk"}> : () -> ()
    %cst_34 = arith.constant dense<0.000000e+00> : vector<8x8x8xf32>
    %86 = tpu.matmul %57, %70, %cst_34 {dimension_numbers = #tpu.dot_dimension_numbers<[2], [2], [1], [1], [0, 0, 0, 1, 1, 1], [0], [0]>} : vector<8x8x16xbf16>, vector<8x8x16xbf16>, vector<8x8x8xf32> -> vector<8x8x8xf32>
    "tpu.trace_stop"() : () -> ()
    %87 = arith.addf %86, %11 : vector<8x8x8xf32>
    %cst_35 = arith.constant dense<0xFF800000> : vector<8x8xf32>
    %88 = vector.multi_reduction <maximumf>, %87, %cst_35 [2] : vector<8x8x8xf32> to vector<8x8xf32>
    %89 = vector.shape_cast %88 : vector<8x8xf32> to vector<8x8x1xf32>
    %90 = vector.broadcast %89 : vector<8x8x1xf32> to vector<8x8x8xf32>
    %91 = arith.subf %87, %90 : vector<8x8x8xf32>
    %92 = math.exp %91 : vector<8x8x8xf32>
    %cst_36 = arith.constant dense<0.000000e+00> : vector<8x8xf32>
    %93 = vector.multi_reduction <add>, %92, %cst_36 [2] : vector<8x8x8xf32> to vector<8x8xf32>
    %94 = vector.shape_cast %93 : vector<8x8xf32> to vector<8x8x1xf32>
    %95 = tpu.reciprocal %94 {approx = true} : vector<8x8x1xf32> -> vector<8x8x1xf32>
    %96 = vector.broadcast %95 : vector<8x8x1xf32> to vector<8x8x8xf32>
    %97 = arith.mulf %92, %96 : vector<8x8x8xf32>
    %98 = arith.truncf %97 : vector<8x8x8xf32> to vector<8x8x8xbf16>
    "tpu.trace_start"() <{level = 10 : i32, message = "nqk,nkd->nqd"}> : () -> ()
    %cst_37 = arith.constant dense<0.000000e+00> : vector<8x8x16xf32>
    %99 = tpu.matmul %98, %83, %cst_37 {dimension_numbers = #tpu.dot_dimension_numbers<[2], [1], [1], [2], [0, 0, 0, 1, 1, 2], [0], [0]>} : vector<8x8x8xbf16>, vector<8x8x16xbf16>, vector<8x8x16xf32> -> vector<8x8x16xf32>
    "tpu.trace_stop"() : () -> ()
    %100 = vector.shape_cast %99 : vector<8x8x16xf32> to vector<4x2x8x16xf32>
    %101 = vector.extract_strided_slice %100 {offsets = [0, 0, 0, 0], sizes = [1, 2, 8, 16], strides = [1, 1, 1, 1]} : vector<4x2x8x16xf32> to vector<1x2x8x16xf32>
    %102 = vector.shape_cast %101 : vector<1x2x8x16xf32> to vector<2x8x16xf32>
    %103 = vector.shape_cast %102 : vector<2x8x16xf32> to vector<16x16xf32>
    %104 = vector.extract_strided_slice %85 {offsets = [0, 0], sizes = [16, 64], strides = [1, 1]} : vector<64x64xbf16> to vector<16x64xbf16>
    %105 = arith.truncf %103 : vector<16x16xf32> to vector<16x16xbf16>
    %cst_38 = arith.constant dense<0.000000e+00> : vector<16x64xf32>
    %106 = tpu.matmul %105, %104, %cst_38 {dimension_numbers = #tpu.dot_dimension_numbers<[1], [0], [0], [1], [0, 0, 1, 1], [], []>} : vector<16x16xbf16>, vector<16x64xbf16>, vector<16x64xf32> -> vector<16x64xf32>
    %107 = vector.extract_strided_slice %100 {offsets = [1, 0, 0, 0], sizes = [1, 2, 8, 16], strides = [1, 1, 1, 1]} : vector<4x2x8x16xf32> to vector<1x2x8x16xf32>
    %108 = vector.shape_cast %107 : vector<1x2x8x16xf32> to vector<2x8x16xf32>
    %109 = vector.shape_cast %108 : vector<2x8x16xf32> to vector<16x16xf32>
    %110 = vector.extract_strided_slice %85 {offsets = [16, 0], sizes = [16, 64], strides = [1, 1]} : vector<64x64xbf16> to vector<16x64xbf16>
    %111 = arith.truncf %109 : vector<16x16xf32> to vector<16x16xbf16>
    %cst_39 = arith.constant dense<0.000000e+00> : vector<16x64xf32>
    %112 = tpu.matmul %111, %110, %cst_39 {dimension_numbers = #tpu.dot_dimension_numbers<[1], [0], [0], [1], [0, 0, 1, 1], [], []>} : vector<16x16xbf16>, vector<16x64xbf16>, vector<16x64xf32> -> vector<16x64xf32>
    %113 = arith.addf %106, %112 : vector<16x64xf32>
    %114 = vector.extract_strided_slice %100 {offsets = [2, 0, 0, 0], sizes = [1, 2, 8, 16], strides = [1, 1, 1, 1]} : vector<4x2x8x16xf32> to vector<1x2x8x16xf32>
    %115 = vector.shape_cast %114 : vector<1x2x8x16xf32> to vector<2x8x16xf32>
    %116 = vector.shape_cast %115 : vector<2x8x16xf32> to vector<16x16xf32>
    %117 = vector.extract_strided_slice %85 {offsets = [32, 0], sizes = [16, 64], strides = [1, 1]} : vector<64x64xbf16> to vector<16x64xbf16>
    %118 = arith.truncf %116 : vector<16x16xf32> to vector<16x16xbf16>
    %cst_40 = arith.constant dense<0.000000e+00> : vector<16x64xf32>
    %119 = tpu.matmul %118, %117, %cst_40 {dimension_numbers = #tpu.dot_dimension_numbers<[1], [0], [0], [1], [0, 0, 1, 1], [], []>} : vector<16x16xbf16>, vector<16x64xbf16>, vector<16x64xf32> -> vector<16x64xf32>
    %120 = arith.addf %113, %119 : vector<16x64xf32>
    %121 = vector.extract_strided_slice %100 {offsets = [3, 0, 0, 0], sizes = [1, 2, 8, 16], strides = [1, 1, 1, 1]} : vector<4x2x8x16xf32> to vector<1x2x8x16xf32>
    %122 = vector.shape_cast %121 : vector<1x2x8x16xf32> to vector<2x8x16xf32>
    %123 = vector.shape_cast %122 : vector<2x8x16xf32> to vector<16x16xf32>
    %124 = vector.extract_strided_slice %85 {offsets = [48, 0], sizes = [16, 64], strides = [1, 1]} : vector<64x64xbf16> to vector<16x64xbf16>
    %125 = arith.truncf %123 : vector<16x16xf32> to vector<16x16xbf16>
    %cst_41 = arith.constant dense<0.000000e+00> : vector<16x64xf32>
    %126 = tpu.matmul %125, %124, %cst_41 {dimension_numbers = #tpu.dot_dimension_numbers<[1], [0], [0], [1], [0, 0, 1, 1], [], []>} : vector<16x16xbf16>, vector<16x64xbf16>, vector<16x64xf32> -> vector<16x64xf32>
    %127 = arith.addf %120, %126 : vector<16x64xf32>
    %128 = arith.addf %29, %127 : vector<16x64xf32>
    %c0_42 = arith.constant 0 : index
    %c0_43 = arith.constant 0 : index
    %c0_44 = arith.constant 0 : index
    %129 = vector.load %arg12[%c0_42, %c0_43, %c0_44] : memref<2x1x64xf32, #tpu.memory_space<vmem>>, vector<1x1x64xf32>
    %130 = vector.shape_cast %129 : vector<1x1x64xf32> to vector<1x64xf32>
    %131 = arith.mulf %128, %128 : vector<16x64xf32>
    %cst_45 = arith.constant dense<0.000000e+00> : vector<16xf32>
    %132 = vector.multi_reduction <add>, %131, %cst_45 [1] : vector<16x64xf32> to vector<16xf32>
    %133 = vector.shape_cast %132 : vector<16xf32> to vector<16x1xf32>
    %cst_46 = arith.constant 6.400000e+01 : f32
    %134 = vector.broadcast %cst_46 : f32 to vector<16x1xf32>
    %135 = arith.divf %133, %134 : vector<16x1xf32>
    %cst_47 = arith.constant 9.99999997E-7 : f32
    %136 = vector.broadcast %cst_47 : f32 to vector<16x1xf32>
    %137 = arith.addf %135, %136 : vector<16x1xf32>
    %138 = math.rsqrt %137 : vector<16x1xf32>
    %139 = vector.broadcast %138 : vector<16x1xf32> to vector<16x64xf32>
    %140 = arith.mulf %128, %139 : vector<16x64xf32>
    %141 = vector.broadcast %130 : vector<1x64xf32> to vector<16x64xf32>
    %142 = arith.mulf %140, %141 : vector<16x64xf32>
    %143 = arith.truncf %142 : vector<16x64xf32> to vector<16x64xbf16>
    %c0_48 = arith.constant 0 : index
    %c0_49 = arith.constant 0 : index
    %c0_50 = arith.constant 0 : index
    %144 = vector.load %arg13[%c0_48, %c0_49, %c0_50] : memref<2x64x256xbf16, #tpu.memory_space<vmem>>, vector<1x64x256xbf16>
    %145 = vector.shape_cast %144 : vector<1x64x256xbf16> to vector<64x256xbf16>
    %cst_51 = arith.constant dense<0.000000e+00> : vector<16x256xf32>
    %146 = tpu.matmul %143, %145, %cst_51 {dimension_numbers = #tpu.dot_dimension_numbers<[1], [0], [0], [1], [0, 0, 1, 1], [], []>} : vector<16x64xbf16>, vector<64x256xbf16>, vector<16x256xf32> -> vector<16x256xf32>
    %147 = vector.extract_strided_slice %146 {offsets = [0, 0], sizes = [16, 128], strides = [1, 1]} : vector<16x256xf32> to vector<16x128xf32>
    %148 = arith.mulf %147, %147 : vector<16x128xf32>
    %149 = arith.mulf %147, %148 : vector<16x128xf32>
    %cst_52 = arith.constant 4.471500e-02 : f32
    %150 = vector.broadcast %cst_52 : f32 to vector<16x128xf32>
    %151 = arith.mulf %150, %149 : vector<16x128xf32>
    %152 = arith.addf %147, %151 : vector<16x128xf32>
    %cst_53 = arith.constant 0.797884583 : f32
    %153 = vector.broadcast %cst_53 : f32 to vector<16x128xf32>
    %154 = arith.mulf %153, %152 : vector<16x128xf32>
    %155 = math.tanh %154 : vector<16x128xf32>
    %cst_54 = arith.constant 1.000000e+00 : f32
    %156 = vector.broadcast %cst_54 : f32 to vector<16x128xf32>
    %157 = arith.addf %156, %155 : vector<16x128xf32>
    %cst_55 = arith.constant 5.000000e-01 : f32
    %158 = vector.broadcast %cst_55 : f32 to vector<16x128xf32>
    %159 = arith.mulf %158, %157 : vector<16x128xf32>
    %160 = arith.mulf %147, %159 : vector<16x128xf32>
    %161 = vector.extract_strided_slice %146 {offsets = [0, 128], sizes = [16, 128], strides = [1, 1]} : vector<16x256xf32> to vector<16x128xf32>
    %162 = arith.mulf %160, %161 : vector<16x128xf32>
    %c0_56 = arith.constant 0 : index
    %c0_57 = arith.constant 0 : index
    %c0_58 = arith.constant 0 : index
    %163 = vector.load %arg14[%c0_56, %c0_57, %c0_58] : memref<2x128x64xbf16, #tpu.memory_space<vmem>>, vector<1x128x64xbf16>
    %164 = vector.shape_cast %163 : vector<1x128x64xbf16> to vector<128x64xbf16>
    %165 = arith.truncf %162 : vector<16x128xf32> to vector<16x128xbf16>
    %cst_59 = arith.constant dense<0.000000e+00> : vector<16x64xf32>
    %166 = tpu.matmul %165, %164, %cst_59 {dimension_numbers = #tpu.dot_dimension_numbers<[1], [0], [0], [1], [0, 0, 1, 1], [], []>} : vector<16x128xbf16>, vector<128x64xbf16>, vector<16x64xf32> -> vector<16x64xf32>
    %167 = arith.addf %128, %166 : vector<16x64xf32>
    %c1 = arith.constant 1 : index
    %c0_60 = arith.constant 0 : index
    %c0_61 = arith.constant 0 : index
    %168 = vector.load %arg7[%c1, %c0_60, %c0_61] : memref<2x1x64xf32, #tpu.memory_space<vmem>>, vector<1x1x64xf32>
    %169 = vector.shape_cast %168 : vector<1x1x64xf32> to vector<1x64xf32>
    %170 = arith.mulf %167, %167 : vector<16x64xf32>
    %cst_62 = arith.constant dense<0.000000e+00> : vector<16xf32>
    %171 = vector.multi_reduction <add>, %170, %cst_62 [1] : vector<16x64xf32> to vector<16xf32>
    %172 = vector.shape_cast %171 : vector<16xf32> to vector<16x1xf32>
    %cst_63 = arith.constant 6.400000e+01 : f32
    %173 = vector.broadcast %cst_63 : f32 to vector<16x1xf32>
    %174 = arith.divf %172, %173 : vector<16x1xf32>
    %cst_64 = arith.constant 9.99999997E-7 : f32
    %175 = vector.broadcast %cst_64 : f32 to vector<16x1xf32>
    %176 = arith.addf %174, %175 : vector<16x1xf32>
    %177 = math.rsqrt %176 : vector<16x1xf32>
    %178 = vector.broadcast %177 : vector<16x1xf32> to vector<16x64xf32>
    %179 = arith.mulf %167, %178 : vector<16x64xf32>
    %180 = vector.broadcast %169 : vector<1x64xf32> to vector<16x64xf32>
    %181 = arith.mulf %179, %180 : vector<16x64xf32>
    %182 = arith.truncf %181 : vector<16x64xf32> to vector<16x64xbf16>
    %c1_65 = arith.constant 1 : index
    %c0_66 = arith.constant 0 : index
    %c0_67 = arith.constant 0 : index
    %183 = vector.load %arg8[%c1_65, %c0_66, %c0_67] : memref<2x64x64xbf16, #tpu.memory_space<vmem>>, vector<1x64x64xbf16>
    %184 = vector.shape_cast %183 : vector<1x64x64xbf16> to vector<64x64xbf16>
    %cst_68 = arith.constant dense<0.000000e+00> : vector<16x64xf32>
    %185 = tpu.matmul %182, %184, %cst_68 {dimension_numbers = #tpu.dot_dimension_numbers<[1], [0], [0], [1], [0, 0, 1, 1], [], []>} : vector<16x64xbf16>, vector<64x64xbf16>, vector<16x64xf32> -> vector<16x64xf32>
    %186 = arith.truncf %185 : vector<16x64xf32> to vector<16x64xbf16>
    %187 = vector.extract_strided_slice %186 {offsets = [0, 0], sizes = [16, 16], strides = [1, 1]} : vector<16x64xbf16> to vector<16x16xbf16>
    %188 = vector.shape_cast %187 : vector<16x16xbf16> to vector<2x8x16xbf16>
    %189 = vector.extract_strided_slice %186 {offsets = [0, 16], sizes = [16, 16], strides = [1, 1]} : vector<16x64xbf16> to vector<16x16xbf16>
    %190 = vector.shape_cast %189 : vector<16x16xbf16> to vector<2x8x16xbf16>
    %191 = vector.extract_strided_slice %186 {offsets = [0, 32], sizes = [16, 16], strides = [1, 1]} : vector<16x64xbf16> to vector<16x16xbf16>
    %192 = vector.shape_cast %191 : vector<16x16xbf16> to vector<2x8x16xbf16>
    %193 = vector.extract_strided_slice %186 {offsets = [0, 48], sizes = [16, 16], strides = [1, 1]} : vector<16x64xbf16> to vector<16x16xbf16>
    %194 = vector.shape_cast %193 : vector<16x16xbf16> to vector<2x8x16xbf16>
    %195 = tpu.concatenate %188, %190, %192, %194 in 0 : vector<2x8x16xbf16>, vector<2x8x16xbf16>, vector<2x8x16xbf16>, vector<2x8x16xbf16> -> vector<8x8x16xbf16>
    %c1_69 = arith.constant 1 : index
    %c0_70 = arith.constant 0 : index
    %c0_71 = arith.constant 0 : index
    %196 = vector.load %arg9[%c1_69, %c0_70, %c0_71] : memref<2x64x64xbf16, #tpu.memory_space<vmem>>, vector<1x64x64xbf16>
    %197 = vector.shape_cast %196 : vector<1x64x64xbf16> to vector<64x64xbf16>
    %cst_72 = arith.constant dense<0.000000e+00> : vector<16x64xf32>
    %198 = tpu.matmul %182, %197, %cst_72 {dimension_numbers = #tpu.dot_dimension_numbers<[1], [0], [0], [1], [0, 0, 1, 1], [], []>} : vector<16x64xbf16>, vector<64x64xbf16>, vector<16x64xf32> -> vector<16x64xf32>
    %199 = arith.truncf %198 : vector<16x64xf32> to vector<16x64xbf16>
    %200 = vector.extract_strided_slice %199 {offsets = [0, 0], sizes = [16, 16], strides = [1, 1]} : vector<16x64xbf16> to vector<16x16xbf16>
    %201 = vector.shape_cast %200 : vector<16x16xbf16> to vector<2x8x16xbf16>
    %202 = vector.extract_strided_slice %199 {offsets = [0, 16], sizes = [16, 16], strides = [1, 1]} : vector<16x64xbf16> to vector<16x16xbf16>
    %203 = vector.shape_cast %202 : vector<16x16xbf16> to vector<2x8x16xbf16>
    %204 = vector.extract_strided_slice %199 {offsets = [0, 32], sizes = [16, 16], strides = [1, 1]} : vector<16x64xbf16> to vector<16x16xbf16>
    %205 = vector.shape_cast %204 : vector<16x16xbf16> to vector<2x8x16xbf16>
    %206 = vector.extract_strided_slice %199 {offsets = [0, 48], sizes = [16, 16], strides = [1, 1]} : vector<16x64xbf16> to vector<16x16xbf16>
    %207 = vector.shape_cast %206 : vector<16x16xbf16> to vector<2x8x16xbf16>
    %208 = tpu.concatenate %201, %203, %205, %207 in 0 : vector<2x8x16xbf16>, vector<2x8x16xbf16>, vector<2x8x16xbf16>, vector<2x8x16xbf16> -> vector<8x8x16xbf16>
    %c1_73 = arith.constant 1 : index
    %c0_74 = arith.constant 0 : index
    %c0_75 = arith.constant 0 : index
    %209 = vector.load %arg10[%c1_73, %c0_74, %c0_75] : memref<2x64x64xbf16, #tpu.memory_space<vmem>>, vector<1x64x64xbf16>
    %210 = vector.shape_cast %209 : vector<1x64x64xbf16> to vector<64x64xbf16>
    %cst_76 = arith.constant dense<0.000000e+00> : vector<16x64xf32>
    %211 = tpu.matmul %182, %210, %cst_76 {dimension_numbers = #tpu.dot_dimension_numbers<[1], [0], [0], [1], [0, 0, 1, 1], [], []>} : vector<16x64xbf16>, vector<64x64xbf16>, vector<16x64xf32> -> vector<16x64xf32>
    %212 = arith.truncf %211 : vector<16x64xf32> to vector<16x64xbf16>
    %213 = vector.extract_strided_slice %212 {offsets = [0, 0], sizes = [16, 16], strides = [1, 1]} : vector<16x64xbf16> to vector<16x16xbf16>
    %214 = vector.shape_cast %213 : vector<16x16xbf16> to vector<2x8x16xbf16>
    %215 = vector.extract_strided_slice %212 {offsets = [0, 16], sizes = [16, 16], strides = [1, 1]} : vector<16x64xbf16> to vector<16x16xbf16>
    %216 = vector.shape_cast %215 : vector<16x16xbf16> to vector<2x8x16xbf16>
    %217 = vector.extract_strided_slice %212 {offsets = [0, 32], sizes = [16, 16], strides = [1, 1]} : vector<16x64xbf16> to vector<16x16xbf16>
    %218 = vector.shape_cast %217 : vector<16x16xbf16> to vector<2x8x16xbf16>
    %219 = vector.extract_strided_slice %212 {offsets = [0, 48], sizes = [16, 16], strides = [1, 1]} : vector<16x64xbf16> to vector<16x16xbf16>
    %220 = vector.shape_cast %219 : vector<16x16xbf16> to vector<2x8x16xbf16>
    %221 = tpu.concatenate %214, %216, %218, %220 in 0 : vector<2x8x16xbf16>, vector<2x8x16xbf16>, vector<2x8x16xbf16>, vector<2x8x16xbf16> -> vector<8x8x16xbf16>
    %c1_77 = arith.constant 1 : index
    %c0_78 = arith.constant 0 : index
    %c0_79 = arith.constant 0 : index
    %222 = vector.load %arg11[%c1_77, %c0_78, %c0_79] : memref<2x64x64xbf16, #tpu.memory_space<vmem>>, vector<1x64x64xbf16>
    %223 = vector.shape_cast %222 : vector<1x64x64xbf16> to vector<64x64xbf16>
    "tpu.trace_start"() <{level = 10 : i32, message = "nqd,nkd->nqk"}> : () -> ()
    %cst_80 = arith.constant dense<0.000000e+00> : vector<8x8x8xf32>
    %224 = tpu.matmul %195, %208, %cst_80 {dimension_numbers = #tpu.dot_dimension_numbers<[2], [2], [1], [1], [0, 0, 0, 1, 1, 1], [0], [0]>} : vector<8x8x16xbf16>, vector<8x8x16xbf16>, vector<8x8x8xf32> -> vector<8x8x8xf32>
    "tpu.trace_stop"() : () -> ()
    %225 = arith.addf %224, %11 : vector<8x8x8xf32>
    %cst_81 = arith.constant dense<0xFF800000> : vector<8x8xf32>
    %226 = vector.multi_reduction <maximumf>, %225, %cst_81 [2] : vector<8x8x8xf32> to vector<8x8xf32>
    %227 = vector.shape_cast %226 : vector<8x8xf32> to vector<8x8x1xf32>
    %228 = vector.broadcast %227 : vector<8x8x1xf32> to vector<8x8x8xf32>
    %229 = arith.subf %225, %228 : vector<8x8x8xf32>
    %230 = math.exp %229 : vector<8x8x8xf32>
    %cst_82 = arith.constant dense<0.000000e+00> : vector<8x8xf32>
    %231 = vector.multi_reduction <add>, %230, %cst_82 [2] : vector<8x8x8xf32> to vector<8x8xf32>
    %232 = vector.shape_cast %231 : vector<8x8xf32> to vector<8x8x1xf32>
    %233 = tpu.reciprocal %232 {approx = true} : vector<8x8x1xf32> -> vector<8x8x1xf32>
    %234 = vector.broadcast %233 : vector<8x8x1xf32> to vector<8x8x8xf32>
    %235 = arith.mulf %230, %234 : vector<8x8x8xf32>
    %236 = arith.truncf %235 : vector<8x8x8xf32> to vector<8x8x8xbf16>
    "tpu.trace_start"() <{level = 10 : i32, message = "nqk,nkd->nqd"}> : () -> ()
    %cst_83 = arith.constant dense<0.000000e+00> : vector<8x8x16xf32>
    %237 = tpu.matmul %236, %221, %cst_83 {dimension_numbers = #tpu.dot_dimension_numbers<[2], [1], [1], [2], [0, 0, 0, 1, 1, 2], [0], [0]>} : vector<8x8x8xbf16>, vector<8x8x16xbf16>, vector<8x8x16xf32> -> vector<8x8x16xf32>
    "tpu.trace_stop"() : () -> ()
    %238 = vector.shape_cast %237 : vector<8x8x16xf32> to vector<4x2x8x16xf32>
    %239 = vector.extract_strided_slice %238 {offsets = [0, 0, 0, 0], sizes = [1, 2, 8, 16], strides = [1, 1, 1, 1]} : vector<4x2x8x16xf32> to vector<1x2x8x16xf32>
    %240 = vector.shape_cast %239 : vector<1x2x8x16xf32> to vector<2x8x16xf32>
    %241 = vector.shape_cast %240 : vector<2x8x16xf32> to vector<16x16xf32>
    %242 = vector.extract_strided_slice %223 {offsets = [0, 0], sizes = [16, 64], strides = [1, 1]} : vector<64x64xbf16> to vector<16x64xbf16>
    %243 = arith.truncf %241 : vector<16x16xf32> to vector<16x16xbf16>
    %cst_84 = arith.constant dense<0.000000e+00> : vector<16x64xf32>
    %244 = tpu.matmul %243, %242, %cst_84 {dimension_numbers = #tpu.dot_dimension_numbers<[1], [0], [0], [1], [0, 0, 1, 1], [], []>} : vector<16x16xbf16>, vector<16x64xbf16>, vector<16x64xf32> -> vector<16x64xf32>
    %245 = vector.extract_strided_slice %238 {offsets = [1, 0, 0, 0], sizes = [1, 2, 8, 16], strides = [1, 1, 1, 1]} : vector<4x2x8x16xf32> to vector<1x2x8x16xf32>
    %246 = vector.shape_cast %245 : vector<1x2x8x16xf32> to vector<2x8x16xf32>
    %247 = vector.shape_cast %246 : vector<2x8x16xf32> to vector<16x16xf32>
    %248 = vector.extract_strided_slice %223 {offsets = [16, 0], sizes = [16, 64], strides = [1, 1]} : vector<64x64xbf16> to vector<16x64xbf16>
    %249 = arith.truncf %247 : vector<16x16xf32> to vector<16x16xbf16>
    %cst_85 = arith.constant dense<0.000000e+00> : vector<16x64xf32>
    %250 = tpu.matmul %249, %248, %cst_85 {dimension_numbers = #tpu.dot_dimension_numbers<[1], [0], [0], [1], [0, 0, 1, 1], [], []>} : vector<16x16xbf16>, vector<16x64xbf16>, vector<16x64xf32> -> vector<16x64xf32>
    %251 = arith.addf %244, %250 : vector<16x64xf32>
    %252 = vector.extract_strided_slice %238 {offsets = [2, 0, 0, 0], sizes = [1, 2, 8, 16], strides = [1, 1, 1, 1]} : vector<4x2x8x16xf32> to vector<1x2x8x16xf32>
    %253 = vector.shape_cast %252 : vector<1x2x8x16xf32> to vector<2x8x16xf32>
    %254 = vector.shape_cast %253 : vector<2x8x16xf32> to vector<16x16xf32>
    %255 = vector.extract_strided_slice %223 {offsets = [32, 0], sizes = [16, 64], strides = [1, 1]} : vector<64x64xbf16> to vector<16x64xbf16>
    %256 = arith.truncf %254 : vector<16x16xf32> to vector<16x16xbf16>
    %cst_86 = arith.constant dense<0.000000e+00> : vector<16x64xf32>
    %257 = tpu.matmul %256, %255, %cst_86 {dimension_numbers = #tpu.dot_dimension_numbers<[1], [0], [0], [1], [0, 0, 1, 1], [], []>} : vector<16x16xbf16>, vector<16x64xbf16>, vector<16x64xf32> -> vector<16x64xf32>
    %258 = arith.addf %251, %257 : vector<16x64xf32>
    %259 = vector.extract_strided_slice %238 {offsets = [3, 0, 0, 0], sizes = [1, 2, 8, 16], strides = [1, 1, 1, 1]} : vector<4x2x8x16xf32> to vector<1x2x8x16xf32>
    %260 = vector.shape_cast %259 : vector<1x2x8x16xf32> to vector<2x8x16xf32>
    %261 = vector.shape_cast %260 : vector<2x8x16xf32> to vector<16x16xf32>
    %262 = vector.extract_strided_slice %223 {offsets = [48, 0], sizes = [16, 64], strides = [1, 1]} : vector<64x64xbf16> to vector<16x64xbf16>
    %263 = arith.truncf %261 : vector<16x16xf32> to vector<16x16xbf16>
    %cst_87 = arith.constant dense<0.000000e+00> : vector<16x64xf32>
    %264 = tpu.matmul %263, %262, %cst_87 {dimension_numbers = #tpu.dot_dimension_numbers<[1], [0], [0], [1], [0, 0, 1, 1], [], []>} : vector<16x16xbf16>, vector<16x64xbf16>, vector<16x64xf32> -> vector<16x64xf32>
    %265 = arith.addf %258, %264 : vector<16x64xf32>
    %266 = arith.addf %167, %265 : vector<16x64xf32>
    %c1_88 = arith.constant 1 : index
    %c0_89 = arith.constant 0 : index
    %c0_90 = arith.constant 0 : index
    %267 = vector.load %arg12[%c1_88, %c0_89, %c0_90] : memref<2x1x64xf32, #tpu.memory_space<vmem>>, vector<1x1x64xf32>
    %268 = vector.shape_cast %267 : vector<1x1x64xf32> to vector<1x64xf32>
    %269 = arith.mulf %266, %266 : vector<16x64xf32>
    %cst_91 = arith.constant dense<0.000000e+00> : vector<16xf32>
    %270 = vector.multi_reduction <add>, %269, %cst_91 [1] : vector<16x64xf32> to vector<16xf32>
    %271 = vector.shape_cast %270 : vector<16xf32> to vector<16x1xf32>
    %cst_92 = arith.constant 6.400000e+01 : f32
    %272 = vector.broadcast %cst_92 : f32 to vector<16x1xf32>
    %273 = arith.divf %271, %272 : vector<16x1xf32>
    %cst_93 = arith.constant 9.99999997E-7 : f32
    %274 = vector.broadcast %cst_93 : f32 to vector<16x1xf32>
    %275 = arith.addf %273, %274 : vector<16x1xf32>
    %276 = math.rsqrt %275 : vector<16x1xf32>
    %277 = vector.broadcast %276 : vector<16x1xf32> to vector<16x64xf32>
    %278 = arith.mulf %266, %277 : vector<16x64xf32>
    %279 = vector.broadcast %268 : vector<1x64xf32> to vector<16x64xf32>
    %280 = arith.mulf %278, %279 : vector<16x64xf32>
    %281 = arith.truncf %280 : vector<16x64xf32> to vector<16x64xbf16>
    %c1_94 = arith.constant 1 : index
    %c0_95 = arith.constant 0 : index
    %c0_96 = arith.constant 0 : index
    %282 = vector.load %arg13[%c1_94, %c0_95, %c0_96] : memref<2x64x256xbf16, #tpu.memory_space<vmem>>, vector<1x64x256xbf16>
    %283 = vector.shape_cast %282 : vector<1x64x256xbf16> to vector<64x256xbf16>
    %cst_97 = arith.constant dense<0.000000e+00> : vector<16x256xf32>
    %284 = tpu.matmul %281, %283, %cst_97 {dimension_numbers = #tpu.dot_dimension_numbers<[1], [0], [0], [1], [0, 0, 1, 1], [], []>} : vector<16x64xbf16>, vector<64x256xbf16>, vector<16x256xf32> -> vector<16x256xf32>
    %285 = vector.extract_strided_slice %284 {offsets = [0, 0], sizes = [16, 128], strides = [1, 1]} : vector<16x256xf32> to vector<16x128xf32>
    %286 = arith.mulf %285, %285 : vector<16x128xf32>
    %287 = arith.mulf %285, %286 : vector<16x128xf32>
    %cst_98 = arith.constant 4.471500e-02 : f32
    %288 = vector.broadcast %cst_98 : f32 to vector<16x128xf32>
    %289 = arith.mulf %288, %287 : vector<16x128xf32>
    %290 = arith.addf %285, %289 : vector<16x128xf32>
    %cst_99 = arith.constant 0.797884583 : f32
    %291 = vector.broadcast %cst_99 : f32 to vector<16x128xf32>
    %292 = arith.mulf %291, %290 : vector<16x128xf32>
    %293 = math.tanh %292 : vector<16x128xf32>
    %cst_100 = arith.constant 1.000000e+00 : f32
    %294 = vector.broadcast %cst_100 : f32 to vector<16x128xf32>
    %295 = arith.addf %294, %293 : vector<16x128xf32>
    %cst_101 = arith.constant 5.000000e-01 : f32
    %296 = vector.broadcast %cst_101 : f32 to vector<16x128xf32>
    %297 = arith.mulf %296, %295 : vector<16x128xf32>
    %298 = arith.mulf %285, %297 : vector<16x128xf32>
    %299 = vector.extract_strided_slice %284 {offsets = [0, 128], sizes = [16, 128], strides = [1, 1]} : vector<16x256xf32> to vector<16x128xf32>
    %300 = arith.mulf %298, %299 : vector<16x128xf32>
    %c1_102 = arith.constant 1 : index
    %c0_103 = arith.constant 0 : index
    %c0_104 = arith.constant 0 : index
    %301 = vector.load %arg14[%c1_102, %c0_103, %c0_104] : memref<2x128x64xbf16, #tpu.memory_space<vmem>>, vector<1x128x64xbf16>
    %302 = vector.shape_cast %301 : vector<1x128x64xbf16> to vector<128x64xbf16>
    %303 = arith.truncf %300 : vector<16x128xf32> to vector<16x128xbf16>
    %cst_105 = arith.constant dense<0.000000e+00> : vector<16x64xf32>
    %304 = tpu.matmul %303, %302, %cst_105 {dimension_numbers = #tpu.dot_dimension_numbers<[1], [0], [0], [1], [0, 0, 1, 1], [], []>} : vector<16x128xbf16>, vector<128x64xbf16>, vector<16x64xf32> -> vector<16x64xf32>
    %305 = arith.addf %266, %304 : vector<16x64xf32>
    %c0_106 = arith.constant 0 : index
    %c0_107 = arith.constant 0 : index
    %306 = vector.load %arg15[%c0_106, %c0_107] : memref<1x64xf32, #tpu.memory_space<vmem>>, vector<1x64xf32>
    %307 = arith.mulf %305, %305 : vector<16x64xf32>
    %cst_108 = arith.constant dense<0.000000e+00> : vector<16xf32>
    %308 = vector.multi_reduction <add>, %307, %cst_108 [1] : vector<16x64xf32> to vector<16xf32>
    %309 = vector.shape_cast %308 : vector<16xf32> to vector<16x1xf32>
    %cst_109 = arith.constant 6.400000e+01 : f32
    %310 = vector.broadcast %cst_109 : f32 to vector<16x1xf32>
    %311 = arith.divf %309, %310 : vector<16x1xf32>
    %cst_110 = arith.constant 9.99999997E-7 : f32
    %312 = vector.broadcast %cst_110 : f32 to vector<16x1xf32>
    %313 = arith.addf %311, %312 : vector<16x1xf32>
    %314 = math.rsqrt %313 : vector<16x1xf32>
    %315 = vector.broadcast %314 : vector<16x1xf32> to vector<16x64xf32>
    %316 = arith.mulf %305, %315 : vector<16x64xf32>
    %317 = vector.broadcast %306 : vector<1x64xf32> to vector<16x64xf32>
    %318 = arith.mulf %316, %317 : vector<16x64xf32>
    %c0_111 = arith.constant 0 : index
    %c0_112 = arith.constant 0 : index
    %319 = vector.load %arg1[%c0_111, %c0_112] : memref<16x1xi32, #tpu.memory_space<vmem>>, vector<16x1xi32>
    %320 = tpu.iota {dimensions = array<i32: 1>} : vector<16x128xi32>
    %321 = vector.broadcast %319 : vector<16x1xi32> to vector<16x128xi32>
    %322 = arith.cmpi eq, %320, %321 : vector<16x128xi32>
    %323 = arith.extui %322 : vector<16x128xi1> to vector<16x128xi32>
    %324 = arith.sitofp %323 : vector<16x128xi32> to vector<16x128xf32>
    %325 = arith.truncf %324 : vector<16x128xf32> to vector<16x128xbf16>
    %c0_113 = arith.constant 0 : index
    %c0_114 = arith.constant 0 : index
    %326 = vector.load %arg4[%c0_113, %c0_114] : memref<128x64xbf16, #tpu.memory_space<vmem>>, vector<128x64xbf16>
    %cst_115 = arith.constant dense<0.000000e+00> : vector<16x64xf32>
    %327 = tpu.matmul %325, %326, %cst_115 {dimension_numbers = #tpu.dot_dimension_numbers<[1], [0], [0], [1], [0, 0, 1, 1], [], []>} : vector<16x128xbf16>, vector<128x64xbf16>, vector<16x64xf32> -> vector<16x64xf32>
    %328 = arith.truncf %318 : vector<16x64xf32> to vector<16x64xbf16>
    %c0_116 = arith.constant 0 : index
    %c0_117 = arith.constant 0 : index
    %c0_118 = arith.constant 0 : index
    %329 = vector.load %arg23[%c0_116, %c0_117, %c0_118] : memref<2x64x64xbf16, #tpu.memory_space<vmem>>, vector<1x64x64xbf16>
    %330 = vector.shape_cast %329 : vector<1x64x64xbf16> to vector<64x64xbf16>
    %cst_119 = arith.constant dense<0.000000e+00> : vector<16x64xf32>
    %331 = tpu.matmul %328, %330, %cst_119 {dimension_numbers = #tpu.dot_dimension_numbers<[1], [0], [0], [1], [0, 0, 1, 1], [], []>} : vector<16x64xbf16>, vector<64x64xbf16>, vector<16x64xf32> -> vector<16x64xf32>
    %332 = arith.truncf %331 : vector<16x64xf32> to vector<16x64xbf16>
    %333 = vector.extract_strided_slice %332 {offsets = [0, 0], sizes = [16, 16], strides = [1, 1]} : vector<16x64xbf16> to vector<16x16xbf16>
    %334 = vector.shape_cast %333 : vector<16x16xbf16> to vector<2x8x16xbf16>
    %335 = vector.extract_strided_slice %332 {offsets = [0, 16], sizes = [16, 16], strides = [1, 1]} : vector<16x64xbf16> to vector<16x16xbf16>
    %336 = vector.shape_cast %335 : vector<16x16xbf16> to vector<2x8x16xbf16>
    %337 = vector.extract_strided_slice %332 {offsets = [0, 32], sizes = [16, 16], strides = [1, 1]} : vector<16x64xbf16> to vector<16x16xbf16>
    %338 = vector.shape_cast %337 : vector<16x16xbf16> to vector<2x8x16xbf16>
    %339 = vector.extract_strided_slice %332 {offsets = [0, 48], sizes = [16, 16], strides = [1, 1]} : vector<16x64xbf16> to vector<16x16xbf16>
    %340 = vector.shape_cast %339 : vector<16x16xbf16> to vector<2x8x16xbf16>
    %341 = tpu.concatenate %334, %336, %338, %340 in 0 : vector<2x8x16xbf16>, vector<2x8x16xbf16>, vector<2x8x16xbf16>, vector<2x8x16xbf16> -> vector<8x8x16xbf16>
    %c0_120 = arith.constant 0 : index
    %c0_121 = arith.constant 0 : index
    %c0_122 = arith.constant 0 : index
    %342 = vector.load %arg24[%c0_120, %c0_121, %c0_122] : memref<2x64x64xbf16, #tpu.memory_space<vmem>>, vector<1x64x64xbf16>
    %343 = vector.shape_cast %342 : vector<1x64x64xbf16> to vector<64x64xbf16>
    %cst_123 = arith.constant dense<0.000000e+00> : vector<16x64xf32>
    %344 = tpu.matmul %328, %343, %cst_123 {dimension_numbers = #tpu.dot_dimension_numbers<[1], [0], [0], [1], [0, 0, 1, 1], [], []>} : vector<16x64xbf16>, vector<64x64xbf16>, vector<16x64xf32> -> vector<16x64xf32>
    %345 = arith.truncf %344 : vector<16x64xf32> to vector<16x64xbf16>
    %346 = vector.extract_strided_slice %345 {offsets = [0, 0], sizes = [16, 16], strides = [1, 1]} : vector<16x64xbf16> to vector<16x16xbf16>
    %347 = vector.shape_cast %346 : vector<16x16xbf16> to vector<2x8x16xbf16>
    %348 = vector.extract_strided_slice %345 {offsets = [0, 16], sizes = [16, 16], strides = [1, 1]} : vector<16x64xbf16> to vector<16x16xbf16>
    %349 = vector.shape_cast %348 : vector<16x16xbf16> to vector<2x8x16xbf16>
    %350 = vector.extract_strided_slice %345 {offsets = [0, 32], sizes = [16, 16], strides = [1, 1]} : vector<16x64xbf16> to vector<16x16xbf16>
    %351 = vector.shape_cast %350 : vector<16x16xbf16> to vector<2x8x16xbf16>
    %352 = vector.extract_strided_slice %345 {offsets = [0, 48], sizes = [16, 16], strides = [1, 1]} : vector<16x64xbf16> to vector<16x16xbf16>
    %353 = vector.shape_cast %352 : vector<16x16xbf16> to vector<2x8x16xbf16>
    %354 = tpu.concatenate %347, %349, %351, %353 in 0 : vector<2x8x16xbf16>, vector<2x8x16xbf16>, vector<2x8x16xbf16>, vector<2x8x16xbf16> -> vector<8x8x16xbf16>
    %c1_124 = arith.constant 1 : index
    %c0_125 = arith.constant 0 : index
    %c0_126 = arith.constant 0 : index
    %355 = vector.load %arg23[%c1_124, %c0_125, %c0_126] : memref<2x64x64xbf16, #tpu.memory_space<vmem>>, vector<1x64x64xbf16>
    %356 = vector.shape_cast %355 : vector<1x64x64xbf16> to vector<64x64xbf16>
    %cst_127 = arith.constant dense<0.000000e+00> : vector<16x64xf32>
    %357 = tpu.matmul %328, %356, %cst_127 {dimension_numbers = #tpu.dot_dimension_numbers<[1], [0], [0], [1], [0, 0, 1, 1], [], []>} : vector<16x64xbf16>, vector<64x64xbf16>, vector<16x64xf32> -> vector<16x64xf32>
    %358 = arith.truncf %357 : vector<16x64xf32> to vector<16x64xbf16>
    %359 = vector.extract_strided_slice %358 {offsets = [0, 0], sizes = [16, 16], strides = [1, 1]} : vector<16x64xbf16> to vector<16x16xbf16>
    %360 = vector.shape_cast %359 : vector<16x16xbf16> to vector<2x8x16xbf16>
    %361 = vector.extract_strided_slice %358 {offsets = [0, 16], sizes = [16, 16], strides = [1, 1]} : vector<16x64xbf16> to vector<16x16xbf16>
    %362 = vector.shape_cast %361 : vector<16x16xbf16> to vector<2x8x16xbf16>
    %363 = vector.extract_strided_slice %358 {offsets = [0, 32], sizes = [16, 16], strides = [1, 1]} : vector<16x64xbf16> to vector<16x16xbf16>
    %364 = vector.shape_cast %363 : vector<16x16xbf16> to vector<2x8x16xbf16>
    %365 = vector.extract_strided_slice %358 {offsets = [0, 48], sizes = [16, 16], strides = [1, 1]} : vector<16x64xbf16> to vector<16x16xbf16>
    %366 = vector.shape_cast %365 : vector<16x16xbf16> to vector<2x8x16xbf16>
    %367 = tpu.concatenate %360, %362, %364, %366 in 0 : vector<2x8x16xbf16>, vector<2x8x16xbf16>, vector<2x8x16xbf16>, vector<2x8x16xbf16> -> vector<8x8x16xbf16>
    %c1_128 = arith.constant 1 : index
    %c0_129 = arith.constant 0 : index
    %c0_130 = arith.constant 0 : index
    %368 = vector.load %arg24[%c1_128, %c0_129, %c0_130] : memref<2x64x64xbf16, #tpu.memory_space<vmem>>, vector<1x64x64xbf16>
    %369 = vector.shape_cast %368 : vector<1x64x64xbf16> to vector<64x64xbf16>
    %cst_131 = arith.constant dense<0.000000e+00> : vector<16x64xf32>
    %370 = tpu.matmul %328, %369, %cst_131 {dimension_numbers = #tpu.dot_dimension_numbers<[1], [0], [0], [1], [0, 0, 1, 1], [], []>} : vector<16x64xbf16>, vector<64x64xbf16>, vector<16x64xf32> -> vector<16x64xf32>
    %371 = arith.truncf %370 : vector<16x64xf32> to vector<16x64xbf16>
    %372 = vector.extract_strided_slice %371 {offsets = [0, 0], sizes = [16, 16], strides = [1, 1]} : vector<16x64xbf16> to vector<16x16xbf16>
    %373 = vector.shape_cast %372 : vector<16x16xbf16> to vector<2x8x16xbf16>
    %374 = vector.extract_strided_slice %371 {offsets = [0, 16], sizes = [16, 16], strides = [1, 1]} : vector<16x64xbf16> to vector<16x16xbf16>
    %375 = vector.shape_cast %374 : vector<16x16xbf16> to vector<2x8x16xbf16>
    %376 = vector.extract_strided_slice %371 {offsets = [0, 32], sizes = [16, 16], strides = [1, 1]} : vector<16x64xbf16> to vector<16x16xbf16>
    %377 = vector.shape_cast %376 : vector<16x16xbf16> to vector<2x8x16xbf16>
    %378 = vector.extract_strided_slice %371 {offsets = [0, 48], sizes = [16, 16], strides = [1, 1]} : vector<16x64xbf16> to vector<16x16xbf16>
    %379 = vector.shape_cast %378 : vector<16x16xbf16> to vector<2x8x16xbf16>
    %380 = tpu.concatenate %373, %375, %377, %379 in 0 : vector<2x8x16xbf16>, vector<2x8x16xbf16>, vector<2x8x16xbf16>, vector<2x8x16xbf16> -> vector<8x8x16xbf16>
    %c0_132 = arith.constant 0 : index
    %c0_133 = arith.constant 0 : index
    %c0_134 = arith.constant 0 : index
    %381 = vector.load %arg16[%c0_132, %c0_133, %c0_134] : memref<2x1x64xf32, #tpu.memory_space<vmem>>, vector<1x1x64xf32>
    %382 = vector.shape_cast %381 : vector<1x1x64xf32> to vector<1x64xf32>
    %383 = arith.mulf %327, %327 : vector<16x64xf32>
    %cst_135 = arith.constant dense<0.000000e+00> : vector<16xf32>
    %384 = vector.multi_reduction <add>, %383, %cst_135 [1] : vector<16x64xf32> to vector<16xf32>
    %385 = vector.shape_cast %384 : vector<16xf32> to vector<16x1xf32>
    %cst_136 = arith.constant 6.400000e+01 : f32
    %386 = vector.broadcast %cst_136 : f32 to vector<16x1xf32>
    %387 = arith.divf %385, %386 : vector<16x1xf32>
    %cst_137 = arith.constant 9.99999997E-7 : f32
    %388 = vector.broadcast %cst_137 : f32 to vector<16x1xf32>
    %389 = arith.addf %387, %388 : vector<16x1xf32>
    %390 = math.rsqrt %389 : vector<16x1xf32>
    %391 = vector.broadcast %390 : vector<16x1xf32> to vector<16x64xf32>
    %392 = arith.mulf %327, %391 : vector<16x64xf32>
    %393 = vector.broadcast %382 : vector<1x64xf32> to vector<16x64xf32>
    %394 = arith.mulf %392, %393 : vector<16x64xf32>
    %395 = arith.truncf %394 : vector<16x64xf32> to vector<16x64xbf16>
    %c0_138 = arith.constant 0 : index
    %c0_139 = arith.constant 0 : index
    %c0_140 = arith.constant 0 : index
    %396 = vector.load %arg17[%c0_138, %c0_139, %c0_140] : memref<2x64x64xbf16, #tpu.memory_space<vmem>>, vector<1x64x64xbf16>
    %397 = vector.shape_cast %396 : vector<1x64x64xbf16> to vector<64x64xbf16>
    %cst_141 = arith.constant dense<0.000000e+00> : vector<16x64xf32>
    %398 = tpu.matmul %395, %397, %cst_141 {dimension_numbers = #tpu.dot_dimension_numbers<[1], [0], [0], [1], [0, 0, 1, 1], [], []>} : vector<16x64xbf16>, vector<64x64xbf16>, vector<16x64xf32> -> vector<16x64xf32>
    %399 = arith.truncf %398 : vector<16x64xf32> to vector<16x64xbf16>
    %400 = vector.extract_strided_slice %399 {offsets = [0, 0], sizes = [16, 16], strides = [1, 1]} : vector<16x64xbf16> to vector<16x16xbf16>
    %401 = vector.shape_cast %400 : vector<16x16xbf16> to vector<2x8x16xbf16>
    %402 = vector.extract_strided_slice %399 {offsets = [0, 16], sizes = [16, 16], strides = [1, 1]} : vector<16x64xbf16> to vector<16x16xbf16>
    %403 = vector.shape_cast %402 : vector<16x16xbf16> to vector<2x8x16xbf16>
    %404 = vector.extract_strided_slice %399 {offsets = [0, 32], sizes = [16, 16], strides = [1, 1]} : vector<16x64xbf16> to vector<16x16xbf16>
    %405 = vector.shape_cast %404 : vector<16x16xbf16> to vector<2x8x16xbf16>
    %406 = vector.extract_strided_slice %399 {offsets = [0, 48], sizes = [16, 16], strides = [1, 1]} : vector<16x64xbf16> to vector<16x16xbf16>
    %407 = vector.shape_cast %406 : vector<16x16xbf16> to vector<2x8x16xbf16>
    %408 = tpu.concatenate %401, %403, %405, %407 in 0 : vector<2x8x16xbf16>, vector<2x8x16xbf16>, vector<2x8x16xbf16>, vector<2x8x16xbf16> -> vector<8x8x16xbf16>
    %c0_142 = arith.constant 0 : index
    %c0_143 = arith.constant 0 : index
    %c0_144 = arith.constant 0 : index
    %409 = vector.load %arg18[%c0_142, %c0_143, %c0_144] : memref<2x64x64xbf16, #tpu.memory_space<vmem>>, vector<1x64x64xbf16>
    %410 = vector.shape_cast %409 : vector<1x64x64xbf16> to vector<64x64xbf16>
    %cst_145 = arith.constant dense<0.000000e+00> : vector<16x64xf32>
    %411 = tpu.matmul %395, %410, %cst_145 {dimension_numbers = #tpu.dot_dimension_numbers<[1], [0], [0], [1], [0, 0, 1, 1], [], []>} : vector<16x64xbf16>, vector<64x64xbf16>, vector<16x64xf32> -> vector<16x64xf32>
    %412 = arith.truncf %411 : vector<16x64xf32> to vector<16x64xbf16>
    %413 = vector.extract_strided_slice %412 {offsets = [0, 0], sizes = [16, 16], strides = [1, 1]} : vector<16x64xbf16> to vector<16x16xbf16>
    %414 = vector.shape_cast %413 : vector<16x16xbf16> to vector<2x8x16xbf16>
    %415 = vector.extract_strided_slice %412 {offsets = [0, 16], sizes = [16, 16], strides = [1, 1]} : vector<16x64xbf16> to vector<16x16xbf16>
    %416 = vector.shape_cast %415 : vector<16x16xbf16> to vector<2x8x16xbf16>
    %417 = vector.extract_strided_slice %412 {offsets = [0, 32], sizes = [16, 16], strides = [1, 1]} : vector<16x64xbf16> to vector<16x16xbf16>
    %418 = vector.shape_cast %417 : vector<16x16xbf16> to vector<2x8x16xbf16>
    %419 = vector.extract_strided_slice %412 {offsets = [0, 48], sizes = [16, 16], strides = [1, 1]} : vector<16x64xbf16> to vector<16x16xbf16>
    %420 = vector.shape_cast %419 : vector<16x16xbf16> to vector<2x8x16xbf16>
    %421 = tpu.concatenate %414, %416, %418, %420 in 0 : vector<2x8x16xbf16>, vector<2x8x16xbf16>, vector<2x8x16xbf16>, vector<2x8x16xbf16> -> vector<8x8x16xbf16>
    %c0_146 = arith.constant 0 : index
    %c0_147 = arith.constant 0 : index
    %c0_148 = arith.constant 0 : index
    %422 = vector.load %arg19[%c0_146, %c0_147, %c0_148] : memref<2x64x64xbf16, #tpu.memory_space<vmem>>, vector<1x64x64xbf16>
    %423 = vector.shape_cast %422 : vector<1x64x64xbf16> to vector<64x64xbf16>
    %cst_149 = arith.constant dense<0.000000e+00> : vector<16x64xf32>
    %424 = tpu.matmul %395, %423, %cst_149 {dimension_numbers = #tpu.dot_dimension_numbers<[1], [0], [0], [1], [0, 0, 1, 1], [], []>} : vector<16x64xbf16>, vector<64x64xbf16>, vector<16x64xf32> -> vector<16x64xf32>
    %425 = arith.truncf %424 : vector<16x64xf32> to vector<16x64xbf16>
    %426 = vector.extract_strided_slice %425 {offsets = [0, 0], sizes = [16, 16], strides = [1, 1]} : vector<16x64xbf16> to vector<16x16xbf16>
    %427 = vector.shape_cast %426 : vector<16x16xbf16> to vector<2x8x16xbf16>
    %428 = vector.extract_strided_slice %425 {offsets = [0, 16], sizes = [16, 16], strides = [1, 1]} : vector<16x64xbf16> to vector<16x16xbf16>
    %429 = vector.shape_cast %428 : vector<16x16xbf16> to vector<2x8x16xbf16>
    %430 = vector.extract_strided_slice %425 {offsets = [0, 32], sizes = [16, 16], strides = [1, 1]} : vector<16x64xbf16> to vector<16x16xbf16>
    %431 = vector.shape_cast %430 : vector<16x16xbf16> to vector<2x8x16xbf16>
    %432 = vector.extract_strided_slice %425 {offsets = [0, 48], sizes = [16, 16], strides = [1, 1]} : vector<16x64xbf16> to vector<16x16xbf16>
    %433 = vector.shape_cast %432 : vector<16x16xbf16> to vector<2x8x16xbf16>
    %434 = tpu.concatenate %427, %429, %431, %433 in 0 : vector<2x8x16xbf16>, vector<2x8x16xbf16>, vector<2x8x16xbf16>, vector<2x8x16xbf16> -> vector<8x8x16xbf16>
    %c0_150 = arith.constant 0 : index
    %c0_151 = arith.constant 0 : index
    %c0_152 = arith.constant 0 : index
    %435 = vector.load %arg20[%c0_150, %c0_151, %c0_152] : memref<2x64x64xbf16, #tpu.memory_space<vmem>>, vector<1x64x64xbf16>
    %436 = vector.shape_cast %435 : vector<1x64x64xbf16> to vector<64x64xbf16>
    "tpu.trace_start"() <{level = 10 : i32, message = "nqd,nkd->nqk"}> : () -> ()
    %cst_153 = arith.constant dense<0.000000e+00> : vector<8x8x8xf32>
    %437 = tpu.matmul %408, %421, %cst_153 {dimension_numbers = #tpu.dot_dimension_numbers<[2], [2], [1], [1], [0, 0, 0, 1, 1, 1], [0], [0]>} : vector<8x8x16xbf16>, vector<8x8x16xbf16>, vector<8x8x8xf32> -> vector<8x8x8xf32>
    "tpu.trace_stop"() : () -> ()
    %438 = arith.addf %437, %16 : vector<8x8x8xf32>
    %cst_154 = arith.constant dense<0xFF800000> : vector<8x8xf32>
    %439 = vector.multi_reduction <maximumf>, %438, %cst_154 [2] : vector<8x8x8xf32> to vector<8x8xf32>
    %440 = vector.shape_cast %439 : vector<8x8xf32> to vector<8x8x1xf32>
    %441 = vector.broadcast %440 : vector<8x8x1xf32> to vector<8x8x8xf32>
    %442 = arith.subf %438, %441 : vector<8x8x8xf32>
    %443 = math.exp %442 : vector<8x8x8xf32>
    %cst_155 = arith.constant dense<0.000000e+00> : vector<8x8xf32>
    %444 = vector.multi_reduction <add>, %443, %cst_155 [2] : vector<8x8x8xf32> to vector<8x8xf32>
    %445 = vector.shape_cast %444 : vector<8x8xf32> to vector<8x8x1xf32>
    %446 = tpu.reciprocal %445 {approx = true} : vector<8x8x1xf32> -> vector<8x8x1xf32>
    %447 = vector.broadcast %446 : vector<8x8x1xf32> to vector<8x8x8xf32>
    %448 = arith.mulf %443, %447 : vector<8x8x8xf32>
    %449 = arith.truncf %448 : vector<8x8x8xf32> to vector<8x8x8xbf16>
    "tpu.trace_start"() <{level = 10 : i32, message = "nqk,nkd->nqd"}> : () -> ()
    %cst_156 = arith.constant dense<0.000000e+00> : vector<8x8x16xf32>
    %450 = tpu.matmul %449, %434, %cst_156 {dimension_numbers = #tpu.dot_dimension_numbers<[2], [1], [1], [2], [0, 0, 0, 1, 1, 2], [0], [0]>} : vector<8x8x8xbf16>, vector<8x8x16xbf16>, vector<8x8x16xf32> -> vector<8x8x16xf32>
    "tpu.trace_stop"() : () -> ()
    %451 = vector.shape_cast %450 : vector<8x8x16xf32> to vector<4x2x8x16xf32>
    %452 = vector.extract_strided_slice %451 {offsets = [0, 0, 0, 0], sizes = [1, 2, 8, 16], strides = [1, 1, 1, 1]} : vector<4x2x8x16xf32> to vector<1x2x8x16xf32>
    %453 = vector.shape_cast %452 : vector<1x2x8x16xf32> to vector<2x8x16xf32>
    %454 = vector.shape_cast %453 : vector<2x8x16xf32> to vector<16x16xf32>
    %455 = vector.extract_strided_slice %436 {offsets = [0, 0], sizes = [16, 64], strides = [1, 1]} : vector<64x64xbf16> to vector<16x64xbf16>
    %456 = arith.truncf %454 : vector<16x16xf32> to vector<16x16xbf16>
    %cst_157 = arith.constant dense<0.000000e+00> : vector<16x64xf32>
    %457 = tpu.matmul %456, %455, %cst_157 {dimension_numbers = #tpu.dot_dimension_numbers<[1], [0], [0], [1], [0, 0, 1, 1], [], []>} : vector<16x16xbf16>, vector<16x64xbf16>, vector<16x64xf32> -> vector<16x64xf32>
    %458 = vector.extract_strided_slice %451 {offsets = [1, 0, 0, 0], sizes = [1, 2, 8, 16], strides = [1, 1, 1, 1]} : vector<4x2x8x16xf32> to vector<1x2x8x16xf32>
    %459 = vector.shape_cast %458 : vector<1x2x8x16xf32> to vector<2x8x16xf32>
    %460 = vector.shape_cast %459 : vector<2x8x16xf32> to vector<16x16xf32>
    %461 = vector.extract_strided_slice %436 {offsets = [16, 0], sizes = [16, 64], strides = [1, 1]} : vector<64x64xbf16> to vector<16x64xbf16>
    %462 = arith.truncf %460 : vector<16x16xf32> to vector<16x16xbf16>
    %cst_158 = arith.constant dense<0.000000e+00> : vector<16x64xf32>
    %463 = tpu.matmul %462, %461, %cst_158 {dimension_numbers = #tpu.dot_dimension_numbers<[1], [0], [0], [1], [0, 0, 1, 1], [], []>} : vector<16x16xbf16>, vector<16x64xbf16>, vector<16x64xf32> -> vector<16x64xf32>
    %464 = arith.addf %457, %463 : vector<16x64xf32>
    %465 = vector.extract_strided_slice %451 {offsets = [2, 0, 0, 0], sizes = [1, 2, 8, 16], strides = [1, 1, 1, 1]} : vector<4x2x8x16xf32> to vector<1x2x8x16xf32>
    %466 = vector.shape_cast %465 : vector<1x2x8x16xf32> to vector<2x8x16xf32>
    %467 = vector.shape_cast %466 : vector<2x8x16xf32> to vector<16x16xf32>
    %468 = vector.extract_strided_slice %436 {offsets = [32, 0], sizes = [16, 64], strides = [1, 1]} : vector<64x64xbf16> to vector<16x64xbf16>
    %469 = arith.truncf %467 : vector<16x16xf32> to vector<16x16xbf16>
    %cst_159 = arith.constant dense<0.000000e+00> : vector<16x64xf32>
    %470 = tpu.matmul %469, %468, %cst_159 {dimension_numbers = #tpu.dot_dimension_numbers<[1], [0], [0], [1], [0, 0, 1, 1], [], []>} : vector<16x16xbf16>, vector<16x64xbf16>, vector<16x64xf32> -> vector<16x64xf32>
    %471 = arith.addf %464, %470 : vector<16x64xf32>
    %472 = vector.extract_strided_slice %451 {offsets = [3, 0, 0, 0], sizes = [1, 2, 8, 16], strides = [1, 1, 1, 1]} : vector<4x2x8x16xf32> to vector<1x2x8x16xf32>
    %473 = vector.shape_cast %472 : vector<1x2x8x16xf32> to vector<2x8x16xf32>
    %474 = vector.shape_cast %473 : vector<2x8x16xf32> to vector<16x16xf32>
    %475 = vector.extract_strided_slice %436 {offsets = [48, 0], sizes = [16, 64], strides = [1, 1]} : vector<64x64xbf16> to vector<16x64xbf16>
    %476 = arith.truncf %474 : vector<16x16xf32> to vector<16x16xbf16>
    %cst_160 = arith.constant dense<0.000000e+00> : vector<16x64xf32>
    %477 = tpu.matmul %476, %475, %cst_160 {dimension_numbers = #tpu.dot_dimension_numbers<[1], [0], [0], [1], [0, 0, 1, 1], [], []>} : vector<16x16xbf16>, vector<16x64xbf16>, vector<16x64xf32> -> vector<16x64xf32>
    %478 = arith.addf %471, %477 : vector<16x64xf32>
    %479 = arith.addf %327, %478 : vector<16x64xf32>
    %c0_161 = arith.constant 0 : index
    %c0_162 = arith.constant 0 : index
    %c0_163 = arith.constant 0 : index
    %480 = vector.load %arg21[%c0_161, %c0_162, %c0_163] : memref<2x1x64xf32, #tpu.memory_space<vmem>>, vector<1x1x64xf32>
    %481 = vector.shape_cast %480 : vector<1x1x64xf32> to vector<1x64xf32>
    %482 = arith.mulf %479, %479 : vector<16x64xf32>
    %cst_164 = arith.constant dense<0.000000e+00> : vector<16xf32>
    %483 = vector.multi_reduction <add>, %482, %cst_164 [1] : vector<16x64xf32> to vector<16xf32>
    %484 = vector.shape_cast %483 : vector<16xf32> to vector<16x1xf32>
    %cst_165 = arith.constant 6.400000e+01 : f32
    %485 = vector.broadcast %cst_165 : f32 to vector<16x1xf32>
    %486 = arith.divf %484, %485 : vector<16x1xf32>
    %cst_166 = arith.constant 9.99999997E-7 : f32
    %487 = vector.broadcast %cst_166 : f32 to vector<16x1xf32>
    %488 = arith.addf %486, %487 : vector<16x1xf32>
    %489 = math.rsqrt %488 : vector<16x1xf32>
    %490 = vector.broadcast %489 : vector<16x1xf32> to vector<16x64xf32>
    %491 = arith.mulf %479, %490 : vector<16x64xf32>
    %492 = vector.broadcast %481 : vector<1x64xf32> to vector<16x64xf32>
    %493 = arith.mulf %491, %492 : vector<16x64xf32>
    %494 = arith.truncf %493 : vector<16x64xf32> to vector<16x64xbf16>
    %c0_167 = arith.constant 0 : index
    %c0_168 = arith.constant 0 : index
    %c0_169 = arith.constant 0 : index
    %495 = vector.load %arg22[%c0_167, %c0_168, %c0_169] : memref<2x64x64xbf16, #tpu.memory_space<vmem>>, vector<1x64x64xbf16>
    %496 = vector.shape_cast %495 : vector<1x64x64xbf16> to vector<64x64xbf16>
    %cst_170 = arith.constant dense<0.000000e+00> : vector<16x64xf32>
    %497 = tpu.matmul %494, %496, %cst_170 {dimension_numbers = #tpu.dot_dimension_numbers<[1], [0], [0], [1], [0, 0, 1, 1], [], []>} : vector<16x64xbf16>, vector<64x64xbf16>, vector<16x64xf32> -> vector<16x64xf32>
    %498 = arith.truncf %497 : vector<16x64xf32> to vector<16x64xbf16>
    %499 = vector.extract_strided_slice %498 {offsets = [0, 0], sizes = [16, 16], strides = [1, 1]} : vector<16x64xbf16> to vector<16x16xbf16>
    %500 = vector.shape_cast %499 : vector<16x16xbf16> to vector<2x8x16xbf16>
    %501 = vector.extract_strided_slice %498 {offsets = [0, 16], sizes = [16, 16], strides = [1, 1]} : vector<16x64xbf16> to vector<16x16xbf16>
    %502 = vector.shape_cast %501 : vector<16x16xbf16> to vector<2x8x16xbf16>
    %503 = vector.extract_strided_slice %498 {offsets = [0, 32], sizes = [16, 16], strides = [1, 1]} : vector<16x64xbf16> to vector<16x16xbf16>
    %504 = vector.shape_cast %503 : vector<16x16xbf16> to vector<2x8x16xbf16>
    %505 = vector.extract_strided_slice %498 {offsets = [0, 48], sizes = [16, 16], strides = [1, 1]} : vector<16x64xbf16> to vector<16x16xbf16>
    %506 = vector.shape_cast %505 : vector<16x16xbf16> to vector<2x8x16xbf16>
    %507 = tpu.concatenate %500, %502, %504, %506 in 0 : vector<2x8x16xbf16>, vector<2x8x16xbf16>, vector<2x8x16xbf16>, vector<2x8x16xbf16> -> vector<8x8x16xbf16>
    %c0_171 = arith.constant 0 : index
    %c0_172 = arith.constant 0 : index
    %c0_173 = arith.constant 0 : index
    %508 = vector.load %arg25[%c0_171, %c0_172, %c0_173] : memref<2x64x64xbf16, #tpu.memory_space<vmem>>, vector<1x64x64xbf16>
    %509 = vector.shape_cast %508 : vector<1x64x64xbf16> to vector<64x64xbf16>
    "tpu.trace_start"() <{level = 10 : i32, message = "nqd,nkd->nqk"}> : () -> ()
    %cst_174 = arith.constant dense<0.000000e+00> : vector<8x8x8xf32>
    %510 = tpu.matmul %507, %341, %cst_174 {dimension_numbers = #tpu.dot_dimension_numbers<[2], [2], [1], [1], [0, 0, 0, 1, 1, 1], [0], [0]>} : vector<8x8x16xbf16>, vector<8x8x16xbf16>, vector<8x8x8xf32> -> vector<8x8x8xf32>
    "tpu.trace_stop"() : () -> ()
    %511 = vector.broadcast %20 : vector<8x1x8xf32> to vector<8x8x8xf32>
    %512 = arith.addf %510, %511 : vector<8x8x8xf32>
    %cst_175 = arith.constant dense<0xFF800000> : vector<8x8xf32>
    %513 = vector.multi_reduction <maximumf>, %512, %cst_175 [2] : vector<8x8x8xf32> to vector<8x8xf32>
    %514 = vector.shape_cast %513 : vector<8x8xf32> to vector<8x8x1xf32>
    %515 = vector.broadcast %514 : vector<8x8x1xf32> to vector<8x8x8xf32>
    %516 = arith.subf %512, %515 : vector<8x8x8xf32>
    %517 = math.exp %516 : vector<8x8x8xf32>
    %cst_176 = arith.constant dense<0.000000e+00> : vector<8x8xf32>
    %518 = vector.multi_reduction <add>, %517, %cst_176 [2] : vector<8x8x8xf32> to vector<8x8xf32>
    %519 = vector.shape_cast %518 : vector<8x8xf32> to vector<8x8x1xf32>
    %520 = tpu.reciprocal %519 {approx = true} : vector<8x8x1xf32> -> vector<8x8x1xf32>
    %521 = vector.broadcast %520 : vector<8x8x1xf32> to vector<8x8x8xf32>
    %522 = arith.mulf %517, %521 : vector<8x8x8xf32>
    %523 = arith.truncf %522 : vector<8x8x8xf32> to vector<8x8x8xbf16>
    "tpu.trace_start"() <{level = 10 : i32, message = "nqk,nkd->nqd"}> : () -> ()
    %cst_177 = arith.constant dense<0.000000e+00> : vector<8x8x16xf32>
    %524 = tpu.matmul %523, %354, %cst_177 {dimension_numbers = #tpu.dot_dimension_numbers<[2], [1], [1], [2], [0, 0, 0, 1, 1, 2], [0], [0]>} : vector<8x8x8xbf16>, vector<8x8x16xbf16>, vector<8x8x16xf32> -> vector<8x8x16xf32>
    "tpu.trace_stop"() : () -> ()
    %525 = vector.shape_cast %524 : vector<8x8x16xf32> to vector<4x2x8x16xf32>
    %526 = vector.extract_strided_slice %525 {offsets = [0, 0, 0, 0], sizes = [1, 2, 8, 16], strides = [1, 1, 1, 1]} : vector<4x2x8x16xf32> to vector<1x2x8x16xf32>
    %527 = vector.shape_cast %526 : vector<1x2x8x16xf32> to vector<2x8x16xf32>
    %528 = vector.shape_cast %527 : vector<2x8x16xf32> to vector<16x16xf32>
    %529 = vector.extract_strided_slice %509 {offsets = [0, 0], sizes = [16, 64], strides = [1, 1]} : vector<64x64xbf16> to vector<16x64xbf16>
    %530 = arith.truncf %528 : vector<16x16xf32> to vector<16x16xbf16>
    %cst_178 = arith.constant dense<0.000000e+00> : vector<16x64xf32>
    %531 = tpu.matmul %530, %529, %cst_178 {dimension_numbers = #tpu.dot_dimension_numbers<[1], [0], [0], [1], [0, 0, 1, 1], [], []>} : vector<16x16xbf16>, vector<16x64xbf16>, vector<16x64xf32> -> vector<16x64xf32>
    %532 = vector.extract_strided_slice %525 {offsets = [1, 0, 0, 0], sizes = [1, 2, 8, 16], strides = [1, 1, 1, 1]} : vector<4x2x8x16xf32> to vector<1x2x8x16xf32>
    %533 = vector.shape_cast %532 : vector<1x2x8x16xf32> to vector<2x8x16xf32>
    %534 = vector.shape_cast %533 : vector<2x8x16xf32> to vector<16x16xf32>
    %535 = vector.extract_strided_slice %509 {offsets = [16, 0], sizes = [16, 64], strides = [1, 1]} : vector<64x64xbf16> to vector<16x64xbf16>
    %536 = arith.truncf %534 : vector<16x16xf32> to vector<16x16xbf16>
    %cst_179 = arith.constant dense<0.000000e+00> : vector<16x64xf32>
    %537 = tpu.matmul %536, %535, %cst_179 {dimension_numbers = #tpu.dot_dimension_numbers<[1], [0], [0], [1], [0, 0, 1, 1], [], []>} : vector<16x16xbf16>, vector<16x64xbf16>, vector<16x64xf32> -> vector<16x64xf32>
    %538 = arith.addf %531, %537 : vector<16x64xf32>
    %539 = vector.extract_strided_slice %525 {offsets = [2, 0, 0, 0], sizes = [1, 2, 8, 16], strides = [1, 1, 1, 1]} : vector<4x2x8x16xf32> to vector<1x2x8x16xf32>
    %540 = vector.shape_cast %539 : vector<1x2x8x16xf32> to vector<2x8x16xf32>
    %541 = vector.shape_cast %540 : vector<2x8x16xf32> to vector<16x16xf32>
    %542 = vector.extract_strided_slice %509 {offsets = [32, 0], sizes = [16, 64], strides = [1, 1]} : vector<64x64xbf16> to vector<16x64xbf16>
    %543 = arith.truncf %541 : vector<16x16xf32> to vector<16x16xbf16>
    %cst_180 = arith.constant dense<0.000000e+00> : vector<16x64xf32>
    %544 = tpu.matmul %543, %542, %cst_180 {dimension_numbers = #tpu.dot_dimension_numbers<[1], [0], [0], [1], [0, 0, 1, 1], [], []>} : vector<16x16xbf16>, vector<16x64xbf16>, vector<16x64xf32> -> vector<16x64xf32>
    %545 = arith.addf %538, %544 : vector<16x64xf32>
    %546 = vector.extract_strided_slice %525 {offsets = [3, 0, 0, 0], sizes = [1, 2, 8, 16], strides = [1, 1, 1, 1]} : vector<4x2x8x16xf32> to vector<1x2x8x16xf32>
    %547 = vector.shape_cast %546 : vector<1x2x8x16xf32> to vector<2x8x16xf32>
    %548 = vector.shape_cast %547 : vector<2x8x16xf32> to vector<16x16xf32>
    %549 = vector.extract_strided_slice %509 {offsets = [48, 0], sizes = [16, 64], strides = [1, 1]} : vector<64x64xbf16> to vector<16x64xbf16>
    %550 = arith.truncf %548 : vector<16x16xf32> to vector<16x16xbf16>
    %cst_181 = arith.constant dense<0.000000e+00> : vector<16x64xf32>
    %551 = tpu.matmul %550, %549, %cst_181 {dimension_numbers = #tpu.dot_dimension_numbers<[1], [0], [0], [1], [0, 0, 1, 1], [], []>} : vector<16x16xbf16>, vector<16x64xbf16>, vector<16x64xf32> -> vector<16x64xf32>
    %552 = arith.addf %545, %551 : vector<16x64xf32>
    %553 = arith.addf %479, %552 : vector<16x64xf32>
    %c0_182 = arith.constant 0 : index
    %c0_183 = arith.constant 0 : index
    %c0_184 = arith.constant 0 : index
    %554 = vector.load %arg26[%c0_182, %c0_183, %c0_184] : memref<2x1x64xf32, #tpu.memory_space<vmem>>, vector<1x1x64xf32>
    %555 = vector.shape_cast %554 : vector<1x1x64xf32> to vector<1x64xf32>
    %556 = arith.mulf %553, %553 : vector<16x64xf32>
    %cst_185 = arith.constant dense<0.000000e+00> : vector<16xf32>
    %557 = vector.multi_reduction <add>, %556, %cst_185 [1] : vector<16x64xf32> to vector<16xf32>
    %558 = vector.shape_cast %557 : vector<16xf32> to vector<16x1xf32>
    %cst_186 = arith.constant 6.400000e+01 : f32
    %559 = vector.broadcast %cst_186 : f32 to vector<16x1xf32>
    %560 = arith.divf %558, %559 : vector<16x1xf32>
    %cst_187 = arith.constant 9.99999997E-7 : f32
    %561 = vector.broadcast %cst_187 : f32 to vector<16x1xf32>
    %562 = arith.addf %560, %561 : vector<16x1xf32>
    %563 = math.rsqrt %562 : vector<16x1xf32>
    %564 = vector.broadcast %563 : vector<16x1xf32> to vector<16x64xf32>
    %565 = arith.mulf %553, %564 : vector<16x64xf32>
    %566 = vector.broadcast %555 : vector<1x64xf32> to vector<16x64xf32>
    %567 = arith.mulf %565, %566 : vector<16x64xf32>
    %568 = arith.truncf %567 : vector<16x64xf32> to vector<16x64xbf16>
    %c0_188 = arith.constant 0 : index
    %c0_189 = arith.constant 0 : index
    %c0_190 = arith.constant 0 : index
    %569 = vector.load %arg27[%c0_188, %c0_189, %c0_190] : memref<2x64x256xbf16, #tpu.memory_space<vmem>>, vector<1x64x256xbf16>
    %570 = vector.shape_cast %569 : vector<1x64x256xbf16> to vector<64x256xbf16>
    %cst_191 = arith.constant dense<0.000000e+00> : vector<16x256xf32>
    %571 = tpu.matmul %568, %570, %cst_191 {dimension_numbers = #tpu.dot_dimension_numbers<[1], [0], [0], [1], [0, 0, 1, 1], [], []>} : vector<16x64xbf16>, vector<64x256xbf16>, vector<16x256xf32> -> vector<16x256xf32>
    %572 = vector.extract_strided_slice %571 {offsets = [0, 0], sizes = [16, 128], strides = [1, 1]} : vector<16x256xf32> to vector<16x128xf32>
    %573 = arith.mulf %572, %572 : vector<16x128xf32>
    %574 = arith.mulf %572, %573 : vector<16x128xf32>
    %cst_192 = arith.constant 4.471500e-02 : f32
    %575 = vector.broadcast %cst_192 : f32 to vector<16x128xf32>
    %576 = arith.mulf %575, %574 : vector<16x128xf32>
    %577 = arith.addf %572, %576 : vector<16x128xf32>
    %cst_193 = arith.constant 0.797884583 : f32
    %578 = vector.broadcast %cst_193 : f32 to vector<16x128xf32>
    %579 = arith.mulf %578, %577 : vector<16x128xf32>
    %580 = math.tanh %579 : vector<16x128xf32>
    %cst_194 = arith.constant 1.000000e+00 : f32
    %581 = vector.broadcast %cst_194 : f32 to vector<16x128xf32>
    %582 = arith.addf %581, %580 : vector<16x128xf32>
    %cst_195 = arith.constant 5.000000e-01 : f32
    %583 = vector.broadcast %cst_195 : f32 to vector<16x128xf32>
    %584 = arith.mulf %583, %582 : vector<16x128xf32>
    %585 = arith.mulf %572, %584 : vector<16x128xf32>
    %586 = vector.extract_strided_slice %571 {offsets = [0, 128], sizes = [16, 128], strides = [1, 1]} : vector<16x256xf32> to vector<16x128xf32>
    %587 = arith.mulf %585, %586 : vector<16x128xf32>
    %c0_196 = arith.constant 0 : index
    %c0_197 = arith.constant 0 : index
    %c0_198 = arith.constant 0 : index
    %588 = vector.load %arg28[%c0_196, %c0_197, %c0_198] : memref<2x128x64xbf16, #tpu.memory_space<vmem>>, vector<1x128x64xbf16>
    %589 = vector.shape_cast %588 : vector<1x128x64xbf16> to vector<128x64xbf16>
    %590 = arith.truncf %587 : vector<16x128xf32> to vector<16x128xbf16>
    %cst_199 = arith.constant dense<0.000000e+00> : vector<16x64xf32>
    %591 = tpu.matmul %590, %589, %cst_199 {dimension_numbers = #tpu.dot_dimension_numbers<[1], [0], [0], [1], [0, 0, 1, 1], [], []>} : vector<16x128xbf16>, vector<128x64xbf16>, vector<16x64xf32> -> vector<16x64xf32>
    %592 = arith.addf %553, %591 : vector<16x64xf32>
    %c1_200 = arith.constant 1 : index
    %c0_201 = arith.constant 0 : index
    %c0_202 = arith.constant 0 : index
    %593 = vector.load %arg16[%c1_200, %c0_201, %c0_202] : memref<2x1x64xf32, #tpu.memory_space<vmem>>, vector<1x1x64xf32>
    %594 = vector.shape_cast %593 : vector<1x1x64xf32> to vector<1x64xf32>
    %595 = arith.mulf %592, %592 : vector<16x64xf32>
    %cst_203 = arith.constant dense<0.000000e+00> : vector<16xf32>
    %596 = vector.multi_reduction <add>, %595, %cst_203 [1] : vector<16x64xf32> to vector<16xf32>
    %597 = vector.shape_cast %596 : vector<16xf32> to vector<16x1xf32>
    %cst_204 = arith.constant 6.400000e+01 : f32
    %598 = vector.broadcast %cst_204 : f32 to vector<16x1xf32>
    %599 = arith.divf %597, %598 : vector<16x1xf32>
    %cst_205 = arith.constant 9.99999997E-7 : f32
    %600 = vector.broadcast %cst_205 : f32 to vector<16x1xf32>
    %601 = arith.addf %599, %600 : vector<16x1xf32>
    %602 = math.rsqrt %601 : vector<16x1xf32>
    %603 = vector.broadcast %602 : vector<16x1xf32> to vector<16x64xf32>
    %604 = arith.mulf %592, %603 : vector<16x64xf32>
    %605 = vector.broadcast %594 : vector<1x64xf32> to vector<16x64xf32>
    %606 = arith.mulf %604, %605 : vector<16x64xf32>
    %607 = arith.truncf %606 : vector<16x64xf32> to vector<16x64xbf16>
    %c1_206 = arith.constant 1 : index
    %c0_207 = arith.constant 0 : index
    %c0_208 = arith.constant 0 : index
    %608 = vector.load %arg17[%c1_206, %c0_207, %c0_208] : memref<2x64x64xbf16, #tpu.memory_space<vmem>>, vector<1x64x64xbf16>
    %609 = vector.shape_cast %608 : vector<1x64x64xbf16> to vector<64x64xbf16>
    %cst_209 = arith.constant dense<0.000000e+00> : vector<16x64xf32>
    %610 = tpu.matmul %607, %609, %cst_209 {dimension_numbers = #tpu.dot_dimension_numbers<[1], [0], [0], [1], [0, 0, 1, 1], [], []>} : vector<16x64xbf16>, vector<64x64xbf16>, vector<16x64xf32> -> vector<16x64xf32>
    %611 = arith.truncf %610 : vector<16x64xf32> to vector<16x64xbf16>
    %612 = vector.extract_strided_slice %611 {offsets = [0, 0], sizes = [16, 16], strides = [1, 1]} : vector<16x64xbf16> to vector<16x16xbf16>
    %613 = vector.shape_cast %612 : vector<16x16xbf16> to vector<2x8x16xbf16>
    %614 = vector.extract_strided_slice %611 {offsets = [0, 16], sizes = [16, 16], strides = [1, 1]} : vector<16x64xbf16> to vector<16x16xbf16>
    %615 = vector.shape_cast %614 : vector<16x16xbf16> to vector<2x8x16xbf16>
    %616 = vector.extract_strided_slice %611 {offsets = [0, 32], sizes = [16, 16], strides = [1, 1]} : vector<16x64xbf16> to vector<16x16xbf16>
    %617 = vector.shape_cast %616 : vector<16x16xbf16> to vector<2x8x16xbf16>
    %618 = vector.extract_strided_slice %611 {offsets = [0, 48], sizes = [16, 16], strides = [1, 1]} : vector<16x64xbf16> to vector<16x16xbf16>
    %619 = vector.shape_cast %618 : vector<16x16xbf16> to vector<2x8x16xbf16>
    %620 = tpu.concatenate %613, %615, %617, %619 in 0 : vector<2x8x16xbf16>, vector<2x8x16xbf16>, vector<2x8x16xbf16>, vector<2x8x16xbf16> -> vector<8x8x16xbf16>
    %c1_210 = arith.constant 1 : index
    %c0_211 = arith.constant 0 : index
    %c0_212 = arith.constant 0 : index
    %621 = vector.load %arg18[%c1_210, %c0_211, %c0_212] : memref<2x64x64xbf16, #tpu.memory_space<vmem>>, vector<1x64x64xbf16>
    %622 = vector.shape_cast %621 : vector<1x64x64xbf16> to vector<64x64xbf16>
    %cst_213 = arith.constant dense<0.000000e+00> : vector<16x64xf32>
    %623 = tpu.matmul %607, %622, %cst_213 {dimension_numbers = #tpu.dot_dimension_numbers<[1], [0], [0], [1], [0, 0, 1, 1], [], []>} : vector<16x64xbf16>, vector<64x64xbf16>, vector<16x64xf32> -> vector<16x64xf32>
    %624 = arith.truncf %623 : vector<16x64xf32> to vector<16x64xbf16>
    %625 = vector.extract_strided_slice %624 {offsets = [0, 0], sizes = [16, 16], strides = [1, 1]} : vector<16x64xbf16> to vector<16x16xbf16>
    %626 = vector.shape_cast %625 : vector<16x16xbf16> to vector<2x8x16xbf16>
    %627 = vector.extract_strided_slice %624 {offsets = [0, 16], sizes = [16, 16], strides = [1, 1]} : vector<16x64xbf16> to vector<16x16xbf16>
    %628 = vector.shape_cast %627 : vector<16x16xbf16> to vector<2x8x16xbf16>
    %629 = vector.extract_strided_slice %624 {offsets = [0, 32], sizes = [16, 16], strides = [1, 1]} : vector<16x64xbf16> to vector<16x16xbf16>
    %630 = vector.shape_cast %629 : vector<16x16xbf16> to vector<2x8x16xbf16>
    %631 = vector.extract_strided_slice %624 {offsets = [0, 48], sizes = [16, 16], strides = [1, 1]} : vector<16x64xbf16> to vector<16x16xbf16>
    %632 = vector.shape_cast %631 : vector<16x16xbf16> to vector<2x8x16xbf16>
    %633 = tpu.concatenate %626, %628, %630, %632 in 0 : vector<2x8x16xbf16>, vector<2x8x16xbf16>, vector<2x8x16xbf16>, vector<2x8x16xbf16> -> vector<8x8x16xbf16>
    %c1_214 = arith.constant 1 : index
    %c0_215 = arith.constant 0 : index
    %c0_216 = arith.constant 0 : index
    %634 = vector.load %arg19[%c1_214, %c0_215, %c0_216] : memref<2x64x64xbf16, #tpu.memory_space<vmem>>, vector<1x64x64xbf16>
    %635 = vector.shape_cast %634 : vector<1x64x64xbf16> to vector<64x64xbf16>
    %cst_217 = arith.constant dense<0.000000e+00> : vector<16x64xf32>
    %636 = tpu.matmul %607, %635, %cst_217 {dimension_numbers = #tpu.dot_dimension_numbers<[1], [0], [0], [1], [0, 0, 1, 1], [], []>} : vector<16x64xbf16>, vector<64x64xbf16>, vector<16x64xf32> -> vector<16x64xf32>
    %637 = arith.truncf %636 : vector<16x64xf32> to vector<16x64xbf16>
    %638 = vector.extract_strided_slice %637 {offsets = [0, 0], sizes = [16, 16], strides = [1, 1]} : vector<16x64xbf16> to vector<16x16xbf16>
    %639 = vector.shape_cast %638 : vector<16x16xbf16> to vector<2x8x16xbf16>
    %640 = vector.extract_strided_slice %637 {offsets = [0, 16], sizes = [16, 16], strides = [1, 1]} : vector<16x64xbf16> to vector<16x16xbf16>
    %641 = vector.shape_cast %640 : vector<16x16xbf16> to vector<2x8x16xbf16>
    %642 = vector.extract_strided_slice %637 {offsets = [0, 32], sizes = [16, 16], strides = [1, 1]} : vector<16x64xbf16> to vector<16x16xbf16>
    %643 = vector.shape_cast %642 : vector<16x16xbf16> to vector<2x8x16xbf16>
    %644 = vector.extract_strided_slice %637 {offsets = [0, 48], sizes = [16, 16], strides = [1, 1]} : vector<16x64xbf16> to vector<16x16xbf16>
    %645 = vector.shape_cast %644 : vector<16x16xbf16> to vector<2x8x16xbf16>
    %646 = tpu.concatenate %639, %641, %643, %645 in 0 : vector<2x8x16xbf16>, vector<2x8x16xbf16>, vector<2x8x16xbf16>, vector<2x8x16xbf16> -> vector<8x8x16xbf16>
    %c1_218 = arith.constant 1 : index
    %c0_219 = arith.constant 0 : index
    %c0_220 = arith.constant 0 : index
    %647 = vector.load %arg20[%c1_218, %c0_219, %c0_220] : memref<2x64x64xbf16, #tpu.memory_space<vmem>>, vector<1x64x64xbf16>
    %648 = vector.shape_cast %647 : vector<1x64x64xbf16> to vector<64x64xbf16>
    "tpu.trace_start"() <{level = 10 : i32, message = "nqd,nkd->nqk"}> : () -> ()
    %cst_221 = arith.constant dense<0.000000e+00> : vector<8x8x8xf32>
    %649 = tpu.matmul %620, %633, %cst_221 {dimension_numbers = #tpu.dot_dimension_numbers<[2], [2], [1], [1], [0, 0, 0, 1, 1, 1], [0], [0]>} : vector<8x8x16xbf16>, vector<8x8x16xbf16>, vector<8x8x8xf32> -> vector<8x8x8xf32>
    "tpu.trace_stop"() : () -> ()
    %650 = arith.addf %649, %16 : vector<8x8x8xf32>
    %cst_222 = arith.constant dense<0xFF800000> : vector<8x8xf32>
    %651 = vector.multi_reduction <maximumf>, %650, %cst_222 [2] : vector<8x8x8xf32> to vector<8x8xf32>
    %652 = vector.shape_cast %651 : vector<8x8xf32> to vector<8x8x1xf32>
    %653 = vector.broadcast %652 : vector<8x8x1xf32> to vector<8x8x8xf32>
    %654 = arith.subf %650, %653 : vector<8x8x8xf32>
    %655 = math.exp %654 : vector<8x8x8xf32>
    %cst_223 = arith.constant dense<0.000000e+00> : vector<8x8xf32>
    %656 = vector.multi_reduction <add>, %655, %cst_223 [2] : vector<8x8x8xf32> to vector<8x8xf32>
    %657 = vector.shape_cast %656 : vector<8x8xf32> to vector<8x8x1xf32>
    %658 = tpu.reciprocal %657 {approx = true} : vector<8x8x1xf32> -> vector<8x8x1xf32>
    %659 = vector.broadcast %658 : vector<8x8x1xf32> to vector<8x8x8xf32>
    %660 = arith.mulf %655, %659 : vector<8x8x8xf32>
    %661 = arith.truncf %660 : vector<8x8x8xf32> to vector<8x8x8xbf16>
    "tpu.trace_start"() <{level = 10 : i32, message = "nqk,nkd->nqd"}> : () -> ()
    %cst_224 = arith.constant dense<0.000000e+00> : vector<8x8x16xf32>
    %662 = tpu.matmul %661, %646, %cst_224 {dimension_numbers = #tpu.dot_dimension_numbers<[2], [1], [1], [2], [0, 0, 0, 1, 1, 2], [0], [0]>} : vector<8x8x8xbf16>, vector<8x8x16xbf16>, vector<8x8x16xf32> -> vector<8x8x16xf32>
    "tpu.trace_stop"() : () -> ()
    %663 = vector.shape_cast %662 : vector<8x8x16xf32> to vector<4x2x8x16xf32>
    %664 = vector.extract_strided_slice %663 {offsets = [0, 0, 0, 0], sizes = [1, 2, 8, 16], strides = [1, 1, 1, 1]} : vector<4x2x8x16xf32> to vector<1x2x8x16xf32>
    %665 = vector.shape_cast %664 : vector<1x2x8x16xf32> to vector<2x8x16xf32>
    %666 = vector.shape_cast %665 : vector<2x8x16xf32> to vector<16x16xf32>
    %667 = vector.extract_strided_slice %648 {offsets = [0, 0], sizes = [16, 64], strides = [1, 1]} : vector<64x64xbf16> to vector<16x64xbf16>
    %668 = arith.truncf %666 : vector<16x16xf32> to vector<16x16xbf16>
    %cst_225 = arith.constant dense<0.000000e+00> : vector<16x64xf32>
    %669 = tpu.matmul %668, %667, %cst_225 {dimension_numbers = #tpu.dot_dimension_numbers<[1], [0], [0], [1], [0, 0, 1, 1], [], []>} : vector<16x16xbf16>, vector<16x64xbf16>, vector<16x64xf32> -> vector<16x64xf32>
    %670 = vector.extract_strided_slice %663 {offsets = [1, 0, 0, 0], sizes = [1, 2, 8, 16], strides = [1, 1, 1, 1]} : vector<4x2x8x16xf32> to vector<1x2x8x16xf32>
    %671 = vector.shape_cast %670 : vector<1x2x8x16xf32> to vector<2x8x16xf32>
    %672 = vector.shape_cast %671 : vector<2x8x16xf32> to vector<16x16xf32>
    %673 = vector.extract_strided_slice %648 {offsets = [16, 0], sizes = [16, 64], strides = [1, 1]} : vector<64x64xbf16> to vector<16x64xbf16>
    %674 = arith.truncf %672 : vector<16x16xf32> to vector<16x16xbf16>
    %cst_226 = arith.constant dense<0.000000e+00> : vector<16x64xf32>
    %675 = tpu.matmul %674, %673, %cst_226 {dimension_numbers = #tpu.dot_dimension_numbers<[1], [0], [0], [1], [0, 0, 1, 1], [], []>} : vector<16x16xbf16>, vector<16x64xbf16>, vector<16x64xf32> -> vector<16x64xf32>
    %676 = arith.addf %669, %675 : vector<16x64xf32>
    %677 = vector.extract_strided_slice %663 {offsets = [2, 0, 0, 0], sizes = [1, 2, 8, 16], strides = [1, 1, 1, 1]} : vector<4x2x8x16xf32> to vector<1x2x8x16xf32>
    %678 = vector.shape_cast %677 : vector<1x2x8x16xf32> to vector<2x8x16xf32>
    %679 = vector.shape_cast %678 : vector<2x8x16xf32> to vector<16x16xf32>
    %680 = vector.extract_strided_slice %648 {offsets = [32, 0], sizes = [16, 64], strides = [1, 1]} : vector<64x64xbf16> to vector<16x64xbf16>
    %681 = arith.truncf %679 : vector<16x16xf32> to vector<16x16xbf16>
    %cst_227 = arith.constant dense<0.000000e+00> : vector<16x64xf32>
    %682 = tpu.matmul %681, %680, %cst_227 {dimension_numbers = #tpu.dot_dimension_numbers<[1], [0], [0], [1], [0, 0, 1, 1], [], []>} : vector<16x16xbf16>, vector<16x64xbf16>, vector<16x64xf32> -> vector<16x64xf32>
    %683 = arith.addf %676, %682 : vector<16x64xf32>
    %684 = vector.extract_strided_slice %663 {offsets = [3, 0, 0, 0], sizes = [1, 2, 8, 16], strides = [1, 1, 1, 1]} : vector<4x2x8x16xf32> to vector<1x2x8x16xf32>
    %685 = vector.shape_cast %684 : vector<1x2x8x16xf32> to vector<2x8x16xf32>
    %686 = vector.shape_cast %685 : vector<2x8x16xf32> to vector<16x16xf32>
    %687 = vector.extract_strided_slice %648 {offsets = [48, 0], sizes = [16, 64], strides = [1, 1]} : vector<64x64xbf16> to vector<16x64xbf16>
    %688 = arith.truncf %686 : vector<16x16xf32> to vector<16x16xbf16>
    %cst_228 = arith.constant dense<0.000000e+00> : vector<16x64xf32>
    %689 = tpu.matmul %688, %687, %cst_228 {dimension_numbers = #tpu.dot_dimension_numbers<[1], [0], [0], [1], [0, 0, 1, 1], [], []>} : vector<16x16xbf16>, vector<16x64xbf16>, vector<16x64xf32> -> vector<16x64xf32>
    %690 = arith.addf %683, %689 : vector<16x64xf32>
    %691 = arith.addf %592, %690 : vector<16x64xf32>
    %c1_229 = arith.constant 1 : index
    %c0_230 = arith.constant 0 : index
    %c0_231 = arith.constant 0 : index
    %692 = vector.load %arg21[%c1_229, %c0_230, %c0_231] : memref<2x1x64xf32, #tpu.memory_space<vmem>>, vector<1x1x64xf32>
    %693 = vector.shape_cast %692 : vector<1x1x64xf32> to vector<1x64xf32>
    %694 = arith.mulf %691, %691 : vector<16x64xf32>
    %cst_232 = arith.constant dense<0.000000e+00> : vector<16xf32>
    %695 = vector.multi_reduction <add>, %694, %cst_232 [1] : vector<16x64xf32> to vector<16xf32>
    %696 = vector.shape_cast %695 : vector<16xf32> to vector<16x1xf32>
    %cst_233 = arith.constant 6.400000e+01 : f32
    %697 = vector.broadcast %cst_233 : f32 to vector<16x1xf32>
    %698 = arith.divf %696, %697 : vector<16x1xf32>
    %cst_234 = arith.constant 9.99999997E-7 : f32
    %699 = vector.broadcast %cst_234 : f32 to vector<16x1xf32>
    %700 = arith.addf %698, %699 : vector<16x1xf32>
    %701 = math.rsqrt %700 : vector<16x1xf32>
    %702 = vector.broadcast %701 : vector<16x1xf32> to vector<16x64xf32>
    %703 = arith.mulf %691, %702 : vector<16x64xf32>
    %704 = vector.broadcast %693 : vector<1x64xf32> to vector<16x64xf32>
    %705 = arith.mulf %703, %704 : vector<16x64xf32>
    %706 = arith.truncf %705 : vector<16x64xf32> to vector<16x64xbf16>
    %c1_235 = arith.constant 1 : index
    %c0_236 = arith.constant 0 : index
    %c0_237 = arith.constant 0 : index
    %707 = vector.load %arg22[%c1_235, %c0_236, %c0_237] : memref<2x64x64xbf16, #tpu.memory_space<vmem>>, vector<1x64x64xbf16>
    %708 = vector.shape_cast %707 : vector<1x64x64xbf16> to vector<64x64xbf16>
    %cst_238 = arith.constant dense<0.000000e+00> : vector<16x64xf32>
    %709 = tpu.matmul %706, %708, %cst_238 {dimension_numbers = #tpu.dot_dimension_numbers<[1], [0], [0], [1], [0, 0, 1, 1], [], []>} : vector<16x64xbf16>, vector<64x64xbf16>, vector<16x64xf32> -> vector<16x64xf32>
    %710 = arith.truncf %709 : vector<16x64xf32> to vector<16x64xbf16>
    %711 = vector.extract_strided_slice %710 {offsets = [0, 0], sizes = [16, 16], strides = [1, 1]} : vector<16x64xbf16> to vector<16x16xbf16>
    %712 = vector.shape_cast %711 : vector<16x16xbf16> to vector<2x8x16xbf16>
    %713 = vector.extract_strided_slice %710 {offsets = [0, 16], sizes = [16, 16], strides = [1, 1]} : vector<16x64xbf16> to vector<16x16xbf16>
    %714 = vector.shape_cast %713 : vector<16x16xbf16> to vector<2x8x16xbf16>
    %715 = vector.extract_strided_slice %710 {offsets = [0, 32], sizes = [16, 16], strides = [1, 1]} : vector<16x64xbf16> to vector<16x16xbf16>
    %716 = vector.shape_cast %715 : vector<16x16xbf16> to vector<2x8x16xbf16>
    %717 = vector.extract_strided_slice %710 {offsets = [0, 48], sizes = [16, 16], strides = [1, 1]} : vector<16x64xbf16> to vector<16x16xbf16>
    %718 = vector.shape_cast %717 : vector<16x16xbf16> to vector<2x8x16xbf16>
    %719 = tpu.concatenate %712, %714, %716, %718 in 0 : vector<2x8x16xbf16>, vector<2x8x16xbf16>, vector<2x8x16xbf16>, vector<2x8x16xbf16> -> vector<8x8x16xbf16>
    %c1_239 = arith.constant 1 : index
    %c0_240 = arith.constant 0 : index
    %c0_241 = arith.constant 0 : index
    %720 = vector.load %arg25[%c1_239, %c0_240, %c0_241] : memref<2x64x64xbf16, #tpu.memory_space<vmem>>, vector<1x64x64xbf16>
    %721 = vector.shape_cast %720 : vector<1x64x64xbf16> to vector<64x64xbf16>
    "tpu.trace_start"() <{level = 10 : i32, message = "nqd,nkd->nqk"}> : () -> ()
    %cst_242 = arith.constant dense<0.000000e+00> : vector<8x8x8xf32>
    %722 = tpu.matmul %719, %367, %cst_242 {dimension_numbers = #tpu.dot_dimension_numbers<[2], [2], [1], [1], [0, 0, 0, 1, 1, 1], [0], [0]>} : vector<8x8x16xbf16>, vector<8x8x16xbf16>, vector<8x8x8xf32> -> vector<8x8x8xf32>
    "tpu.trace_stop"() : () -> ()
    %723 = vector.broadcast %20 : vector<8x1x8xf32> to vector<8x8x8xf32>
    %724 = arith.addf %722, %723 : vector<8x8x8xf32>
    %cst_243 = arith.constant dense<0xFF800000> : vector<8x8xf32>
    %725 = vector.multi_reduction <maximumf>, %724, %cst_243 [2] : vector<8x8x8xf32> to vector<8x8xf32>
    %726 = vector.shape_cast %725 : vector<8x8xf32> to vector<8x8x1xf32>
    %727 = vector.broadcast %726 : vector<8x8x1xf32> to vector<8x8x8xf32>
    %728 = arith.subf %724, %727 : vector<8x8x8xf32>
    %729 = math.exp %728 : vector<8x8x8xf32>
    %cst_244 = arith.constant dense<0.000000e+00> : vector<8x8xf32>
    %730 = vector.multi_reduction <add>, %729, %cst_244 [2] : vector<8x8x8xf32> to vector<8x8xf32>
    %731 = vector.shape_cast %730 : vector<8x8xf32> to vector<8x8x1xf32>
    %732 = tpu.reciprocal %731 {approx = true} : vector<8x8x1xf32> -> vector<8x8x1xf32>
    %733 = vector.broadcast %732 : vector<8x8x1xf32> to vector<8x8x8xf32>
    %734 = arith.mulf %729, %733 : vector<8x8x8xf32>
    %735 = arith.truncf %734 : vector<8x8x8xf32> to vector<8x8x8xbf16>
    "tpu.trace_start"() <{level = 10 : i32, message = "nqk,nkd->nqd"}> : () -> ()
    %cst_245 = arith.constant dense<0.000000e+00> : vector<8x8x16xf32>
    %736 = tpu.matmul %735, %380, %cst_245 {dimension_numbers = #tpu.dot_dimension_numbers<[2], [1], [1], [2], [0, 0, 0, 1, 1, 2], [0], [0]>} : vector<8x8x8xbf16>, vector<8x8x16xbf16>, vector<8x8x16xf32> -> vector<8x8x16xf32>
    "tpu.trace_stop"() : () -> ()
    %737 = vector.shape_cast %736 : vector<8x8x16xf32> to vector<4x2x8x16xf32>
    %738 = vector.extract_strided_slice %737 {offsets = [0, 0, 0, 0], sizes = [1, 2, 8, 16], strides = [1, 1, 1, 1]} : vector<4x2x8x16xf32> to vector<1x2x8x16xf32>
    %739 = vector.shape_cast %738 : vector<1x2x8x16xf32> to vector<2x8x16xf32>
    %740 = vector.shape_cast %739 : vector<2x8x16xf32> to vector<16x16xf32>
    %741 = vector.extract_strided_slice %721 {offsets = [0, 0], sizes = [16, 64], strides = [1, 1]} : vector<64x64xbf16> to vector<16x64xbf16>
    %742 = arith.truncf %740 : vector<16x16xf32> to vector<16x16xbf16>
    %cst_246 = arith.constant dense<0.000000e+00> : vector<16x64xf32>
    %743 = tpu.matmul %742, %741, %cst_246 {dimension_numbers = #tpu.dot_dimension_numbers<[1], [0], [0], [1], [0, 0, 1, 1], [], []>} : vector<16x16xbf16>, vector<16x64xbf16>, vector<16x64xf32> -> vector<16x64xf32>
    %744 = vector.extract_strided_slice %737 {offsets = [1, 0, 0, 0], sizes = [1, 2, 8, 16], strides = [1, 1, 1, 1]} : vector<4x2x8x16xf32> to vector<1x2x8x16xf32>
    %745 = vector.shape_cast %744 : vector<1x2x8x16xf32> to vector<2x8x16xf32>
    %746 = vector.shape_cast %745 : vector<2x8x16xf32> to vector<16x16xf32>
    %747 = vector.extract_strided_slice %721 {offsets = [16, 0], sizes = [16, 64], strides = [1, 1]} : vector<64x64xbf16> to vector<16x64xbf16>
    %748 = arith.truncf %746 : vector<16x16xf32> to vector<16x16xbf16>
    %cst_247 = arith.constant dense<0.000000e+00> : vector<16x64xf32>
    %749 = tpu.matmul %748, %747, %cst_247 {dimension_numbers = #tpu.dot_dimension_numbers<[1], [0], [0], [1], [0, 0, 1, 1], [], []>} : vector<16x16xbf16>, vector<16x64xbf16>, vector<16x64xf32> -> vector<16x64xf32>
    %750 = arith.addf %743, %749 : vector<16x64xf32>
    %751 = vector.extract_strided_slice %737 {offsets = [2, 0, 0, 0], sizes = [1, 2, 8, 16], strides = [1, 1, 1, 1]} : vector<4x2x8x16xf32> to vector<1x2x8x16xf32>
    %752 = vector.shape_cast %751 : vector<1x2x8x16xf32> to vector<2x8x16xf32>
    %753 = vector.shape_cast %752 : vector<2x8x16xf32> to vector<16x16xf32>
    %754 = vector.extract_strided_slice %721 {offsets = [32, 0], sizes = [16, 64], strides = [1, 1]} : vector<64x64xbf16> to vector<16x64xbf16>
    %755 = arith.truncf %753 : vector<16x16xf32> to vector<16x16xbf16>
    %cst_248 = arith.constant dense<0.000000e+00> : vector<16x64xf32>
    %756 = tpu.matmul %755, %754, %cst_248 {dimension_numbers = #tpu.dot_dimension_numbers<[1], [0], [0], [1], [0, 0, 1, 1], [], []>} : vector<16x16xbf16>, vector<16x64xbf16>, vector<16x64xf32> -> vector<16x64xf32>
    %757 = arith.addf %750, %756 : vector<16x64xf32>
    %758 = vector.extract_strided_slice %737 {offsets = [3, 0, 0, 0], sizes = [1, 2, 8, 16], strides = [1, 1, 1, 1]} : vector<4x2x8x16xf32> to vector<1x2x8x16xf32>
    %759 = vector.shape_cast %758 : vector<1x2x8x16xf32> to vector<2x8x16xf32>
    %760 = vector.shape_cast %759 : vector<2x8x16xf32> to vector<16x16xf32>
    %761 = vector.extract_strided_slice %721 {offsets = [48, 0], sizes = [16, 64], strides = [1, 1]} : vector<64x64xbf16> to vector<16x64xbf16>
    %762 = arith.truncf %760 : vector<16x16xf32> to vector<16x16xbf16>
    %cst_249 = arith.constant dense<0.000000e+00> : vector<16x64xf32>
    %763 = tpu.matmul %762, %761, %cst_249 {dimension_numbers = #tpu.dot_dimension_numbers<[1], [0], [0], [1], [0, 0, 1, 1], [], []>} : vector<16x16xbf16>, vector<16x64xbf16>, vector<16x64xf32> -> vector<16x64xf32>
    %764 = arith.addf %757, %763 : vector<16x64xf32>
    %765 = arith.addf %691, %764 : vector<16x64xf32>
    %c1_250 = arith.constant 1 : index
    %c0_251 = arith.constant 0 : index
    %c0_252 = arith.constant 0 : index
    %766 = vector.load %arg26[%c1_250, %c0_251, %c0_252] : memref<2x1x64xf32, #tpu.memory_space<vmem>>, vector<1x1x64xf32>
    %767 = vector.shape_cast %766 : vector<1x1x64xf32> to vector<1x64xf32>
    %768 = arith.mulf %765, %765 : vector<16x64xf32>
    %cst_253 = arith.constant dense<0.000000e+00> : vector<16xf32>
    %769 = vector.multi_reduction <add>, %768, %cst_253 [1] : vector<16x64xf32> to vector<16xf32>
    %770 = vector.shape_cast %769 : vector<16xf32> to vector<16x1xf32>
    %cst_254 = arith.constant 6.400000e+01 : f32
    %771 = vector.broadcast %cst_254 : f32 to vector<16x1xf32>
    %772 = arith.divf %770, %771 : vector<16x1xf32>
    %cst_255 = arith.constant 9.99999997E-7 : f32
    %773 = vector.broadcast %cst_255 : f32 to vector<16x1xf32>
    %774 = arith.addf %772, %773 : vector<16x1xf32>
    %775 = math.rsqrt %774 : vector<16x1xf32>
    %776 = vector.broadcast %775 : vector<16x1xf32> to vector<16x64xf32>
    %777 = arith.mulf %765, %776 : vector<16x64xf32>
    %778 = vector.broadcast %767 : vector<1x64xf32> to vector<16x64xf32>
    %779 = arith.mulf %777, %778 : vector<16x64xf32>
    %780 = arith.truncf %779 : vector<16x64xf32> to vector<16x64xbf16>
    %c1_256 = arith.constant 1 : index
    %c0_257 = arith.constant 0 : index
    %c0_258 = arith.constant 0 : index
    %781 = vector.load %arg27[%c1_256, %c0_257, %c0_258] : memref<2x64x256xbf16, #tpu.memory_space<vmem>>, vector<1x64x256xbf16>
    %782 = vector.shape_cast %781 : vector<1x64x256xbf16> to vector<64x256xbf16>
    %cst_259 = arith.constant dense<0.000000e+00> : vector<16x256xf32>
    %783 = tpu.matmul %780, %782, %cst_259 {dimension_numbers = #tpu.dot_dimension_numbers<[1], [0], [0], [1], [0, 0, 1, 1], [], []>} : vector<16x64xbf16>, vector<64x256xbf16>, vector<16x256xf32> -> vector<16x256xf32>
    %784 = vector.extract_strided_slice %783 {offsets = [0, 0], sizes = [16, 128], strides = [1, 1]} : vector<16x256xf32> to vector<16x128xf32>
    %785 = arith.mulf %784, %784 : vector<16x128xf32>
    %786 = arith.mulf %784, %785 : vector<16x128xf32>
    %cst_260 = arith.constant 4.471500e-02 : f32
    %787 = vector.broadcast %cst_260 : f32 to vector<16x128xf32>
    %788 = arith.mulf %787, %786 : vector<16x128xf32>
    %789 = arith.addf %784, %788 : vector<16x128xf32>
    %cst_261 = arith.constant 0.797884583 : f32
    %790 = vector.broadcast %cst_261 : f32 to vector<16x128xf32>
    %791 = arith.mulf %790, %789 : vector<16x128xf32>
    %792 = math.tanh %791 : vector<16x128xf32>
    %cst_262 = arith.constant 1.000000e+00 : f32
    %793 = vector.broadcast %cst_262 : f32 to vector<16x128xf32>
    %794 = arith.addf %793, %792 : vector<16x128xf32>
    %cst_263 = arith.constant 5.000000e-01 : f32
    %795 = vector.broadcast %cst_263 : f32 to vector<16x128xf32>
    %796 = arith.mulf %795, %794 : vector<16x128xf32>
    %797 = arith.mulf %784, %796 : vector<16x128xf32>
    %798 = vector.extract_strided_slice %783 {offsets = [0, 128], sizes = [16, 128], strides = [1, 1]} : vector<16x256xf32> to vector<16x128xf32>
    %799 = arith.mulf %797, %798 : vector<16x128xf32>
    %c1_264 = arith.constant 1 : index
    %c0_265 = arith.constant 0 : index
    %c0_266 = arith.constant 0 : index
    %800 = vector.load %arg28[%c1_264, %c0_265, %c0_266] : memref<2x128x64xbf16, #tpu.memory_space<vmem>>, vector<1x128x64xbf16>
    %801 = vector.shape_cast %800 : vector<1x128x64xbf16> to vector<128x64xbf16>
    %802 = arith.truncf %799 : vector<16x128xf32> to vector<16x128xbf16>
    %cst_267 = arith.constant dense<0.000000e+00> : vector<16x64xf32>
    %803 = tpu.matmul %802, %801, %cst_267 {dimension_numbers = #tpu.dot_dimension_numbers<[1], [0], [0], [1], [0, 0, 1, 1], [], []>} : vector<16x128xbf16>, vector<128x64xbf16>, vector<16x64xf32> -> vector<16x64xf32>
    %804 = arith.addf %765, %803 : vector<16x64xf32>
    %c0_268 = arith.constant 0 : index
    %c0_269 = arith.constant 0 : index
    %805 = vector.load %arg29[%c0_268, %c0_269] : memref<1x64xf32, #tpu.memory_space<vmem>>, vector<1x64xf32>
    %806 = arith.mulf %804, %804 : vector<16x64xf32>
    %cst_270 = arith.constant dense<0.000000e+00> : vector<16xf32>
    %807 = vector.multi_reduction <add>, %806, %cst_270 [1] : vector<16x64xf32> to vector<16xf32>
    %808 = vector.shape_cast %807 : vector<16xf32> to vector<16x1xf32>
    %cst_271 = arith.constant 6.400000e+01 : f32
    %809 = vector.broadcast %cst_271 : f32 to vector<16x1xf32>
    %810 = arith.divf %808, %809 : vector<16x1xf32>
    %cst_272 = arith.constant 9.99999997E-7 : f32
    %811 = vector.broadcast %cst_272 : f32 to vector<16x1xf32>
    %812 = arith.addf %810, %811 : vector<16x1xf32>
    %813 = math.rsqrt %812 : vector<16x1xf32>
    %814 = vector.broadcast %813 : vector<16x1xf32> to vector<16x64xf32>
    %815 = arith.mulf %804, %814 : vector<16x64xf32>
    %816 = vector.broadcast %805 : vector<1x64xf32> to vector<16x64xf32>
    %817 = arith.mulf %815, %816 : vector<16x64xf32>
    %c0_273 = arith.constant 0 : index
    %c0_274 = arith.constant 0 : index
    %818 = vector.load %arg30[%c0_273, %c0_274] : memref<64x128xbf16, #tpu.memory_space<vmem>>, vector<64x128xbf16>
    %819 = arith.truncf %817 : vector<16x64xf32> to vector<16x64xbf16>
    %cst_275 = arith.constant dense<0.000000e+00> : vector<16x128xf32>
    %820 = tpu.matmul %819, %818, %cst_275 {dimension_numbers = #tpu.dot_dimension_numbers<[1], [0], [0], [1], [0, 0, 1, 1], [], []>} : vector<16x64xbf16>, vector<64x128xbf16>, vector<16x128xf32> -> vector<16x128xf32>
    %c0_276 = arith.constant 0 : index
    %c0_277 = arith.constant 0 : index
    %821 = vector.load %arg31[%c0_276, %c0_277] : memref<16x128xf32, #tpu.memory_space<vmem>>, vector<16x128xf32>
    tpu.vector_store %arg31[%c0_276, %c0_277], %820 {strides = array<i32>} : memref<16x128xf32, #tpu.memory_space<vmem>>, vector<16x128xf32>,
    %c0_278 = arith.constant 0 : index
    %c0_279 = arith.constant 0 : index
    %822 = vector.load %arg2[%c0_278, %c0_279] : memref<16x1xi32, #tpu.memory_space<vmem>>, vector<16x1xi32>
    %cst_280 = arith.constant dense<0xFF800000> : vector<16xf32>
    %823 = vector.multi_reduction <maximumf>, %820, %cst_280 [1] : vector<16x128xf32> to vector<16xf32>
    %824 = vector.shape_cast %823 : vector<16xf32> to vector<16x1xf32>
    %825 = vector.broadcast %824 : vector<16x1xf32> to vector<16x128xf32>
    %826 = arith.subf %820, %825 : vector<16x128xf32>
    %827 = math.exp %826 : vector<16x128xf32>
    %cst_281 = arith.constant dense<0.000000e+00> : vector<16xf32>
    %828 = vector.multi_reduction <add>, %827, %cst_281 [1] : vector<16x128xf32> to vector<16xf32>
    %829 = vector.shape_cast %828 : vector<16xf32> to vector<16x1xf32>
    %830 = math.log %829 : vector<16x1xf32>
    %831 = tpu.iota {dimensions = array<i32: 1>} : vector<16x128xi32>
    %832 = vector.broadcast %822 : vector<16x1xi32> to vector<16x128xi32>
    %833 = arith.cmpi eq, %831, %832 : vector<16x128xi32>
    %834 = arith.extui %833 : vector<16x128xi1> to vector<16x128xi32>
    %835 = arith.sitofp %834 : vector<16x128xi32> to vector<16x128xf32>
    %836 = arith.mulf %826, %835 : vector<16x128xf32>
    %cst_282 = arith.constant dense<0.000000e+00> : vector<16xf32>
    %837 = vector.multi_reduction <add>, %836, %cst_282 [1] : vector<16x128xf32> to vector<16xf32>
    %838 = vector.shape_cast %837 : vector<16xf32> to vector<16x1xf32>
    %839 = arith.subf %830, %838 : vector<16x1xf32>
    %c-100_i32 = arith.constant -100 : i32
    %840 = vector.broadcast %c-100_i32 : i32 to vector<16x1xi32>
    %841 = arith.cmpi ne, %822, %840 : vector<16x1xi32>
    %842 = arith.extui %841 : vector<16x1xi1> to vector<16x1xi32>
    %843 = arith.sitofp %842 : vector<16x1xi32> to vector<16x1xf32>
    %844 = arith.mulf %839, %843 : vector<16x1xf32>
    %cst_283 = arith.constant dense<0.000000e+00> : vector<1xf32>
    %845 = vector.multi_reduction <add>, %844, %cst_283 [0] : vector<16x1xf32> to vector<1xf32>
    %846 = vector.shape_cast %845 : vector<1xf32> to vector<1x1xf32>
    %cst_284 = arith.constant dense<0.000000e+00> : vector<1xf32>
    %847 = vector.multi_reduction <add>, %843, %cst_284 [0] : vector<16x1xf32> to vector<1xf32>
    %848 = vector.shape_cast %847 : vector<1xf32> to vector<1x1xf32>
    %cst_285 = arith.constant 1.000000e+00 : f32
    %849 = vector.broadcast %cst_285 : f32 to vector<1x1xf32>
    %850 = arith.maximumf %848, %849 : vector<1x1xf32>
    %851 = arith.divf %846, %850 : vector<1x1xf32>
    %c0_286 = arith.constant 0 : index
    %c0_287 = arith.constant 0 : index
    %852 = vector.load %arg32[%c0_286, %c0_287] : memref<1x1xf32, #tpu.memory_space<vmem>>, vector<1x1xf32>
    tpu.vector_store %arg32[%c0_286, %c0_287], %851 {strides = array<i32>} : memref<1x1xf32, #tpu.memory_space<vmem>>, vector<1x1xf32>,
    return
  }
}

</mosaic_0001>

<bundles_post_ra>
// kernel: forward.1
= control target key start
LH: loop header
LB: loop body
LE: loop exit
PB: predicated region body
PF: predicated region fallthrough
CT: control target
= control target key end

     0   :  { %s7582_s6 = smov 1   ;;  %s7583_s10 = smov 2   ;;  %s8994_s0 = inlined_call_operand.smem [shape: u32[33], index: -1, kind: input, shape index: {}] }
   0x1   :  { %s7633_s5 = sld [smem:[%s8994_s0]]   ;;  %s7584_s14 = smov 3  }
   0x2   :  { %s7638_s9 = sld [smem:[%s8994_s0 + %s7582_s6]]   ;;  %s7585_s18 = smov 4  }
   0x3   :  { %s7643_s13 = sld [smem:[%s8994_s0 + %s7583_s10]]   ;;  %s7586_s22 = smov 5  }
   0x4   :  { %s7648_s17 = sld [smem:[%s8994_s0 + %s7584_s14]]   ;;  %s7587_s26 = smov 6  }
   0x5   :  { %s7653_s21 = sld [smem:[%s8994_s0 + %s7585_s18]]   ;;  %s7588_s30 = smov 7  }
   0x6   :  { %s7658_s25 = sld [smem:[%s8994_s0 + %s7586_s22]]   ;;  %s7589_s4 = smov 8  }
   0x7   :  { %s7663_s29 = sld [smem:[%s8994_s0 + %s7587_s26]]   ;;  %s7590_s10 = smov 9  }
   0x8   :  { %s7668_s3 = sld [smem:[%s8994_s0 + %s7588_s30]]   ;;  %s7591_s15 = smov 10  }
   0x9   :  { %9009 = sst [smem:[#allocation8_spill]] %s7643_s13  ;;  %s7592_s20 = smov 11  }
   0xa   :  { %s7673_s8 = sld [smem:[%s8994_s0 + %s7589_s4]]   ;;  %s7593_s26 = smov 12  }
   0xb   :  { %s7678_s14 = sld [smem:[%s8994_s0 + %s7590_s10]]   ;;  %s7594_s1 = smov 13  }
   0xc   :  { %s7683_s19 = sld [smem:[%s8994_s0 + %s7591_s15]]   ;;  %s7595_s7 = smov 14  }
   0xd   :  { %9010 = sst [smem:[#allocation9_spill]] %s7663_s29  ;;  %s7596_s15 = smov 15  }
   0xe   :  { %s7688_s24 = sld [smem:[%s8994_s0 + %s7592_s20]]   ;;  %s7597_s22 = smov 16  }
   0xf   :  { %s7693_s30 = sld [smem:[%s8994_s0 + %s7593_s26]]   ;;  %s7598_s28 = smov 17  }
  0x10   :  { %s7698_s6 = sld [smem:[%s8994_s0 + %s7594_s1]]  }
  0x11   :  { %s7703_s12 = sld [smem:[%s8994_s0 + %s7595_s7]]   ;;  %s7599_s7 = smov 18  }
  0x12   :  { %s7708_s20 = sld [smem:[%s8994_s0 + %s7596_s15]]   ;;  %s7600_s15 = smov 19  }
  0x13   :  { %s7713_s27 = sld [smem:[%s8994_s0 + %s7597_s22]]   ;;  %s7601_s22 = smov 20  }
  0x14   :  { %s7718_s4 = sld [smem:[%s8994_s0 + %s7598_s28]]   ;;  %s7602_s28 = smov 21  }
  0x15   :  { %s7723_s13 = sld [smem:[%s8994_s0 + %s7599_s7]]   ;;  %s7603_s7 = smov 22  }
  0x16   :  { %s7728_s29 = sld [smem:[%s8994_s0 + %s7600_s15]]   ;;  %s7604_s15 = smov 23  }
  0x18   :  { %9011 = sst [smem:[#allocation10_spill]] %s7708_s20 }
  0x19   :  { %9012 = sst [smem:[#allocation11_spill]] %s7713_s27 }
  0x1a   :  { %9013 = sst [smem:[#allocation12_spill]] %s7718_s4 }
  0x1b   :  { %s7733_s20 = sld [smem:[%s8994_s0 + %s7601_s22]]   ;;  %s7605_s22 = smov 24  }
  0x1c   :  { %9014 = sst [smem:[#allocation13_spill]] %s7728_s29 }
  0x1d   :  { %s7738_s4 = sld [smem:[%s8994_s0 + %s7602_s28]]   ;;  %s7606_s28 = smov 25  }
  0x1e   :  { %s7743_s27 = sld [smem:[%s8994_s0 + %s7603_s7]]   ;;  %s7607_s7 = smov 26  }
  0x1f   :  { %s7748_s29 = sld [smem:[%s8994_s0 + %s7604_s15]]   ;;  %s7608_s15 = smov 27  }
  0x21   :  { %9015 = sst [smem:[#allocation14_spill]] %s7733_s20 }
  0x22   :  { %s7753_s20 = sld [smem:[%s8994_s0 + %s7605_s22]]   ;;  %s7609_s22 = smov 28  }
  0x23   :  { %9016 = sst [smem:[#allocation15_spill]] %s7738_s4 }
  0x24   :  { %9017 = sst [smem:[#allocation16_spill]] %s7743_s27 }
  0x25   :  { %9018 = sst [smem:[#allocation17_spill]] %s7748_s29 }
  0x26   :  { %s7758_s4 = sld [smem:[%s8994_s0 + %s7606_s28]]   ;;  %s7610_s28 = smov 29  }
  0x27   :  { %s7763_s27 = sld [smem:[%s8994_s0 + %s7607_s7]]   ;;  %s7611_s7 = smov 30  }
  0x28   :  { %9019 = sst [smem:[#allocation18_spill]] %s7753_s20 }
  0x29   :  { %s7768_s29 = sld [smem:[%s8994_s0 + %s7608_s15]]   ;;  %s7612_s15 = smov 31  }
  0x2a   :  { %s7773_s20 = sld [smem:[%s8994_s0 + %s7609_s22]]   ;;  %s7613_s22 = smov 32  }
  0x2c   :  { %9020 = sst [smem:[#allocation19_spill]] %s7758_s4 }
  0x2d   :  { %9021 = sst [smem:[#allocation20_spill]] %s7763_s27 }
  0x2e   :  { %s7778_s4 = sld [smem:[%s8994_s0 + %s7610_s28]]  }
  0x2f   :  { %9022 = sst [smem:[#allocation21_spill]] %s7768_s29 }
  0x30   :  { %9023 = sst [smem:[#allocation22_spill]] %s7773_s20 }
  0x31   :  { %s7783_s27 = sld [smem:[%s8994_s0 + %s7611_s7]]  }
  0x32   :  { %s7788_s29 = sld [smem:[%s8994_s0 + %s7612_s15]]  }
  0x33   :  { %s7793_s20 = sld [smem:[%s8994_s0 + %s7613_s22]]  }
  0x34   :  { %71 = vsyncpa [#allocation3], 0  ;;  %v161_v0 = vld [vmem:[%s7633_s5] sm:$0xff]  ;;  %v7027_v1 = vld [vmem:[%s7653_s21 + $0x38] sm:$0xff]  ;;  %v7614_v2 = vmov 0  }
  0x35   :  { %7243 = vset.pattern.permute.xlu0 %v7614_v2  ;;  %7244 = vset.pattern.permute.xlu1 %v7614_v2  ;;  %v7026_v3 = vld [vmem:[%s7653_s21 + $0x30] sm:$0xff]  ;;  %v7025_v4 = vld [vmem:[%s7653_s21 + $0x28] sm:$0xff] }
  0x36   :  { %166 = vperm.xlu0 %7243, %v161_v0   ;;  %242 = vmatpush.bf16.msra.mxu0 %v7027_v1 }
  0x37   :  { %7245 = vset.pattern.permute.xlu2 %v7614_v2 }
  0x3a   :  { %243 = vmatpush.bf16.msra.mxu0 %v7026_v3 }
  0x3b   :  { %72 = vsyncpa [#allocation5], 0  ;;  %v162_v5 = vld [vmem:[%s7633_s5 + $0x8] sm:$0xff]  ;;  %v7024_v6 = vld [vmem:[%s7653_s21 + $0x20] sm:$0xff]  ;;  %v163_v12 = vlaneseq  ;;  %v7615_v15 = vmov 1.0|1.0  }
  0x3c   :  { %v7023_v7 = vld [vmem:[%s7653_s21 + $0x18] sm:$0xff]  ;;  %v7022_v8 = vld [vmem:[%s7653_s21 + $0x10] sm:$0xff]  ;;  %v7021_v9 = vld [vmem:[%s7653_s21 + $0x8] sm:$0xff]  ;;  %vm259_vm3 = vcmask 523264   ;;  %v7616_v22 = vmov 64.0   ;;  %s7617_s0 = smov 112  }
  0x3d   :  { %v7020_v10 = vld [vmem:[%s7653_s21] sm:$0xff]  ;;  %v7805_v13 = vand.u32 127, %v163_v12  ;;  %7258 = vrcp.f32 %v7616_v22  ;;  %v7031_v26 = vld [vmem:[%s7673_s8 + $0x18] sm:$0xff]  ;;  %v7030_v30 = vld [vmem:[%s7673_s8 + $0x10] sm:$0xff]  ;;  %vm502_vm11 = vcmask 130048   ;;  %s7618_s5 = smov 80  }
  0x3e   :  { %169 = vperm.xlu0 %7243, %v162_v5   ;;  %244 = vmatpush.bf16.msra.mxu0 %v7025_v4  ;;  %v7035_v27 = vld [vmem:[%s7678_s14 + $0x18] sm:$0xff]  ;;  %v7034_v31 = vld [vmem:[%s7678_s14 + $0x10] sm:$0xff]  ;;  %v7029_v34 = vld [vmem:[%s7673_s8 + $0x8] sm:$0xff]  ;;  %s7619_s28 = smov 96   ;;  %vm755_vm12 = vcmask 1043456   ;;  %vm655_vm13 = vcmask 64512  }
  0x3f   :  { %v7039_v28 = vld [vmem:[%s7683_s19 + $0x18] sm:$0xff]  ;;  %344 = vmatpush.bf16.msra.mxu1 %v7031_v26  ;;  %406 = vmatpush.bf16.msra.mxu2 %v7035_v27  ;;  %v7038_v32 = vld [vmem:[%s7683_s19 + $0x10] sm:$0xff]  ;;  %v7033_v35 = vld [vmem:[%s7678_s14 + $0x8] sm:$0xff]  ;;  %s9036_s1 = sld [smem:[#allocation20_spill]]  ;;  %s7546_s15 = scalar_lea.hbm %s7788_s29, 16 }
  0x40   :  { %468 = vmatpush.bf16.msra.mxu3 %v7039_v28  ;;  %v7037_v36 = vld [vmem:[%s7683_s19 + $0x8] sm:$0xff]  ;;  %v7028_v38 = vld [vmem:[%s7673_s8] sm:$0xff]  ;;  %s9037_s2 = sld [smem:[#allocation22_spill]] }
  0x41   :  { %v7032_v39 = vld [vmem:[%s7678_s14] sm:$0xff] }
  0x42   :  { %245 = vmatpush.bf16.msra.mxu0 %v7024_v6  ;;  %v7036_v40 = vld [vmem:[%s7683_s19] sm:$0xff] }
  0x43   :  { %v7259_v23 = vpop.eup %7258  ;;  %345 = vmatpush.bf16.msra.mxu1 %v7030_v30  ;;  %407 = vmatpush.bf16.msra.mxu2 %v7034_v31  ;;  %v7246_v61 = vld [vmem:[%s7668_s3] ss:$0 sm:$0xff] }
  0x44   :  { %v267_v24 = vmul.f32 64.0, %v7259_v23  ;;  %vm271_vm4 = vweird.f32 %v7259_v23  ;;  %469 = vmatpush.bf16.msra.mxu3 %v7038_v32  ;;  %v136_v27 = vld [vmem:[%s7648_s17] sm:$0x3]  ;;  %s9025_s17 = sld [smem:[#allocation12_spill]] }
  0x46   :  { %246 = vmatpush.bf16.msra.mxu0 %v7023_v7  ;;  %v268_v25 = vsub.f32 1.0, %v267_v24 }
  0x47   :  { %346 = vmatpush.bf16.msra.mxu1 %v7029_v34  ;;  %408 = vmatpush.bf16.msra.mxu2 %v7033_v35 }
  0x48   :  { %v269_v29 = vmul.f32 %v7259_v23, %v268_v25  ;;  %470 = vmatpush.bf16.msra.mxu3 %v7037_v36  ;;  %v139_v36 = vld [vmem:[%s7658_s25] sm:$0xff] }
  0x4a   :  { %247 = vmatpush.bf16.msra.mxu0 %v7022_v8  ;;  %v270_v33 = vadd.f32 %v7259_v23, %v269_v29  ;;  %v137_v29 = vsub.f32 1.0, %v136_v27 }
  0x4b   :  { %347 = vmatpush.bf16.msra.mxu1 %v7028_v38  ;;  %409 = vmatpush.bf16.msra.mxu2 %v7032_v39 }
  0x4c   :  { %v7829_v37 = vsel %vm271_vm4, %v7259_v23, %v270_v33  ;;  %471 = vmatpush.bf16.msra.mxu3 %v7036_v40  ;;  %v138_v32 = vmul.f32 -1e+09, %v137_v29 }
  0x4e   :  { %248 = vmatpush.bf16.msra.mxu0 %v7021_v9  ;;  %v7870_v35 = vperm.slane %v138_v32, 0 }
  0x50   :  { %v7876_v40 = vadd.f32 %v7870_v35, %v139_v36 }
  0x52   :  { %249 = vmatpush.bf16.msra.mxu0 %v7020_v10 }
  0xa8   :  { %v167_v11 = vpop.permute.xlu0 %166 }
  0xa9   :  { %vm171_vm0 = vcmp.eq.s32.totalorder %v7805_v13, %v167_v11 }
  0xb0   :  { %v170_v14 = vpop.permute.xlu0 %169 }
  0xb1   :  { %vm172_vm1 = vcmp.eq.s32.totalorder %v7805_v13, %v170_v14 }
  0xb2   :  { %vm6026_vm2 = vmpackc.low %vm172_vm1, %vm171_vm0 }
  0xb3   :  { %6027 = vmatmul.msk.bf16.vlgmr.msra.gmra.mxu0 %vm6026_vm2, %v7615_v15 }
 0x130   :  { %v7810_v16 = vpop.f32.mrf.mxu0 }
 0x131   :  { %v257_v17 = vmul.f32 %v7810_v16, %v7810_v16 }
 0x133   :  { %v260_v18 = vsel %vm259_vm3, %v257_v17, 0.0 }
 0x134   :  { %261 = vadd.xlane.f32.xlu1 %v260_v18 }
 0x138   :  { %v7815_v19 = vpop.f32.mrf.mxu0 }
 0x139   :  { %v258_v20 = vmul.f32 %v7815_v19, %v7815_v19 }
 0x13b   :  { %v263_v21 = vsel %vm259_vm3, %v258_v20, 0.0 }
 0x13c   :  { %264 = vadd.xlane.f32.xlu1 %v263_v21 }
 0x1a7   :  { %v262_v41 = vpop.xlane.xlu1 %261 }
 0x1a8   :  { %v273_v42 = vmul.f32 %v7829_v37, %v262_v41 }
 0x1aa   :  { %v275_v43 = vadd.f32 1e-06, %v273_v42 }
 0x1ac   :  { %7260 = vrsqrt.f32 %v275_v43  ;;  %vm283_vm6 = vweird.f32 %v275_v43 }
 0x1af   :  { %v265_v44 = vpop.xlane.xlu1 %264 }
 0x1b0   :  { %v274_v45 = vmul.f32 %v7829_v37, %v265_v44 }
 0x1b2   :  { %v7261_v46 = vpop.eup %7260  ;;  %v276_v47 = vadd.f32 1e-06, %v274_v45 }
 0x1b3   :  { %v278_v48 = vmul.f32 %v7261_v46, %v275_v43  ;;  %vm284_vm5 = vweird.f32 %v7261_v46 }
 0x1b4   :  { %7262 = vrsqrt.f32 %v276_v47  ;;  %vm285_vm7 = vmor %vm283_vm6, %vm284_vm5  ;;  %vm293_vm9 = vweird.f32 %v276_v47 }
 0x1b5   :  { %v279_v49 = vmul.f32 %v7261_v46, %v278_v48 }
 0x1b7   :  { %v280_v50 = vmul.f32 0.5, %v279_v49 }
 0x1b9   :  { %v281_v51 = vsub.f32 1.5, %v280_v50 }
 0x1ba   :  { %v7263_v52 = vpop.eup %7262 }
 0x1bb   :  { %v288_v53 = vmul.f32 %v7263_v52, %v276_v47  ;;  %v282_v54 = vmul.f32 %v7261_v46, %v281_v51  ;;  %vm294_vm8 = vweird.f32 %v7263_v52  ;;  %v144_v47 = vrot.slane %v138_v32, 1 }
 0x1bc   :  { %vm295_vm10 = vmor %vm293_vm9, %vm294_vm8 }
 0x1bd   :  { %v289_v55 = vmul.f32 %v7263_v52, %v288_v53  ;;  %v286_v58 = vsel %vm285_vm7, %v7261_v46, %v282_v54  ;;  %v7886_v51 = vperm.slane %v144_v47, 0 }
 0x1be   :  { %v297_v60 = vmul.f32 %v286_v58, %v7810_v16 }
 0x1bf   :  { %v290_v56 = vmul.f32 0.5, %v289_v55  ;;  %v7889_v53 = vadd.f32 %v7886_v51, %v139_v36 }
 0x1c0   :  { %v302_v0 = vmul.f32 %v7246_v61, %v297_v60 }
 0x1c1   :  { %v291_v57 = vsub.f32 1.5, %v290_v56 }
 0x1c3   :  { %v292_v59 = vmul.f32 %v7263_v52, %v291_v57 }
 0x1c5   :  { %v296_v62 = vsel %vm295_vm10, %v7263_v52, %v292_v59 }
 0x1c6   :  { %v298_v63 = vmul.f32 %v296_v62, %v7815_v19 }
 0x1c8   :  { %v303_v1 = vmul.f32 %v7246_v61, %v298_v63 }
 0x1ca   :  { %v304_v2 = vpack.c.bf16 %v303_v1, %v302_v0 }
 0x1cc   :  { %6044 = vmatmul.msk.bf16.vlgmr.msra.gmra.mxu1 %vm259_vm3, %v304_v2  ;;  %6061 = vmatmul.msk.bf16.vlgmr.msra.gmra.mxu2 %vm259_vm3, %v304_v2 }
 0x1cd   :  { %6078 = vmatmul.msk.bf16.vlgmr.msra.gmra.mxu3 %vm259_vm3, %v304_v2  ;;  %v140_v2 = vld [vmem:[%s7658_s25 + $0x8] sm:$0xff] }
 0x249   :  { %v349_v3 = vpop.f32.mrf.mxu1 }
 0x24a   :  { %v354_v4 = vpack.c.bf16 %v349_v3, %v349_v3  ;;  %v141_v3 = vld [vmem:[%s7658_s25 + $0x10] sm:$0xff] }
 0x24c   :  { %358 = vrot.lane.b32.xlu1 %v354_v4, %s7617_s0 }
 0x24f   :  { %v411_v5 = vpop.f32.mrf.mxu2 }
 0x250   :  { %v416_v6 = vpack.c.bf16 %v411_v5, %v411_v5  ;;  %v473_v17 = vpop.f32.mrf.mxu3  ;;  %v7897_v5 = vadd.f32 %v7870_v35, %v141_v3 }
 0x251   :  { %v351_v7 = vpop.f32.mrf.mxu1  ;;  %v7873_v38 = vpack.c.bf16 %v473_v17, %v473_v17 }
 0x252   :  { %v355_v8 = vpack.c.bf16 %v351_v7, %v351_v7  ;;  %420 = vrot.lane.b32.xlu0 %v416_v6, %s7617_s0  ;;  %v507_v9 = vsel %vm502_vm11, %v416_v6, 0 }
 0x253   :  { %516 = vmatpush.bf16.xpose.msrb.mxu1 %v507_v9  ;;  %v757_v44 = vsel %vm755_vm12, %v7873_v38, 0 }
 0x254   :  { %368 = vrot.lane.b32.xlu1 %v355_v8, %s7618_s5 }
 0x257   :  { %v413_v10 = vpop.f32.mrf.mxu2 }
 0x258   :  { %v417_v11 = vpack.c.bf16 %v413_v10, %v413_v10  ;;  %v475_v21 = vpop.f32.mrf.mxu3 }
 0x259   :  { %v7860_v22 = vpack.c.bf16 %v475_v21, %v475_v21 }
 0x25a   :  { %422 = vrot.lane.b32.xlu2 %v417_v11, %s7617_s0  ;;  %6079 = vmatmul.msk.bf16.vlgmr.msrb.gmra.mxu1 %vm502_vm11, %v354_v4  ;;  %v526_v12 = vsel %vm502_vm11, %v417_v11, 0 }
 0x25b   :  { %364 = vrot.lane.b32.xlu0 %v355_v8, %s7619_s28  ;;  %535 = vmatpush.bf16.xpose.msrb.mxu2 %v526_v12  ;;  %v776_v28 = vsel %vm755_vm12, %v7860_v22, 0 }
 0x262   :  { %360 = vrot.lane.b32.xlu2 %v355_v8, %s7617_s0  ;;  %6080 = vmatmul.msk.bf16.vlgmr.msrb.gmra.mxu2 %vm502_vm11, %v355_v8  ;;  %v7900_v8 = vadd.f32 %v7886_v51, %v140_v2 }
 0x263   :  { %424 = vrot.lane.b32.xlu0 %v416_v6, %s7619_s28 }
 0x26a   :  { %426 = vrot.lane.b32.xlu2 %v417_v11, %s7619_s28 }
 0x26b   :  { %362 = vrot.lane.b32.xlu0 %v354_v4, %s7619_s28 }
 0x272   :  { %428 = vrot.lane.b32.xlu2 %v416_v6, %s7618_s5 }
 0x27a   :  { %366 = vrot.lane.b32.xlu2 %v354_v4, %s7618_s5 }
 0x282   :  { %430 = vrot.lane.b32.xlu2 %v417_v11, %s7618_s5 }
 0x2b4   :  { %v423_v14 = vpop.permute.xlu2 %422 }
 0x2b5   :  { %v564_v18 = vsel %vm502_vm11, %v423_v14, 0  ;;  %v7906_v14 = vadd.f32 %v7870_v35, %v140_v2 }
 0x2b6   :  { %573 = vmatpush.bf16.xpose.msra.mxu2 %v564_v18  ;;  %v142_v18 = vld [vmem:[%s7658_s25 + $0x18] sm:$0xff]  ;;  %s9027_s25 = sld [smem:[#allocation17_spill]] }
 0x2bc   :  { %v361_v20 = vpop.permute.xlu2 %360 }
 0x2bd   :  { %6082 = vmatmul.msk.bf16.vlgmr.msra.gmra.mxu2 %vm502_vm11, %v361_v20  ;;  %v7911_v20 = vadd.f32 %v7886_v51, %v142_v18 }
 0x2be   :  { %v359_v30 = vpop.permute.xlu1 %358 }
 0x2c4   :  { %v421_v23 = vpop.permute.xlu0 %420  ;;  %v427_v24 = vpop.permute.xlu2 %426 }
 0x2c5   :  { %v602_v25 = vsel %vm502_vm11, %v427_v24, 0  ;;  %v545_v26 = vsel %vm502_vm11, %v421_v23, 0  ;;  %v7915_v24 = vadd.f32 %v7870_v35, %v142_v18 }
 0x2c6   :  { %554 = vmatpush.bf16.xpose.msrb.mxu3 %v545_v26  ;;  %611 = vmatpush.bf16.xpose.msrb.mxu2 %v602_v25  ;;  %v369_v54 = vpop.permute.xlu1 %368 }
 0x2cc   :  { %v429_v31 = vpop.permute.xlu2 %428 }
 0x2cd   :  { %v365_v33 = vpop.permute.xlu0 %364  ;;  %v621_v34 = vsel %vm502_vm11, %v429_v31, 0  ;;  %6081 = vmatmul.msk.bf16.vlgmr.msrb.gmra.mxu3 %vm502_vm11, %v359_v30 }
 0x2ce   :  { %785 = vmatpush.bf16.msra.mxu2 %v776_v28  ;;  %630 = vmatpush.bf16.xpose.msra.mxu3 %v621_v34 }
 0x2cf   :  { %6084 = vmatmul.msk.bf16.vlgmr.msrb.gmra.mxu2 %vm502_vm11, %v365_v33 }
 0x2d4   :  { %v367_v39 = vpop.permute.xlu2 %366 }
 0x2d5   :  { %v425_v41 = vpop.permute.xlu0 %424 }
 0x2d6   :  { %v583_v42 = vsel %vm502_vm11, %v425_v41, 0  ;;  %v7933_v41 = vadd.f32 %v7886_v51, %v141_v3 }
 0x2d7   :  { %592 = vmatpush.bf16.xpose.msra.mxu1 %v583_v42  ;;  %v518_v43 = vpop.f32.mrf.mxu1 }
 0x2d8   :  { %v519_v45 = vadd.f32 %v518_v43, %v7876_v40 }
 0x2da   :  { %v656_v46 = vsel %vm655_vm13, %v519_v45, -inf }
 0x2db   :  { %657 = vmax.xlane.f32.xlu2 %v656_v46 }
 0x2dc   :  { %v431_v48 = vpop.permute.xlu2 %430 }
 0x2dd   :  { %v363_v49 = vpop.permute.xlu0 %362  ;;  %6085 = vmatmul.msk.bf16.vlgmr.msra.gmra.mxu3 %vm502_vm11, %v367_v39  ;;  %v640_v50 = vsel %vm502_vm11, %v431_v48, 0 }
 0x2de   :  { %6083 = vmatmul.msk.bf16.vlgmr.msra.gmra.mxu1 %vm502_vm11, %v363_v49  ;;  %649 = vmatpush.bf16.xpose.msrb.mxu0 %v640_v50 }
 0x2df   :  { %766 = vmatpush.bf16.msrb.mxu1 %v757_v44  ;;  %v520_v52 = vpop.f32.mrf.mxu1 }
 0x2e5   :  { %v537_v55 = vpop.f32.mrf.mxu2  ;;  %6086 = vmatmul.msk.bf16.vlgmr.msrb.gmra.mxu0 %vm502_vm11, %v369_v54 }
 0x2e6   :  { %v538_v56 = vadd.f32 %v537_v55, %v7889_v53 }
 0x2e8   :  { %v659_v57 = vsel %vm655_vm13, %v538_v56, -inf }
 0x2e9   :  { %660 = vmax.xlane.f32.xlu0 %v659_v57 }
 0x2ed   :  { %v539_v58 = vpop.f32.mrf.mxu2 }
 0x340   :  { %v575_v59 = vpop.f32.mrf.mxu2 }
 0x341   :  { %v576_v12 = vadd.f32 %v575_v59, %v7900_v8 }
 0x343   :  { %v665_v26 = vsel %vm655_vm13, %v576_v12, -inf }
 0x348   :  { %v577_v60 = vpop.f32.mrf.mxu2 }
 0x34e   :  { %v658_v61 = vpop.xlane.xlu2 %657 }
 0x34f   :  { %v680_v62 = vsub.f32 %v519_v45, %v658_v61 }
 0x350   :  { %v556_v63 = vpop.f32.mrf.mxu3 }
 0x351   :  { %v688_v0 = vmul.f32 1.442695, %v680_v62  ;;  %v557_v23 = vadd.f32 %v556_v63, %v7906_v14 }
 0x352   :  { %v613_v1 = vpop.f32.mrf.mxu2 }
 0x353   :  { %7264 = vpow2.f32 %v688_v0  ;;  %v662_v31 = vsel %vm655_vm13, %v557_v23, -inf  ;;  %v614_v43 = vadd.f32 %v613_v1, %v7933_v41 }
 0x355   :  { %v671_v44 = vsel %vm655_vm13, %v614_v43, -inf }
 0x358   :  { %v558_v4 = vpop.f32.mrf.mxu3 }
 0x359   :  { %v7265_v6 = vpop.eup %7264 }
 0x35a   :  { %v615_v7 = vpop.f32.mrf.mxu2  ;;  %v704_v9 = vsel %vm655_vm13, %v7265_v6, 0.0 }
 0x35b   :  { %v594_v10 = vpop.f32.mrf.mxu1  ;;  %705 = vadd.xlane.f32.xlu2 %v704_v9 }
 0x35c   :  { %v595_v11 = vadd.f32 %v594_v10, %v7897_v5  ;;  %v661_v36 = vpop.xlane.xlu0 %660 }
 0x35d   :  { %v681_v39 = vsub.f32 %v538_v56, %v661_v36 }
 0x35e   :  { %v668_v17 = vsel %vm655_vm13, %v595_v11, -inf }
 0x35f   :  { %669 = vmax.xlane.f32.xlu1 %v668_v17  ;;  %v690_v42 = vmul.f32 1.442695, %v681_v39 }
 0x360   :  { %v632_v21 = vpop.f32.mrf.mxu3 }
 0x361   :  { %v633_v30 = vadd.f32 %v632_v21, %v7915_v24  ;;  %7266 = vpow2.f32 %v690_v42 }
 0x362   :  { %v651_v25 = vpop.f32.mrf.mxu0 }
 0x363   :  { %v596_v27 = vpop.f32.mrf.mxu1  ;;  %v7919_v28 = vadd.f32 %v651_v25, %v7911_v20  ;;  %666 = vmax.xlane.f32.xlu2 %v665_v26  ;;  %v674_v34 = vsel %vm655_vm13, %v633_v30, -inf }
 0x365   :  { %v677_v29 = vsel %vm655_vm13, %v7919_v28, -inf }
 0x366   :  { %678 = vmax.xlane.f32.xlu0 %v677_v29 }
 0x367   :  { %663 = vmax.xlane.f32.xlu1 %v662_v31  ;;  %v7267_v45 = vpop.eup %7266 }
 0x368   :  { %v634_v32 = vpop.f32.mrf.mxu3  ;;  %v707_v46 = vsel %vm655_vm13, %v7267_v45, 0.0 }
 0x36a   :  { %v653_v33 = vpop.f32.mrf.mxu0 }
 0x36b   :  { %675 = vmax.xlane.f32.xlu2 %v674_v34 }
 0x37a   :  { %488 = vrot.lane.b32.xlu0 %v7860_v22, %s7619_s28 }
 0x380   :  { %484 = vrot.lane.b32.xlu1 %v7860_v22, %s7617_s0 }
 0x383   :  { %482 = vrot.lane.b32.xlu2 %v7873_v38, %s7617_s0 }
 0x3a4   :  { %672 = vmax.xlane.f32.xlu0 %v671_v44 }
 0x3aa   :  { %708 = vadd.xlane.f32.xlu1 %v707_v46 }
 0x3ce   :  { %v706_v47 = vpop.xlane.xlu2 %705 }
 0x3cf   :  { %7268 = vrcp.f32 %v706_v47 }
 0x3d2   :  { %v670_v48 = vpop.xlane.xlu1 %669 }
 0x3d3   :  { %v684_v49 = vsub.f32 %v595_v11, %v670_v48 }
 0x3d5   :  { %v7269_v50 = vpop.eup %7268  ;;  %v696_v52 = vmul.f32 1.442695, %v684_v49 }
 0x3d6   :  { %v736_v54 = vmul.f32 %v7269_v50, %v7265_v6  ;;  %v667_v55 = vpop.xlane.xlu2 %666 }
 0x3d7   :  { %7270 = vpow2.f32 %v696_v52  ;;  %v683_v56 = vsub.f32 %v576_v12, %v667_v55 }
 0x3d8   :  { %v744_v57 = vpack.c.bf16 %v736_v54, %v736_v54 }
 0x3d9   :  { %v694_v58 = vmul.f32 1.442695, %v683_v56  ;;  %v679_v6 = vpop.xlane.xlu0 %678 }
 0x3da   :  { %v664_v59 = vpop.xlane.xlu1 %663  ;;  %6087 = vmatmul.msk.bf16.vlgmr.msrb.gmra.mxu1 %vm655_vm13, %v744_v57  ;;  %v687_v26 = vsub.f32 %v7919_v28, %v679_v6 }
 0x3db   :  { %7272 = vpow2.f32 %v694_v58  ;;  %v682_v60 = vsub.f32 %v557_v23, %v664_v59 }
 0x3dc   :  { %v702_v27 = vmul.f32 1.442695, %v687_v26  ;;  %v7041_v26 = vld [vmem:[%s7688_s24 + $0x8] sm:$0xff] }
 0x3dd   :  { %v7939_v61 = vpop.eup %7270  ;;  %v692_v62 = vmul.f32 1.442695, %v682_v60 }
 0x3de   :  { %v676_v63 = vpop.xlane.xlu2 %675  ;;  %v716_v0 = vsel %vm655_vm13, %v7939_v61, 0.0 }
 0x3df   :  { %7274 = vpow2.f32 %v692_v62  ;;  %v686_v1 = vsub.f32 %v633_v30, %v676_v63  ;;  %717 = vadd.xlane.f32.xlu0 %v716_v0 }
 0x3e1   :  { %v7273_v2 = vpop.eup %7272  ;;  %v700_v3 = vmul.f32 1.442695, %v686_v1 }
 0x3e2   :  { %v713_v4 = vsel %vm655_vm13, %v7273_v2, 0.0 }
 0x3e3   :  { %7276 = vpow2.f32 %v700_v3  ;;  %714 = vadd.xlane.f32.xlu1 %v713_v4  ;;  %v7040_v3 = vld [vmem:[%s7688_s24] sm:$0xff] }
 0x3e4   :  { %7278 = vpow2.f32 %v702_v27 }
 0x3e5   :  { %v7275_v7 = vpop.eup %7274 }
 0x3e6   :  { %v483_v9 = vpop.permute.xlu2 %482  ;;  %v710_v10 = vsel %vm655_vm13, %v7275_v7, 0.0 }
 0x3e7   :  { %v795_v11 = vsel %vm755_vm12, %v483_v9, 0  ;;  %711 = vadd.xlane.f32.xlu0 %v710_v10 }
 0x3e8   :  { %804 = vmatpush.bf16.msrb.mxu3 %v795_v11 }
 0x3e9   :  { %v7277_v12 = vpop.eup %7276 }
 0x3ea   :  { %v722_v17 = vsel %vm655_vm13, %v7277_v12, 0.0  ;;  %v7279_v33 = vpop.eup %7278 }
 0x3eb   :  { %723 = vadd.xlane.f32.xlu2 %v722_v17  ;;  %v725_v44 = vsel %vm655_vm13, %v7279_v33, 0.0 }
 0x3ec   :  { %v489_v18 = vpop.permute.xlu0 %488 }
 0x3ed   :  { %v852_v21 = vsel %vm755_vm12, %v489_v18, 0 }
 0x3ee   :  { %861 = vmatpush.bf16.msrb.mxu2 %v852_v21 }
 0x3f2   :  { %v485_v23 = vpop.permute.xlu1 %484 }
 0x3f3   :  { %v814_v25 = vsel %vm755_vm12, %v485_v23, 0 }
 0x3f4   :  { %823 = vmatpush.bf16.msra.mxu0 %v814_v25 }
 0x3fb   :  { %490 = vrot.lane.b32.xlu0 %v7873_v38, %s7618_s5 }
 0x3fc   :  { %486 = vrot.lane.b32.xlu1 %v7873_v38, %s7619_s28 }
 0x417   :  { %v673_v29 = vpop.xlane.xlu0 %672 }
 0x418   :  { %v685_v30 = vsub.f32 %v614_v43, %v673_v29 }
 0x41a   :  { %v698_v31 = vmul.f32 1.442695, %v685_v30 }
 0x41c   :  { %7280 = vpow2.f32 %v698_v31 }
 0x41d   :  { %v709_v32 = vpop.xlane.xlu1 %708 }
 0x41e   :  { %7282 = vrcp.f32 %v709_v32 }
 0x422   :  { %v7281_v34 = vpop.eup %7280 }
 0x423   :  { %v719_v36 = vsel %vm655_vm13, %v7281_v34, 0.0 }
 0x424   :  { %v7283_v39 = vpop.eup %7282 }
 0x425   :  { %v737_v42 = vmul.f32 %v7283_v39, %v7267_v45  ;;  %720 = vadd.xlane.f32.xlu0 %v719_v36 }
 0x426   :  { %726 = vadd.xlane.f32.xlu1 %v725_v44  ;;  %v7043_v44 = vld [vmem:[%s7688_s24 + $0x18] sm:$0xff] }
 0x427   :  { %v745_v38 = vpack.c.bf16 %v737_v42, %v737_v42  ;;  %v7042_v42 = vld [vmem:[%s7688_s24 + $0x10] sm:$0xff] }
 0x429   :  { %6088 = vmatmul.msk.bf16.vlgmr.msra.gmra.mxu2 %vm655_vm13, %v745_v38 }
 0x42a   :  { %946 = vmatpush.bf16.msra.mxu2 %v7040_v3 }
 0x439   :  { %492 = vrot.lane.b32.xlu0 %v7860_v22, %s7618_s5 }
 0x452   :  { %v718_v28 = vpop.xlane.xlu0 %717 }
 0x456   :  { %v715_v43 = vpop.xlane.xlu1 %714 }
 0x457   :  { %7284 = vrcp.f32 %v715_v43  ;;  %v768_v46 = vpop.f32.mrf.mxu1 }
 0x45a   :  { %v712_v47 = vpop.xlane.xlu0 %711 }
 0x45b   :  { %7286 = vrcp.f32 %v712_v47 }
 0x45c   :  { %7288 = vrcp.f32 %v718_v28 }
 0x45d   :  { %v7285_v48 = vpop.eup %7284 }
 0x45e   :  { %v739_v49 = vmul.f32 %v7285_v48, %v7273_v2  ;;  %v724_v56 = vpop.xlane.xlu2 %723 }
 0x45f   :  { %v770_v50 = vpop.f32.mrf.mxu1  ;;  %7290 = vrcp.f32 %v724_v56 }
 0x460   :  { %v747_v45 = vpack.c.bf16 %v739_v49, %v739_v49 }
 0x461   :  { %v7287_v52 = vpop.eup %7286 }
 0x462   :  { %v738_v54 = vmul.f32 %v7287_v52, %v7275_v7  ;;  %6090 = vmatmul.msk.bf16.vlgmr.msra.gmra.mxu0 %vm655_vm13, %v747_v45  ;;  %v7289_v22 = vpop.eup %7288 }
 0x463   :  { %v740_v58 = vmul.f32 %v7289_v22, %v7939_v61 }
 0x464   :  { %v746_v55 = vpack.c.bf16 %v738_v54, %v738_v54 }
 0x465   :  { %v7291_v57 = vpop.eup %7290  ;;  %v748_v1 = vpack.c.bf16 %v740_v58, %v740_v58 }
 0x466   :  { %6089 = vmatmul.msk.bf16.vlgmr.msrb.gmra.mxu3 %vm655_vm13, %v746_v55  ;;  %v742_v0 = vmul.f32 %v7291_v57, %v7277_v12 }
 0x468   :  { %v750_v2 = vpack.c.bf16 %v742_v0, %v742_v0 }
 0x46d   :  { %v491_v59 = vpop.permute.xlu0 %490 }
 0x46e   :  { %v871_v60 = vsel %vm755_vm12, %v491_v59, 0  ;;  %v487_v62 = vpop.permute.xlu1 %486 }
 0x46f   :  { %v833_v63 = vsel %vm755_vm12, %v487_v62, 0  ;;  %880 = vmatpush.bf16.msra.mxu3 %v871_v60 }
 0x470   :  { %842 = vmatpush.bf16.msra.mxu1 %v833_v63 }
 0x473   :  { %6091 = vmatmul.msk.bf16.vlgmr.msra.gmra.mxu1 %vm655_vm13, %v748_v1  ;;  %970 = vmatpush.bf16.msrb.mxu3 %v7042_v42  ;;  %v6119_v42 = vld [vmem:[%s7698_s6 + $0x8] sm:$0xf0] }
 0x474   :  { %923 = vmatpush.bf16.msrb.mxu1 %v7041_v26  ;;  %v7047_v26 = vld [vmem:[%s7698_s6 + $0x14] sm:$0xf0] }
 0x476   :  { %6093 = vmatmul.msk.bf16.vlgmr.msra.gmra.mxu3 %vm655_vm13, %v750_v2 }
 0x498   :  { %v721_v4 = vpop.xlane.xlu0 %720 }
 0x499   :  { %7292 = vrcp.f32 %v721_v4  ;;  %v727_v61 = vpop.xlane.xlu1 %726 }
 0x49a   :  { %7294 = vrcp.f32 %v727_v61  ;;  %v6141_v61 = vld [vmem:[%s7698_s6 + $0x30] sm:$0xf] }
 0x49f   :  { %v7293_v6 = vpop.eup %7292 }
 0x4a0   :  { %v741_v7 = vmul.f32 %v7293_v6, %v7281_v34  ;;  %v7295_v10 = vpop.eup %7294  ;;  %v7051_v6 = vld [vmem:[%s7698_s6 + $0x34] sm:$0xf0] }
 0x4a1   :  { %v743_v11 = vmul.f32 %v7295_v10, %v7279_v33  ;;  %v6143_v10 = vld [vmem:[%s7698_s6 + $0x38] sm:$0xf0] }
 0x4a2   :  { %v749_v9 = vpack.c.bf16 %v741_v7, %v741_v7  ;;  %v7050_v7 = vld [vmem:[%s7698_s6 + $0x34] sm:$0xf] }
 0x4a3   :  { %v751_v21 = vpack.c.bf16 %v743_v11, %v743_v11  ;;  %v6146_v11 = vor.u32 %v7050_v7, %v6143_v10  ;;  %v7058_v7 = vld [vmem:[%s7703_s12 + $0x30] sm:$0xff]  ;;  %v7056_v10 = vld [vmem:[%s7703_s12 + $0x20] sm:$0xff] }
 0x4a4   :  { %6092 = vmatmul.msk.bf16.vlgmr.msrb.gmra.mxu2 %vm655_vm13, %v749_v9  ;;  %v6142_v9 = vor.u32 %v7051_v6, %v6141_v61  ;;  %v7059_v6 = vld [vmem:[%s7703_s12 + $0x38] sm:$0xff] }
 0x4a5   :  { %1117 = vmatpush.bf16.msrb.mxu2 %v6146_v11  ;;  %1212 = vmatpush.bf16.msra.mxu3 %v7059_v6  ;;  %v7055_v11 = vld [vmem:[%s7703_s12 + $0x18] sm:$0xff]  ;;  %v7060_v6 = vld [vmem:[%s7673_s8 + $0x20] sm:$0xff] }
 0x4a6   :  { %1103 = vmatpush.bf16.msra.mxu1 %v6142_v9  ;;  %v7057_v9 = vld [vmem:[%s7703_s12 + $0x28] sm:$0xff] }
 0x4a9   :  { %1213 = vmatpush.bf16.msra.mxu3 %v7058_v7  ;;  %v7064_v7 = vld [vmem:[%s7678_s14 + $0x20] sm:$0xff] }
 0x4ab   :  { %v493_v12 = vpop.permute.xlu0 %492 }
 0x4ac   :  { %v890_v17 = vsel %vm755_vm12, %v493_v12, 0  ;;  %v787_v18 = vpop.f32.mrf.mxu2  ;;  %v7049_v12 = vld [vmem:[%s7698_s6 + $0x24] sm:$0xf0] }
 0x4ad   :  { %899 = vmatpush.bf16.msrb.mxu0 %v890_v17  ;;  %v905_v23 = vpack.c.bf16 %v787_v18, %v768_v46  ;;  %v7048_v17 = vld [vmem:[%s7698_s6 + $0x24] sm:$0xf]  ;;  %1214 = vmatpush.bf16.msra.mxu3 %v7057_v9 }
 0x4ae   :  { %v7068_v9 = vld [vmem:[%s7683_s19 + $0x20] sm:$0xff] }
 0x4b0   :  { %6094 = vmatmul.msk.bf16.vlgmr.msrb.gmra.mxu0 %vm655_vm13, %v751_v21  ;;  %v6135_v21 = vld [vmem:[%s7698_s6 + $0x28] sm:$0xf0] }
 0x4b1   :  { %996 = vmatpush.bf16.msra.mxu0 %v7043_v44  ;;  %1215 = vmatpush.bf16.msra.mxu3 %v7056_v10 }
 0x4b4   :  { %v789_v25 = vpop.f32.mrf.mxu2  ;;  %6104 = vmatmul.msk.bf16.vlgmr.msra.gmra.mxu2 %vm502_vm11, %v905_v23  ;;  %v6138_v23 = vor.u32 %v7048_v17, %v6135_v21  ;;  %v7052_v17 = vld [vmem:[%s7703_s12] sm:$0xff] }
 0x4b5   :  { %v6125_v25 = vld [vmem:[%s7698_s6 + $0x10] sm:$0xf]  ;;  %1216 = vmatpush.bf16.msra.mxu3 %v7055_v11 }
 0x4b6   :  { %1118 = vmatpush.bf16.msrb.mxu2 %v6138_v23 }
 0x4df   :  { %v825_v27 = vpop.f32.mrf.mxu0 }
 0x4e7   :  { %v827_v29 = vpop.f32.mrf.mxu0 }
 0x4e8   :  { %v6126_v29 = vor.u32 %v7047_v26, %v6125_v25 }
 0x4e9   :  { %v806_v30 = vpop.f32.mrf.mxu3 }
 0x4ea   :  { %v906_v31 = vpack.c.bf16 %v825_v27, %v806_v30  ;;  %v7046_v27 = vld [vmem:[%s7698_s6 + $0x14] sm:$0xf]  ;;  %v6127_v30 = vld [vmem:[%s7698_s6 + $0x18] sm:$0xf0] }
 0x4ec   :  { %6099 = vmatmul.msk.bf16.vlgmr.msrb.gmra.mxu1 %vm502_vm11, %v906_v31  ;;  %v6130_v31 = vor.u32 %v7046_v27, %v6127_v30 }
 0x4ee   :  { %1119 = vmatpush.bf16.msrb.mxu2 %v6130_v31 }
 0x4f0   :  { %v844_v32 = vpop.f32.mrf.mxu1 }
 0x4f1   :  { %v808_v33 = vpop.f32.mrf.mxu3 }
 0x4f2   :  { %v7045_v33 = vld [vmem:[%s7698_s6 + $0x4] sm:$0xf0] }
 0x4f8   :  { %v846_v34 = vpop.f32.mrf.mxu1 }
 0x4f9   :  { %v882_v36 = vpop.f32.mrf.mxu3  ;;  %v7044_v34 = vld [vmem:[%s7698_s6 + $0x4] sm:$0xf] }
 0x501   :  { %v884_v39 = vpop.f32.mrf.mxu3 }
 0x527   :  { %v863_v38 = vpop.f32.mrf.mxu2 }
 0x528   :  { %v953_v28 = vpack.c.bf16 %v863_v38, %v844_v32  ;;  %v6117_v32 = vld [vmem:[%s7698_s6] sm:$0xf]  ;;  %v6122_v38 = vor.u32 %v7044_v34, %v6119_v42 }
 0x529   :  { %v6118_v39 = vor.u32 %v7045_v33, %v6117_v32 }
 0x52a   :  { %6109 = vmatmul.msk.bf16.vlgmr.msrb.gmra.mxu3 %vm502_vm11, %v953_v28  ;;  %1120 = vmatpush.bf16.msrb.mxu2 %v6122_v38 }
 0x52d   :  { %v901_v43 = vpop.f32.mrf.mxu0 }
 0x52e   :  { %v979_v46 = vpack.c.bf16 %v901_v43, %v882_v36 }
 0x52f   :  { %v865_v47 = vpop.f32.mrf.mxu2 }
 0x530   :  { %6114 = vmatmul.msk.bf16.vlgmr.msra.gmra.mxu0 %vm502_vm11, %v979_v46 }
 0x535   :  { %v903_v48 = vpop.f32.mrf.mxu0 }
 0x537   :  { %v948_v50 = vpop.f32.mrf.mxu2 }
 0x53f   :  { %v950_v58 = vpop.f32.mrf.mxu2 }
 0x569   :  { %v925_v49 = vpop.f32.mrf.mxu1 }
 0x56a   :  { %v949_v45 = vadd.f32 %v948_v50, %v925_v49 }
 0x571   :  { %v927_v22 = vpop.f32.mrf.mxu1 }
 0x572   :  { %v951_v59 = vadd.f32 %v950_v58, %v927_v22 }
 0x5ad   :  { %v972_v52 = vpop.f32.mrf.mxu3  ;;  %v998_v54 = vpop.f32.mrf.mxu0 }
 0x5ae   :  { %v977_v55 = vadd.f32 %v972_v52, %v949_v45 }
 0x5b0   :  { %v1003_v56 = vadd.f32 %v998_v54, %v977_v55 }
 0x5b2   :  { %v7978_v57 = vadd.f32 %v1003_v56, %v7810_v16 }
 0x5b4   :  { %v1008_v60 = vmul.f32 %v7978_v57, %v7978_v57 }
 0x5b5   :  { %v974_v62 = vpop.f32.mrf.mxu3  ;;  %v1000_v1 = vpop.f32.mrf.mxu0 }
 0x5b6   :  { %v978_v63 = vadd.f32 %v974_v62, %v951_v59  ;;  %v1010_v0 = vsel %vm259_vm3, %v1008_v60, 0.0 }
 0x5b7   :  { %1011 = vadd.xlane.f32.xlu0 %v1010_v0 }
 0x5b8   :  { %v1004_v2 = vadd.f32 %v1000_v1, %v978_v63  ;;  %v7247_v63 = vld [vmem:[%s7693_s30] ss:$0 sm:$0xff] }
 0x5ba   :  { %v7984_v16 = vadd.f32 %v1004_v2, %v7815_v19  ;;  %v6133_v19 = vld [vmem:[%s7698_s6 + $0x20] sm:$0xf] }
 0x5bb   :  { %v6134_v18 = vor.u32 %v7049_v12, %v6133_v19  ;;  %v7054_v19 = vld [vmem:[%s7703_s12 + $0x10] sm:$0xff]  ;;  %v7053_v12 = vld [vmem:[%s7703_s12 + $0x8] sm:$0xff] }
 0x5bc   :  { %v1009_v3 = vmul.f32 %v7984_v16, %v7984_v16  ;;  %1217 = vmatpush.bf16.msra.mxu3 %v7054_v19 }
 0x5bd   :  { %1104 = vmatpush.bf16.msra.mxu1 %v6134_v18 }
 0x5be   :  { %v1013_v4 = vsel %vm259_vm3, %v1009_v3, 0.0 }
 0x5bf   :  { %1014 = vadd.xlane.f32.xlu2 %v1013_v4 }
 0x5c0   :  { %1218 = vmatpush.bf16.msra.mxu3 %v7053_v12 }
 0x5c1   :  { %1105 = vmatpush.bf16.msra.mxu1 %v6126_v29 }
 0x5c4   :  { %1219 = vmatpush.bf16.msra.mxu3 %v7052_v17 }
 0x5c5   :  { %1106 = vmatpush.bf16.msra.mxu1 %v6118_v39 }
 0x62a   :  { %v1012_v36 = vpop.xlane.xlu0 %1011 }
 0x62b   :  { %v1016_v44 = vmul.f32 %v1012_v36, %v7829_v37 }
 0x62d   :  { %v1018_v28 = vadd.f32 1e-06, %v1016_v44 }
 0x62f   :  { %7296 = vrsqrt.f32 %v1018_v28  ;;  %vm1026_vm15 = vweird.f32 %v1018_v28 }
 0x632   :  { %v1015_v43 = vpop.xlane.xlu2 %1014 }
 0x633   :  { %v1017_v46 = vmul.f32 %v1015_v43, %v7829_v37 }
 0x635   :  { %v7297_v47 = vpop.eup %7296  ;;  %v1019_v48 = vadd.f32 1e-06, %v1017_v46 }
 0x636   :  { %v1021_v49 = vmul.f32 %v7297_v47, %v1018_v28  ;;  %vm1027_vm14 = vweird.f32 %v7297_v47 }
 0x637   :  { %7298 = vrsqrt.f32 %v1019_v48  ;;  %vm1028_vm0 = vmor %vm1026_vm15, %vm1027_vm14  ;;  %vm1036_vm2 = vweird.f32 %v1019_v48 }
 0x638   :  { %v1022_v50 = vmul.f32 %v7297_v47, %v1021_v49 }
 0x63a   :  { %v1023_v45 = vmul.f32 0.5, %v1022_v50 }
 0x63c   :  { %v1024_v52 = vsub.f32 1.5, %v1023_v45 }
 0x63d   :  { %v7299_v54 = vpop.eup %7298 }
 0x63e   :  { %v1031_v55 = vmul.f32 %v7299_v54, %v1019_v48  ;;  %v1025_v56 = vmul.f32 %v7297_v47, %v1024_v52  ;;  %vm1037_vm1 = vweird.f32 %v7299_v54 }
 0x63f   :  { %vm1038_vm4 = vmor %vm1036_vm2, %vm1037_vm1 }
 0x640   :  { %v1032_v22 = vmul.f32 %v7299_v54, %v1031_v55  ;;  %v1029_v59 = vsel %vm1028_vm0, %v7297_v47, %v1025_v56 }
 0x641   :  { %v1040_v0 = vmul.f32 %v1029_v59, %v7978_v57 }
 0x642   :  { %v1033_v58 = vmul.f32 0.5, %v1032_v22 }
 0x643   :  { %v1045_v3 = vmul.f32 %v7247_v63, %v1040_v0  ;;  %v7066_v0 = vld [vmem:[%s7678_s14 + $0x30] sm:$0xff] }
 0x644   :  { %v1034_v60 = vsub.f32 1.5, %v1033_v58 }
 0x646   :  { %v1035_v62 = vmul.f32 %v7299_v54, %v1034_v60  ;;  %v7063_v60 = vld [vmem:[%s7673_s8 + $0x38] sm:$0xff] }
 0x647   :  { %1310 = vmatpush.bf16.msrb.mxu0 %v7063_v60 }
 0x648   :  { %v1039_v1 = vsel %vm1038_vm4, %v7299_v54, %v1035_v62  ;;  %v7067_v62 = vld [vmem:[%s7678_s14 + $0x38] sm:$0xff] }
 0x649   :  { %v1041_v2 = vmul.f32 %v1039_v1, %v7984_v16  ;;  %1373 = vmatpush.bf16.msrb.mxu1 %v7067_v62  ;;  %v7070_v1 = vld [vmem:[%s7683_s19 + $0x30] sm:$0xff] }
 0x64b   :  { %v1046_v4 = vmul.f32 %v7247_v63, %v1041_v2  ;;  %v7071_v63 = vld [vmem:[%s7683_s19 + $0x38] sm:$0xff]  ;;  %v7061_v2 = vld [vmem:[%s7673_s8 + $0x28] sm:$0xff] }
 0x64c   :  { %1436 = vmatpush.bf16.msra.mxu2 %v7071_v63 }
 0x64d   :  { %v1047_v61 = vpack.c.bf16 %v1046_v4, %v1045_v3  ;;  %1374 = vmatpush.bf16.msrb.mxu1 %v7066_v0  ;;  %v7065_v3 = vld [vmem:[%s7678_s14 + $0x28] sm:$0xff]  ;;  %s9030_s14 = sld [smem:[#allocation9_spill]] }
 0x64e   :  { %v7069_v4 = vld [vmem:[%s7683_s19 + $0x28] sm:$0xff]  ;;  %s9031_s19 = sld [smem:[#allocation14_spill]] }
 0x64f   :  { %6147 = vmatmul.msk.bf16.vlgmr.msra.gmra.mxu1 %vm259_vm3, %v1047_v61  ;;  %6148 = vmatmul.msk.bf16.vlgmr.msrb.gmra.mxu2 %vm259_vm3, %v1047_v61 }
 0x650   :  { %1437 = vmatpush.bf16.msra.mxu2 %v7070_v1 }
 0x651   :  { %1375 = vmatpush.bf16.msrb.mxu1 %v7065_v3 }
 0x654   :  { %1438 = vmatpush.bf16.msra.mxu2 %v7069_v4 }
 0x655   :  { %1376 = vmatpush.bf16.msrb.mxu1 %v7064_v7 }
 0x658   :  { %1439 = vmatpush.bf16.msra.mxu2 %v7068_v9 }
 0x6cc   :  { %v1108_v18 = vpop.f32.mrf.mxu1 }
 0x6cd   :  { %v1127_v21 = vmul.f32 %v1108_v18, %v1108_v18 }
 0x6cf   :  { %v1129_v23 = vmul.f32 %v1127_v21, %v1108_v18 }
 0x6d1   :  { %v1131_v25 = vmul.f32 0.044715, %v1129_v23 }
 0x6d2   :  { %v1122_v42 = vpop.f32.mrf.mxu2 }
 0x6d3   :  { %v1133_v26 = vadd.f32 %v1131_v25, %v1108_v18 }
 0x6d4   :  { %v1110_v27 = vpop.f32.mrf.mxu1 }
 0x6d5   :  { %v1135_v29 = vmul.f32 0.7978846, %v1133_v26  ;;  %v1128_v30 = vmul.f32 %v1110_v27, %v1110_v27 }
 0x6d7   :  { %7300 = vtanh.f32 %v1135_v29  ;;  %v1130_v31 = vmul.f32 %v1128_v30, %v1110_v27 }
 0x6d9   :  { %v1132_v32 = vmul.f32 0.044715, %v1130_v31 }
 0x6da   :  { %v1124_v48 = vpop.f32.mrf.mxu2 }
 0x6db   :  { %v1134_v33 = vadd.f32 %v1132_v32, %v1110_v27 }
 0x6dd   :  { %v7301_v34 = vpop.eup %7300  ;;  %v1136_v36 = vmul.f32 0.7978846, %v1134_v33 }
 0x6de   :  { %v1139_v39 = vadd.f32 1.0, %v7301_v34 }
 0x6df   :  { %7302 = vtanh.f32 %v1136_v36 }
 0x6e0   :  { %v1141_v44 = vmul.f32 0.5, %v1139_v39  ;;  %v7248_v39 = vld [vmem:[%s7668_s3 + $0x1] ss:$0 sm:$0xff]  ;;  %s9028_s3 = sld [smem:[#allocation10_spill]] }
 0x6e2   :  { %v1143_v43 = vmul.f32 %v1141_v44, %v1108_v18 }
 0x6e4   :  { %v1145_v49 = vmul.f32 %v1143_v43, %v1122_v42 }
 0x6e5   :  { %v7303_v38 = vpop.eup %7302 }
 0x6e6   :  { %v1140_v28 = vadd.f32 1.0, %v7303_v38 }
 0x6e8   :  { %v1142_v46 = vmul.f32 0.5, %v1140_v28 }
 0x6ea   :  { %v1144_v47 = vmul.f32 %v1142_v46, %v1110_v27 }
 0x6ec   :  { %v1146_v50 = vmul.f32 %v1144_v47, %v1124_v48 }
 0x6ee   :  { %v1163_v45 = vpack.c.bf16 %v1146_v50, %v1145_v49 }
 0x6f0   :  { %1220 = vmatmul.bf16.vlgmr.msra.gmra.mxu3 %v1163_v45 }
 0x773   :  { %v1221_v52 = vpop.f32.mrf.mxu3 }
 0x774   :  { %v8021_v54 = vadd.f32 %v1221_v52, %v7978_v57 }
 0x776   :  { %v1230_v55 = vmul.f32 %v8021_v54, %v8021_v54 }
 0x778   :  { %v1232_v56 = vsel %vm259_vm3, %v1230_v55, 0.0 }
 0x779   :  { %1233 = vadd.xlane.f32.xlu2 %v1232_v56 }
 0x77b   :  { %v1223_v22 = vpop.f32.mrf.mxu3 }
 0x77c   :  { %v8027_v58 = vadd.f32 %v1223_v22, %v7984_v16  ;;  %v7062_v16 = vld [vmem:[%s7673_s8 + $0x30] sm:$0xff]  ;;  %s9029_s8 = sld [smem:[#allocation13_spill]] }
 0x77d   :  { %1311 = vmatpush.bf16.msrb.mxu0 %v7062_v16 }
 0x77e   :  { %v1231_v59 = vmul.f32 %v8027_v58, %v8027_v58 }
 0x780   :  { %v1235_v57 = vsel %vm259_vm3, %v1231_v59, 0.0 }
 0x781   :  { %1236 = vadd.xlane.f32.xlu1 %v1235_v57  ;;  %1312 = vmatpush.bf16.msrb.mxu0 %v7061_v2 }
 0x785   :  { %1313 = vmatpush.bf16.msrb.mxu0 %v7060_v6 }
 0x7ec   :  { %v1234_v61 = vpop.xlane.xlu2 %1233 }
 0x7ed   :  { %v1238_v10 = vmul.f32 %v1234_v61, %v7829_v37 }
 0x7ef   :  { %v1240_v11 = vadd.f32 1e-06, %v1238_v10 }
 0x7f1   :  { %7304 = vrsqrt.f32 %v1240_v11  ;;  %vm1248_vm6 = vweird.f32 %v1240_v11 }
 0x7f4   :  { %v1237_v19 = vpop.xlane.xlu1 %1236 }
 0x7f5   :  { %v1239_v12 = vmul.f32 %v1237_v19, %v7829_v37 }
 0x7f7   :  { %v7305_v17 = vpop.eup %7304  ;;  %v1241_v18 = vadd.f32 1e-06, %v1239_v12 }
 0x7f8   :  { %v1243_v21 = vmul.f32 %v7305_v17, %v1240_v11  ;;  %vm1249_vm5 = vweird.f32 %v7305_v17 }
 0x7f9   :  { %7306 = vrsqrt.f32 %v1241_v18  ;;  %vm1250_vm7 = vmor %vm1248_vm6, %vm1249_vm5  ;;  %vm1258_vm9 = vweird.f32 %v1241_v18 }
 0x7fa   :  { %v1244_v23 = vmul.f32 %v7305_v17, %v1243_v21 }
 0x7fc   :  { %v1245_v25 = vmul.f32 0.5, %v1244_v23 }
 0x7fe   :  { %v1246_v26 = vsub.f32 1.5, %v1245_v25 }
 0x7ff   :  { %v7307_v27 = vpop.eup %7306 }
 0x800   :  { %v1253_v29 = vmul.f32 %v7307_v27, %v1241_v18  ;;  %v1247_v30 = vmul.f32 %v7305_v17, %v1246_v26  ;;  %vm1259_vm8 = vweird.f32 %v7307_v27 }
 0x801   :  { %vm1260_vm10 = vmor %vm1258_vm9, %vm1259_vm8 }
 0x802   :  { %v1254_v31 = vmul.f32 %v7307_v27, %v1253_v29  ;;  %v1251_v33 = vsel %vm1250_vm7, %v7305_v17, %v1247_v30 }
 0x803   :  { %v1262_v42 = vmul.f32 %v1251_v33, %v8021_v54 }
 0x804   :  { %v1255_v32 = vmul.f32 0.5, %v1254_v31 }
 0x805   :  { %v1267_v28 = vmul.f32 %v7248_v39, %v1262_v42 }
 0x806   :  { %v1256_v34 = vsub.f32 1.5, %v1255_v32 }
 0x808   :  { %v1257_v36 = vmul.f32 %v7307_v27, %v1256_v34 }
 0x80a   :  { %v1261_v44 = vsel %vm1260_vm10, %v7307_v27, %v1257_v36 }
 0x80b   :  { %v1263_v38 = vmul.f32 %v1261_v44, %v8027_v58 }
 0x80d   :  { %v1268_v43 = vmul.f32 %v7248_v39, %v1263_v38 }
 0x80f   :  { %v1269_v46 = vpack.c.bf16 %v1268_v43, %v1267_v28 }
 0x811   :  { %6206 = vmatmul.msk.bf16.vlgmr.msrb.gmra.mxu0 %vm259_vm3, %v1269_v46  ;;  %6231 = vmatmul.msk.bf16.vlgmr.msrb.gmra.mxu1 %vm259_vm3, %v1269_v46 }
 0x812   :  { %6256 = vmatmul.msk.bf16.vlgmr.msra.gmra.mxu2 %vm259_vm3, %v1269_v46 }
 0x88e   :  { %v1315_v47 = vpop.f32.mrf.mxu0  ;;  %v1378_v48 = vpop.f32.mrf.mxu1 }
 0x88f   :  { %v1320_v49 = vpack.c.bf16 %v1315_v47, %v1315_v47  ;;  %v1383_v50 = vpack.c.bf16 %v1378_v48, %v1378_v48 }
 0x891   :  { %1387 = vrot.lane.b32.xlu2 %v1383_v50, %s7617_s0  ;;  %1324 = vrot.lane.b32.xlu0 %v1320_v49, %s7617_s0  ;;  %v1475_v45 = vsel %vm502_vm11, %v1383_v50, 0 }
 0x892   :  { %1484 = vmatpush.bf16.xpose.msra.mxu0 %v1475_v45 }
 0x895   :  { %v1441_v16 = vpop.f32.mrf.mxu2 }
 0x896   :  { %v1317_v52 = vpop.f32.mrf.mxu0  ;;  %v1380_v55 = vpop.f32.mrf.mxu1  ;;  %v8069_v0 = vpack.c.bf16 %v1441_v16, %v1441_v16 }
 0x897   :  { %v1321_v56 = vpack.c.bf16 %v1317_v52, %v1317_v52  ;;  %v1384_v22 = vpack.c.bf16 %v1380_v55, %v1380_v55 }
 0x898   :  { %v1723_v4 = vsel %vm755_vm12, %v8069_v0, 0 }
 0x899   :  { %1389 = vrot.lane.b32.xlu1 %v1384_v22, %s7617_s0  ;;  %1332 = vrot.lane.b32.xlu0 %v1320_v49, %s7618_s5  ;;  %v1494_v59 = vsel %vm502_vm11, %v1384_v22, 0 }
 0x89a   :  { %6265 = vmatmul.msk.bf16.vlgmr.msra.gmra.mxu0 %vm502_vm11, %v1320_v49  ;;  %1326 = vrot.lane.b32.xlu2 %v1321_v56, %s7617_s0 }
 0x89b   :  { %1503 = vmatpush.bf16.xpose.msra.mxu1 %v1494_v59 }
 0x89d   :  { %v1443_v10 = vpop.f32.mrf.mxu2 }
 0x89e   :  { %v8077_v11 = vpack.c.bf16 %v1443_v10, %v1443_v10 }
 0x8a0   :  { %v1742_v21 = vsel %vm755_vm12, %v8077_v11, 0 }
 0x8a1   :  { %1395 = vrot.lane.b32.xlu1 %v1383_v50, %s7618_s5  ;;  %1393 = vrot.lane.b32.xlu0 %v1384_v22, %s7619_s28 }
 0x8a2   :  { %1397 = vrot.lane.b32.xlu2 %v1384_v22, %s7618_s5  ;;  %6266 = vmatmul.msk.bf16.vlgmr.msra.gmra.mxu1 %vm502_vm11, %v1321_v56 }
 0x8a9   :  { %1334 = vrot.lane.b32.xlu1 %v1321_v56, %s7618_s5 }
 0x8aa   :  { %1391 = vrot.lane.b32.xlu2 %v1383_v50, %s7619_s28 }
 0x8b1   :  { %1328 = vrot.lane.b32.xlu1 %v1320_v49, %s7619_s28 }
 0x8b2   :  { %1330 = vrot.lane.b32.xlu2 %v1321_v56, %s7619_s28 }
 0x8eb   :  { %v1388_v57 = vpop.permute.xlu2 %1387 }
 0x8ec   :  { %v1513_v60 = vsel %vm502_vm11, %v1388_v57, 0 }
 0x8ed   :  { %1522 = vmatpush.bf16.xpose.msrb.mxu2 %v1513_v60 }
 0x8f4   :  { %v1327_v62 = vpop.permute.xlu2 %1326 }
 0x8fc   :  { %v1398_v63 = vpop.permute.xlu2 %1397 }
 0x8fd   :  { %v1608_v9 = vsel %vm502_vm11, %v1398_v63, 0 }
 0x903   :  { %v1325_v1 = vpop.permute.xlu0 %1324 }
 0x904   :  { %v1392_v2 = vpop.permute.xlu2 %1391  ;;  %6267 = vmatmul.msk.bf16.vlgmr.msrb.gmra.mxu2 %vm502_vm11, %v1325_v1 }
 0x905   :  { %v1551_v3 = vsel %vm502_vm11, %v1392_v2, 0 }
 0x906   :  { %1560 = vmatpush.bf16.xpose.msrb.mxu0 %v1551_v3 }
 0x90b   :  { %v1390_v61 = vpop.permute.xlu1 %1389  ;;  %v1333_v6 = vpop.permute.xlu0 %1332 }
 0x90c   :  { %v1532_v7 = vsel %vm502_vm11, %v1390_v61, 0  ;;  %v1331_v27 = vpop.permute.xlu2 %1330 }
 0x90d   :  { %1541 = vmatpush.bf16.xpose.msrb.mxu3 %v1532_v7 }
 0x90e   :  { %1732 = vmatpush.bf16.msra.mxu0 %v1723_v4 }
 0x913   :  { %v1396_v19 = vpop.permute.xlu1 %1395  ;;  %v1394_v12 = vpop.permute.xlu0 %1393 }
 0x914   :  { %v1589_v17 = vsel %vm502_vm11, %v1396_v19, 0  ;;  %v1570_v18 = vsel %vm502_vm11, %v1394_v12, 0  ;;  %6268 = vmatmul.msk.bf16.vlgmr.msrb.gmra.mxu3 %vm502_vm11, %v1327_v62 }
 0x915   :  { %1617 = vmatpush.bf16.xpose.msra.mxu3 %v1608_v9  ;;  %1579 = vmatpush.bf16.xpose.msrb.mxu1 %v1570_v18 }
 0x916   :  { %1598 = vmatpush.bf16.xpose.msra.mxu2 %v1589_v17 }
 0x917   :  { %v1486_v23 = vpop.f32.mrf.mxu0 }
 0x918   :  { %v1487_v25 = vadd.f32 %v1486_v23, %v7876_v40 }
 0x91a   :  { %v1623_v26 = vsel %vm655_vm13, %v1487_v25, -inf }
 0x91b   :  { %1624 = vmax.xlane.f32.xlu2 %v1623_v26  ;;  %v1335_v29 = vpop.permute.xlu1 %1334 }
 0x91c   :  { %6270 = vmatmul.msk.bf16.vlgmr.msrb.gmra.mxu1 %vm502_vm11, %v1331_v27 }
 0x91d   :  { %1751 = vmatpush.bf16.msra.mxu1 %v1742_v21  ;;  %6271 = vmatmul.msk.bf16.vlgmr.msra.gmra.mxu2 %vm502_vm11, %v1333_v6 }
 0x91f   :  { %v1488_v30 = vpop.f32.mrf.mxu0  ;;  %v1505_v31 = vpop.f32.mrf.mxu1 }
 0x920   :  { %v1506_v32 = vadd.f32 %v1505_v31, %v7889_v53 }
 0x922   :  { %v1626_v33 = vsel %vm655_vm13, %v1506_v32, -inf }
 0x923   :  { %1627 = vmax.xlane.f32.xlu0 %v1626_v33  ;;  %v1329_v34 = vpop.permute.xlu1 %1328 }
 0x924   :  { %6269 = vmatmul.msk.bf16.vlgmr.msrb.gmra.mxu0 %vm502_vm11, %v1329_v34  ;;  %6272 = vmatmul.msk.bf16.vlgmr.msra.gmra.mxu3 %vm502_vm11, %v1335_v29 }
 0x927   :  { %v1507_v40 = vpop.f32.mrf.mxu1 }
 0x987   :  { %v1524_v36 = vpop.f32.mrf.mxu2 }
 0x988   :  { %v1525_v39 = vadd.f32 %v1524_v36, %v7906_v14 }
 0x98a   :  { %v1629_v42 = vsel %vm655_vm13, %v1525_v39, -inf }
 0x98b   :  { %1630 = vmax.xlane.f32.xlu0 %v1629_v42 }
 0x98e   :  { %v1625_v53 = vpop.xlane.xlu2 %1624 }
 0x98f   :  { %v1526_v44 = vpop.f32.mrf.mxu2  ;;  %v1647_v49 = vsub.f32 %v1487_v25, %v1625_v53 }
 0x991   :  { %v1655_v45 = vmul.f32 1.442695, %v1647_v49 }
 0x996   :  { %v1628_v38 = vpop.xlane.xlu0 %1627 }
 0x997   :  { %v1648_v28 = vsub.f32 %v1506_v32, %v1628_v38  ;;  %v1543_v43 = vpop.f32.mrf.mxu3 }
 0x998   :  { %v1544_v55 = vadd.f32 %v1543_v43, %v7900_v8 }
 0x999   :  { %v1657_v46 = vmul.f32 1.442695, %v1648_v28  ;;  %v1581_v47 = vpop.f32.mrf.mxu1 }
 0x99a   :  { %v1582_v48 = vadd.f32 %v1581_v47, %v7933_v41  ;;  %v1632_v41 = vsel %vm655_vm13, %v1544_v55, -inf }
 0x99b   :  { %7308 = vpow2.f32 %v1657_v46 }
 0x99c   :  { %v1638_v50 = vsel %vm655_vm13, %v1582_v48, -inf  ;;  %7310 = vpow2.f32 %v1655_v45 }
 0x99d   :  { %1639 = vmax.xlane.f32.xlu1 %v1638_v50 }
 0x99f   :  { %v1545_v52 = vpop.f32.mrf.mxu3 }
 0x9a0   :  { %v1600_v14 = vpop.f32.mrf.mxu2 }
 0x9a1   :  { %v7309_v56 = vpop.eup %7308  ;;  %v1562_v22 = vpop.f32.mrf.mxu0  ;;  %v1601_v61 = vadd.f32 %v1600_v14, %v7915_v24 }
 0x9a2   :  { %v1583_v59 = vpop.f32.mrf.mxu1  ;;  %v8098_v57 = vadd.f32 %v1562_v22, %v7897_v5  ;;  %v1674_v60 = vsel %vm655_vm13, %v7309_v56, 0.0  ;;  %v7311_v1 = vpop.eup %7310 }
 0x9a3   :  { %1675 = vadd.xlane.f32.xlu2 %v1674_v60  ;;  %v1671_v3 = vsel %vm655_vm13, %v7311_v1, 0.0  ;;  %v1641_v6 = vsel %vm655_vm13, %v1601_v61, -inf }
 0x9a4   :  { %v1635_v62 = vsel %vm655_vm13, %v8098_v57, -inf }
 0x9a5   :  { %1633 = vmax.xlane.f32.xlu1 %v1632_v41  ;;  %1636 = vmax.xlane.f32.xlu0 %v1635_v62 }
 0x9a7   :  { %v1619_v16 = vpop.f32.mrf.mxu3 }
 0x9a8   :  { %v1602_v63 = vpop.f32.mrf.mxu2  ;;  %v1620_v8 = vadd.f32 %v1619_v16, %v7911_v20 }
 0x9a9   :  { %v1564_v2 = vpop.f32.mrf.mxu0  ;;  %v2237_v63 = vld [vmem:[%s7638_s9] sm:$0xff] }
 0x9aa   :  { %v1644_v5 = vsel %vm655_vm13, %v1620_v8, -inf }
 0x9ab   :  { %1645 = vmax.xlane.f32.xlu2 %v1644_v5 }
 0x9ad   :  { %1672 = vadd.xlane.f32.xlu1 %v1671_v3 }
 0x9af   :  { %v1621_v4 = vpop.f32.mrf.mxu3 }
 0x9b5   :  { %1642 = vmax.xlane.f32.xlu1 %v1641_v6 }
 0x9ce   :  { %1452 = vrot.lane.b32.xlu1 %v8077_v11, %s7617_s0 }
 0x9d6   :  { %1458 = vrot.lane.b32.xlu1 %v8069_v0, %s7618_s5 }
 0x9de   :  { %1454 = vrot.lane.b32.xlu1 %v8069_v0, %s7619_s28 }
 0x9e6   :  { %1456 = vrot.lane.b32.xlu1 %v8077_v11, %s7619_s28 }
 0x9fe   :  { %v1631_v20 = vpop.xlane.xlu0 %1630 }
 0x9ff   :  { %v1649_v7 = vsub.f32 %v1525_v39, %v1631_v20 }
 0xa01   :  { %v1659_v9 = vmul.f32 1.442695, %v1649_v7 }
 0xa03   :  { %7312 = vpow2.f32 %v1659_v9 }
 0xa09   :  { %v8117_v24 = vpop.eup %7312 }
 0xa0a   :  { %v1677_v10 = vsel %vm655_vm13, %v8117_v24, 0.0 }
 0xa0b   :  { %1678 = vadd.xlane.f32.xlu2 %v1677_v10 }
 0xa10   :  { %v1640_v19 = vpop.xlane.xlu1 %1639 }
 0xa11   :  { %v1652_v12 = vsub.f32 %v1582_v48, %v1640_v19 }
 0xa13   :  { %v1665_v17 = vmul.f32 1.442695, %v1652_v12 }
 0xa15   :  { %7314 = vpow2.f32 %v1665_v17 }
 0xa16   :  { %v1676_v18 = vpop.xlane.xlu2 %1675 }
 0xa17   :  { %7316 = vrcp.f32 %v1676_v18 }
 0xa18   :  { %v1634_v21 = vpop.xlane.xlu1 %1633  ;;  %v1637_v14 = vpop.xlane.xlu0 %1636 }
 0xa19   :  { %v1650_v23 = vsub.f32 %v1544_v55, %v1634_v21 }
 0xa1b   :  { %v7315_v25 = vpop.eup %7314  ;;  %v1661_v26 = vmul.f32 1.442695, %v1650_v23 }
 0xa1c   :  { %v1686_v27 = vsel %vm655_vm13, %v7315_v25, 0.0 }
 0xa1d   :  { %v7317_v29 = vpop.eup %7316  ;;  %7318 = vpow2.f32 %v1661_v26  ;;  %1687 = vadd.xlane.f32.xlu2 %v1686_v27 }
 0xa1e   :  { %v1704_v30 = vmul.f32 %v7317_v29, %v7309_v56  ;;  %v1646_v36 = vpop.xlane.xlu2 %1645  ;;  %v1651_v56 = vsub.f32 %v8098_v57, %v1637_v14  ;;  %v2238_v57 = vld [vmem:[%s7638_s9 + $0x8] sm:$0xff]  ;;  %s9024_s9 = sld [smem:[#allocation11_spill]] }
 0xa1f   :  { %v1654_v28 = vsub.f32 %v1620_v8, %v1646_v36  ;;  %v7072_v8 = vld [vmem:[%s7688_s24 + $0x20] sm:$0xff]  ;;  %v7093_v14 = vld [vmem:[%s7653_s21 + $0x8] sm:$0xff] }
 0xa20   :  { %v1712_v31 = vpack.c.bf16 %v1704_v30, %v1704_v30  ;;  %v1673_v32 = vpop.xlane.xlu1 %1672 }
 0xa21   :  { %7320 = vrcp.f32 %v1673_v32  ;;  %v1669_v53 = vmul.f32 1.442695, %v1654_v28  ;;  %v7075_v28 = vld [vmem:[%s7688_s24 + $0x38] sm:$0xff] }
 0xa22   :  { %6274 = vmatmul.msk.bf16.vlgmr.msra.gmra.mxu1 %vm655_vm13, %v1712_v31 }
 0xa23   :  { %v7319_v33 = vpop.eup %7318 }
 0xa24   :  { %v1680_v34 = vsel %vm655_vm13, %v7319_v33, 0.0 }
 0xa25   :  { %1681 = vadd.xlane.f32.xlu0 %v1680_v34 }
 0xa27   :  { %v7321_v40 = vpop.eup %7320 }
 0xa28   :  { %v1703_v39 = vmul.f32 %v7321_v40, %v7311_v1  ;;  %v1643_v42 = vpop.xlane.xlu1 %1642 }
 0xa29   :  { %v1653_v44 = vsub.f32 %v1601_v61, %v1643_v42 }
 0xa2a   :  { %v1711_v38 = vpack.c.bf16 %v1703_v39, %v1703_v39 }
 0xa2b   :  { %v1667_v43 = vmul.f32 1.442695, %v1653_v44 }
 0xa2c   :  { %6273 = vmatmul.msk.bf16.vlgmr.msra.gmra.mxu0 %vm655_vm13, %v1711_v38  ;;  %v7073_v38 = vld [vmem:[%s7688_s24 + $0x28] sm:$0xff] }
 0xa2d   :  { %7322 = vpow2.f32 %v1667_v43  ;;  %v7099_v43 = vld [vmem:[%s7653_s21 + $0x38] sm:$0xff] }
 0xa2e   :  { %7324 = vpow2.f32 %v1669_v53 }
 0xa33   :  { %v8125_v46 = vpop.eup %7322 }
 0xa34   :  { %v1689_v47 = vsel %vm655_vm13, %v8125_v46, 0.0  ;;  %v8129_v48 = vpop.eup %7324 }
 0xa35   :  { %1690 = vadd.xlane.f32.xlu2 %v1689_v47  ;;  %v1692_v49 = vsel %vm655_vm13, %v8129_v48, 0.0  ;;  %v7097_v47 = vld [vmem:[%s7653_s21 + $0x28] sm:$0xff] }
 0xa39   :  { %1450 = vrot.lane.b32.xlu0 %v8069_v0, %s7617_s0  ;;  %v1663_v0 = vmul.f32 1.442695, %v1651_v56  ;;  %v7092_v56 = vld [vmem:[%s7653_s21] sm:$0xff] }
 0xa3b   :  { %7326 = vpow2.f32 %v1663_v0 }
 0xa3d   :  { %1693 = vadd.xlane.f32.xlu2 %v1692_v49  ;;  %v7096_v49 = vld [vmem:[%s7653_s21 + $0x20] sm:$0xff] }
 0xa40   :  { %v1453_v50 = vpop.permute.xlu1 %1452 }
 0xa41   :  { %v1780_v45 = vsel %vm755_vm12, %v1453_v50, 0  ;;  %v7327_v41 = vpop.eup %7326  ;;  %v7095_v50 = vld [vmem:[%s7653_s21 + $0x18] sm:$0xff] }
 0xa42   :  { %1789 = vmatpush.bf16.msrb.mxu3 %v1780_v45  ;;  %v1683_v62 = vsel %vm655_vm13, %v7327_v41, 0.0 }
 0xa48   :  { %v1459_v52 = vpop.permute.xlu1 %1458 }
 0xa49   :  { %v1837_v23 = vsel %vm755_vm12, %v1459_v52, 0  ;;  %v7094_v52 = vld [vmem:[%s7653_s21 + $0x10] sm:$0xff] }
 0xa50   :  { %v1455_v55 = vpop.permute.xlu1 %1454 }
 0xa51   :  { %v1799_v22 = vsel %vm755_vm12, %v1455_v55, 0 }
 0xa52   :  { %1808 = vmatpush.bf16.msrb.mxu0 %v1799_v22 }
 0xa55   :  { %1460 = vrot.lane.b32.xlu2 %v8077_v11, %s7618_s5 }
 0xa56   :  { %1889 = vmatpush.bf16.msra.mxu0 %v7073_v38  ;;  %v7123_v38 = vld [vmem:[%s7723_s13 + $0x18] sm:$0xff] }
 0xa58   :  { %v1457_v59 = vpop.permute.xlu1 %1456 }
 0xa59   :  { %v1818_v60 = vsel %vm755_vm12, %v1457_v59, 0 }
 0xa5a   :  { %1827 = vmatpush.bf16.msrb.mxu1 %v1818_v60  ;;  %v7074_v60 = vld [vmem:[%s7688_s24 + $0x30] sm:$0xff]  ;;  %s9032_s24 = sld [smem:[#allocation16_spill]] }
 0xa5e   :  { %1912 = vmatpush.bf16.msra.mxu1 %v7072_v8 }
 0xa63   :  { %1684 = vadd.xlane.f32.xlu0 %v1683_v62 }
 0xa77   :  { %2240 = vperm.xlu0 %7243, %v2237_v63  }
 0xa7e   :  { %v1679_v16 = vpop.xlane.xlu2 %1678 }
 0xa7f   :  { %2243 = vperm.xlu0 %7243, %v2238_v57  }
 0xa90   :  { %v1688_v1 = vpop.xlane.xlu2 %1687 }
 0xa91   :  { %7328 = vrcp.f32 %v1688_v1 }
 0xa97   :  { %v7329_v2 = vpop.eup %7328 }
 0xa98   :  { %v1708_v11 = vmul.f32 %v7329_v2, %v7315_v25  ;;  %v1682_v5 = vpop.xlane.xlu0 %1681 }
 0xa99   :  { %7330 = vrcp.f32 %v1682_v5 }
 0xa9a   :  { %v1716_v3 = vpack.c.bf16 %v1708_v11, %v1708_v11  ;;  %7332 = vrcp.f32 %v1679_v16 }
 0xa9c   :  { %6278 = vmatmul.msk.bf16.vlgmr.msrb.gmra.mxu1 %vm655_vm13, %v1716_v3 }
 0xa9f   :  { %v7331_v4 = vpop.eup %7330  ;;  %v1753_v61 = vpop.f32.mrf.mxu1 }
 0xaa0   :  { %v1706_v6 = vmul.f32 %v7331_v4, %v7319_v33  ;;  %v7333_v7 = vpop.eup %7332 }
 0xaa1   :  { %v1705_v12 = vmul.f32 %v7333_v7, %v8117_v24 }
 0xaa2   :  { %v1714_v20 = vpack.c.bf16 %v1706_v6, %v1706_v6 }
 0xaa3   :  { %v1713_v25 = vpack.c.bf16 %v1705_v12, %v1705_v12 }
 0xaa4   :  { %6276 = vmatmul.msk.bf16.vlgmr.msrb.gmra.mxu3 %vm655_vm13, %v1714_v20 }
 0xaa7   :  { %v1755_v9 = vpop.f32.mrf.mxu1 }
 0xaa8   :  { %v1691_v10 = vpop.xlane.xlu2 %1690 }
 0xaa9   :  { %v1734_v19 = vpop.f32.mrf.mxu0  ;;  %7334 = vrcp.f32 %v1691_v10 }
 0xaaa   :  { %v1871_v17 = vpack.c.bf16 %v1753_v61, %v1734_v19 }
 0xaab   :  { %v1451_v18 = vpop.permute.xlu0 %1450 }
 0xaac   :  { %v1761_v21 = vsel %vm755_vm12, %v1451_v18, 0  ;;  %6290 = vmatmul.msk.bf16.vlgmr.msra.gmra.mxu1 %vm502_vm11, %v1871_v17 }
 0xaad   :  { %1770 = vmatpush.bf16.msrb.mxu2 %v1761_v21 }
 0xaaf   :  { %v7335_v29 = vpop.eup %7334 }
 0xab0   :  { %v1694_v26 = vpop.xlane.xlu2 %1693  ;;  %6275 = vmatmul.msk.bf16.vlgmr.msrb.gmra.mxu2 %vm655_vm13, %v1713_v25  ;;  %v1709_v33 = vmul.f32 %v7335_v29, %v8125_v46  ;;  %v7098_v46 = vld [vmem:[%s7653_s21 + $0x30] sm:$0xff]  ;;  %s9026_s21 = sld [smem:[#allocation18_spill]] }
 0xab1   :  { %1846 = vmatpush.bf16.msra.mxu2 %v1837_v23  ;;  %7336 = vrcp.f32 %v1694_v26  ;;  %v1736_v27 = vpop.f32.mrf.mxu0 }
 0xab2   :  { %v1717_v40 = vpack.c.bf16 %v1709_v33, %v1709_v33 }
 0xab5   :  { %1936 = vmatpush.bf16.msrb.mxu2 %v7074_v60 }
 0xab7   :  { %v7337_v30 = vpop.eup %7336 }
 0xab8   :  { %v1710_v24 = vmul.f32 %v7337_v30, %v8129_v48  ;;  %v1461_v31 = vpop.permute.xlu2 %1460 }
 0xab9   :  { %v1856_v32 = vsel %vm755_vm12, %v1461_v31, 0 }
 0xaba   :  { %v1718_v34 = vpack.c.bf16 %v1710_v24, %v1710_v24  ;;  %1865 = vmatpush.bf16.msra.mxu3 %v1856_v32 }
 0xabd   :  { %6280 = vmatmul.msk.bf16.vlgmr.msra.gmra.mxu3 %vm655_vm13, %v1718_v34 }
 0xabe   :  { %1962 = vmatpush.bf16.msrb.mxu3 %v7075_v28 }
 0xac0   :  { %6279 = vmatmul.msk.bf16.vlgmr.msra.gmra.mxu2 %vm655_vm13, %v1717_v40 }
 0xac2   :  { %2316 = vmatpush.bf16.msra.mxu3 %v7099_v43 }
 0xac6   :  { %2317 = vmatpush.bf16.msra.mxu3 %v7098_v46  ;;  %v7081_v46 = vld [vmem:[%s7698_s6 + $0x64] sm:$0xf0] }
 0xaca   :  { %2318 = vmatpush.bf16.msra.mxu3 %v7097_v47  ;;  %v7080_v47 = vld [vmem:[%s7698_s6 + $0x64] sm:$0xf] }
 0xace   :  { %2319 = vmatpush.bf16.msra.mxu3 %v7096_v49  ;;  %v6330_v49 = vld [vmem:[%s7698_s6 + $0x68] sm:$0xf0] }
 0xad2   :  { %2320 = vmatpush.bf16.msra.mxu3 %v7095_v50  ;;  %v7122_v50 = vld [vmem:[%s7723_s13 + $0x10] sm:$0xff] }
 0xad6   :  { %v1685_v36 = vpop.xlane.xlu0 %1684  ;;  %2321 = vmatpush.bf16.msra.mxu3 %v7094_v52  ;;  %v6333_v52 = vor.u32 %v7080_v47, %v6330_v49  ;;  %v7250_v47 = vld [vmem:[%s7693_s30 + $0x1] ss:$0 sm:$0xff]  ;;  %s9033_s30 = sld [smem:[#allocation15_spill]] }
 0xad7   :  { %7338 = vrcp.f32 %v1685_v36  ;;  %v6336_v36 = vld [vmem:[%s7698_s6 + $0x70] sm:$0xf] }
 0xada   :  { %2322 = vmatpush.bf16.msra.mxu3 %v7093_v14  ;;  %v6320_v14 = vld [vmem:[%s7698_s6 + $0x50] sm:$0xf] }
 0xadd   :  { %v7339_v39 = vpop.eup %7338 }
 0xade   :  { %v1707_v42 = vmul.f32 %v7339_v39, %v7327_v41  ;;  %2323 = vmatpush.bf16.msra.mxu3 %v7092_v56  ;;  %v7082_v39 = vld [vmem:[%s7698_s6 + $0x74] sm:$0xf] }
 0xadf   :  { %v7078_v56 = vld [vmem:[%s7698_s6 + $0x54] sm:$0xf] }
 0xae0   :  { %v1715_v44 = vpack.c.bf16 %v1707_v42, %v1707_v42 }
 0xae2   :  { %6277 = vmatmul.msk.bf16.vlgmr.msrb.gmra.mxu0 %vm655_vm13, %v1715_v44  ;;  %v6338_v44 = vld [vmem:[%s7698_s6 + $0x78] sm:$0xf0] }
 0xae3   :  { %v6341_v43 = vor.u32 %v7082_v39, %v6338_v44 }
 0xae5   :  { %2085 = vmatpush.bf16.msrb.mxu1 %v6341_v43 }
 0xae9   :  { %v2241_v57 = vpop.permute.xlu0 %2240  ;;  %2086 = vmatpush.bf16.msrb.mxu1 %v6333_v52 }
 0xaea   :  { %vm2245_vm15 = vcmp.eq.s32.totalorder %v7805_v13, %v2241_v57 }
 0xaf1   :  { %v2244_v1 = vpop.permute.xlu0 %2243 }
 0xaf2   :  { %vm2246_vm14 = vcmp.eq.s32.totalorder %v7805_v13, %v2244_v1  ;;  %v6314_v1 = vld [vmem:[%s7698_s6 + $0x48] sm:$0xf0] }
 0xaf3   :  { %vm6426_vm0 = vmpackc.low %vm2246_vm14, %vm2245_vm15 }
 0xb19   :  { %v1829_v53 = vpop.f32.mrf.mxu1 }
 0xb21   :  { %v1831_v48 = vpop.f32.mrf.mxu1 }
 0xb27   :  { %v1791_v45 = vpop.f32.mrf.mxu3 }
 0xb29   :  { %v1914_v9 = vpop.f32.mrf.mxu1 }
 0xb2f   :  { %v1793_v55 = vpop.f32.mrf.mxu3 }
 0xb30   :  { %v7079_v55 = vld [vmem:[%s7698_s6 + $0x54] sm:$0xf0] }
 0xb31   :  { %v1916_v21 = vpop.f32.mrf.mxu1 }
 0xb33   :  { %v1772_v22 = vpop.f32.mrf.mxu2 }
 0xb34   :  { %v1872_v0 = vpack.c.bf16 %v1791_v45, %v1772_v22  ;;  %v6321_v22 = vor.u32 %v7079_v55, %v6320_v14 }
 0xb36   :  { %6285 = vmatmul.msk.bf16.vlgmr.msra.gmra.mxu0 %vm502_vm11, %v1872_v0  ;;  %v6322_v0 = vld [vmem:[%s7698_s6 + $0x58] sm:$0xf0] }
 0xb37   :  { %v6325_v60 = vor.u32 %v7078_v56, %v6322_v0 }
 0xb39   :  { %2087 = vmatpush.bf16.msrb.mxu1 %v6325_v60 }
 0xb3b   :  { %v1774_v59 = vpop.f32.mrf.mxu2 }
 0xb3c   :  { %v7121_v59 = vld [vmem:[%s7723_s13 + $0x8] sm:$0xff] }
 0xb40   :  { %v1867_v41 = vpop.f32.mrf.mxu3 }
 0xb43   :  { %v1848_v62 = vpop.f32.mrf.mxu2 }
 0xb44   :  { %v1945_v63 = vpack.c.bf16 %v1867_v41, %v1848_v62  ;;  %v6312_v62 = vld [vmem:[%s7698_s6 + $0x40] sm:$0xf] }
 0xb46   :  { %6300 = vmatmul.msk.bf16.vlgmr.msrb.gmra.mxu3 %vm502_vm11, %v1945_v63  ;;  %v7077_v63 = vld [vmem:[%s7698_s6 + $0x44] sm:$0xf0] }
 0xb47   :  { %2726 = vmatpush.bf16.msrb.mxu3 %v7123_v38 }
 0xb48   :  { %v1869_v16 = vpop.f32.mrf.mxu3 }
 0xb49   :  { %v6313_v16 = vor.u32 %v7077_v63, %v6312_v62  ;;  %v7089_v63 = vld [vmem:[%s7703_s12 + $0x68] sm:$0xff] }
 0xb4b   :  { %v1850_v8 = vpop.f32.mrf.mxu2  ;;  %2727 = vmatpush.bf16.msrb.mxu3 %v7122_v50  ;;  %v7249_v50 = vld [vmem:[%s9024_s9] ss:$0 sm:$0xff] }
 0xb4c   :  { %v7076_v8 = vld [vmem:[%s7698_s6 + $0x44] sm:$0xf] }
 0xb4f   :  { %2728 = vmatpush.bf16.msrb.mxu3 %v7121_v59 }
 0xb56   :  { %6427 = vmatmul.msk.bf16.vlgmr.msra.gmra.mxu3 %vm6426_vm0, %v7615_v15 }
 0xb5f   :  { %v1810_v2 = vpop.f32.mrf.mxu0 }
 0xb60   :  { %v1919_v11 = vpack.c.bf16 %v1829_v53, %v1810_v2  ;;  %v6328_v53 = vld [vmem:[%s7698_s6 + $0x60] sm:$0xf] }
 0xb61   :  { %v6329_v48 = vor.u32 %v7081_v46, %v6328_v53  ;;  %v7120_v2 = vld [vmem:[%s7723_s13] sm:$0xff] }
 0xb62   :  { %6295 = vmatmul.msk.bf16.vlgmr.msrb.gmra.mxu2 %vm502_vm11, %v1919_v11  ;;  %v6317_v11 = vor.u32 %v7076_v8, %v6314_v1  ;;  %2729 = vmatpush.bf16.msrb.mxu3 %v7120_v2  ;;  %v7086_v8 = vld [vmem:[%s7703_s12 + $0x50] sm:$0xff]  ;;  %v7085_v1 = vld [vmem:[%s7703_s12 + $0x48] sm:$0xff]  ;;  %v7084_v2 = vld [vmem:[%s7703_s12 + $0x40] sm:$0xff] }
 0xb64   :  { %2088 = vmatpush.bf16.msrb.mxu1 %v6317_v11  ;;  %v7119_v11 = vld [vmem:[%s9025_s17 + $0x18] sm:$0xff] }
 0xb67   :  { %v1812_v5 = vpop.f32.mrf.mxu0 }
 0xbb3   :  { %v1891_v7 = vpop.f32.mrf.mxu0 }
 0xbb4   :  { %v1915_v10 = vadd.f32 %v1914_v9, %v1891_v7  ;;  %v7090_v9 = vld [vmem:[%s7703_s12 + $0x70] sm:$0xff] }
 0xbbb   :  { %v1893_v17 = vpop.f32.mrf.mxu0 }
 0xbbc   :  { %v1917_v23 = vadd.f32 %v1916_v21, %v1893_v17 }
 0xbc9   :  { %v1964_v3 = vpop.f32.mrf.mxu3 }
 0xbd1   :  { %v1966_v4 = vpop.f32.mrf.mxu3 }
 0xbd9   :  { %v8175_v61 = vpop.f32.mrf.mxu3 }
 0xbda   :  { %v2585_v6 = vmul.f32 %v8175_v61, %v8175_v61 }
 0xbdc   :  { %v2587_v20 = vsel %vm259_vm3, %v2585_v6, 0.0 }
 0xbdd   :  { %2588 = vadd.xlane.f32.xlu0 %v2587_v20 }
 0xbe1   :  { %v8186_v30 = vpop.f32.mrf.mxu3 }
 0xbe2   :  { %v2586_v31 = vmul.f32 %v8186_v30, %v8186_v30 }
 0xbe4   :  { %v2590_v34 = vsel %vm259_vm3, %v2586_v31, 0.0 }
 0xbe5   :  { %v1938_v19 = vpop.f32.mrf.mxu2 }
 0xbe6   :  { %v1943_v15 = vadd.f32 %v1938_v19, %v1915_v10 }
 0xbe8   :  { %v1969_v12 = vadd.f32 %v1964_v3, %v1943_v15 }
 0xbea   :  { %v8181_v18 = vadd.f32 %v1969_v12, %v8021_v54 }
 0xbec   :  { %v1975_v25 = vmul.f32 %v8181_v18, %v8181_v18 }
 0xbed   :  { %v1940_v26 = vpop.f32.mrf.mxu2 }
 0xbee   :  { %v1944_v27 = vadd.f32 %v1940_v26, %v1917_v23  ;;  %v1977_v29 = vsel %vm259_vm3, %v1975_v25, 0.0 }
 0xbef   :  { %1978 = vadd.xlane.f32.xlu1 %v1977_v29 }
 0xbf0   :  { %v1970_v24 = vadd.f32 %v1966_v4, %v1944_v27  ;;  %v7091_v4 = vld [vmem:[%s7703_s12 + $0x78] sm:$0xff] }
 0xbf1   :  { %2181 = vmatpush.bf16.msra.mxu2 %v7091_v4 }
 0xbf2   :  { %v8189_v54 = vadd.f32 %v1970_v24, %v8027_v58  ;;  %v7083_v58 = vld [vmem:[%s7698_s6 + $0x74] sm:$0xf0]  ;;  %s9034_s6 = sld [smem:[#allocation19_spill]] }
 0xbf3   :  { %v6337_v42 = vor.u32 %v7083_v58, %v6336_v36 }
 0xbf4   :  { %v1976_v32 = vmul.f32 %v8189_v54, %v8189_v54 }
 0xbf5   :  { %2071 = vmatpush.bf16.msrb.mxu0 %v6337_v42  ;;  %2182 = vmatpush.bf16.msra.mxu2 %v7090_v9 }
 0xbf6   :  { %v1980_v33 = vsel %vm259_vm3, %v1976_v32, 0.0 }
 0xbf7   :  { %1981 = vadd.xlane.f32.xlu2 %v1980_v33  ;;  %2591 = vadd.xlane.f32.xlu1 %v2590_v34 }
 0xbf9   :  { %2072 = vmatpush.bf16.msrb.mxu0 %v6329_v48  ;;  %2183 = vmatpush.bf16.msra.mxu2 %v7089_v63  ;;  %v7101_v63 = vld [vmem:[%s9027_s25 + $0x8] sm:$0xff] }
 0xbfd   :  { %2073 = vmatpush.bf16.msrb.mxu0 %v6321_v22 }
 0xc01   :  { %2074 = vmatpush.bf16.msrb.mxu0 %v6313_v16  ;;  %v7087_v16 = vld [vmem:[%s7703_s12 + $0x58] sm:$0xff] }
 0xc50   :  { %v2589_v40 = vpop.xlane.xlu0 %2588 }
 0xc51   :  { %v2593_v28 = vmul.f32 %v2589_v40, %v7829_v37 }
 0xc53   :  { %v8208_v45 = vadd.f32 1e-06, %v2593_v28 }
 0xc55   :  { %7340 = vrsqrt.f32 %v8208_v45  ;;  %vm2603_vm5 = vweird.f32 %v8208_v45 }
 0xc5b   :  { %v7341_v3 = vpop.eup %7340 }
 0xc5c   :  { %v2598_v6 = vmul.f32 %v7341_v3, %v8208_v45  ;;  %vm2604_vm2 = vweird.f32 %v7341_v3 }
 0xc5d   :  { %vm2605_vm7 = vmor %vm2603_vm5, %vm2604_vm2 }
 0xc5e   :  { %v2599_v12 = vmul.f32 %v7341_v3, %v2598_v6 }
 0xc60   :  { %v2600_v26 = vmul.f32 0.5, %v2599_v12 }
 0xc62   :  { %v1979_v41 = vpop.xlane.xlu1 %1978  ;;  %v2601_v31 = vsub.f32 1.5, %v2600_v26 }
 0xc63   :  { %v1983_v57 = vmul.f32 %v1979_v41, %v7829_v37 }
 0xc64   :  { %v2602_v58 = vmul.f32 %v7341_v3, %v2601_v31 }
 0xc65   :  { %v1985_v5 = vadd.f32 1e-06, %v1983_v57  ;;  %v7088_v57 = vld [vmem:[%s7703_s12 + $0x60] sm:$0xff]  ;;  %s9035_s12 = sld [smem:[#allocation21_spill]] }
 0xc66   :  { %v2606_v43 = vsel %vm2605_vm7, %v7341_v3, %v2602_v58  ;;  %2184 = vmatpush.bf16.msra.mxu2 %v7088_v57  ;;  %v7117_v3 = vld [vmem:[%s9025_s17 + $0x8] sm:$0xff]  ;;  %v7104_v57 = vld [vmem:[%s9026_s21] sm:$0xff] }
 0xc67   :  { %7342 = vrsqrt.f32 %v1985_v5  ;;  %vm1993_vm4 = vweird.f32 %v1985_v5  ;;  %v2617_v45 = vmul.f32 %v2606_v43, %v8175_v61 }
 0xc69   :  { %v2622_v59 = vmul.f32 %v7249_v50, %v2617_v45 }
 0xc6a   :  { %v1982_v20 = vpop.xlane.xlu2 %1981  ;;  %v2592_v7 = vpop.xlane.xlu1 %2591  ;;  %2185 = vmatpush.bf16.msra.mxu2 %v7087_v16  ;;  %v7115_v16 = vld [vmem:[%s9026_s21 + $0x38] sm:$0xff] }
 0xc6b   :  { %v1984_v10 = vmul.f32 %v1982_v20, %v7829_v37  ;;  %v2594_v19 = vmul.f32 %v2592_v7, %v7829_v37  ;;  %v7116_v20 = vld [vmem:[%s9025_s17] sm:$0xff] }
 0xc6d   :  { %v7343_v15 = vpop.eup %7342  ;;  %v1986_v17 = vadd.f32 1e-06, %v1984_v10  ;;  %v2596_v21 = vadd.f32 1e-06, %v2594_v19 }
 0xc6e   :  { %v1988_v23 = vmul.f32 %v7343_v15, %v1985_v5  ;;  %vm1994_vm1 = vweird.f32 %v7343_v15  ;;  %2186 = vmatpush.bf16.msra.mxu2 %v7086_v8  ;;  %v7118_v5 = vld [vmem:[%s9025_s17 + $0x10] sm:$0xff]  ;;  %v7100_v8 = vld [vmem:[%s9027_s25] sm:$0xff] }
 0xc6f   :  { %7344 = vrsqrt.f32 %v1986_v17  ;;  %vm1995_vm6 = vmor %vm1993_vm4, %vm1994_vm1  ;;  %vm2003_vm10 = vweird.f32 %v1986_v17  ;;  %vm2613_vm15 = vweird.f32 %v2596_v21 }
 0xc70   :  { %v1989_v25 = vmul.f32 %v7343_v15, %v1988_v23  ;;  %7346 = vrsqrt.f32 %v2596_v21 }
 0xc72   :  { %v1990_v27 = vmul.f32 0.5, %v1989_v25  ;;  %2187 = vmatpush.bf16.msra.mxu2 %v7085_v1  ;;  %v7111_v1 = vld [vmem:[%s9027_s25 + $0x38] sm:$0xff] }
 0xc74   :  { %v1991_v29 = vsub.f32 1.5, %v1990_v27 }
 0xc75   :  { %v7345_v24 = vpop.eup %7344 }
 0xc76   :  { %v7347_v32 = vpop.eup %7346  ;;  %v1998_v33 = vmul.f32 %v7345_v24, %v1986_v17  ;;  %v1992_v40 = vmul.f32 %v7343_v15, %v1991_v29  ;;  %vm2004_vm8 = vweird.f32 %v7345_v24  ;;  %2188 = vmatpush.bf16.msra.mxu2 %v7084_v2  ;;  %v7114_v2 = vld [vmem:[%s9026_s21 + $0x30] sm:$0xff] }
 0xc77   :  { %v2608_v34 = vmul.f32 %v7347_v32, %v2596_v21  ;;  %vm2614_vm9 = vweird.f32 %v7347_v32  ;;  %vm2005_vm14 = vmor %vm2003_vm10, %vm2004_vm8 }
 0xc78   :  { %v1999_v36 = vmul.f32 %v7345_v24, %v1998_v33  ;;  %v1996_v38 = vsel %vm1995_vm6, %v7343_v15, %v1992_v40  ;;  %vm2615_vm0 = vmor %vm2613_vm15, %vm2614_vm9 }
 0xc79   :  { %v2609_v39 = vmul.f32 %v7347_v32, %v2608_v34  ;;  %v2007_v48 = vmul.f32 %v1996_v38, %v8181_v18 }
 0xc7a   :  { %v2000_v42 = vmul.f32 0.5, %v1999_v36  ;;  %2664 = vmatpush.bf16.msrb.mxu2 %v7119_v11  ;;  %v7110_v11 = vld [vmem:[%s9027_s25 + $0x30] sm:$0xff] }
 0xc7b   :  { %v2610_v44 = vmul.f32 0.5, %v2609_v39  ;;  %v2012_v22 = vmul.f32 %v7250_v47, %v2007_v48 }
 0xc7c   :  { %v2001_v28 = vsub.f32 1.5, %v2000_v42 }
 0xc7d   :  { %v2611_v53 = vsub.f32 1.5, %v2610_v44 }
 0xc7e   :  { %v2002_v46 = vmul.f32 %v7345_v24, %v2001_v28  ;;  %2665 = vmatpush.bf16.msrb.mxu2 %v7118_v5  ;;  %v7113_v5 = vld [vmem:[%s9026_s21 + $0x28] sm:$0xff] }
 0xc7f   :  { %v2612_v49 = vmul.f32 %v7347_v32, %v2611_v53 }
 0xc80   :  { %v2006_v52 = vsel %vm2005_vm14, %v7345_v24, %v2002_v46 }
 0xc81   :  { %v2008_v14 = vmul.f32 %v2006_v52, %v8189_v54  ;;  %v2616_v55 = vsel %vm2615_vm0, %v7347_v32, %v2612_v49 }
 0xc82   :  { %v2618_v56 = vmul.f32 %v2616_v55, %v8186_v30  ;;  %2666 = vmatpush.bf16.msrb.mxu2 %v7117_v3 }
 0xc83   :  { %v2013_v0 = vmul.f32 %v7250_v47, %v2008_v14 }
 0xc84   :  { %v2623_v60 = vmul.f32 %v7249_v50, %v2618_v56 }
 0xc85   :  { %v2014_v41 = vpack.c.bf16 %v2013_v0, %v2012_v22  ;;  %v7107_v22 = vld [vmem:[%s9026_s21 + $0x18] sm:$0xff] }
 0xc86   :  { %v8234_v62 = vpack.c.bf16 %v2623_v60, %v2622_v59  ;;  %2667 = vmatpush.bf16.msrb.mxu2 %v7116_v20  ;;  %2432 = vmatpush.bf16.msra.mxu1 %v7107_v22  ;;  %v7103_v0 = vld [vmem:[%s9027_s25 + $0x18] sm:$0xff]  ;;  %v7106_v59 = vld [vmem:[%s9026_s21 + $0x10] sm:$0xff] }
 0xc87   :  { %6342 = vmatmul.msk.bf16.vlgmr.msrb.gmra.mxu0 %vm259_vm3, %v2014_v41  ;;  %6343 = vmatmul.msk.bf16.vlgmr.msrb.gmra.mxu1 %vm259_vm3, %v2014_v41  ;;  %v7102_v60 = vld [vmem:[%s9027_s25 + $0x10] sm:$0xff]  ;;  %v7105_v41 = vld [vmem:[%s9026_s21 + $0x8] sm:$0xff] }
 0xc88   :  { %6545 = vmatmul.msk.bf16.vlgmr.msrb.gmra.mxu3 %vm259_vm3, %v8234_v62  ;;  %2370 = vmatpush.bf16.msra.mxu0 %v7103_v0 }
 0xc8a   :  { %2433 = vmatpush.bf16.msra.mxu1 %v7106_v59 }
 0xc8c   :  { %2371 = vmatpush.bf16.msra.mxu0 %v7102_v60  ;;  %v7125_v60 = vld [vmem:[%s9029_s8 + $0x8] sm:$0xff] }
 0xc8e   :  { %2434 = vmatpush.bf16.msra.mxu1 %v7105_v41 }
 0xc90   :  { %2372 = vmatpush.bf16.msra.mxu0 %v7101_v63 }
 0xc92   :  { %2435 = vmatpush.bf16.msra.mxu1 %v7104_v57 }
 0xc94   :  { %2373 = vmatpush.bf16.msra.mxu0 %v7100_v8 }
 0xc96   :  { %2558 = vmatpush.bf16.msrb.mxu1 %v7115_v16 }
 0xc98   :  { %2495 = vmatpush.bf16.msrb.mxu0 %v7111_v1 }
 0xc9a   :  { %2559 = vmatpush.bf16.msrb.mxu1 %v7114_v2 }
 0xc9c   :  { %2496 = vmatpush.bf16.msrb.mxu0 %v7110_v11 }
 0xc9e   :  { %2560 = vmatpush.bf16.msrb.mxu1 %v7113_v5 }
 0xd04   :  { %v2076_v4 = vpop.f32.mrf.mxu0  ;;  %v2090_v32 = vpop.f32.mrf.mxu1 }
 0xd05   :  { %v2095_v6 = vmul.f32 %v2076_v4, %v2076_v4 }
 0xd07   :  { %v2097_v7 = vmul.f32 %v2095_v6, %v2076_v4  ;;  %v7109_v6 = vld [vmem:[%s9027_s25 + $0x28] sm:$0xff] }
 0xd08   :  { %2497 = vmatpush.bf16.msrb.mxu0 %v7109_v6 }
 0xd09   :  { %v2099_v9 = vmul.f32 0.044715, %v2097_v7  ;;  %v7112_v7 = vld [vmem:[%s9026_s21 + $0x20] sm:$0xff] }
 0xd0a   :  { %2561 = vmatpush.bf16.msrb.mxu1 %v7112_v7 }
 0xd0b   :  { %v2101_v10 = vadd.f32 %v2099_v9, %v2076_v4  ;;  %v2731_v19 = vpop.f32.mrf.mxu3  ;;  %v7108_v9 = vld [vmem:[%s9027_s25 + $0x20] sm:$0xff] }
 0xd0c   :  { %v2078_v15 = vpop.f32.mrf.mxu0  ;;  %v2092_v42 = vpop.f32.mrf.mxu1  ;;  %v8268_v56 = vpack.c.bf16 %v2731_v19, %v2731_v19  ;;  %2498 = vmatpush.bf16.msrb.mxu0 %v7108_v9 }
 0xd0d   :  { %v2103_v12 = vmul.f32 0.7978846, %v2101_v10  ;;  %v2096_v17 = vmul.f32 %v2078_v15, %v2078_v15 }
 0xd0f   :  { %7348 = vtanh.f32 %v2103_v12  ;;  %v2098_v21 = vmul.f32 %v2096_v17, %v2078_v15 }
 0xd11   :  { %v2100_v23 = vmul.f32 0.044715, %v2098_v21 }
 0xd13   :  { %v2102_v25 = vadd.f32 %v2100_v23, %v2078_v15  ;;  %v2733_v26 = vpop.f32.mrf.mxu3 }
 0xd14   :  { %v2737_v27 = vpack.c.bf16 %v2733_v26, %v2733_v26 }
 0xd15   :  { %v7349_v29 = vpop.eup %7348  ;;  %v2104_v24 = vmul.f32 0.7978846, %v2102_v25 }
 0xd16   :  { %2742 = vrot.lane.b32.xlu0 %v2737_v27, %s7617_s0  ;;  %v2107_v31 = vadd.f32 1.0, %v7349_v29  ;;  %v2845_v43 = vsel %vm502_vm11, %v2737_v27, 0 }
 0xd17   :  { %7350 = vtanh.f32 %v2104_v24 }
 0xd18   :  { %v2109_v33 = vmul.f32 0.5, %v2107_v31 }
 0xd1a   :  { %v2111_v36 = vmul.f32 %v2109_v33, %v2076_v4 }
 0xd1c   :  { %v2113_v44 = vmul.f32 %v2111_v36, %v2090_v32 }
 0xd1d   :  { %v7351_v34 = vpop.eup %7350 }
 0xd1e   :  { %v2108_v40 = vadd.f32 1.0, %v7351_v34  ;;  %2750 = vrot.lane.b32.xlu0 %v2737_v27, %s7618_s5 }
 0xd20   :  { %v2110_v58 = vmul.f32 0.5, %v2108_v40 }
 0xd22   :  { %v2112_v39 = vmul.f32 %v2110_v58, %v2078_v15 }
 0xd24   :  { %v2114_v38 = vmul.f32 %v2112_v39, %v2092_v42 }
 0xd26   :  { %v2132_v28 = vpack.c.bf16 %v2114_v38, %v2113_v44  ;;  %v7251_v44 = vld [vmem:[%s9028_s3] ss:$0 sm:$0xff] }
 0xd28   :  { %2189 = vmatmul.bf16.vlgmr.msra.gmra.mxu2 %v2132_v28 }
 0xd29   :  { %2854 = vmatpush.bf16.xpose.msra.mxu2 %v2845_v43 }
 0xd38   :  { %6528 = vmatmul.msk.bf16.vlgmr.msrb.gmra.mxu2 %vm259_vm3, %v8234_v62 }
 0xd88   :  { %v2743_v57 = vpop.permute.xlu0 %2742 }
 0xd89   :  { %v2883_v8 = vsel %vm502_vm11, %v2743_v57, 0 }
 0xd90   :  { %v2751_v2 = vpop.permute.xlu0 %2750 }
 0xd91   :  { %v2959_v11 = vsel %vm502_vm11, %v2751_v2, 0 }
 0xdab   :  { %v2190_v53 = vpop.f32.mrf.mxu2 }
 0xdac   :  { %v8256_v46 = vadd.f32 %v2190_v53, %v8181_v18 }
 0xdae   :  { %v2198_v47 = vmul.f32 %v8256_v46, %v8256_v46 }
 0xdb0   :  { %v2200_v48 = vsel %vm259_vm3, %v2198_v47, 0.0 }
 0xdb1   :  { %2201 = vadd.xlane.f32.xlu2 %v2200_v48 }
 0xdb3   :  { %v2192_v49 = vpop.f32.mrf.mxu2 }
 0xdb4   :  { %v8262_v50 = vadd.f32 %v2192_v49, %v8189_v54  ;;  %v7127_v49 = vld [vmem:[%s9029_s8 + $0x18] sm:$0xff] }
 0xdb6   :  { %v2199_v45 = vmul.f32 %v8262_v50, %v8262_v50 }
 0xdb8   :  { %v2203_v52 = vsel %vm259_vm3, %v2199_v45, 0.0 }
 0xdb9   :  { %2204 = vadd.xlane.f32.xlu1 %v2203_v52  ;;  %v8315_v52 = vld [vmem:[%s9030_s14] sm:$0xff] }
 0xdbb   :  { %v2669_v14 = vpop.f32.mrf.mxu2 }
 0xdbc   :  { %v8272_v54 = vpack.c.bf16 %v2669_v14, %v2669_v14 }
 0xdc3   :  { %v2671_v18 = vpop.f32.mrf.mxu2 }
 0xdc4   :  { %v2675_v55 = vpack.c.bf16 %v2671_v18, %v2671_v18 }
 0xdc6   :  { %6564 = vmatmul.msk.bf16.vlgmr.msra.gmra.mxu2 %vm502_vm11, %v2675_v55 }
 0xdc9   :  { %2740 = vrot.lane.b32.xlu2 %v8268_v56, %s7617_s0 }
 0xdd1   :  { %2746 = vrot.lane.b32.xlu2 %v2737_v27, %s7619_s28 }
 0xdd2   :  { %2678 = vrot.lane.b32.xlu1 %v8272_v54, %s7617_s0 }
 0xdd9   :  { %2684 = vrot.lane.b32.xlu2 %v2675_v55, %s7619_s28 }
 0xdda   :  { %2748 = vrot.lane.b32.xlu1 %v8268_v56, %s7618_s5 }
 0xde1   :  { %2680 = vrot.lane.b32.xlu2 %v2675_v55, %s7617_s0 }
 0xde2   :  { %2744 = vrot.lane.b32.xlu1 %v8268_v56, %s7619_s28 }
 0xde9   :  { %2686 = vrot.lane.b32.xlu2 %v8272_v54, %s7618_s5 }
 0xdea   :  { %2682 = vrot.lane.b32.xlu1 %v8272_v54, %s7619_s28 }
 0xdf1   :  { %2688 = vrot.lane.b32.xlu2 %v2675_v55, %s7618_s5  ;;  %v7126_v55 = vld [vmem:[%s9029_s8 + $0x10] sm:$0xff] }
 0xe24   :  { %v2202_v3 = vpop.xlane.xlu2 %2201 }
 0xe25   :  { %v2206_v4 = vmul.f32 %v2202_v3, %v7829_v37 }
 0xe27   :  { %v2208_v20 = vadd.f32 1e-06, %v2206_v4  ;;  %v159_v4 = vld [vmem:[%s9030_s14 + $0x10] sm:$0xff] }
 0xe29   :  { %7352 = vrsqrt.f32 %v2208_v20  ;;  %vm2216_vm2 = vweird.f32 %v2208_v20 }
 0xe2c   :  { %v2741_v10 = vpop.permute.xlu2 %2740  ;;  %v2205_v19 = vpop.xlane.xlu1 %2204 }
 0xe2d   :  { %v2864_v15 = vsel %vm502_vm11, %v2741_v10, 0  ;;  %v2207_v12 = vmul.f32 %v2205_v19, %v7829_v37 }
 0xe2e   :  { %2873 = vmatpush.bf16.xpose.msra.mxu3 %v2864_v15  ;;  %v158_v15 = vld [vmem:[%s9030_s14 + $0x8] sm:$0xff] }
 0xe2f   :  { %v7353_v17 = vpop.eup %7352  ;;  %v2209_v21 = vadd.f32 1e-06, %v2207_v12 }
 0xe30   :  { %v2211_v23 = vmul.f32 %v7353_v17, %v2208_v20  ;;  %vm2217_vm1 = vweird.f32 %v7353_v17 }
 0xe31   :  { %7354 = vrsqrt.f32 %v2209_v21  ;;  %vm2218_vm4 = vmor %vm2216_vm2, %vm2217_vm1  ;;  %vm2226_vm6 = vweird.f32 %v2209_v21 }
 0xe32   :  { %v2212_v25 = vmul.f32 %v7353_v17, %v2211_v23 }
 0xe34   :  { %v2213_v26 = vmul.f32 0.5, %v2212_v25  ;;  %v2747_v27 = vpop.permute.xlu2 %2746 }
 0xe35   :  { %v2921_v29 = vsel %vm502_vm11, %v2747_v27, 0 }
 0xe36   :  { %v2214_v24 = vsub.f32 1.5, %v2213_v26  ;;  %2930 = vmatpush.bf16.xpose.msrb.mxu2 %v2921_v29 }
 0xe37   :  { %v7355_v31 = vpop.eup %7354 }
 0xe38   :  { %v2221_v32 = vmul.f32 %v7355_v31, %v2209_v21  ;;  %v2215_v33 = vmul.f32 %v7353_v17, %v2214_v24  ;;  %vm2227_vm5 = vweird.f32 %v7355_v31 }
 0xe39   :  { %vm2228_vm7 = vmor %vm2226_vm6, %vm2227_vm5 }
 0xe3a   :  { %v2222_v34 = vmul.f32 %v7355_v31, %v2221_v32  ;;  %v2219_v58 = vsel %vm2218_vm4, %v7353_v17, %v2215_v33  ;;  %v160_v33 = vld [vmem:[%s9030_s14 + $0x18] sm:$0xff] }
 0xe3b   :  { %v2230_v38 = vmul.f32 %v2219_v58, %v8256_v46  ;;  %v2826_v46 = vsel %vm502_vm11, %v8268_v56, 0  ;;  %v7124_v56 = vld [vmem:[%s9029_s8] sm:$0xff] }
 0xe3c   :  { %v2223_v40 = vmul.f32 0.5, %v2222_v34  ;;  %v2685_v36 = vpop.permute.xlu2 %2684 }
 0xe3d   :  { %6568 = vmatmul.msk.bf16.vlgmr.msrb.gmra.mxu2 %vm502_vm11, %v2685_v36  ;;  %v2235_v47 = vmul.f32 %v7251_v44, %v2230_v38 }
 0xe3e   :  { %v2224_v39 = vsub.f32 1.5, %v2223_v40 }
 0xe40   :  { %v2225_v42 = vmul.f32 %v7355_v31, %v2224_v39 }
 0xe42   :  { %v2229_v28 = vsel %vm2228_vm7, %v7355_v31, %v2225_v42 }
 0xe43   :  { %v2231_v43 = vmul.f32 %v2229_v28, %v8262_v50 }
 0xe44   :  { %v2679_v53 = vpop.permute.xlu1 %2678  ;;  %v2681_v14 = vpop.permute.xlu2 %2680 }
 0xe45   :  { %v2236_v48 = vmul.f32 %v7251_v44, %v2231_v43  ;;  %6565 = vmatmul.msk.bf16.vlgmr.msra.gmra.mxu3 %vm502_vm11, %v2679_v53 }
 0xe47   :  { %v2330_v45 = vpack.c.bf16 %v2236_v48, %v2235_v47 }
 0xe49   :  { %6444 = vmatmul.msk.bf16.vlgmr.msra.gmra.mxu0 %vm259_vm3, %v2330_v45  ;;  %6461 = vmatmul.msk.bf16.vlgmr.msra.gmra.mxu1 %vm259_vm3, %v2330_v45  ;;  %v2856_v50 = vpop.f32.mrf.mxu2 }
 0xe4a   :  { %2835 = vmatpush.bf16.xpose.msra.mxu1 %v2826_v46  ;;  %v2857_v18 = vadd.f32 %v2856_v50, %v8315_v52  ;;  %2788 = vmatpush.bf16.msra.mxu0 %v7127_v49 }
 0xe4c   :  { %v2749_v22 = vpop.permute.xlu1 %2748  ;;  %v2977_v0 = vsel %vm655_vm13, %v2857_v18, -inf  ;;  %v2687_v63 = vpop.permute.xlu2 %2686 }
 0xe4d   :  { %v2940_v59 = vsel %vm502_vm11, %v2749_v22, 0  ;;  %2978 = vmax.xlane.f32.xlu1 %v2977_v0 }
 0xe4e   :  { %2949 = vmatpush.bf16.xpose.msrb.mxu3 %v2940_v59  ;;  %2789 = vmatpush.bf16.msra.mxu0 %v7126_v55 }
 0xe51   :  { %v2858_v41 = vpop.f32.mrf.mxu2 }
 0xe52   :  { %2790 = vmatpush.bf16.msra.mxu0 %v7125_v60 }
 0xe54   :  { %v2745_v16 = vpop.permute.xlu1 %2744  ;;  %v2689_v3 = vpop.permute.xlu2 %2688 }
 0xe55   :  { %6569 = vmatmul.msk.bf16.vlgmr.msrb.gmra.mxu3 %vm502_vm11, %v2687_v63  ;;  %v2902_v1 = vsel %vm502_vm11, %v2745_v16, 0 }
 0xe56   :  { %2791 = vmatpush.bf16.msra.mxu0 %v7124_v56 }
 0xe59   :  { %6486 = vmatmul.msk.bf16.vlgmr.msrb.gmra.mxu0 %vm259_vm3, %v2330_v45  ;;  %6511 = vmatmul.msk.bf16.vlgmr.msrb.gmra.mxu1 %vm259_vm3, %v2330_v45 }
 0xe5a   :  { %2892 = vmatpush.bf16.xpose.msrb.mxu0 %v2883_v8  ;;  %2911 = vmatpush.bf16.xpose.msrb.mxu1 %v2902_v1 }
 0xe5c   :  { %v2683_v5 = vpop.permute.xlu1 %2682 }
 0xe69   :  { %6562 = vmatmul.msk.bf16.vlgmr.msra.gmra.mxu0 %vm259_vm3, %v8234_v62  ;;  %6563 = vmatmul.msk.bf16.vlgmr.msra.gmra.mxu1 %vm502_vm11, %v8272_v54 }
 0xe6a   :  { %2968 = vmatpush.bf16.xpose.msra.mxu0 %v2959_v11 }
 0xe79   :  { %6566 = vmatmul.msk.bf16.vlgmr.msrb.gmra.mxu0 %vm502_vm11, %v2681_v14  ;;  %6567 = vmatmul.msk.bf16.vlgmr.msrb.gmra.mxu1 %vm502_vm11, %v2683_v5 }
 0xe89   :  { %6570 = vmatmul.msk.bf16.vlgmr.msra.gmra.mxu0 %vm502_vm11, %v2689_v3 }
 0xec0   :  { %v2932_v6 = vpop.f32.mrf.mxu2  ;;  %v2979_v20 = vpop.xlane.xlu1 %2978 }
 0xec1   :  { %v8341_v7 = vadd.f32 %v2932_v6, %v159_v4  ;;  %v2999_v9 = vsub.f32 %v2857_v18, %v2979_v20 }
 0xec3   :  { %v2989_v62 = vsel %vm655_vm13, %v8341_v7, -inf  ;;  %v3008_v54 = vmul.f32 1.442695, %v2999_v9 }
 0xec4   :  { %2990 = vmax.xlane.f32.xlu0 %v2989_v62 }
 0xec5   :  { %7356 = vpow2.f32 %v3008_v54 }
 0xec6   :  { %v8345_v10 = vpop.f32.mrf.mxu0  ;;  %v8347_v19 = vpop.f32.mrf.mxu1 }
 0xec8   :  { %v2875_v12 = vpop.f32.mrf.mxu3  ;;  %v2934_v17 = vpop.f32.mrf.mxu2 }
 0xec9   :  { %v2876_v21 = vadd.f32 %v2875_v12, %v158_v15 }
 0xecb   :  { %v2980_v23 = vsel %vm655_vm13, %v2876_v21, -inf  ;;  %v7357_v27 = vpop.eup %7356 }
 0xecc   :  { %2981 = vmax.xlane.f32.xlu2 %v2980_v23  ;;  %v3025_v24 = vsel %vm655_vm13, %v7357_v27, 0.0 }
 0xece   :  { %v8351_v25 = vpop.f32.mrf.mxu0  ;;  %v8353_v26 = vpop.f32.mrf.mxu1 }
 0xed0   :  { %v2877_v29 = vpop.f32.mrf.mxu3 }
 0xed4   :  { %3026 = vadd.xlane.f32.xlu2 %v3025_v24 }
 0xed6   :  { %v8356_v31 = vpop.f32.mrf.mxu0  ;;  %v8358_v32 = vpop.f32.mrf.mxu1 }
 0xed8   :  { %v2951_v34 = vpop.f32.mrf.mxu3 }
 0xed9   :  { %v8361_v40 = vadd.f32 %v2951_v34, %v160_v33 }
 0xedb   :  { %v2992_v36 = vsel %vm655_vm13, %v8361_v40, -inf }
 0xedc   :  { %2993 = vmax.xlane.f32.xlu1 %v2992_v36 }
 0xede   :  { %v8365_v58 = vpop.f32.mrf.mxu0  ;;  %v8367_v39 = vpop.f32.mrf.mxu1 }
 0xee0   :  { %v2953_v42 = vpop.f32.mrf.mxu3 }
 0xee6   :  { %v2793_v44 = vpop.f32.mrf.mxu0  ;;  %v2837_v38 = vpop.f32.mrf.mxu1 }
 0xee7   :  { %v8369_v28 = vpack.c.bf16 %v2793_v44, %v2793_v44  ;;  %v2838_v43 = vadd.f32 %v2837_v38, %v8315_v52 }
 0xee9   :  { %v2974_v53 = vsel %vm655_vm13, %v2838_v43, -inf  ;;  %v3074_v47 = vsel %vm755_vm12, %v8369_v28, 0 }
 0xeea   :  { %2975 = vmax.xlane.f32.xlu0 %v2974_v53  ;;  %3083 = vmatpush.bf16.msra.mxu1 %v3074_v47 }
 0xeee   :  { %v2795_v48 = vpop.f32.mrf.mxu0  ;;  %v2839_v49 = vpop.f32.mrf.mxu1 }
 0xeef   :  { %v8375_v45 = vpack.c.bf16 %v2795_v48, %v2795_v48 }
 0xef1   :  { %v3093_v46 = vsel %vm755_vm12, %v8375_v45, 0 }
 0xef2   :  { %3102 = vmatpush.bf16.msra.mxu2 %v3093_v46 }
 0xef6   :  { %v2894_v50 = vpop.f32.mrf.mxu0  ;;  %v2913_v14 = vpop.f32.mrf.mxu1 }
 0xef7   :  { %v2895_v18 = vadd.f32 %v2894_v50, %v158_v15  ;;  %v2914_v55 = vadd.f32 %v2913_v14, %v159_v4 }
 0xef9   :  { %v2983_v52 = vsel %vm655_vm13, %v2895_v18, -inf  ;;  %v2986_v22 = vsel %vm655_vm13, %v2914_v55, -inf }
 0xefa   :  { %2984 = vmax.xlane.f32.xlu1 %v2983_v52  ;;  %2987 = vmax.xlane.f32.xlu2 %v2986_v22 }
 0xefe   :  { %v2896_v0 = vpop.f32.mrf.mxu0  ;;  %v2915_v59 = vpop.f32.mrf.mxu1 }
 0xeff   :  { %v8421_v59 = vpack.c.bf16 %v8351_v25, %v8351_v25 }
 0xf06   :  { %v2970_v60 = vpop.f32.mrf.mxu0 }
 0xf07   :  { %v2971_v41 = vadd.f32 %v2970_v60, %v160_v33 }
 0xf09   :  { %v2995_v56 = vsel %vm655_vm13, %v2971_v41, -inf }
 0xf0a   :  { %2996 = vmax.xlane.f32.xlu0 %v2995_v56 }
 0xf0e   :  { %v2972_v63 = vpop.f32.mrf.mxu0 }
 0xf0f   :  { %v7128_v63 = vld [vmem:[%s9031_s19] sm:$0xff] }
 0xf12   :  { %2804 = vrot.lane.b32.xlu2 %v8375_v45, %s7617_s0 }
 0xf1a   :  { %2806 = vrot.lane.b32.xlu2 %v8369_v28, %s7619_s28 }
 0xf37   :  { %v2991_v57 = vpop.xlane.xlu0 %2990 }
 0xf38   :  { %v3003_v1 = vsub.f32 %v8341_v7, %v2991_v57  ;;  %v8434_v57 = vpack.c.bf16 %v8345_v10, %v8345_v10 }
 0xf3a   :  { %v3016_v11 = vmul.f32 1.442695, %v3003_v1 }
 0xf3f   :  { %v2982_v16 = vpop.xlane.xlu2 %2981 }
 0xf40   :  { %v3000_v8 = vsub.f32 %v2876_v21, %v2982_v16 }
 0xf42   :  { %v3010_v2 = vmul.f32 1.442695, %v3000_v8 }
 0xf44   :  { %7358 = vpow2.f32 %v3010_v2 }
 0xf47   :  { %v3027_v5 = vpop.xlane.xlu2 %3026 }
 0xf48   :  { %7360 = vrcp.f32 %v3027_v5 }
 0xf49   :  { %7362 = vpow2.f32 %v3016_v11  ;;  %v3442_v11 = vsel %vm502_vm11, %v8434_v57, 0 }
 0xf4a   :  { %v8387_v3 = vpop.eup %7358 }
 0xf4b   :  { %v3028_v4 = vsel %vm655_vm13, %v8387_v3, 0.0 }
 0xf4c   :  { %3029 = vadd.xlane.f32.xlu0 %v3028_v4 }
 0xf4e   :  { %v7361_v6 = vpop.eup %7360 }
 0xf4f   :  { %v3055_v20 = vmul.f32 %v7361_v6, %v7357_v27  ;;  %v7363_v9 = vpop.eup %7362  ;;  %v2994_v17 = vpop.xlane.xlu1 %2993 }
 0xf50   :  { %v3037_v7 = vsel %vm655_vm13, %v7363_v9, 0.0  ;;  %v3004_v52 = vsub.f32 %v8361_v40, %v2994_v17 }
 0xf51   :  { %v3063_v62 = vpack.c.bf16 %v3055_v20, %v3055_v20 }
 0xf52   :  { %v3018_v22 = vmul.f32 1.442695, %v3004_v52  ;;  %v7132_v52 = vld [vmem:[%s9032_s24] sm:$0xff] }
 0xf53   :  { %6572 = vmatmul.msk.bf16.vlgmr.msra.gmra.mxu2 %vm655_vm13, %v3063_v62 }
 0xf54   :  { %3038 = vadd.xlane.f32.xlu0 %v3037_v7 }
 0xf5d   :  { %v2976_v54 = vpop.xlane.xlu0 %2975 }
 0xf5e   :  { %v2998_v15 = vsub.f32 %v2838_v43, %v2976_v54 }
 0xf60   :  { %v3006_v12 = vmul.f32 1.442695, %v2998_v15 }
 0xf62   :  { %7364 = vpow2.f32 %v3006_v12 }
 0xf68   :  { %v8393_v21 = vpop.eup %7364  ;;  %2808 = vrot.lane.b32.xlu0 %v8375_v45, %s7619_s28 }
 0xf69   :  { %v3022_v23 = vsel %vm655_vm13, %v8393_v21, 0.0 }
 0xf6a   :  { %3023 = vadd.xlane.f32.xlu1 %v3022_v23 }
 0xf6d   :  { %v2988_v27 = vpop.xlane.xlu2 %2987  ;;  %v2985_v29 = vpop.xlane.xlu1 %2984 }
 0xf6e   :  { %v3001_v24 = vsub.f32 %v2895_v18, %v2985_v29  ;;  %v3002_v53 = vsub.f32 %v2914_v55, %v2988_v27 }
 0xf70   :  { %v3012_v33 = vmul.f32 1.442695, %v3001_v24  ;;  %v3014_v47 = vmul.f32 1.442695, %v3002_v53  ;;  %v7130_v24 = vld [vmem:[%s9031_s19 + $0x10] sm:$0xff] }
 0xf72   :  { %7366 = vpow2.f32 %v3012_v33 }
 0xf73   :  { %7368 = vpow2.f32 %v3014_v47 }
 0xf75   :  { %v2805_v34 = vpop.permute.xlu2 %2804 }
 0xf76   :  { %v3131_v36 = vsel %vm755_vm12, %v2805_v34, 0 }
 0xf77   :  { %3140 = vmatpush.bf16.msrb.mxu0 %v3131_v36 }
 0xf78   :  { %v7367_v42 = vpop.eup %7366 }
 0xf79   :  { %v3031_v44 = vsel %vm655_vm13, %v7367_v42, 0.0  ;;  %v8404_v50 = vpop.eup %7368 }
 0xf7a   :  { %3032 = vadd.xlane.f32.xlu2 %v3031_v44  ;;  %v3034_v14 = vsel %vm655_vm13, %v8404_v50, 0.0 }
 0xf7d   :  { %v2807_v38 = vpop.permute.xlu2 %2806  ;;  %v2997_v48 = vpop.xlane.xlu0 %2996 }
 0xf7e   :  { %v3150_v43 = vsel %vm755_vm12, %v2807_v38, 0  ;;  %v3005_v49 = vsub.f32 %v2971_v41, %v2997_v48 }
 0xf7f   :  { %3159 = vmatpush.bf16.msrb.mxu1 %v3150_v43 }
 0xf80   :  { %v3020_v46 = vmul.f32 1.442695, %v3005_v49 }
 0xf82   :  { %7370 = vpow2.f32 %v3020_v46  ;;  %v3461_v46 = vsel %vm502_vm11, %v8421_v59, 0 }
 0xf83   :  { %2802 = vrot.lane.b32.xlu1 %v8369_v28, %s7617_s0  ;;  %7372 = vpow2.f32 %v3018_v22 }
 0xf88   :  { %v8410_v18 = vpop.eup %7370 }
 0xf89   :  { %v3043_v55 = vsel %vm655_vm13, %v8410_v18, 0.0  ;;  %v8417_v0 = vpop.eup %7372 }
 0xf92   :  { %3035 = vadd.xlane.f32.xlu0 %v3034_v14  ;;  %2810 = vrot.lane.b32.xlu2 %v8369_v28, %s7618_s5  ;;  %v3040_v28 = vsel %vm655_vm13, %v8417_v0, 0.0  ;;  %v7135_v14 = vld [vmem:[%s9032_s24 + $0x18] sm:$0xff] }
 0xf9a   :  { %3044 = vadd.xlane.f32.xlu0 %v3043_v55  ;;  %2812 = vrot.lane.b32.xlu2 %v8375_v45, %s7618_s5  ;;  %v7133_v55 = vld [vmem:[%s9032_s24 + $0x8] sm:$0xff] }
 0xfad   :  { %3041 = vadd.xlane.f32.xlu1 %v3040_v28 }
 0xfae   :  { %2386 = vrot.lane.b32.xlu0 %v8421_v59, %s7617_s0 }
 0xfb6   :  { %2390 = vrot.lane.b32.xlu0 %v8421_v59, %s7619_s28 }
 0xfbf   :  { %v3030_v40 = vpop.xlane.xlu0 %3029 }
 0xfc7   :  { %v3039_v45 = vpop.xlane.xlu0 %3038 }
 0xfc8   :  { %7374 = vrcp.f32 %v3039_v45 }
 0xfce   :  { %v7375_v60 = vpop.eup %7374 }
 0xfcf   :  { %v3059_v56 = vmul.f32 %v7375_v60, %v7363_v9 }
 0xfd1   :  { %v3067_v8 = vpack.c.bf16 %v3059_v56, %v3059_v56 }
 0xfd6   :  { %v8429_v41 = vpop.f32.mrf.mxu2 }
 0xfda   :  { %v2809_v25 = vpop.permute.xlu0 %2808 }
 0xfdb   :  { %v3169_v16 = vsel %vm755_vm12, %v2809_v25, 0 }
 0xfdc   :  { %3178 = vmatpush.bf16.msrb.mxu2 %v3169_v16 }
 0xfdd   :  { %v3024_v1 = vpop.xlane.xlu1 %3023 }
 0xfde   :  { %7376 = vrcp.f32 %v3024_v1  ;;  %v3106_v2 = vpop.f32.mrf.mxu2 }
 0xfdf   :  { %6576 = vmatmul.msk.bf16.vlgmr.msrb.gmra.mxu2 %vm655_vm13, %v3067_v8  ;;  %7378 = vrcp.f32 %v3030_v40 }
 0xfe0   :  { %3263 = vmatpush.bf16.msra.mxu2 %v7128_v63 }
 0xfe4   :  { %3451 = vmatpush.bf16.xpose.msrb.mxu2 %v3442_v11  ;;  %v7377_v5 = vpop.eup %7376 }
 0xfe5   :  { %v3054_v4 = vmul.f32 %v7377_v5, %v8393_v21  ;;  %v7379_v20 = vpop.eup %7378  ;;  %v7131_v5 = vld [vmem:[%s9031_s19 + $0x18] sm:$0xff] }
 0xfe6   :  { %v3056_v9 = vmul.f32 %v7379_v20, %v8387_v3 }
 0xfe7   :  { %v3062_v6 = vpack.c.bf16 %v3054_v4, %v3054_v4 }
 0xfe8   :  { %v3064_v21 = vpack.c.bf16 %v3056_v9, %v3056_v9 }
 0xfe9   :  { %6571 = vmatmul.msk.bf16.vlgmr.msra.gmra.mxu1 %vm655_vm13, %v3062_v6 }
 0xfed   :  { %v3033_v10 = vpop.xlane.xlu2 %3032 }
 0xfee   :  { %7380 = vrcp.f32 %v3033_v10 }
 0xff4   :  { %v7381_v62 = vpop.eup %7380 }
 0xff5   :  { %v2803_v7 = vpop.permute.xlu1 %2802  ;;  %v3057_v54 = vmul.f32 %v7381_v62, %v7367_v42  ;;  %v2811_v15 = vpop.permute.xlu2 %2810 }
 0xff6   :  { %v3112_v12 = vsel %vm755_vm12, %v2803_v7, 0  ;;  %v3188_v17 = vsel %vm755_vm12, %v2811_v15, 0 }
 0xff7   :  { %3121 = vmatpush.bf16.msra.mxu3 %v3112_v12  ;;  %v3065_v23 = vpack.c.bf16 %v3057_v54, %v3057_v54 }
 0xff9   :  { %6574 = vmatmul.msk.bf16.vlgmr.msrb.gmra.mxu0 %vm655_vm13, %v3065_v23 }
 0xffa   :  { %6573 = vmatmul.msk.bf16.vlgmr.msra.gmra.mxu3 %vm655_vm13, %v3064_v21 }
 0xffb   :  { %3197 = vmatpush.bf16.msrb.mxu3 %v3188_v17 }
 0xffd   :  { %v2813_v27 = vpop.permute.xlu2 %2812 }
 0xffe   :  { %v3207_v3 = vsel %vm755_vm12, %v2813_v27, 0 }
 0xfff   :  { %3216 = vmatpush.bf16.msra.mxu0 %v3207_v3  ;;  %3287 = vmatpush.bf16.msra.mxu3 %v7130_v24 }
0x1003   :  { %3313 = vmatpush.bf16.msrb.mxu0 %v7131_v5 }
0x1005   :  { %v3036_v29 = vpop.xlane.xlu0 %3035 }
0x1006   :  { %7382 = vrcp.f32 %v3036_v29 }
0x100c   :  { %v7383_v33 = vpop.eup %7382 }
0x100d   :  { %v3058_v34 = vmul.f32 %v7383_v33, %v8404_v50  ;;  %v3045_v36 = vpop.xlane.xlu0 %3044  ;;  %v7129_v50 = vld [vmem:[%s9031_s19 + $0x8] sm:$0xff] }
0x100e   :  { %7384 = vrcp.f32 %v3045_v36  ;;  %3240 = vmatpush.bf16.msra.mxu1 %v7129_v50 }
0x100f   :  { %v3066_v42 = vpack.c.bf16 %v3058_v34, %v3058_v34 }
0x1011   :  { %6575 = vmatmul.msk.bf16.vlgmr.msrb.gmra.mxu1 %vm655_vm13, %v3066_v42 }
0x1012   :  { %3404 = vmatpush.bf16.msrb.mxu1 %v7135_v14 }
0x1014   :  { %v7385_v44 = vpop.eup %7384 }
0x1015   :  { %v3061_v38 = vmul.f32 %v7385_v44, %v8410_v18  ;;  %v7134_v18 = vld [vmem:[%s9032_s24 + $0x10] sm:$0xff] }
0x1016   :  { %3405 = vmatpush.bf16.msrb.mxu1 %v7134_v18 }
0x1017   :  { %v3069_v43 = vpack.c.bf16 %v3061_v38, %v3061_v38 }
0x1019   :  { %6578 = vmatmul.msk.bf16.vlgmr.msra.gmra.mxu0 %vm655_vm13, %v3069_v43 }
0x101a   :  { %3406 = vmatpush.bf16.msrb.mxu1 %v7133_v55 }
0x101e   :  { %3407 = vmatpush.bf16.msrb.mxu1 %v7132_v52 }
0x1020   :  { %v3042_v53 = vpop.xlane.xlu1 %3041  ;;  %v2387_v56 = vpop.permute.xlu0 %2386 }
0x1021   :  { %7386 = vrcp.f32 %v3042_v53  ;;  %v3499_v8 = vsel %vm502_vm11, %v2387_v56, 0 }
0x1027   :  { %v7387_v47 = vpop.eup %7386 }
0x1028   :  { %v3060_v48 = vmul.f32 %v7387_v47, %v8417_v0  ;;  %v2391_v2 = vpop.permute.xlu0 %2390 }
0x102a   :  { %v3068_v49 = vpack.c.bf16 %v3060_v48, %v3060_v48  ;;  %v8490_v48 = vpack.c.bf16 %v8347_v19, %v8347_v19 }
0x102c   :  { %6577 = vmatmul.msk.bf16.vlgmr.msrb.gmra.mxu3 %vm655_vm13, %v3068_v49 }
0x102d   :  { %3470 = vmatpush.bf16.xpose.msrb.mxu3 %v3461_v46 }
0x1062   :  { %v3180_v22 = vpop.f32.mrf.mxu2 }
0x1066   :  { %v3085_v28 = vpop.f32.mrf.mxu1 }
0x1067   :  { %v3222_v0 = vpack.c.bf16 %v8429_v41, %v3085_v28  ;;  %v3537_v41 = vsel %vm502_vm11, %v2391_v2, 0 }
0x1069   :  { %6588 = vmatmul.msk.bf16.vlgmr.msra.gmra.mxu2 %vm502_vm11, %v3222_v0 }
0x106a   :  { %v3182_v40 = vpop.f32.mrf.mxu2 }
0x106e   :  { %v3087_v45 = vpop.f32.mrf.mxu1 }
0x1076   :  { %v3142_v60 = vpop.f32.mrf.mxu0 }
0x107d   :  { %v3123_v63 = vpop.f32.mrf.mxu3 }
0x107e   :  { %v3223_v25 = vpack.c.bf16 %v3142_v60, %v3123_v63  ;;  %v3144_v16 = vpop.f32.mrf.mxu0 }
0x1080   :  { %6583 = vmatmul.msk.bf16.vlgmr.msra.gmra.mxu1 %vm502_vm11, %v3223_v25 }
0x1081   :  { %3508 = vmatpush.bf16.xpose.msra.mxu1 %v3499_v8 }
0x1085   :  { %v3125_v1 = vpop.f32.mrf.mxu3 }
0x1086   :  { %v7252_v1 = vld [vmem:[%s9033_s30] ss:$0 sm:$0xff] }
0x108e   :  { %v3161_v11 = vpop.f32.mrf.mxu1 }
0x108f   :  { %v3270_v4 = vpack.c.bf16 %v3180_v22, %v3161_v11 }
0x1091   :  { %6593 = vmatmul.msk.bf16.vlgmr.msra.gmra.mxu3 %vm502_vm11, %v3270_v4 }
0x1092   :  { %3546 = vmatpush.bf16.xpose.msra.mxu3 %v3537_v41 }
0x1096   :  { %v3163_v6 = vpop.f32.mrf.mxu1  ;;  %v3218_v10 = vpop.f32.mrf.mxu0 }
0x109e   :  { %v3220_v20 = vpop.f32.mrf.mxu0 }
0x10af   :  { %v3199_v9 = vpop.f32.mrf.mxu3 }
0x10b0   :  { %v3296_v62 = vpack.c.bf16 %v3218_v10, %v3199_v9 }
0x10b2   :  { %6598 = vmatmul.msk.bf16.vlgmr.msrb.gmra.mxu0 %vm502_vm11, %v3296_v62 }
0x10b7   :  { %v3201_v7 = vpop.f32.mrf.mxu3 }
0x10ec   :  { %v3265_v15 = vpop.f32.mrf.mxu2 }
0x10f4   :  { %v3267_v24 = vpop.f32.mrf.mxu2 }
0x10fd   :  { %v3242_v54 = vpop.f32.mrf.mxu1 }
0x10fe   :  { %v3266_v17 = vadd.f32 %v3265_v15, %v3242_v54  ;;  %v3690_v15 = vsel %vm755_vm12, %v8490_v48, 0 }
0x1105   :  { %v3244_v3 = vpop.f32.mrf.mxu1 }
0x1106   :  { %v3268_v34 = vadd.f32 %v3267_v24, %v3244_v3 }
0x1114   :  { %v3289_v12 = vpop.f32.mrf.mxu3 }
0x1115   :  { %v3294_v21 = vadd.f32 %v3289_v12, %v3266_v17  ;;  %v8509_v12 = vpack.c.bf16 %v8353_v26, %v8353_v26 }
0x111c   :  { %v3291_v33 = vpop.f32.mrf.mxu3 }
0x111d   :  { %v3295_v42 = vadd.f32 %v3291_v33, %v3268_v34 }
0x112f   :  { %v3315_v23 = vpop.f32.mrf.mxu0 }
0x1130   :  { %v3320_v27 = vadd.f32 %v3315_v23, %v3294_v21  ;;  %v3709_v23 = vsel %vm755_vm12, %v8509_v12, 0 }
0x1132   :  { %v8471_v29 = vadd.f32 %v3320_v27, %v8175_v61 }
0x1134   :  { %v3325_v36 = vmul.f32 %v8471_v29, %v8471_v29 }
0x1136   :  { %v3327_v44 = vsel %vm259_vm3, %v3325_v36, 0.0 }
0x1137   :  { %v3317_v38 = vpop.f32.mrf.mxu0  ;;  %3328 = vadd.xlane.f32.xlu2 %v3327_v44 }
0x1138   :  { %v3321_v43 = vadd.f32 %v3317_v38, %v3295_v42 }
0x113a   :  { %v8477_v53 = vadd.f32 %v3321_v43, %v8186_v30 }
0x113c   :  { %v3326_v47 = vmul.f32 %v8477_v53, %v8477_v53 }
0x113e   :  { %v3330_v61 = vsel %vm259_vm3, %v3326_v47, 0.0 }
0x113f   :  { %3331 = vadd.xlane.f32.xlu1 %v3330_v61 }
0x114f   :  { %2388 = vrot.lane.b32.xlu2 %v8434_v57, %s7619_s28 }
0x1157   :  { %2394 = vrot.lane.b32.xlu2 %v8421_v59, %s7618_s5 }
0x1158   :  { %2384 = vrot.lane.b32.xlu1 %v8434_v57, %s7617_s0 }
0x115f   :  { %2446 = vrot.lane.b32.xlu2 %v8490_v48, %s7617_s0 }
0x11aa   :  { %v3329_v30 = vpop.xlane.xlu2 %3328 }
0x11ab   :  { %v3333_v49 = vmul.f32 %v3329_v30, %v7829_v37 }
0x11ad   :  { %v3335_v46 = vadd.f32 1e-06, %v3333_v49 }
0x11af   :  { %7388 = vrsqrt.f32 %v3335_v46  ;;  %vm3343_vm9 = vweird.f32 %v3335_v46 }
0x11b2   :  { %v2389_v50 = vpop.permute.xlu2 %2388  ;;  %v3332_v14 = vpop.xlane.xlu1 %3331 }
0x11b3   :  { %v3518_v18 = vsel %vm502_vm11, %v2389_v50, 0  ;;  %v3334_v59 = vmul.f32 %v3332_v14, %v7829_v37 }
0x11b4   :  { %3527 = vmatpush.bf16.xpose.msra.mxu2 %v3518_v18 }
0x11b5   :  { %v7389_v55 = vpop.eup %7388  ;;  %v3336_v52 = vadd.f32 1e-06, %v3334_v59 }
0x11b6   :  { %v3338_v22 = vmul.f32 %v7389_v55, %v3335_v46  ;;  %vm3344_vm8 = vweird.f32 %v7389_v55 }
0x11b7   :  { %7390 = vrsqrt.f32 %v3336_v52  ;;  %vm3345_vm10 = vmor %vm3343_vm9, %vm3344_vm8  ;;  %vm3353_vm15 = vweird.f32 %v3336_v52 }
0x11b8   :  { %v3339_v19 = vmul.f32 %v7389_v55, %v3338_v22 }
0x11ba   :  { %v3340_v28 = vmul.f32 0.5, %v3339_v19  ;;  %v2395_v20 = vpop.permute.xlu2 %2394 }
0x11bb   :  { %v3575_v62 = vsel %vm502_vm11, %v2395_v20, 0 }
0x11bc   :  { %v3341_v0 = vsub.f32 1.5, %v3340_v28 }
0x11bd   :  { %v7391_v40 = vpop.eup %7390 }
0x11be   :  { %v3348_v45 = vmul.f32 %v7391_v40, %v3336_v52  ;;  %v3342_v60 = vmul.f32 %v7389_v55, %v3341_v0  ;;  %vm3354_vm14 = vweird.f32 %v7391_v40 }
0x11bf   :  { %vm3355_vm0 = vmor %vm3353_vm15, %vm3354_vm14 }
0x11c0   :  { %v3349_v56 = vmul.f32 %v7391_v40, %v3348_v45  ;;  %v3346_v25 = vsel %vm3345_vm10, %v7389_v55, %v3342_v60 }
0x11c1   :  { %v3357_v2 = vmul.f32 %v3346_v25, %v8471_v29 }
0x11c2   :  { %v3350_v63 = vmul.f32 0.5, %v3349_v56  ;;  %v2447_v24 = vpop.permute.xlu2 %2446 }
0x11c3   :  { %v3362_v41 = vmul.f32 %v7252_v1, %v3357_v2  ;;  %v3728_v42 = vsel %vm755_vm12, %v2447_v24, 0 }
0x11c4   :  { %v3351_v16 = vsub.f32 1.5, %v3350_v63 }
0x11c6   :  { %v3352_v8 = vmul.f32 %v7391_v40, %v3351_v16 }
0x11c8   :  { %v3356_v11 = vsel %vm3355_vm0, %v7391_v40, %v3352_v8 }
0x11c9   :  { %v3358_v5 = vmul.f32 %v3356_v11, %v8477_v53 }
0x11ca   :  { %v2385_v4 = vpop.permute.xlu1 %2384 }
0x11cb   :  { %v3363_v6 = vmul.f32 %v7252_v1, %v3358_v5  ;;  %v3480_v10 = vsel %vm502_vm11, %v2385_v4, 0 }
0x11cc   :  { %3489 = vmatpush.bf16.xpose.msra.mxu0 %v3480_v10 }
0x11cd   :  { %v3364_v9 = vpack.c.bf16 %v3363_v6, %v3362_v41 }
0x11cf   :  { %6615 = vmatmul.msk.bf16.vlgmr.msrb.gmra.mxu1 %vm259_vm3, %v3364_v9 }
0x11d0   :  { %3584 = vmatpush.bf16.xpose.msrb.mxu1 %v3575_v62 }
0x124c   :  { %v3409_v7 = vpop.f32.mrf.mxu1 }
0x124d   :  { %v3414_v54 = vpack.c.bf16 %v3409_v7, %v3409_v7 }
0x124f   :  { %3418 = vrot.lane.b32.xlu1 %v3414_v54, %s7617_s0  ;;  %6616 = vmatmul.msk.bf16.vlgmr.msrb.gmra.mxu2 %vm502_vm11, %v3414_v54 }
0x1250   :  { %3699 = vmatpush.bf16.msrb.mxu2 %v3690_v15 }
0x1254   :  { %v3411_v17 = vpop.f32.mrf.mxu1 }
0x1255   :  { %v3415_v21 = vpack.c.bf16 %v3411_v17, %v3411_v17 }
0x1257   :  { %3422 = vrot.lane.b32.xlu1 %v3414_v54, %s7619_s28  ;;  %3420 = vrot.lane.b32.xlu0 %v3415_v21, %s7617_s0 }
0x1258   :  { %6617 = vmatmul.msk.bf16.vlgmr.msrb.gmra.mxu3 %vm502_vm11, %v3415_v21 }
0x1259   :  { %3718 = vmatpush.bf16.msrb.mxu3 %v3709_v23 }
0x125f   :  { %2392 = vrot.lane.b32.xlu1 %v8434_v57, %s7618_s5  ;;  %3424 = vrot.lane.b32.xlu0 %v3415_v21, %s7619_s28 }
0x1267   :  { %3428 = vrot.lane.b32.xlu1 %v3415_v21, %s7618_s5  ;;  %3426 = vrot.lane.b32.xlu0 %v3414_v54, %s7618_s5 }
0x12c1   :  { %v3419_v26 = vpop.permute.xlu1 %3418 }
0x12c2   :  { %6618 = vmatmul.msk.bf16.vlgmr.msra.gmra.mxu0 %vm502_vm11, %v3419_v26 }
0x12c9   :  { %v3421_v27 = vpop.permute.xlu0 %3420  ;;  %v3423_v3 = vpop.permute.xlu1 %3422 }
0x12ca   :  { %6619 = vmatmul.msk.bf16.vlgmr.msra.gmra.mxu1 %vm502_vm11, %v3421_v27  ;;  %6620 = vmatmul.msk.bf16.vlgmr.msra.gmra.mxu2 %vm502_vm11, %v3423_v3 }
0x12d1   :  { %v3425_v33 = vpop.permute.xlu0 %3424  ;;  %v2393_v34 = vpop.permute.xlu1 %2392 }
0x12d2   :  { %v3556_v57 = vsel %vm502_vm11, %v2393_v34, 0  ;;  %v3453_v36 = vpop.f32.mrf.mxu2  ;;  %6621 = vmatmul.msk.bf16.vlgmr.msra.gmra.mxu3 %vm502_vm11, %v3425_v33 }
0x12d3   :  { %v3454_v44 = vadd.f32 %v3453_v36, %v7870_v35  ;;  %3565 = vmatpush.bf16.xpose.msrb.mxu0 %v3556_v57 }
0x12d5   :  { %v3590_v38 = vsel %vm655_vm13, %v3454_v44, -inf }
0x12d6   :  { %3591 = vmax.xlane.f32.xlu2 %v3590_v38 }
0x12d9   :  { %v3427_v43 = vpop.permute.xlu0 %3426  ;;  %v3429_v47 = vpop.permute.xlu1 %3428 }
0x12da   :  { %v3455_v61 = vpop.f32.mrf.mxu2  ;;  %6622 = vmatmul.msk.bf16.vlgmr.msrb.gmra.mxu0 %vm502_vm11, %v3427_v43  ;;  %6623 = vmatmul.msk.bf16.vlgmr.msrb.gmra.mxu1 %vm502_vm11, %v3429_v47 }
0x12db   :  { %3737 = vmatpush.bf16.msra.mxu0 %v3728_v42  ;;  %v3472_v30 = vpop.f32.mrf.mxu3 }
0x12dc   :  { %v3473_v49 = vadd.f32 %v3472_v30, %v7886_v51 }
0x12de   :  { %v3593_v46 = vsel %vm655_vm13, %v3473_v49, -inf }
0x12df   :  { %3594 = vmax.xlane.f32.xlu0 %v3593_v46 }
0x12e3   :  { %v3474_v50 = vpop.f32.mrf.mxu3 }
0x133f   :  { %v3491_v14 = vpop.f32.mrf.mxu0 }
0x1340   :  { %v3492_v18 = vadd.f32 %v3491_v14, %v7870_v35 }
0x1342   :  { %v3596_v59 = vsel %vm655_vm13, %v3492_v18, -inf }
0x1343   :  { %3597 = vmax.xlane.f32.xlu1 %v3596_v59 }
0x1347   :  { %v3493_v55 = vpop.f32.mrf.mxu0  ;;  %v3510_v52 = vpop.f32.mrf.mxu1 }
0x1348   :  { %v3511_v22 = vadd.f32 %v3510_v52, %v7886_v51 }
0x1349   :  { %v3592_v28 = vpop.xlane.xlu2 %3591 }
0x134a   :  { %v3599_v19 = vsel %vm655_vm13, %v3511_v22, -inf  ;;  %v3614_v45 = vsub.f32 %v3454_v44, %v3592_v28 }
0x134b   :  { %3600 = vmax.xlane.f32.xlu2 %v3599_v19 }
0x134c   :  { %v3622_v25 = vmul.f32 1.442695, %v3614_v45 }
0x134d   :  { %v3529_v0 = vpop.f32.mrf.mxu2 }
0x134e   :  { %v3530_v40 = vadd.f32 %v3529_v0, %v7870_v35  ;;  %7392 = vpow2.f32 %v3622_v25 }
0x134f   :  { %v3512_v60 = vpop.f32.mrf.mxu1 }
0x1350   :  { %v3602_v56 = vsel %vm655_vm13, %v3530_v40, -inf }
0x1351   :  { %3603 = vmax.xlane.f32.xlu0 %v3602_v56 }
0x1352   :  { %v3595_v63 = vpop.xlane.xlu0 %3594 }
0x1353   :  { %v3615_v16 = vsub.f32 %v3473_v49, %v3595_v63 }
0x1354   :  { %v7393_v62 = vpop.eup %7392 }
0x1355   :  { %v3624_v8 = vmul.f32 1.442695, %v3615_v16  ;;  %v3531_v1 = vpop.f32.mrf.mxu2  ;;  %v3548_v2 = vpop.f32.mrf.mxu3  ;;  %v3638_v21 = vsel %vm655_vm13, %v7393_v62, 0.0 }
0x1356   :  { %v3549_v11 = vadd.f32 %v3548_v2, %v7886_v51 }
0x1357   :  { %v3567_v5 = vpop.f32.mrf.mxu0  ;;  %v3586_v4 = vpop.f32.mrf.mxu1  ;;  %7394 = vpow2.f32 %v3624_v8 }
0x1358   :  { %v8541_v41 = vadd.f32 %v3567_v5, %v7870_v35  ;;  %v3587_v6 = vadd.f32 %v3586_v4, %v7886_v51  ;;  %v3605_v10 = vsel %vm655_vm13, %v3549_v11, -inf }
0x1359   :  { %3606 = vmax.xlane.f32.xlu1 %v3605_v10 }
0x135a   :  { %v3608_v20 = vsel %vm655_vm13, %v8541_v41, -inf  ;;  %v3611_v9 = vsel %vm655_vm13, %v3587_v6, -inf }
0x135b   :  { %3609 = vmax.xlane.f32.xlu2 %v3608_v20  ;;  %3612 = vmax.xlane.f32.xlu0 %v3611_v9 }
0x135d   :  { %v3550_v7 = vpop.f32.mrf.mxu3  ;;  %v7395_v54 = vpop.eup %7394 }
0x135e   :  { %v3641_v23 = vsel %vm655_vm13, %v7395_v54, 0.0 }
0x135f   :  { %v3569_v15 = vpop.f32.mrf.mxu0  ;;  %v3588_v17 = vpop.f32.mrf.mxu1 }
0x1361   :  { %3639 = vadd.xlane.f32.xlu1 %v3638_v21 }
0x1363   :  { %3642 = vadd.xlane.f32.xlu2 %v3641_v23  ;;  %v7136_v23 = vld [vmem:[%s9034_s6] sm:$0xff] }
0x137a   :  { %2450 = vrot.lane.b32.xlu1 %v8490_v48, %s7619_s28 }
0x137b   :  { %2452 = vrot.lane.b32.xlu2 %v8509_v12, %s7619_s28 }
0x13b6   :  { %v3598_v26 = vpop.xlane.xlu1 %3597 }
0x13b7   :  { %v3616_v27 = vsub.f32 %v3492_v18, %v3598_v26 }
0x13b9   :  { %v3626_v3 = vmul.f32 1.442695, %v3616_v27 }
0x13bb   :  { %7396 = vpow2.f32 %v3626_v3 }
0x13be   :  { %v3601_v34 = vpop.xlane.xlu2 %3600 }
0x13bf   :  { %v3617_v42 = vsub.f32 %v3511_v22, %v3601_v34 }
0x13c1   :  { %v7397_v24 = vpop.eup %7396  ;;  %v3628_v38 = vmul.f32 1.442695, %v3617_v42 }
0x13c2   :  { %v3644_v33 = vsel %vm655_vm13, %v7397_v24, 0.0 }
0x13c3   :  { %3645 = vadd.xlane.f32.xlu0 %v3644_v33 }
0x13c4   :  { %v3604_v57 = vpop.xlane.xlu0 %3603 }
0x13c5   :  { %v3618_v36 = vsub.f32 %v3530_v40, %v3604_v57 }
0x13c7   :  { %v3630_v44 = vmul.f32 1.442695, %v3618_v36 }
0x13c9   :  { %7398 = vpow2.f32 %v3630_v44 }
0x13ca   :  { %7400 = vpow2.f32 %v3628_v38 }
0x13cc   :  { %v3607_v43 = vpop.xlane.xlu1 %3606 }
0x13cd   :  { %v3619_v47 = vsub.f32 %v3549_v11, %v3607_v43 }
0x13ce   :  { %v3610_v61 = vpop.xlane.xlu2 %3609  ;;  %v3613_v30 = vpop.xlane.xlu0 %3612 }
0x13cf   :  { %v7399_v49 = vpop.eup %7398  ;;  %v3621_v46 = vsub.f32 %v3587_v6, %v3613_v30  ;;  %v3632_v18 = vmul.f32 1.442695, %v3619_v47  ;;  %v3620_v5 = vsub.f32 %v8541_v41, %v3610_v61 }
0x13d0   :  { %v3650_v50 = vsel %vm655_vm13, %v7399_v49, 0.0  ;;  %v7401_v55 = vpop.eup %7400 }
0x13d1   :  { %v3636_v14 = vmul.f32 1.442695, %v3621_v46  ;;  %3651 = vadd.xlane.f32.xlu1 %v3650_v50  ;;  %v3647_v22 = vsel %vm655_vm13, %v7401_v55, 0.0  ;;  %v3634_v4 = vmul.f32 1.442695, %v3620_v5 }
0x13d3   :  { %7402 = vpow2.f32 %v3636_v14 }
0x13d4   :  { %v3640_v59 = vpop.xlane.xlu1 %3639 }
0x13d5   :  { %7404 = vrcp.f32 %v3640_v59 }
0x13d6   :  { %7406 = vpow2.f32 %v3632_v18  ;;  %v3643_v52 = vpop.xlane.xlu2 %3642 }
0x13d7   :  { %7408 = vrcp.f32 %v3643_v52  ;;  %2448 = vrot.lane.b32.xlu0 %v8509_v12, %s7617_s0 }
0x13d8   :  { %7410 = vpow2.f32 %v3634_v4 }
0x13d9   :  { %3648 = vadd.xlane.f32.xlu1 %v3647_v22  ;;  %v8559_v19 = vpop.eup %7402 }
0x13da   :  { %v3659_v0 = vsel %vm655_vm13, %v8559_v19, 0.0 }
0x13db   :  { %v7405_v28 = vpop.eup %7404  ;;  %3660 = vadd.xlane.f32.xlu2 %v3659_v0 }
0x13dc   :  { %v7407_v40 = vpop.eup %7406  ;;  %v3670_v45 = vmul.f32 %v7405_v28, %v7393_v62  ;;  %v7137_v28 = vld [vmem:[%s9034_s6 + $0x8] sm:$0xff] }
0x13dd   :  { %v7409_v60 = vpop.eup %7408  ;;  %v3653_v1 = vsel %vm655_vm13, %v7407_v40, 0.0 }
0x13de   :  { %v3678_v56 = vpack.c.bf16 %v3670_v45, %v3670_v45  ;;  %v3671_v63 = vmul.f32 %v7409_v60, %v7395_v54  ;;  %v2453_v25 = vpop.permute.xlu2 %2452  ;;  %v7411_v6 = vpop.eup %7410 }
0x13df   :  { %v3785_v16 = vsel %vm755_vm12, %v2453_v25, 0  ;;  %v3656_v10 = vsel %vm655_vm13, %v7411_v6, 0.0 }
0x13e0   :  { %v3679_v8 = vpack.c.bf16 %v3671_v63, %v3671_v63  ;;  %6624 = vmatmul.msk.bf16.vlgmr.msrb.gmra.mxu2 %vm655_vm13, %v3678_v56  ;;  %3794 = vmatpush.bf16.msra.mxu3 %v3785_v16  ;;  %v7139_v16 = vld [vmem:[%s9034_s6 + $0x18] sm:$0xff] }
0x13e1   :  { %3654 = vadd.xlane.f32.xlu1 %v3653_v1 }
0x13e2   :  { %6625 = vmatmul.msk.bf16.vlgmr.msrb.gmra.mxu3 %vm655_vm13, %v3679_v8 }
0x13e4   :  { %3879 = vmatpush.bf16.msrb.mxu3 %v7136_v23 }
0x13ec   :  { %v2451_v2 = vpop.permute.xlu1 %2450 }
0x13ed   :  { %v3766_v11 = vsel %vm755_vm12, %v2451_v2, 0 }
0x13ee   :  { %3775 = vmatpush.bf16.msra.mxu2 %v3766_v11 }
0x13f2   :  { %3856 = vmatpush.bf16.msrb.mxu2 %v7137_v28 }
0x13fa   :  { %2454 = vrot.lane.b32.xlu1 %v8490_v48, %s7618_s5 }
0x1401   :  { %3657 = vadd.xlane.f32.xlu0 %v3656_v10 }
0x1402   :  { %2456 = vrot.lane.b32.xlu1 %v8509_v12, %s7618_s5 }
0x1436   :  { %v3646_v20 = vpop.xlane.xlu0 %3645 }
0x1437   :  { %7412 = vrcp.f32 %v3646_v20 }
0x143d   :  { %v7413_v9 = vpop.eup %7412 }
0x143e   :  { %v3672_v62 = vmul.f32 %v7413_v9, %v7397_v24 }
0x1440   :  { %v3680_v7 = vpack.c.bf16 %v3672_v62, %v3672_v62 }
0x1442   :  { %6626 = vmatmul.msk.bf16.vlgmr.msra.gmra.mxu0 %vm655_vm13, %v3680_v7 }
0x1444   :  { %v3652_v41 = vpop.xlane.xlu1 %3651 }
0x1445   :  { %7414 = vrcp.f32 %v3652_v41 }
0x1449   :  { %v2449_v54 = vpop.permute.xlu0 %2448 }
0x144a   :  { %v3747_v48 = vsel %vm755_vm12, %v2449_v54, 0 }
0x144b   :  { %v7415_v15 = vpop.eup %7414  ;;  %3756 = vmatpush.bf16.msra.mxu1 %v3747_v48 }
0x144c   :  { %v3674_v17 = vmul.f32 %v7415_v15, %v7399_v49  ;;  %v3649_v21 = vpop.xlane.xlu1 %3648 }
0x144d   :  { %7416 = vrcp.f32 %v3649_v21 }
0x144e   :  { %v3682_v12 = vpack.c.bf16 %v3674_v17, %v3674_v17  ;;  %v3661_v44 = vpop.xlane.xlu2 %3660 }
0x1450   :  { %6628 = vmatmul.msk.bf16.vlgmr.msra.gmra.mxu2 %vm655_vm13, %v3682_v12 }
0x1453   :  { %v7417_v26 = vpop.eup %7416 }
0x1454   :  { %v3673_v27 = vmul.f32 %v7417_v26, %v7401_v55  ;;  %v3655_v3 = vpop.xlane.xlu1 %3654 }
0x1455   :  { %7418 = vrcp.f32 %v3655_v3 }
0x1456   :  { %v3681_v24 = vpack.c.bf16 %v3673_v27, %v3673_v27  ;;  %7420 = vrcp.f32 %v3661_v44  ;;  %v7146_v44 = vld [vmem:[%s9035_s12 + $0x34] sm:$0xf] }
0x1458   :  { %6627 = vmatmul.msk.bf16.vlgmr.msra.gmra.mxu1 %vm655_vm13, %v3681_v24 }
0x145b   :  { %v7419_v33 = vpop.eup %7418 }
0x145c   :  { %v3675_v34 = vmul.f32 %v7419_v33, %v7407_v40  ;;  %v7421_v49 = vpop.eup %7420  ;;  %v7138_v40 = vld [vmem:[%s9034_s6 + $0x10] sm:$0xff] }
0x145d   :  { %v3677_v46 = vmul.f32 %v7421_v49, %v8559_v19 }
0x145e   :  { %v3683_v57 = vpack.c.bf16 %v3675_v34, %v3675_v34 }
0x145f   :  { %v3685_v59 = vpack.c.bf16 %v3677_v46, %v3677_v46  ;;  %v6672_v46 = vld [vmem:[%s9035_s12 + $0x28] sm:$0xf0] }
0x1460   :  { %6629 = vmatmul.msk.bf16.vlgmr.msra.gmra.mxu3 %vm655_vm13, %v3683_v57 }
0x1463   :  { %v3701_v36 = vpop.f32.mrf.mxu2 }
0x1465   :  { %v3720_v42 = vpop.f32.mrf.mxu3 }
0x1466   :  { %v3838_v30 = vpack.c.bf16 %v3720_v42, %v3701_v36  ;;  %v6678_v36 = vld [vmem:[%s9035_s12 + $0x30] sm:$0xf]  ;;  %v7147_v42 = vld [vmem:[%s9035_s12 + $0x34] sm:$0xf0] }
0x146b   :  { %v3703_v38 = vpop.f32.mrf.mxu2 }
0x146c   :  { %v2455_v43 = vpop.permute.xlu1 %2454  ;;  %v6679_v38 = vor.u32 %v7147_v42, %v6678_v36  ;;  %v7151_v36 = vld [vmem:[%s9037_s2 + $0x18] sm:$0xff]  ;;  %v7150_v42 = vld [vmem:[%s9037_s2 + $0x10] sm:$0xff] }
0x146d   :  { %v3804_v47 = vsel %vm755_vm12, %v2455_v43, 0  ;;  %v3722_v61 = vpop.f32.mrf.mxu3  ;;  %v6680_v43 = vld [vmem:[%s9035_s12 + $0x38] sm:$0xf0] }
0x146e   :  { %3813 = vmatpush.bf16.msrb.mxu0 %v3804_v47  ;;  %v6683_v47 = vor.u32 %v7146_v44, %v6680_v43  ;;  %4036 = vmatpush.bf16.msra.mxu2 %v6679_v38  ;;  %v7145_v61 = vld [vmem:[%s9035_s12 + $0x24] sm:$0xf0] }
0x146f   :  { %v7149_v44 = vld [vmem:[%s9037_s2 + $0x8] sm:$0xff] }
0x1470   :  { %6641 = vmatmul.msk.bf16.vlgmr.msrb.gmra.mxu3 %vm502_vm11, %v3838_v30  ;;  %v7144_v30 = vld [vmem:[%s9035_s12 + $0x24] sm:$0xf] }
0x1471   :  { %4050 = vmatpush.bf16.msra.mxu3 %v6683_v47  ;;  %v7148_v47 = vld [vmem:[%s9037_s2] sm:$0xff] }
0x1472   :  { %3903 = vmatpush.bf16.msra.mxu0 %v7138_v40  ;;  %v6654_v40 = vld [vmem:[%s9035_s12] sm:$0xf] }
0x1474   :  { %v3658_v50 = vpop.xlane.xlu0 %3657  ;;  %v2457_v14 = vpop.permute.xlu1 %2456 }
0x1475   :  { %7422 = vrcp.f32 %v3658_v50  ;;  %v3823_v18 = vsel %vm755_vm12, %v2457_v14, 0  ;;  %v6675_v50 = vor.u32 %v7144_v30, %v6672_v46  ;;  %v6662_v14 = vld [vmem:[%s9035_s12 + $0x10] sm:$0xf] }
0x1476   :  { %3832 = vmatpush.bf16.msrb.mxu1 %v3823_v18  ;;  %v7143_v18 = vld [vmem:[%s9035_s12 + $0x14] sm:$0xf0] }
0x1477   :  { %4051 = vmatpush.bf16.msra.mxu3 %v6675_v50 }
0x1479   :  { %6631 = vmatmul.msk.bf16.vlgmr.msrb.gmra.mxu1 %vm655_vm13, %v3685_v59  ;;  %v7142_v59 = vld [vmem:[%s9035_s12 + $0x14] sm:$0xf] }
0x147a   :  { %3929 = vmatpush.bf16.msra.mxu1 %v7139_v16 }
0x147b   :  { %v7423_v55 = vpop.eup %7422 }
0x147c   :  { %v3676_v52 = vmul.f32 %v7423_v55, %v7411_v6  ;;  %v6663_v55 = vor.u32 %v7143_v18, %v6662_v14 }
0x147e   :  { %v3684_v22 = vpack.c.bf16 %v3676_v52, %v3676_v52  ;;  %v6664_v52 = vld [vmem:[%s9035_s12 + $0x18] sm:$0xf0] }
0x1480   :  { %6630 = vmatmul.msk.bf16.vlgmr.msrb.gmra.mxu0 %vm655_vm13, %v3684_v22  ;;  %v6667_v22 = vor.u32 %v7142_v59, %v6664_v52 }
0x1482   :  { %4052 = vmatpush.bf16.msra.mxu3 %v6667_v22 }
0x14bf   :  { %v3739_v0 = vpop.f32.mrf.mxu0 }
0x14c7   :  { %v3741_v19 = vpop.f32.mrf.mxu0 }
0x14c8   :  { %v7141_v19 = vld [vmem:[%s9035_s12 + $0x4] sm:$0xf0] }
0x14d3   :  { %v3777_v45 = vpop.f32.mrf.mxu2 }
0x14d5   :  { %v3758_v60 = vpop.f32.mrf.mxu1 }
0x14d6   :  { %v3839_v56 = vpack.c.bf16 %v3758_v60, %v3739_v0  ;;  %v6655_v60 = vor.u32 %v7141_v19, %v6654_v40 }
0x14d8   :  { %6636 = vmatmul.msk.bf16.vlgmr.msrb.gmra.mxu2 %vm502_vm11, %v3839_v56  ;;  %v6656_v56 = vld [vmem:[%s9035_s12 + $0x8] sm:$0xf0] }
0x14db   :  { %v3779_v63 = vpop.f32.mrf.mxu2 }
0x14dd   :  { %v3760_v25 = vpop.f32.mrf.mxu1 }
0x14e3   :  { %v3796_v8 = vpop.f32.mrf.mxu3 }
0x14e4   :  { %v3886_v1 = vpack.c.bf16 %v3796_v8, %v3777_v45  ;;  %v7140_v45 = vld [vmem:[%s9035_s12 + $0x4] sm:$0xf] }
0x14e5   :  { %v6659_v25 = vor.u32 %v7140_v45, %v6656_v56 }
0x14e6   :  { %6646 = vmatmul.msk.bf16.vlgmr.msra.gmra.mxu0 %vm502_vm11, %v3886_v1 }
0x14e7   :  { %4053 = vmatpush.bf16.msra.mxu3 %v6659_v25 }
0x14eb   :  { %v3798_v2 = vpop.f32.mrf.mxu3 }
0x14f3   :  { %v3881_v9 = vpop.f32.mrf.mxu3 }
0x14f6   :  { %v3834_v11 = vpop.f32.mrf.mxu1 }
0x14fb   :  { %v3883_v21 = vpop.f32.mrf.mxu3 }
0x14fd   :  { %v3815_v5 = vpop.f32.mrf.mxu0 }
0x14fe   :  { %v3912_v4 = vpack.c.bf16 %v3834_v11, %v3815_v5  ;;  %v3836_v6 = vpop.f32.mrf.mxu1 }
0x1500   :  { %6651 = vmatmul.msk.bf16.vlgmr.msra.gmra.mxu1 %vm502_vm11, %v3912_v4 }
0x1505   :  { %v3817_v10 = vpop.f32.mrf.mxu0 }
0x155b   :  { %v3858_v20 = vpop.f32.mrf.mxu2 }
0x155c   :  { %v3882_v7 = vadd.f32 %v3881_v9, %v3858_v20 }
0x1563   :  { %v3905_v62 = vpop.f32.mrf.mxu0  ;;  %v3860_v15 = vpop.f32.mrf.mxu2 }
0x1564   :  { %v3910_v41 = vadd.f32 %v3905_v62, %v3882_v7  ;;  %v3884_v12 = vadd.f32 %v3883_v21, %v3860_v15  ;;  %v7253_v15 = vld [vmem:[%s9036_s1] ss:$0 sm:$0xff] }
0x156b   :  { %v3907_v23 = vpop.f32.mrf.mxu0 }
0x156c   :  { %v3911_v27 = vadd.f32 %v3907_v23, %v3884_v12 }
0x157d   :  { %v3931_v54 = vpop.f32.mrf.mxu1 }
0x157e   :  { %v3936_v48 = vadd.f32 %v3931_v54, %v3910_v41 }
0x1580   :  { %v8593_v17 = vadd.f32 %v3936_v48, %v8471_v29 }
0x1582   :  { %v3941_v26 = vmul.f32 %v8593_v17, %v8593_v17 }
0x1584   :  { %v3943_v3 = vsel %vm259_vm3, %v3941_v26, 0.0 }
0x1585   :  { %3944 = vadd.xlane.f32.xlu1 %v3943_v3  ;;  %v3933_v24 = vpop.f32.mrf.mxu1 }
0x1586   :  { %v3937_v33 = vadd.f32 %v3933_v24, %v3911_v27  ;;  %v7155_v24 = vld [vmem:[%s9037_s2 + $0x38] sm:$0xff] }
0x1587   :  { %4145 = vmatpush.bf16.msrb.mxu0 %v7155_v24 }
0x1588   :  { %v8599_v29 = vadd.f32 %v3937_v33, %v8477_v53  ;;  %v6670_v53 = vld [vmem:[%s9035_s12 + $0x20] sm:$0xf]  ;;  %v7154_v33 = vld [vmem:[%s9037_s2 + $0x30] sm:$0xff] }
0x1589   :  { %v6671_v49 = vor.u32 %v7145_v61, %v6670_v53 }
0x158a   :  { %v3942_v34 = vmul.f32 %v8599_v29, %v8599_v29 }
0x158b   :  { %4037 = vmatpush.bf16.msra.mxu2 %v6671_v49  ;;  %4146 = vmatpush.bf16.msrb.mxu0 %v7154_v33 }
0x158c   :  { %v3946_v57 = vsel %vm259_vm3, %v3942_v34, 0.0  ;;  %v7153_v34 = vld [vmem:[%s9037_s2 + $0x28] sm:$0xff] }
0x158d   :  { %3947 = vadd.xlane.f32.xlu0 %v3946_v57  ;;  %v7152_v57 = vld [vmem:[%s9037_s2 + $0x20] sm:$0xff] }
0x158f   :  { %4038 = vmatpush.bf16.msra.mxu2 %v6663_v55  ;;  %4147 = vmatpush.bf16.msrb.mxu0 %v7153_v34 }
0x1593   :  { %4039 = vmatpush.bf16.msra.mxu2 %v6655_v60  ;;  %4148 = vmatpush.bf16.msrb.mxu0 %v7152_v57 }
0x1597   :  { %4149 = vmatpush.bf16.msrb.mxu0 %v7151_v36 }
0x159b   :  { %4150 = vmatpush.bf16.msrb.mxu0 %v7150_v42 }
0x159f   :  { %4151 = vmatpush.bf16.msrb.mxu0 %v7149_v44 }
0x15a3   :  { %4152 = vmatpush.bf16.msrb.mxu0 %v7148_v47 }
0x15f8   :  { %v3945_v28 = vpop.xlane.xlu1 %3944 }
0x15f9   :  { %v3949_v0 = vmul.f32 %v3945_v28, %v7829_v37 }
0x15fb   :  { %v3951_v63 = vadd.f32 1e-06, %v3949_v0 }
0x15fd   :  { %7424 = vrsqrt.f32 %v3951_v63  ;;  %vm3959_vm2 = vweird.f32 %v3951_v63 }
0x1600   :  { %v3948_v16 = vpop.xlane.xlu0 %3947 }
0x1601   :  { %v3950_v8 = vmul.f32 %v3948_v16, %v7829_v37 }
0x1603   :  { %v7425_v1 = vpop.eup %7424  ;;  %v3952_v2 = vadd.f32 1e-06, %v3950_v8 }
0x1604   :  { %v3954_v11 = vmul.f32 %v7425_v1, %v3951_v63  ;;  %vm3960_vm1 = vweird.f32 %v7425_v1 }
0x1605   :  { %7426 = vrsqrt.f32 %v3952_v2  ;;  %vm3961_vm4 = vmor %vm3959_vm2, %vm3960_vm1  ;;  %vm3969_vm6 = vweird.f32 %v3952_v2 }
0x1606   :  { %v3955_v5 = vmul.f32 %v7425_v1, %v3954_v11 }
0x1608   :  { %v3956_v4 = vmul.f32 0.5, %v3955_v5 }
0x160a   :  { %v3957_v6 = vsub.f32 1.5, %v3956_v4 }
0x160b   :  { %v7427_v10 = vpop.eup %7426 }
0x160c   :  { %v3964_v20 = vmul.f32 %v7427_v10, %v3952_v2  ;;  %v3958_v9 = vmul.f32 %v7425_v1, %v3957_v6  ;;  %vm3970_vm5 = vweird.f32 %v7427_v10 }
0x160d   :  { %vm3971_vm7 = vmor %vm3969_vm6, %vm3970_vm5 }
0x160e   :  { %v3965_v62 = vmul.f32 %v7427_v10, %v3964_v20  ;;  %v3962_v41 = vsel %vm3961_vm4, %v7425_v1, %v3958_v9  ;;  %v7159_v20 = vld [vmem:[%s9025_s17 + $0x38] sm:$0xff] }
0x160f   :  { %v3973_v21 = vmul.f32 %v3962_v41, %v8593_v17  ;;  %v7163_v9 = vld [vmem:[%s7723_s13 + $0x38] sm:$0xff]  ;;  %4243 = vmatpush.bf16.msrb.mxu1 %v7159_v20  ;;  %v7166_v41 = vld [vmem:[%s9029_s8 + $0x30] sm:$0xff] }
0x1610   :  { %v3966_v7 = vmul.f32 0.5, %v3965_v62  ;;  %v7167_v62 = vld [vmem:[%s9029_s8 + $0x38] sm:$0xff]  ;;  %4306 = vmatpush.bf16.msrb.mxu2 %v7163_v9 }
0x1611   :  { %v3978_v26 = vmul.f32 %v7253_v15, %v3973_v21  ;;  %4369 = vmatpush.bf16.msrb.mxu3 %v7167_v62 }
0x1612   :  { %v3967_v54 = vsub.f32 1.5, %v3966_v7  ;;  %v7158_v7 = vld [vmem:[%s9025_s17 + $0x30] sm:$0xff] }
0x1613   :  { %4244 = vmatpush.bf16.msrb.mxu1 %v7158_v7 }
0x1614   :  { %v3968_v48 = vmul.f32 %v7427_v10, %v3967_v54  ;;  %v7157_v54 = vld [vmem:[%s9025_s17 + $0x28] sm:$0xff] }
0x1615   :  { %4370 = vmatpush.bf16.msrb.mxu3 %v7166_v41 }
0x1616   :  { %v3972_v23 = vsel %vm3971_vm7, %v7427_v10, %v3968_v48  ;;  %v7161_v48 = vld [vmem:[%s7723_s13 + $0x28] sm:$0xff] }
0x1617   :  { %v3974_v12 = vmul.f32 %v3972_v23, %v8599_v29  ;;  %4245 = vmatpush.bf16.msrb.mxu1 %v7157_v54 }
0x1619   :  { %v3979_v27 = vmul.f32 %v7253_v15, %v3974_v12  ;;  %v7165_v15 = vld [vmem:[%s9029_s8 + $0x28] sm:$0xff]  ;;  %v7156_v12 = vld [vmem:[%s9025_s17 + $0x20] sm:$0xff] }
0x161a   :  { %4371 = vmatpush.bf16.msrb.mxu3 %v7165_v15 }
0x161b   :  { %v3980_v3 = vpack.c.bf16 %v3979_v27, %v3978_v26  ;;  %v7160_v26 = vld [vmem:[%s7723_s13 + $0x20] sm:$0xff]  ;;  %4246 = vmatpush.bf16.msrb.mxu1 %v7156_v12 }
0x161c   :  { %v7164_v27 = vld [vmem:[%s9029_s8 + $0x20] sm:$0xff] }
0x161d   :  { %6684 = vmatmul.msk.bf16.vlgmr.msra.gmra.mxu2 %vm259_vm3, %v3980_v3  ;;  %6685 = vmatmul.msk.bf16.vlgmr.msra.gmra.mxu3 %vm259_vm3, %v3980_v3 }
0x161e   :  { %4372 = vmatpush.bf16.msrb.mxu3 %v7164_v27  ;;  %v7526_v27 = vld [vmem:[%s9030_s14] sm:$0xff] }
0x16a0   :  { %v4041_v38 = vpop.f32.mrf.mxu2  ;;  %v4055_v28 = vpop.f32.mrf.mxu3 }
0x16a1   :  { %v4060_v43 = vmul.f32 %v4041_v38, %v4041_v38 }
0x16a3   :  { %v4062_v53 = vmul.f32 %v4060_v43, %v4041_v38 }
0x16a5   :  { %v4064_v61 = vmul.f32 0.044715, %v4062_v53 }
0x16a7   :  { %v4066_v30 = vadd.f32 %v4064_v61, %v4041_v38 }
0x16a8   :  { %v4043_v49 = vpop.f32.mrf.mxu2  ;;  %v4057_v63 = vpop.f32.mrf.mxu3 }
0x16a9   :  { %v4068_v46 = vmul.f32 0.7978846, %v4066_v30  ;;  %v4061_v50 = vmul.f32 %v4043_v49, %v4043_v49 }
0x16ab   :  { %7428 = vtanh.f32 %v4068_v46  ;;  %v4063_v14 = vmul.f32 %v4061_v50, %v4043_v49 }
0x16ad   :  { %v4065_v18 = vmul.f32 0.044715, %v4063_v14  ;;  %v7254_v14 = vld [vmem:[%s9024_s9 + $0x1] ss:$0 sm:$0xff] }
0x16af   :  { %v4067_v59 = vadd.f32 %v4065_v18, %v4043_v49 }
0x16b1   :  { %v7429_v55 = vpop.eup %7428  ;;  %v4069_v52 = vmul.f32 0.7978846, %v4067_v59 }
0x16b2   :  { %v4072_v22 = vadd.f32 1.0, %v7429_v55 }
0x16b3   :  { %7430 = vtanh.f32 %v4069_v52 }
0x16b4   :  { %v4074_v0 = vmul.f32 0.5, %v4072_v22 }
0x16b6   :  { %v4076_v45 = vmul.f32 %v4074_v0, %v4041_v38 }
0x16b8   :  { %v4078_v25 = vmul.f32 %v4076_v45, %v4055_v28 }
0x16b9   :  { %v7431_v40 = vpop.eup %7430 }
0x16ba   :  { %v4073_v19 = vadd.f32 1.0, %v7431_v40 }
0x16bc   :  { %v4075_v60 = vmul.f32 0.5, %v4073_v19 }
0x16be   :  { %v4077_v56 = vmul.f32 %v4075_v60, %v4043_v49 }
0x16c0   :  { %v4079_v16 = vmul.f32 %v4077_v56, %v4057_v63 }
0x16c2   :  { %v4096_v8 = vpack.c.bf16 %v4079_v16, %v4078_v25 }
0x16c4   :  { %4153 = vmatmul.bf16.vlgmr.msrb.gmra.mxu0 %v4096_v8 }
0x1741   :  { %v4154_v1 = vpop.f32.mrf.mxu0 }
0x1742   :  { %v8636_v2 = vadd.f32 %v4154_v1, %v8593_v17 }
0x1744   :  { %v4163_v11 = vmul.f32 %v8636_v2, %v8636_v2 }
0x1746   :  { %v4165_v5 = vsel %vm259_vm3, %v4163_v11, 0.0 }
0x1747   :  { %4166 = vadd.xlane.f32.xlu2 %v4165_v5 }
0x1749   :  { %v4156_v4 = vpop.f32.mrf.mxu0 }
0x174a   :  { %v8642_v6 = vadd.f32 %v4156_v4, %v8599_v29  ;;  %v7162_v29 = vld [vmem:[%s7723_s13 + $0x30] sm:$0xff]  ;;  %s9038_s13 = sld [smem:[#allocation8_spill]] }
0x174b   :  { %4307 = vmatpush.bf16.msrb.mxu2 %v7162_v29 }
0x174c   :  { %v4164_v10 = vmul.f32 %v8642_v6, %v8642_v6 }
0x174e   :  { %v4168_v17 = vsel %vm259_vm3, %v4164_v10, 0.0 }
0x174f   :  { %4169 = vadd.xlane.f32.xlu0 %v4168_v17  ;;  %4308 = vmatpush.bf16.msrb.mxu2 %v7161_v48 }
0x1753   :  { %4309 = vmatpush.bf16.msrb.mxu2 %v7160_v26 }
0x17ba   :  { %v4167_v21 = vpop.xlane.xlu2 %4166 }
0x17bb   :  { %v4171_v23 = vmul.f32 %v4167_v21, %v7829_v37 }
0x17bd   :  { %v4173_v3 = vadd.f32 1e-06, %v4171_v23 }
0x17bf   :  { %7432 = vrsqrt.f32 %v4173_v3  ;;  %vm4181_vm9 = vweird.f32 %v4173_v3 }
0x17c2   :  { %v4170_v24 = vpop.xlane.xlu0 %4169 }
0x17c3   :  { %v4172_v33 = vmul.f32 %v4170_v24, %v7829_v37 }
0x17c5   :  { %v7433_v34 = vpop.eup %7432  ;;  %v4174_v57 = vadd.f32 1e-06, %v4172_v33 }
0x17c6   :  { %v4176_v36 = vmul.f32 %v7433_v34, %v4173_v3  ;;  %vm4182_vm8 = vweird.f32 %v7433_v34 }
0x17c7   :  { %7434 = vrsqrt.f32 %v4174_v57  ;;  %vm4183_vm10 = vmor %vm4181_vm9, %vm4182_vm8  ;;  %vm4191_vm15 = vweird.f32 %v4174_v57 }
0x17c8   :  { %v4177_v42 = vmul.f32 %v7433_v34, %v4176_v36 }
0x17ca   :  { %v4178_v44 = vmul.f32 0.5, %v4177_v42 }
0x17cc   :  { %v4179_v38 = vsub.f32 1.5, %v4178_v44 }
0x17cd   :  { %v7435_v43 = vpop.eup %7434 }
0x17ce   :  { %v4186_v47 = vmul.f32 %v7435_v43, %v4174_v57  ;;  %v4180_v53 = vmul.f32 %v7433_v34, %v4179_v38  ;;  %vm4192_vm14 = vweird.f32 %v7435_v43 }
0x17cf   :  { %vm4193_vm0 = vmor %vm4191_vm15, %vm4192_vm14 }
0x17d0   :  { %v4187_v61 = vmul.f32 %v7435_v43, %v4186_v47  ;;  %v4184_v49 = vsel %vm4183_vm10, %v7433_v34, %v4180_v53 }
0x17d1   :  { %v4195_v18 = vmul.f32 %v4184_v49, %v8636_v2 }
0x17d2   :  { %v4188_v30 = vmul.f32 0.5, %v4187_v61 }
0x17d3   :  { %v4200_v52 = vmul.f32 %v7254_v14, %v4195_v18 }
0x17d4   :  { %v4189_v46 = vsub.f32 1.5, %v4188_v30 }
0x17d6   :  { %v4190_v50 = vmul.f32 %v7435_v43, %v4189_v46 }
0x17d8   :  { %v4194_v59 = vsel %vm4193_vm0, %v7435_v43, %v4190_v50 }
0x17d9   :  { %v4196_v55 = vmul.f32 %v4194_v59, %v8642_v6  ;;  %v7527_v59 = vld [vmem:[%s9030_s14 + $0x8] sm:$0xff] }
0x17db   :  { %v4201_v22 = vmul.f32 %v7254_v14, %v4196_v55 }
0x17dd   :  { %v4202_v28 = vpack.c.bf16 %v4201_v22, %v4200_v52 }
0x17df   :  { %6743 = vmatmul.msk.bf16.vlgmr.msrb.gmra.mxu1 %vm259_vm3, %v4202_v28  ;;  %6768 = vmatmul.msk.bf16.vlgmr.msrb.gmra.mxu2 %vm259_vm3, %v4202_v28 }
0x17e0   :  { %6793 = vmatmul.msk.bf16.vlgmr.msrb.gmra.mxu3 %vm259_vm3, %v4202_v28  ;;  %v7528_v28 = vld [vmem:[%s9030_s14 + $0x10] sm:$0xff] }
0x185c   :  { %v4248_v0 = vpop.f32.mrf.mxu1 }
0x185d   :  { %v4253_v40 = vpack.c.bf16 %v4248_v0, %v4248_v0 }
0x185f   :  { %4257 = vrot.lane.b32.xlu0 %v4253_v40, %s7617_s0 }
0x1862   :  { %v4311_v19 = vpop.f32.mrf.mxu2 }
0x1863   :  { %v4316_v45 = vpack.c.bf16 %v4311_v19, %v4311_v19  ;;  %v4374_v4 = vpop.f32.mrf.mxu3 }
0x1864   :  { %v4250_v56 = vpop.f32.mrf.mxu1  ;;  %v8696_v24 = vpack.c.bf16 %v4374_v4, %v4374_v4 }
0x1865   :  { %4320 = vrot.lane.b32.xlu2 %v4316_v45, %s7617_s0  ;;  %v4408_v60 = vsel %vm502_vm11, %v4316_v45, 0  ;;  %v4254_v16 = vpack.c.bf16 %v4250_v56, %v4250_v56 }
0x1866   :  { %4417 = vmatpush.bf16.xpose.msra.mxu1 %v4408_v60  ;;  %v4656_v36 = vsel %vm755_vm12, %v8696_v24, 0 }
0x186a   :  { %v4313_v63 = vpop.f32.mrf.mxu2 }
0x186b   :  { %v4317_v25 = vpack.c.bf16 %v4313_v63, %v4313_v63  ;;  %v4376_v9 = vpop.f32.mrf.mxu3 }
0x186c   :  { %v8685_v62 = vpack.c.bf16 %v4376_v9, %v4376_v9 }
0x186d   :  { %4322 = vrot.lane.b32.xlu1 %v4317_v25, %s7617_s0  ;;  %4326 = vrot.lane.b32.xlu0 %v4317_v25, %s7619_s28  ;;  %v4427_v8 = vsel %vm502_vm11, %v4317_v25, 0 }
0x186e   :  { %6802 = vmatmul.msk.bf16.vlgmr.msra.gmra.mxu1 %vm502_vm11, %v4253_v40  ;;  %4263 = vrot.lane.b32.xlu2 %v4254_v16, %s7619_s28  ;;  %v4675_v21 = vsel %vm755_vm12, %v8685_v62, 0 }
0x186f   :  { %4436 = vmatpush.bf16.xpose.msra.mxu2 %v4427_v8 }
0x1875   :  { %4328 = vrot.lane.b32.xlu0 %v4316_v45, %s7618_s5  ;;  %4267 = vrot.lane.b32.xlu1 %v4254_v16, %s7618_s5 }
0x1876   :  { %4259 = vrot.lane.b32.xlu2 %v4254_v16, %s7617_s0  ;;  %6803 = vmatmul.msk.bf16.vlgmr.msra.gmra.mxu2 %vm502_vm11, %v4254_v16 }
0x187d   :  { %4324 = vrot.lane.b32.xlu0 %v4316_v45, %s7619_s28 }
0x187e   :  { %4265 = vrot.lane.b32.xlu2 %v4253_v40, %s7618_s5 }
0x1885   :  { %4261 = vrot.lane.b32.xlu0 %v4253_v40, %s7619_s28 }
0x1886   :  { %4330 = vrot.lane.b32.xlu2 %v4317_v25, %s7618_s5  ;;  %v7529_v25 = vld [vmem:[%s9030_s14 + $0x18] sm:$0xff] }
0x18bf   :  { %v4321_v1 = vpop.permute.xlu2 %4320 }
0x18c0   :  { %v4446_v11 = vsel %vm502_vm11, %v4321_v1, 0 }
0x18c1   :  { %4455 = vmatpush.bf16.xpose.msra.mxu3 %v4446_v11 }
0x18c8   :  { %v4264_v5 = vpop.permute.xlu2 %4263 }
0x18d0   :  { %v4260_v10 = vpop.permute.xlu2 %4259 }
0x18d1   :  { %v4258_v17 = vpop.permute.xlu0 %4257 }
0x18d2   :  { %6804 = vmatmul.msk.bf16.vlgmr.msra.gmra.mxu3 %vm502_vm11, %v4258_v17 }
0x18d8   :  { %v4266_v20 = vpop.permute.xlu2 %4265 }
0x18df   :  { %v4323_v7 = vpop.permute.xlu1 %4322  ;;  %v4327_v29 = vpop.permute.xlu0 %4326 }
0x18e0   :  { %v4465_v41 = vsel %vm502_vm11, %v4323_v7, 0  ;;  %v4503_v54 = vsel %vm502_vm11, %v4327_v29, 0  ;;  %v4331_v48 = vpop.permute.xlu2 %4330 }
0x18e1   :  { %v4541_v15 = vsel %vm502_vm11, %v4331_v48, 0  ;;  %4474 = vmatpush.bf16.xpose.msra.mxu0 %v4465_v41  ;;  %4512 = vmatpush.bf16.xpose.msrb.mxu2 %v4503_v54 }
0x18e7   :  { %v4329_v23 = vpop.permute.xlu0 %4328  ;;  %v4268_v44 = vpop.permute.xlu1 %4267 }
0x18e8   :  { %v4522_v12 = vsel %vm502_vm11, %v4329_v23, 0  ;;  %6805 = vmatmul.msk.bf16.vlgmr.msra.gmra.mxu0 %vm502_vm11, %v4260_v10  ;;  %6807 = vmatmul.msk.bf16.vlgmr.msrb.gmra.mxu2 %vm502_vm11, %v4264_v5 }
0x18e9   :  { %4550 = vmatpush.bf16.xpose.msrb.mxu0 %v4541_v15  ;;  %4684 = vmatpush.bf16.msra.mxu2 %v4675_v21 }
0x18ea   :  { %4531 = vmatpush.bf16.xpose.msrb.mxu3 %v4522_v12 }
0x18eb   :  { %v4419_v26 = vpop.f32.mrf.mxu1 }
0x18ec   :  { %v4420_v3 = vadd.f32 %v7526_v27, %v4419_v26 }
0x18ee   :  { %v4556_v33 = vsel %vm655_vm13, %v4420_v3, -inf }
0x18ef   :  { %4557 = vmax.xlane.f32.xlu2 %v4556_v33  ;;  %v4325_v34 = vpop.permute.xlu0 %4324 }
0x18f0   :  { %v4484_v57 = vsel %vm502_vm11, %v4325_v34, 0 }
0x18f1   :  { %6808 = vmatmul.msk.bf16.vlgmr.msrb.gmra.mxu3 %vm502_vm11, %v4266_v20  ;;  %4493 = vmatpush.bf16.xpose.msrb.mxu1 %v4484_v57 }
0x18f3   :  { %v4421_v42 = vpop.f32.mrf.mxu1 }
0x18f7   :  { %v4262_v38 = vpop.permute.xlu0 %4261 }
0x18f8   :  { %6806 = vmatmul.msk.bf16.vlgmr.msrb.gmra.mxu1 %vm502_vm11, %v4262_v38  ;;  %6809 = vmatmul.msk.bf16.vlgmr.msrb.gmra.mxu0 %vm502_vm11, %v4268_v44 }
0x18f9   :  { %4665 = vmatpush.bf16.msra.mxu1 %v4656_v36  ;;  %v4438_v43 = vpop.f32.mrf.mxu2 }
0x18fa   :  { %v4439_v47 = vadd.f32 %v7526_v27, %v4438_v43 }
0x18fc   :  { %v4559_v53 = vsel %vm655_vm13, %v4439_v47, -inf }
0x18fd   :  { %4560 = vmax.xlane.f32.xlu0 %v4559_v53 }
0x1901   :  { %v4440_v61 = vpop.f32.mrf.mxu2 }
0x1955   :  { %v4457_v30 = vpop.f32.mrf.mxu3 }
0x1956   :  { %v4458_v17 = vadd.f32 %v7527_v59, %v4457_v30 }
0x1958   :  { %v4562_v7 = vsel %vm655_vm13, %v4458_v17, -inf }
0x195d   :  { %v4459_v49 = vpop.f32.mrf.mxu3 }
0x1962   :  { %v4558_v46 = vpop.xlane.xlu2 %4557 }
0x1963   :  { %v4580_v50 = vsub.f32 %v4420_v3, %v4558_v46 }
0x1965   :  { %v4588_v14 = vmul.f32 1.442695, %v4580_v50  ;;  %v4476_v18 = vpop.f32.mrf.mxu0 }
0x1966   :  { %v4477_v55 = vadd.f32 %v7527_v59, %v4476_v18 }
0x1967   :  { %7436 = vpow2.f32 %v4588_v14 }
0x1968   :  { %v4565_v52 = vsel %vm655_vm13, %v4477_v55, -inf }
0x1969   :  { %4566 = vmax.xlane.f32.xlu0 %v4565_v52 }
0x196b   :  { %v4514_v22 = vpop.f32.mrf.mxu2 }
0x196c   :  { %v8709_v0 = vadd.f32 %v7528_v28, %v4514_v22 }
0x196d   :  { %v7437_v40 = vpop.eup %7436  ;;  %v4478_v19 = vpop.f32.mrf.mxu0 }
0x196e   :  { %v4571_v45 = vsel %vm655_vm13, %v8709_v0, -inf  ;;  %v4604_v60 = vsel %vm655_vm13, %v7437_v40, 0.0 }
0x196f   :  { %4572 = vmax.xlane.f32.xlu2 %v4571_v45 }
0x1970   :  { %v4561_v41 = vpop.xlane.xlu0 %4560 }
0x1971   :  { %4605 = vadd.xlane.f32.xlu0 %v4604_v60  ;;  %v4581_v48 = vsub.f32 %v4439_v47, %v4561_v41 }
0x1973   :  { %v4516_v56 = vpop.f32.mrf.mxu2  ;;  %v4590_v15 = vmul.f32 1.442695, %v4581_v48 }
0x1974   :  { %v4533_v63 = vpop.f32.mrf.mxu3 }
0x1975   :  { %v4534_v16 = vadd.f32 %v7529_v25, %v4533_v63  ;;  %v4495_v8 = vpop.f32.mrf.mxu1  ;;  %v4552_v1 = vpop.f32.mrf.mxu0  ;;  %7438 = vpow2.f32 %v4590_v15 }
0x1976   :  { %v4496_v11 = vadd.f32 %v7528_v28, %v4495_v8  ;;  %v8724_v29 = vadd.f32 %v7529_v25, %v4552_v1 }
0x1977   :  { %v4574_v4 = vsel %vm655_vm13, %v4534_v16, -inf }
0x1978   :  { %v4568_v5 = vsel %vm655_vm13, %v4496_v11, -inf  ;;  %v4577_v54 = vsel %vm655_vm13, %v8724_v29, -inf }
0x1979   :  { %4569 = vmax.xlane.f32.xlu1 %v4568_v5  ;;  %4575 = vmax.xlane.f32.xlu0 %v4574_v4 }
0x197b   :  { %v8728_v21 = vpop.eup %7438 }
0x197c   :  { %v4535_v10 = vpop.f32.mrf.mxu3  ;;  %v4607_v23 = vsel %vm655_vm13, %v8728_v21, 0.0 }
0x197d   :  { %v4497_v20 = vpop.f32.mrf.mxu1  ;;  %v4554_v9 = vpop.f32.mrf.mxu0 }
0x197e   :  { %v8763_v9 = vpack.c.bf16 %v8365_v58, %v8365_v58 }
0x1981   :  { %4563 = vmax.xlane.f32.xlu1 %v4562_v7 }
0x1987   :  { %4389 = vrot.lane.b32.xlu2 %v8685_v62, %s7619_s28 }
0x198d   :  { %4383 = vrot.lane.b32.xlu0 %v8696_v24, %s7617_s0 }
0x199a   :  { %4385 = vrot.lane.b32.xlu1 %v8685_v62, %s7617_s0 }
0x19b0   :  { %4578 = vmax.xlane.f32.xlu2 %v4577_v54  ;;  %v7168_v54 = vld [vmem:[%s9031_s19 + $0x20] sm:$0xff] }
0x19c4   :  { %4608 = vadd.xlane.f32.xlu1 %v4607_v23 }
0x19dc   :  { %v4567_v12 = vpop.xlane.xlu0 %4566 }
0x19dd   :  { %v4583_v26 = vsub.f32 %v4477_v55, %v4567_v12 }
0x19df   :  { %v4594_v27 = vmul.f32 1.442695, %v4583_v26 }
0x19e1   :  { %7440 = vpow2.f32 %v4594_v27 }
0x19e2   :  { %v4573_v3 = vpop.xlane.xlu2 %4572 }
0x19e3   :  { %v4585_v59 = vsub.f32 %v8709_v0, %v4573_v3 }
0x19e4   :  { %v4606_v33 = vpop.xlane.xlu0 %4605 }
0x19e5   :  { %7442 = vrcp.f32 %v4606_v33 }
0x19e7   :  { %v8732_v34 = vpop.eup %7440 }
0x19e8   :  { %v4613_v57 = vsel %vm655_vm13, %v8732_v34, 0.0 }
0x19e9   :  { %4614 = vadd.xlane.f32.xlu1 %v4613_v57 }
0x19ea   :  { %v4390_v36 = vpop.permute.xlu2 %4389 }
0x19eb   :  { %v7443_v42 = vpop.eup %7442  ;;  %v4751_v44 = vsel %vm755_vm12, %v4390_v36, 0 }
0x19ec   :  { %v4636_v38 = vmul.f32 %v7443_v42, %v7437_v40  ;;  %v4570_v43 = vpop.xlane.xlu1 %4569  ;;  %4760 = vmatpush.bf16.msrb.mxu2 %v4751_v44  ;;  %v4576_v47 = vpop.xlane.xlu0 %4575  ;;  %v4598_v40 = vmul.f32 1.442695, %v4585_v59  ;;  %v5046_v59 = vsel %vm502_vm11, %v8763_v9, 0 }
0x19ed   :  { %v4584_v53 = vsub.f32 %v4496_v11, %v4570_v43  ;;  %v4586_v61 = vsub.f32 %v4534_v16, %v4576_v47  ;;  %v8776_v43 = vpack.c.bf16 %v8356_v31, %v8356_v31 }
0x19ee   :  { %v4644_v30 = vpack.c.bf16 %v4636_v38, %v4636_v38  ;;  %v7170_v38 = vld [vmem:[%s9031_s19 + $0x30] sm:$0xff] }
0x19ef   :  { %v4596_v49 = vmul.f32 1.442695, %v4584_v53  ;;  %v4600_v46 = vmul.f32 1.442695, %v4586_v61 }
0x19f0   :  { %6810 = vmatmul.msk.bf16.vlgmr.msra.gmra.mxu1 %vm655_vm13, %v4644_v30 }
0x19f1   :  { %7444 = vpow2.f32 %v4596_v49 }
0x19f2   :  { %7446 = vpow2.f32 %v4600_v46  ;;  %v5027_v46 = vsel %vm502_vm11, %v8776_v43, 0 }
0x19f4   :  { %v4564_v50 = vpop.xlane.xlu1 %4563 }
0x19f5   :  { %v4582_v14 = vsub.f32 %v4458_v17, %v4564_v50 }
0x19f7   :  { %v7445_v18 = vpop.eup %7444  ;;  %v4592_v55 = vmul.f32 1.442695, %v4582_v14 }
0x19f8   :  { %v8739_v52 = vpop.eup %7446  ;;  %v4616_v22 = vsel %vm655_vm13, %v7445_v18, 0.0 }
0x19f9   :  { %7448 = vpow2.f32 %v4592_v55  ;;  %4617 = vadd.xlane.f32.xlu2 %v4616_v22  ;;  %v4622_v28 = vsel %vm655_vm13, %v8739_v52, 0.0 }
0x19fa   :  { %4623 = vadd.xlane.f32.xlu0 %v4622_v28  ;;  %7450 = vpow2.f32 %v4598_v40 }
0x19ff   :  { %v7449_v19 = vpop.eup %7448  ;;  %v4384_v45 = vpop.permute.xlu0 %4383 }
0x1a00   :  { %v4694_v60 = vsel %vm755_vm12, %v4384_v45, 0  ;;  %v4610_v56 = vsel %vm655_vm13, %v7449_v19, 0.0  ;;  %v7451_v0 = vpop.eup %7450 }
0x1a01   :  { %4611 = vadd.xlane.f32.xlu2 %v4610_v56  ;;  %4703 = vmatpush.bf16.msra.mxu3 %v4694_v60  ;;  %v4619_v63 = vsel %vm655_vm13, %v7451_v0, 0.0  ;;  %v7169_v60 = vld [vmem:[%s9031_s19 + $0x28] sm:$0xff]  ;;  %v7175_v56 = vld [vmem:[%s9032_s24 + $0x38] sm:$0xff] }
0x1a02   :  { %4387 = vrot.lane.b32.xlu1 %v8696_v24, %s7619_s28 }
0x1a09   :  { %4620 = vadd.xlane.f32.xlu2 %v4619_v63  ;;  %v7173_v63 = vld [vmem:[%s9032_s24 + $0x28] sm:$0xff] }
0x1a0c   :  { %v4386_v25 = vpop.permute.xlu1 %4385 }
0x1a0d   :  { %v4713_v16 = vsel %vm755_vm12, %v4386_v25, 0  ;;  %v7172_v25 = vld [vmem:[%s9032_s24 + $0x20] sm:$0xff] }
0x1a0e   :  { %4722 = vmatpush.bf16.msra.mxu0 %v4713_v16 }
0x1a21   :  { %4391 = vrot.lane.b32.xlu2 %v8696_v24, %s7618_s5 }
0x1a23   :  { %v4579_v8 = vpop.xlane.xlu2 %4578 }
0x1a24   :  { %v4587_v1 = vsub.f32 %v8724_v29, %v4579_v8 }
0x1a26   :  { %v4602_v11 = vmul.f32 1.442695, %v4587_v1 }
0x1a28   :  { %7452 = vpow2.f32 %v4602_v11 }
0x1a29   :  { %4393 = vrot.lane.b32.xlu2 %v8685_v62, %s7618_s5 }
0x1a2e   :  { %v8755_v5 = vpop.eup %7452 }
0x1a2f   :  { %v4625_v4 = vsel %vm655_vm13, %v8755_v5, 0.0 }
0x1a30   :  { %4626 = vadd.xlane.f32.xlu1 %v4625_v4 }
0x1a37   :  { %v4609_v10 = vpop.xlane.xlu1 %4608 }
0x1a38   :  { %7454 = vrcp.f32 %v4609_v10 }
0x1a3e   :  { %v7455_v17 = vpop.eup %7454 }
0x1a3f   :  { %v4637_v24 = vmul.f32 %v7455_v17, %v8728_v21 }
0x1a41   :  { %v4645_v20 = vpack.c.bf16 %v4637_v24, %v4637_v24 }
0x1a43   :  { %6811 = vmatmul.msk.bf16.vlgmr.msra.gmra.mxu2 %vm655_vm13, %v4645_v20 }
0x1a44   :  { %4845 = vmatpush.bf16.msra.mxu2 %v7168_v54 }
0x1a49   :  { %2511 = vrot.lane.b32.xlu1 %v8763_v9, %s7617_s0 }
0x1a5c   :  { %v4615_v62 = vpop.xlane.xlu1 %4614 }
0x1a5d   :  { %7456 = vrcp.f32 %v4615_v62 }
0x1a63   :  { %v7457_v7 = vpop.eup %7456 }
0x1a64   :  { %v4639_v29 = vmul.f32 %v7457_v7, %v8732_v34  ;;  %v7171_v7 = vld [vmem:[%s9031_s19 + $0x38] sm:$0xff] }
0x1a66   :  { %v4647_v41 = vpack.c.bf16 %v4639_v29, %v4639_v29 }
0x1a68   :  { %6813 = vmatmul.msk.bf16.vlgmr.msra.gmra.mxu0 %vm655_vm13, %v4647_v41 }
0x1a6c   :  { %v4618_v48 = vpop.xlane.xlu2 %4617 }
0x1a6d   :  { %7458 = vrcp.f32 %v4618_v48  ;;  %v4667_v15 = vpop.f32.mrf.mxu1  ;;  %v4624_v36 = vpop.xlane.xlu0 %4623 }
0x1a73   :  { %v7459_v21 = vpop.eup %7458 }
0x1a74   :  { %v4640_v23 = vmul.f32 %v7459_v21, %v7445_v18  ;;  %v4612_v58 = vpop.xlane.xlu2 %4611  ;;  %v4388_v12 = vpop.permute.xlu1 %4387 }
0x1a75   :  { %7460 = vrcp.f32 %v4612_v58  ;;  %v4732_v26 = vsel %vm755_vm12, %v4388_v12, 0  ;;  %v4669_v27 = vpop.f32.mrf.mxu1 }
0x1a76   :  { %v4648_v3 = vpack.c.bf16 %v4640_v23, %v4640_v23  ;;  %4741 = vmatpush.bf16.msrb.mxu1 %v4732_v26 }
0x1a79   :  { %6814 = vmatmul.msk.bf16.vlgmr.msrb.gmra.mxu1 %vm655_vm13, %v4648_v3 }
0x1a7a   :  { %4822 = vmatpush.bf16.msra.mxu1 %v7169_v60 }
0x1a7b   :  { %v7461_v33 = vpop.eup %7460 }
0x1a7c   :  { %v4638_v34 = vmul.f32 %v7461_v33, %v7449_v19  ;;  %v4621_v57 = vpop.xlane.xlu2 %4620 }
0x1a7d   :  { %7462 = vrcp.f32 %v4621_v57 }
0x1a7e   :  { %v4646_v42 = vpack.c.bf16 %v4638_v34, %v4638_v34  ;;  %7464 = vrcp.f32 %v4624_v36  ;;  %4988 = vmatpush.bf16.msrb.mxu1 %v7175_v56 }
0x1a80   :  { %6812 = vmatmul.msk.bf16.vlgmr.msra.gmra.mxu3 %vm655_vm13, %v4646_v42 }
0x1a83   :  { %v7463_v44 = vpop.eup %7462 }
0x1a84   :  { %v4641_v47 = vmul.f32 %v7463_v44, %v7451_v0  ;;  %v4392_v53 = vpop.permute.xlu2 %4391  ;;  %v7465_v49 = vpop.eup %7464  ;;  %v7174_v0 = vld [vmem:[%s9032_s24 + $0x30] sm:$0xff] }
0x1a85   :  { %v4770_v61 = vsel %vm755_vm12, %v4392_v53, 0  ;;  %v4642_v50 = vmul.f32 %v7465_v49, %v8739_v52  ;;  %4989 = vmatpush.bf16.msrb.mxu1 %v7174_v0 }
0x1a86   :  { %v4649_v30 = vpack.c.bf16 %v4641_v47, %v4641_v47  ;;  %4779 = vmatpush.bf16.msrb.mxu3 %v4770_v61 }
0x1a87   :  { %v4650_v18 = vpack.c.bf16 %v4642_v50, %v4642_v50 }
0x1a88   :  { %6815 = vmatmul.msk.bf16.vlgmr.msrb.gmra.mxu2 %vm655_vm13, %v4649_v30 }
0x1a89   :  { %5036 = vmatpush.bf16.xpose.msrb.mxu2 %v5027_v46  ;;  %4990 = vmatpush.bf16.msrb.mxu1 %v7173_v63 }
0x1a8a   :  { %4869 = vmatpush.bf16.msra.mxu3 %v7170_v38 }
0x1a8c   :  { %v4394_v14 = vpop.permute.xlu2 %4393 }
0x1a8d   :  { %v4789_v31 = vsel %vm755_vm12, %v4394_v14, 0  ;;  %4991 = vmatpush.bf16.msrb.mxu1 %v7172_v25 }
0x1a8e   :  { %4798 = vmatpush.bf16.msrb.mxu0 %v4789_v31 }
0x1a90   :  { %6816 = vmatmul.msk.bf16.vlgmr.msrb.gmra.mxu3 %vm655_vm13, %v4650_v18 }
0x1a91   :  { %5055 = vmatpush.bf16.xpose.msrb.mxu3 %v5046_v59 }
0x1a92   :  { %4895 = vmatpush.bf16.msra.mxu0 %v7171_v7 }
0x1aa3   :  { %v4627_v55 = vpop.xlane.xlu1 %4626 }
0x1aa4   :  { %7466 = vrcp.f32 %v4627_v55 }
0x1aaa   :  { %v7467_v22 = vpop.eup %7466 }
0x1aab   :  { %v4643_v52 = vmul.f32 %v7467_v22, %v8755_v5 }
0x1aad   :  { %v4651_v28 = vpack.c.bf16 %v4643_v52, %v4643_v52 }
0x1aaf   :  { %6817 = vmatmul.msk.bf16.vlgmr.msrb.gmra.mxu0 %vm655_vm13, %v4651_v28 }
0x1abb   :  { %v2512_v5 = vpop.permute.xlu1 %2511 }
0x1abc   :  { %v5084_v17 = vsel %vm502_vm11, %v2512_v5, 0 }
0x1ac6   :  { %v4686_v40 = vpop.f32.mrf.mxu2 }
0x1ac7   :  { %v4804_v19 = vpack.c.bf16 %v4686_v40, %v4667_v15 }
0x1ac9   :  { %6827 = vmatmul.msk.bf16.vlgmr.msra.gmra.mxu2 %vm502_vm11, %v4804_v19 }
0x1ace   :  { %v4688_v45 = vpop.f32.mrf.mxu2 }
0x1ae5   :  { %v4724_v16 = vpop.f32.mrf.mxu0 }
0x1aed   :  { %v4726_v8 = vpop.f32.mrf.mxu0 }
0x1af6   :  { %v4743_v1 = vpop.f32.mrf.mxu1 }
0x1afe   :  { %v4745_v11 = vpop.f32.mrf.mxu1 }
0x1aff   :  { %v7255_v11 = vld [vmem:[%s9033_s30 + $0x1] ss:$0 sm:$0xff] }
0x1b03   :  { %v4705_v4 = vpop.f32.mrf.mxu3 }
0x1b04   :  { %v4805_v10 = vpack.c.bf16 %v4724_v16, %v4705_v4 }
0x1b06   :  { %6822 = vmatmul.msk.bf16.vlgmr.msra.gmra.mxu1 %vm502_vm11, %v4805_v10 }
0x1b07   :  { %5093 = vmatpush.bf16.xpose.msra.mxu1 %v5084_v17 }
0x1b0b   :  { %v4707_v24 = vpop.f32.mrf.mxu3  ;;  %v4762_v20 = vpop.f32.mrf.mxu2 }
0x1b0c   :  { %v4852_v62 = vpack.c.bf16 %v4762_v20, %v4743_v1 }
0x1b0e   :  { %6832 = vmatmul.msk.bf16.vlgmr.msra.gmra.mxu3 %vm502_vm11, %v4852_v62 }
0x1b13   :  { %v4764_v29 = vpop.f32.mrf.mxu2  ;;  %v4781_v41 = vpop.f32.mrf.mxu3 }
0x1b1b   :  { %v4783_v54 = vpop.f32.mrf.mxu3 }
0x1b1c   :  { %v8829_v54 = vpack.c.bf16 %v8358_v32, %v8358_v32 }
0x1b2c   :  { %v4800_v48 = vpop.f32.mrf.mxu0 }
0x1b2d   :  { %v4878_v15 = vpack.c.bf16 %v4800_v48, %v4781_v41 }
0x1b2f   :  { %6837 = vmatmul.msk.bf16.vlgmr.msra.gmra.mxu0 %vm502_vm11, %v4878_v15 }
0x1b34   :  { %v4802_v21 = vpop.f32.mrf.mxu0 }
0x1b35   :  { %v5275_v21 = vsel %vm755_vm12, %v8829_v54, 0 }
0x1b4c   :  { %v4847_v58 = vpop.f32.mrf.mxu2 }
0x1b54   :  { %v4849_v36 = vpop.f32.mrf.mxu2 }
0x1b83   :  { %v4824_v23 = vpop.f32.mrf.mxu1 }
0x1b84   :  { %v4848_v26 = vadd.f32 %v4847_v58, %v4824_v23  ;;  %v8838_v23 = vpack.c.bf16 %v8367_v39, %v8367_v39 }
0x1b86   :  { %v5294_v32 = vsel %vm755_vm12, %v8838_v23, 0 }
0x1b8b   :  { %v4826_v34 = vpop.f32.mrf.mxu1 }
0x1b8c   :  { %v4850_v44 = vadd.f32 %v4849_v36, %v4826_v34 }
0x1b91   :  { %v4871_v12 = vpop.f32.mrf.mxu3 }
0x1b92   :  { %v4876_v27 = vadd.f32 %v4871_v12, %v4848_v26 }
0x1b99   :  { %v4873_v42 = vpop.f32.mrf.mxu3 }
0x1b9a   :  { %v4877_v47 = vadd.f32 %v4873_v42, %v4850_v44 }
0x1bac   :  { %v4897_v3 = vpop.f32.mrf.mxu0 }
0x1bad   :  { %v4902_v33 = vadd.f32 %v4897_v3, %v4876_v27 }
0x1baf   :  { %v8801_v57 = vadd.f32 %v4902_v33, %v8636_v2 }
0x1bb1   :  { %v4908_v38 = vmul.f32 %v8801_v57, %v8801_v57 }
0x1bb3   :  { %v4910_v53 = vsel %vm259_vm3, %v4908_v38, 0.0 }
0x1bb4   :  { %v4899_v61 = vpop.f32.mrf.mxu0  ;;  %4911 = vadd.xlane.f32.xlu2 %v4910_v53 }
0x1bb5   :  { %v4903_v30 = vadd.f32 %v4899_v61, %v4877_v47 }
0x1bb7   :  { %v8807_v49 = vadd.f32 %v4903_v30, %v8642_v6 }
0x1bb9   :  { %v4909_v46 = vmul.f32 %v8807_v49, %v8807_v49 }
0x1bbb   :  { %v4913_v2 = vsel %vm259_vm3, %v4909_v46, 0.0 }
0x1bbc   :  { %4914 = vadd.xlane.f32.xlu0 %v4913_v2 }
0x1bd0   :  { %2509 = vrot.lane.b32.xlu0 %v8776_v43, %s7617_s0 }
0x1bd8   :  { %2513 = vrot.lane.b32.xlu0 %v8776_v43, %s7619_s28 }
0x1be0   :  { %2515 = vrot.lane.b32.xlu0 %v8763_v9, %s7619_s28 }
0x1c27   :  { %v4912_v50 = vpop.xlane.xlu2 %4911 }
0x1c28   :  { %v4916_v14 = vmul.f32 %v4912_v50, %v7829_v37 }
0x1c2a   :  { %v4918_v6 = vadd.f32 1e-06, %v4916_v14 }
0x1c2c   :  { %7468 = vrsqrt.f32 %v4918_v6  ;;  %vm4926_vm2 = vweird.f32 %v4918_v6 }
0x1c2f   :  { %v4915_v31 = vpop.xlane.xlu0 %4914 }
0x1c30   :  { %v4917_v18 = vmul.f32 %v4915_v31, %v7829_v37 }
0x1c32   :  { %v7469_v59 = vpop.eup %7468  ;;  %v4919_v55 = vadd.f32 1e-06, %v4917_v18 }
0x1c33   :  { %v4921_v22 = vmul.f32 %v7469_v59, %v4918_v6  ;;  %vm4927_vm1 = vweird.f32 %v7469_v59 }
0x1c34   :  { %7470 = vrsqrt.f32 %v4919_v55  ;;  %vm4928_vm4 = vmor %vm4926_vm2, %vm4927_vm1  ;;  %vm4936_vm6 = vweird.f32 %v4919_v55 }
0x1c35   :  { %v4922_v52 = vmul.f32 %v7469_v59, %v4921_v22 }
0x1c37   :  { %v4923_v28 = vmul.f32 0.5, %v4922_v52 }
0x1c39   :  { %v4924_v40 = vsub.f32 1.5, %v4923_v28 }
0x1c3a   :  { %v7471_v19 = vpop.eup %7470 }
0x1c3b   :  { %v4931_v45 = vmul.f32 %v7471_v19, %v4919_v55  ;;  %v4925_v60 = vmul.f32 %v7469_v59, %v4924_v40  ;;  %vm4937_vm5 = vweird.f32 %v7471_v19 }
0x1c3c   :  { %vm4938_vm7 = vmor %vm4936_vm6, %vm4937_vm5 }
0x1c3d   :  { %v4932_v56 = vmul.f32 %v7471_v19, %v4931_v45  ;;  %v4929_v63 = vsel %vm4928_vm4, %v7469_v59, %v4925_v60 }
0x1c3e   :  { %v4940_v5 = vmul.f32 %v4929_v63, %v8801_v57 }
0x1c3f   :  { %v4933_v0 = vmul.f32 0.5, %v4932_v56 }
0x1c40   :  { %v4945_v17 = vmul.f32 %v7255_v11, %v4940_v5 }
0x1c41   :  { %v4934_v25 = vsub.f32 1.5, %v4933_v0 }
0x1c42   :  { %v2510_v16 = vpop.permute.xlu0 %2509 }
0x1c43   :  { %v4935_v8 = vmul.f32 %v7471_v19, %v4934_v25  ;;  %v5065_v1 = vsel %vm502_vm11, %v2510_v16, 0 }
0x1c44   :  { %5074 = vmatpush.bf16.xpose.msrb.mxu0 %v5065_v1 }
0x1c45   :  { %v4939_v4 = vsel %vm4938_vm7, %v7471_v19, %v4935_v8 }
0x1c46   :  { %v4941_v10 = vmul.f32 %v4939_v4, %v8807_v49 }
0x1c48   :  { %v4946_v24 = vmul.f32 %v7255_v11, %v4941_v10 }
0x1c4a   :  { %v4947_v20 = vpack.c.bf16 %v4946_v24, %v4945_v17  ;;  %v2514_v62 = vpop.permute.xlu0 %2513 }
0x1c4b   :  { %v5103_v7 = vsel %vm502_vm11, %v2514_v62, 0 }
0x1c4c   :  { %6863 = vmatmul.msk.bf16.vlgmr.msrb.gmra.mxu1 %vm259_vm3, %v4947_v20  ;;  %5112 = vmatpush.bf16.xpose.msra.mxu2 %v5103_v7 }
0x1c52   :  { %v2516_v29 = vpop.permute.xlu0 %2515 }
0x1c53   :  { %v5122_v41 = vsel %vm502_vm11, %v2516_v29, 0 }
0x1c54   :  { %5131 = vmatpush.bf16.xpose.msra.mxu3 %v5122_v41 }
0x1cc9   :  { %v4993_v48 = vpop.f32.mrf.mxu1 }
0x1cca   :  { %v4998_v15 = vpack.c.bf16 %v4993_v48, %v4993_v48 }
0x1ccc   :  { %5006 = vrot.lane.b32.xlu0 %v4998_v15, %s7619_s28  ;;  %5002 = vrot.lane.b32.xlu2 %v4998_v15, %s7617_s0 }
0x1ccd   :  { %6872 = vmatmul.msk.bf16.vlgmr.msrb.gmra.mxu2 %vm502_vm11, %v4998_v15 }
0x1cce   :  { %5284 = vmatpush.bf16.msrb.mxu2 %v5275_v21 }
0x1cd1   :  { %v4995_v58 = vpop.f32.mrf.mxu1 }
0x1cd2   :  { %v4999_v12 = vpack.c.bf16 %v4995_v58, %v4995_v58 }
0x1cd4   :  { %2517 = vrot.lane.b32.xlu0 %v8776_v43, %s7618_s5  ;;  %5012 = vrot.lane.b32.xlu2 %v4999_v12, %s7618_s5 }
0x1cd5   :  { %5004 = vrot.lane.b32.xlu1 %v4999_v12, %s7617_s0  ;;  %6873 = vmatmul.msk.bf16.vlgmr.msrb.gmra.mxu3 %vm502_vm11, %v4999_v12 }
0x1cd6   :  { %5303 = vmatpush.bf16.msrb.mxu3 %v5294_v32 }
0x1cdc   :  { %5010 = vrot.lane.b32.xlu0 %v4998_v15, %s7618_s5 }
0x1cdd   :  { %5008 = vrot.lane.b32.xlu1 %v4999_v12, %s7619_s28 }
0x1ce5   :  { %2519 = vrot.lane.b32.xlu1 %v8763_v9, %s7618_s5 }
0x1ced   :  { %2572 = vrot.lane.b32.xlu1 %v8829_v54, %s7617_s0 }
0x1d26   :  { %v5003_v39 = vpop.permute.xlu2 %5002 }
0x1d27   :  { %6874 = vmatmul.msk.bf16.vlgmr.msrb.gmra.mxu0 %vm502_vm11, %v5003_v39 }
0x1d2e   :  { %v5013_v46 = vpop.permute.xlu2 %5012 }
0x1d3e   :  { %v5007_v43 = vpop.permute.xlu0 %5006 }
0x1d3f   :  { %6876 = vmatmul.msk.bf16.vlgmr.msra.gmra.mxu2 %vm502_vm11, %v5007_v43 }
0x1d46   :  { %v2518_v26 = vpop.permute.xlu0 %2517 }
0x1d47   :  { %v5005_v27 = vpop.permute.xlu1 %5004  ;;  %v5141_v3 = vsel %vm502_vm11, %v2518_v26, 0 }
0x1d48   :  { %6875 = vmatmul.msk.bf16.vlgmr.msra.gmra.mxu1 %vm502_vm11, %v5005_v27  ;;  %5150 = vmatpush.bf16.xpose.msra.mxu0 %v5141_v3 }
0x1d4e   :  { %v5011_v33 = vpop.permute.xlu0 %5010 }
0x1d4f   :  { %v5009_v34 = vpop.permute.xlu1 %5008  ;;  %6878 = vmatmul.msk.bf16.vlgmr.msra.gmra.mxu0 %vm502_vm11, %v5011_v33 }
0x1d50   :  { %v5038_v9 = vpop.f32.mrf.mxu2  ;;  %6877 = vmatmul.msk.bf16.vlgmr.msra.gmra.mxu3 %vm502_vm11, %v5009_v34 }
0x1d51   :  { %v5039_v36 = vadd.f32 %v5038_v9, %v7870_v35 }
0x1d53   :  { %v5175_v42 = vsel %vm655_vm13, %v5039_v36, -inf }
0x1d54   :  { %5176 = vmax.xlane.f32.xlu1 %v5175_v42 }
0x1d57   :  { %v2520_v44 = vpop.permute.xlu1 %2519 }
0x1d58   :  { %v5160_v38 = vsel %vm502_vm11, %v2520_v44, 0  ;;  %v5040_v47 = vpop.f32.mrf.mxu2  ;;  %v5057_v53 = vpop.f32.mrf.mxu3 }
0x1d59   :  { %v5058_v61 = vadd.f32 %v5057_v53, %v7886_v51  ;;  %5169 = vmatpush.bf16.xpose.msrb.mxu1 %v5160_v38 }
0x1d5b   :  { %v5178_v30 = vsel %vm655_vm13, %v5058_v61, -inf }
0x1d5c   :  { %5179 = vmax.xlane.f32.xlu0 %v5178_v30 }
0x1d5f   :  { %v2573_v2 = vpop.permute.xlu1 %2572 }
0x1d60   :  { %v5313_v50 = vsel %vm755_vm12, %v2573_v2, 0  ;;  %v5059_v14 = vpop.f32.mrf.mxu3  ;;  %6879 = vmatmul.msk.bf16.vlgmr.msrb.gmra.mxu1 %vm502_vm11, %v5013_v46 }
0x1d61   :  { %5322 = vmatpush.bf16.msrb.mxu0 %v5313_v50 }
0x1da4   :  { %v5076_v6 = vpop.f32.mrf.mxu0 }
0x1da5   :  { %v5077_v31 = vadd.f32 %v5076_v6, %v7870_v35 }
0x1da7   :  { %v5181_v18 = vsel %vm655_vm13, %v5077_v31, -inf }
0x1da8   :  { %5182 = vmax.xlane.f32.xlu2 %v5181_v18 }
0x1dac   :  { %v5078_v59 = vpop.f32.mrf.mxu0 }
0x1dc2   :  { %v5114_v55 = vpop.f32.mrf.mxu2 }
0x1dc3   :  { %v5115_v22 = vadd.f32 %v5114_v55, %v7870_v35 }
0x1dc5   :  { %v5095_v52 = vpop.f32.mrf.mxu1  ;;  %v5187_v28 = vsel %vm655_vm13, %v5115_v22, -inf }
0x1dc6   :  { %v5096_v40 = vadd.f32 %v5095_v52, %v7886_v51  ;;  %5188 = vmax.xlane.f32.xlu2 %v5187_v28 }
0x1dc7   :  { %v5177_v45 = vpop.xlane.xlu1 %5176 }
0x1dc8   :  { %v5184_v19 = vsel %vm655_vm13, %v5096_v40, -inf  ;;  %v5199_v0 = vsub.f32 %v5039_v36, %v5177_v45 }
0x1dc9   :  { %5185 = vmax.xlane.f32.xlu1 %v5184_v19 }
0x1dca   :  { %v5116_v60 = vpop.f32.mrf.mxu2  ;;  %v5207_v11 = vmul.f32 1.442695, %v5199_v0 }
0x1dcc   :  { %v5152_v56 = vpop.f32.mrf.mxu0 }
0x1dcd   :  { %v5097_v63 = vpop.f32.mrf.mxu1  ;;  %v8873_v25 = vadd.f32 %v5152_v56, %v7870_v35 }
0x1dcf   :  { %v5180_v16 = vpop.xlane.xlu0 %5179  ;;  %v5193_v8 = vsel %vm655_vm13, %v8873_v25, -inf }
0x1dd0   :  { %v5200_v1 = vsub.f32 %v5058_v61, %v5180_v16 }
0x1dd1   :  { %5194 = vmax.xlane.f32.xlu1 %v5193_v8 }
0x1dd2   :  { %v5209_v5 = vmul.f32 1.442695, %v5200_v1 }
0x1dd3   :  { %v5133_v4 = vpop.f32.mrf.mxu3 }
0x1dd4   :  { %7472 = vpow2.f32 %v5209_v5  ;;  %v5134_v10 = vadd.f32 %v5133_v4, %v7886_v51  ;;  %v5154_v17 = vpop.f32.mrf.mxu0 }
0x1dd5   :  { %7474 = vpow2.f32 %v5207_v11 }
0x1dd6   :  { %v5190_v24 = vsel %vm655_vm13, %v5134_v10, -inf }
0x1dd7   :  { %5191 = vmax.xlane.f32.xlu0 %v5190_v24 }
0x1dda   :  { %v7473_v20 = vpop.eup %7472 }
0x1ddb   :  { %v7475_v35 = vpop.eup %7474  ;;  %v5135_v62 = vpop.f32.mrf.mxu3  ;;  %v5226_v7 = vsel %vm655_vm13, %v7473_v20, 0.0 }
0x1ddc   :  { %5227 = vadd.xlane.f32.xlu1 %v5226_v7  ;;  %v5223_v48 = vsel %vm655_vm13, %v7475_v35, 0.0  ;;  %v7176_v62 = vld [vmem:[%s9034_s6 + $0x20] sm:$0xff] }
0x1ddd   :  { %v5171_v29 = vpop.f32.mrf.mxu1 }
0x1dde   :  { %v5172_v41 = vadd.f32 %v5171_v29, %v7886_v51 }
0x1ddf   :  { %5224 = vadd.xlane.f32.xlu0 %v5223_v48 }
0x1de0   :  { %v5196_v15 = vsel %vm655_vm13, %v5172_v41, -inf }
0x1de1   :  { %5197 = vmax.xlane.f32.xlu2 %v5196_v15 }
0x1de5   :  { %v5173_v21 = vpop.f32.mrf.mxu1 }
0x1df3   :  { %2576 = vrot.lane.b32.xlu0 %v8829_v54, %s7619_s28 }
0x1df5   :  { %2578 = vrot.lane.b32.xlu1 %v8838_v23, %s7619_s28 }
0x1e1b   :  { %v5183_v58 = vpop.xlane.xlu2 %5182 }
0x1e1c   :  { %v5201_v12 = vsub.f32 %v5077_v31, %v5183_v58 }
0x1e1e   :  { %v5211_v32 = vmul.f32 1.442695, %v5201_v12 }
0x1e20   :  { %7476 = vpow2.f32 %v5211_v32 }
0x1e26   :  { %v7477_v39 = vpop.eup %7476 }
0x1e27   :  { %v5229_v51 = vsel %vm655_vm13, %v7477_v39, 0.0 }
0x1e28   :  { %5230 = vadd.xlane.f32.xlu2 %v5229_v51 }
0x1e39   :  { %v5189_v43 = vpop.xlane.xlu2 %5188 }
0x1e3a   :  { %v5203_v26 = vsub.f32 %v5115_v22, %v5189_v43 }
0x1e3c   :  { %v5215_v27 = vmul.f32 1.442695, %v5203_v26  ;;  %v5186_v3 = vpop.xlane.xlu1 %5185 }
0x1e3d   :  { %v5202_v33 = vsub.f32 %v5096_v40, %v5186_v3 }
0x1e3e   :  { %7478 = vpow2.f32 %v5215_v27 }
0x1e3f   :  { %v5213_v34 = vmul.f32 1.442695, %v5202_v33 }
0x1e40   :  { %2574 = vrot.lane.b32.xlu2 %v8838_v23, %s7617_s0 }
0x1e41   :  { %7480 = vpow2.f32 %v5213_v34 }
0x1e44   :  { %v7479_v9 = vpop.eup %7478  ;;  %v5195_v42 = vpop.xlane.xlu1 %5194 }
0x1e45   :  { %v5235_v36 = vsel %vm655_vm13, %v7479_v9, 0.0  ;;  %v5205_v18 = vsub.f32 %v8873_v25, %v5195_v42 }
0x1e46   :  { %5236 = vadd.xlane.f32.xlu0 %v5235_v36 }
0x1e47   :  { %v8891_v44 = vpop.eup %7480  ;;  %v5219_v40 = vmul.f32 1.442695, %v5205_v18 }
0x1e48   :  { %v5232_v61 = vsel %vm655_vm13, %v8891_v44, 0.0 }
0x1e4a   :  { %v5192_v38 = vpop.xlane.xlu0 %5191 }
0x1e4b   :  { %v5204_v47 = vsub.f32 %v5134_v10, %v5192_v38 }
0x1e4d   :  { %v5217_v53 = vmul.f32 1.442695, %v5204_v47 }
0x1e4e   :  { %5233 = vadd.xlane.f32.xlu0 %v5232_v61 }
0x1e4f   :  { %7482 = vpow2.f32 %v5217_v53  ;;  %v5228_v30 = vpop.xlane.xlu1 %5227 }
0x1e50   :  { %7484 = vrcp.f32 %v5228_v30  ;;  %v7177_v30 = vld [vmem:[%s9034_s6 + $0x28] sm:$0xff] }
0x1e52   :  { %v5225_v46 = vpop.xlane.xlu0 %5224 }
0x1e53   :  { %7486 = vrcp.f32 %v5225_v46 }
0x1e54   :  { %v5198_v2 = vpop.xlane.xlu2 %5197 }
0x1e55   :  { %v7483_v50 = vpop.eup %7482  ;;  %v5206_v14 = vsub.f32 %v5172_v41, %v5198_v2  ;;  %v7178_v2 = vld [vmem:[%s9034_s6 + $0x30] sm:$0xff] }
0x1e56   :  { %v7485_v6 = vpop.eup %7484  ;;  %v5238_v31 = vsel %vm655_vm13, %v7483_v50, 0.0 }
0x1e57   :  { %v5256_v59 = vmul.f32 %v7485_v6, %v7473_v20  ;;  %v5221_v55 = vmul.f32 1.442695, %v5206_v14  ;;  %5239 = vadd.xlane.f32.xlu0 %v5238_v31 }
0x1e59   :  { %v7487_v22 = vpop.eup %7486  ;;  %v5264_v52 = vpack.c.bf16 %v5256_v59, %v5256_v59  ;;  %7488 = vpow2.f32 %v5221_v55 }
0x1e5a   :  { %v5255_v28 = vmul.f32 %v7487_v22, %v7475_v35  ;;  %7490 = vpow2.f32 %v5219_v40 }
0x1e5b   :  { %6881 = vmatmul.msk.bf16.vlgmr.msrb.gmra.mxu3 %vm655_vm13, %v5264_v52 }
0x1e5c   :  { %v5263_v19 = vpack.c.bf16 %v5255_v28, %v5255_v28 }
0x1e5e   :  { %6880 = vmatmul.msk.bf16.vlgmr.msrb.gmra.mxu2 %vm655_vm13, %v5263_v19 }
0x1e5f   :  { %v7489_v45 = vpop.eup %7488 }
0x1e60   :  { %v5244_v60 = vsel %vm655_vm13, %v7489_v45, 0.0  ;;  %v7491_v56 = vpop.eup %7490 }
0x1e61   :  { %5245 = vadd.xlane.f32.xlu1 %v5244_v60  ;;  %v5241_v8 = vsel %vm655_vm13, %v7491_v56, 0.0 }
0x1e65   :  { %v2577_v0 = vpop.permute.xlu0 %2576 }
0x1e66   :  { %v5351_v63 = vsel %vm755_vm12, %v2577_v0, 0 }
0x1e67   :  { %v2579_v25 = vpop.permute.xlu1 %2578  ;;  %5360 = vmatpush.bf16.msra.mxu2 %v5351_v63 }
0x1e68   :  { %v5370_v16 = vsel %vm755_vm12, %v2579_v25, 0 }
0x1e69   :  { %5379 = vmatpush.bf16.msra.mxu3 %v5370_v16  ;;  %5242 = vadd.xlane.f32.xlu2 %v5241_v8 }
0x1e6b   :  { %2580 = vrot.lane.b32.xlu0 %v8829_v54, %s7618_s5  ;;  %5441 = vmatpush.bf16.msrb.mxu2 %v7177_v30 }
0x1e6d   :  { %5464 = vmatpush.bf16.msrb.mxu3 %v7176_v62 }
0x1e73   :  { %2582 = vrot.lane.b32.xlu0 %v8838_v23, %s7618_s5 }
0x1e9b   :  { %v5231_v1 = vpop.xlane.xlu2 %5230 }
0x1e9c   :  { %7492 = vrcp.f32 %v5231_v1 }
0x1ea2   :  { %v7493_v11 = vpop.eup %7492 }
0x1ea3   :  { %v5257_v5 = vmul.f32 %v7493_v11, %v7477_v39  ;;  %v2575_v4 = vpop.permute.xlu2 %2574 }
0x1ea4   :  { %v5332_v10 = vsel %vm755_vm12, %v2575_v4, 0 }
0x1ea5   :  { %v5265_v17 = vpack.c.bf16 %v5257_v5, %v5257_v5  ;;  %5341 = vmatpush.bf16.msra.mxu1 %v5332_v10 }
0x1ea7   :  { %6882 = vmatmul.msk.bf16.vlgmr.msrb.gmra.mxu0 %vm655_vm13, %v5265_v17 }
0x1eb9   :  { %v5237_v24 = vpop.xlane.xlu0 %5236 }
0x1eba   :  { %7494 = vrcp.f32 %v5237_v24 }
0x1ec0   :  { %v7495_v20 = vpop.eup %7494 }
0x1ec1   :  { %v5259_v35 = vmul.f32 %v7495_v20, %v7479_v9  ;;  %v5234_v54 = vpop.xlane.xlu0 %5233 }
0x1ec2   :  { %7496 = vrcp.f32 %v5234_v54 }
0x1ec3   :  { %v5267_v23 = vpack.c.bf16 %v5259_v35, %v5259_v35 }
0x1ec5   :  { %6884 = vmatmul.msk.bf16.vlgmr.msra.gmra.mxu2 %vm655_vm13, %v5267_v23 }
0x1ec8   :  { %v7497_v7 = vpop.eup %7496 }
0x1ec9   :  { %v5258_v29 = vmul.f32 %v7497_v7, %v8891_v44 }
0x1eca   :  { %v5240_v41 = vpop.xlane.xlu0 %5239 }
0x1ecb   :  { %v5266_v48 = vpack.c.bf16 %v5258_v29, %v5258_v29  ;;  %7498 = vrcp.f32 %v5240_v41  ;;  %v6943_v29 = vld [vmem:[%s9035_s12 + $0x70] sm:$0xf]  ;;  %v7187_v41 = vld [vmem:[%s9035_s12 + $0x74] sm:$0xf0] }
0x1ecd   :  { %6883 = vmatmul.msk.bf16.vlgmr.msra.gmra.mxu1 %vm655_vm13, %v5266_v48  ;;  %v7186_v48 = vld [vmem:[%s9035_s12 + $0x74] sm:$0xf] }
0x1ed1   :  { %v7499_v15 = vpop.eup %7498 }
0x1ed2   :  { %v5260_v21 = vmul.f32 %v7499_v15, %v7483_v50  ;;  %v7179_v50 = vld [vmem:[%s9034_s6 + $0x38] sm:$0xff]  ;;  %v6944_v15 = vor.u32 %v7187_v41, %v6943_v29 }
0x1ed4   :  { %v5268_v58 = vpack.c.bf16 %v5260_v21, %v5260_v21  ;;  %v5246_v12 = vpop.xlane.xlu1 %5245  ;;  %v6945_v21 = vld [vmem:[%s9035_s12 + $0x78] sm:$0xf0]  ;;  %5623 = vmatpush.bf16.msra.mxu2 %v6944_v15 }
0x1ed5   :  { %7500 = vrcp.f32 %v5246_v12  ;;  %v7185_v12 = vld [vmem:[%s9035_s12 + $0x64] sm:$0xf0] }
0x1ed6   :  { %6885 = vmatmul.msk.bf16.vlgmr.msra.gmra.mxu3 %vm655_vm13, %v5268_v58  ;;  %v6948_v58 = vor.u32 %v7186_v48, %v6945_v21 }
0x1ed8   :  { %5637 = vmatpush.bf16.msra.mxu3 %v6948_v58 }
0x1edb   :  { %v7501_v26 = vpop.eup %7500 }
0x1edc   :  { %v5243_v32 = vpop.xlane.xlu2 %5242  ;;  %v5262_v33 = vmul.f32 %v7501_v26, %v7489_v45  ;;  %v6927_v26 = vld [vmem:[%s9035_s12 + $0x50] sm:$0xf] }
0x1edd   :  { %7502 = vrcp.f32 %v5243_v32  ;;  %v2581_v39 = vpop.permute.xlu0 %2580  ;;  %v7184_v32 = vld [vmem:[%s9035_s12 + $0x64] sm:$0xf] }
0x1ede   :  { %v5389_v51 = vsel %vm755_vm12, %v2581_v39, 0  ;;  %v5305_v43 = vpop.f32.mrf.mxu3  ;;  %v5270_v47 = vpack.c.bf16 %v5262_v33, %v5262_v33 }
0x1edf   :  { %5398 = vmatpush.bf16.msra.mxu0 %v5389_v51  ;;  %v6937_v51 = vld [vmem:[%s9035_s12 + $0x68] sm:$0xf0] }
0x1ee1   :  { %v5286_v27 = vpop.f32.mrf.mxu2 }
0x1ee2   :  { %v5423_v9 = vpack.c.bf16 %v5305_v43, %v5286_v27  ;;  %v6940_v43 = vor.u32 %v7184_v32, %v6937_v51  ;;  %v7183_v27 = vld [vmem:[%s9035_s12 + $0x54] sm:$0xf0] }
0x1ee3   :  { %v7503_v3 = vpop.eup %7502  ;;  %5488 = vmatpush.bf16.msrb.mxu0 %v7178_v2  ;;  %v6928_v33 = vor.u32 %v7183_v27, %v6927_v26 }
0x1ee4   :  { %v5261_v34 = vmul.f32 %v7503_v3, %v7491_v56  ;;  %5638 = vmatpush.bf16.msra.mxu3 %v6940_v43  ;;  %v7182_v3 = vld [vmem:[%s9035_s12 + $0x54] sm:$0xf] }
0x1ee5   :  { %v2583_v36 = vpop.permute.xlu0 %2582 }
0x1ee6   :  { %v5269_v42 = vpack.c.bf16 %v5261_v34, %v5261_v34  ;;  %v5408_v44 = vsel %vm755_vm12, %v2583_v36, 0  ;;  %v5307_v38 = vpop.f32.mrf.mxu3  ;;  %6897 = vmatmul.msk.bf16.vlgmr.msrb.gmra.mxu3 %vm502_vm11, %v5423_v9  ;;  %v6929_v34 = vld [vmem:[%s9035_s12 + $0x58] sm:$0xf0] }
0x1ee7   :  { %5417 = vmatpush.bf16.msrb.mxu1 %v5408_v44  ;;  %v6932_v9 = vor.u32 %v7182_v3, %v6929_v34  ;;  %v7181_v44 = vld [vmem:[%s9035_s12 + $0x44] sm:$0xf0]  ;;  %v7180_v38 = vld [vmem:[%s9035_s12 + $0x44] sm:$0xf] }
0x1ee8   :  { %6886 = vmatmul.msk.bf16.vlgmr.msra.gmra.mxu0 %vm655_vm13, %v5269_v42  ;;  %v6919_v42 = vld [vmem:[%s9035_s12 + $0x40] sm:$0xf] }
0x1ee9   :  { %v5288_v53 = vpop.f32.mrf.mxu2  ;;  %5639 = vmatpush.bf16.msra.mxu3 %v6932_v9 }
0x1eea   :  { %6887 = vmatmul.msk.bf16.vlgmr.msrb.gmra.mxu1 %vm655_vm13, %v5270_v47  ;;  %v6920_v53 = vor.u32 %v7181_v44, %v6919_v42 }
0x1eeb   :  { %5514 = vmatpush.bf16.msra.mxu1 %v7179_v50 }
0x1f24   :  { %v5324_v61 = vpop.f32.mrf.mxu0 }
0x1f2c   :  { %v5326_v46 = vpop.f32.mrf.mxu0 }
0x1f48   :  { %v5362_v14 = vpop.f32.mrf.mxu2 }
0x1f4a   :  { %v5343_v6 = vpop.f32.mrf.mxu1 }
0x1f4b   :  { %v5424_v31 = vpack.c.bf16 %v5343_v6, %v5324_v61  ;;  %v6921_v61 = vld [vmem:[%s9035_s12 + $0x48] sm:$0xf0] }
0x1f4c   :  { %v6924_v30 = vor.u32 %v7180_v38, %v6921_v61 }
0x1f4d   :  { %6892 = vmatmul.msk.bf16.vlgmr.msrb.gmra.mxu2 %vm502_vm11, %v5424_v31 }
0x1f4e   :  { %5640 = vmatpush.bf16.msra.mxu3 %v6924_v30 }
0x1f50   :  { %v5364_v18 = vpop.f32.mrf.mxu2 }
0x1f52   :  { %v5345_v59 = vpop.f32.mrf.mxu1 }
0x1f59   :  { %v5381_v55 = vpop.f32.mrf.mxu3 }
0x1f5a   :  { %v5471_v22 = vpack.c.bf16 %v5381_v55, %v5362_v14 }
0x1f5c   :  { %6902 = vmatmul.msk.bf16.vlgmr.msrb.gmra.mxu0 %vm502_vm11, %v5471_v22 }
0x1f61   :  { %v5383_v52 = vpop.f32.mrf.mxu3 }
0x1f65   :  { %v5400_v28 = vpop.f32.mrf.mxu0 }
0x1f67   :  { %v5419_v40 = vpop.f32.mrf.mxu1 }
0x1f68   :  { %v5497_v19 = vpack.c.bf16 %v5419_v40, %v5400_v28 }
0x1f69   :  { %v5466_v0 = vpop.f32.mrf.mxu3 }
0x1f6a   :  { %6907 = vmatmul.msk.bf16.vlgmr.msra.gmra.mxu1 %vm502_vm11, %v5497_v19 }
0x1f6d   :  { %v5402_v45 = vpop.f32.mrf.mxu0 }
0x1f6f   :  { %v5421_v60 = vpop.f32.mrf.mxu1 }
0x1f71   :  { %v5468_v4 = vpop.f32.mrf.mxu3 }
0x1fd0   :  { %v5443_v56 = vpop.f32.mrf.mxu2 }
0x1fd1   :  { %v5467_v25 = vadd.f32 %v5466_v0, %v5443_v56  ;;  %v7256_v0 = vld [vmem:[%s9036_s1 + $0x1] ss:$0 sm:$0xff] }
0x1fd8   :  { %v5445_v11 = vpop.f32.mrf.mxu2 }
0x1fd9   :  { %v5490_v63 = vpop.f32.mrf.mxu0  ;;  %v5469_v17 = vadd.f32 %v5468_v4, %v5445_v11  ;;  %v7195_v4 = vld [vmem:[%s9037_s2 + $0x78] sm:$0xff] }
0x1fda   :  { %v5495_v16 = vadd.f32 %v5490_v63, %v5467_v25  ;;  %5733 = vmatpush.bf16.msra.mxu0 %v7195_v4 }
0x1fe1   :  { %v5492_v10 = vpop.f32.mrf.mxu0 }
0x1fe2   :  { %v5496_v20 = vadd.f32 %v5492_v10, %v5469_v17  ;;  %v7194_v10 = vld [vmem:[%s9037_s2 + $0x70] sm:$0xff]  ;;  %v7193_v17 = vld [vmem:[%s9037_s2 + $0x68] sm:$0xff] }
0x1fe3   :  { %5734 = vmatpush.bf16.msra.mxu0 %v7194_v10  ;;  %v7257_v10 = vld [vmem:[%s7778_s4] ss:$0 sm:$0xff]  ;;  %s7621_s4 = smov [#allocation2]  }
0x1fe4   :  { %s5930_s7 = sshll.u32 %s7621_s4, 4  ;;  %s5931_s7 = int_to_ptr.vmem [resolvable:$true] %s5930_s7 }
0x1fe7   :  { %v5516_v8 = vpop.f32.mrf.mxu1  ;;  %5735 = vmatpush.bf16.msra.mxu0 %v7193_v17 }
0x1fe8   :  { %v5521_v1 = vadd.f32 %v5516_v8, %v5495_v16 }
0x1fea   :  { %v8926_v5 = vadd.f32 %v5521_v1, %v8801_v57 }
0x1fec   :  { %v5527_v24 = vmul.f32 %v8926_v5, %v8926_v5 }
0x1fee   :  { %v5529_v35 = vsel %vm259_vm3, %v5527_v24, 0.0  ;;  %v7192_v24 = vld [vmem:[%s9037_s2 + $0x60] sm:$0xff] }
0x1fef   :  { %5530 = vadd.xlane.f32.xlu0 %v5529_v35  ;;  %v5518_v54 = vpop.f32.mrf.mxu1  ;;  %5736 = vmatpush.bf16.msra.mxu0 %v7192_v24  ;;  %v7190_v35 = vld [vmem:[%s9037_s2 + $0x50] sm:$0xff] }
0x1ff0   :  { %v5522_v62 = vadd.f32 %v5518_v54, %v5496_v20  ;;  %v7191_v20 = vld [vmem:[%s9037_s2 + $0x58] sm:$0xff]  ;;  %v7189_v54 = vld [vmem:[%s9037_s2 + $0x48] sm:$0xff] }
0x1ff2   :  { %v8932_v57 = vadd.f32 %v5522_v62, %v8807_v49  ;;  %v6935_v49 = vld [vmem:[%s9035_s12 + $0x60] sm:$0xf] }
0x1ff3   :  { %v6936_v39 = vor.u32 %v7185_v12, %v6935_v49  ;;  %5737 = vmatpush.bf16.msra.mxu0 %v7191_v20 }
0x1ff4   :  { %v5528_v23 = vmul.f32 %v8932_v57, %v8932_v57 }
0x1ff5   :  { %5624 = vmatpush.bf16.msra.mxu2 %v6936_v39 }
0x1ff6   :  { %v5532_v7 = vsel %vm259_vm3, %v5528_v23, 0.0  ;;  %v7188_v23 = vld [vmem:[%s9037_s2 + $0x40] sm:$0xff] }
0x1ff7   :  { %5533 = vadd.xlane.f32.xlu2 %v5532_v7  ;;  %5738 = vmatpush.bf16.msra.mxu0 %v7190_v35 }
0x1ff9   :  { %5625 = vmatpush.bf16.msra.mxu2 %v6928_v33 }
0x1ffb   :  { %5739 = vmatpush.bf16.msra.mxu0 %v7189_v54 }
0x1ffd   :  { %5626 = vmatpush.bf16.msra.mxu2 %v6920_v53 }
0x1fff   :  { %5740 = vmatpush.bf16.msra.mxu0 %v7188_v23 }
0x2062   :  { %v5531_v36 = vpop.xlane.xlu0 %5530 }
0x2063   :  { %v5535_v47 = vmul.f32 %v5531_v36, %v7829_v37 }
0x2065   :  { %v5537_v46 = vadd.f32 1e-06, %v5535_v47 }
0x2067   :  { %7504 = vrsqrt.f32 %v5537_v46  ;;  %vm5545_vm12 = vweird.f32 %v5537_v46 }
0x206a   :  { %v5534_v2 = vpop.xlane.xlu2 %5533 }
0x206b   :  { %v5536_v50 = vmul.f32 %v5534_v2, %v7829_v37 }
0x206d   :  { %v7505_v14 = vpop.eup %7504  ;;  %v5538_v6 = vadd.f32 1e-06, %v5536_v50 }
0x206e   :  { %v5540_v31 = vmul.f32 %v7505_v14, %v5537_v46  ;;  %vm5546_vm11 = vweird.f32 %v7505_v14 }
0x206f   :  { %7506 = vrsqrt.f32 %v5538_v6  ;;  %vm5547_vm13 = vmor %vm5545_vm12, %vm5546_vm11  ;;  %vm5555_vm9 = vweird.f32 %v5538_v6 }
0x2070   :  { %v5541_v18 = vmul.f32 %v7505_v14, %v5540_v31  ;;  %v7199_v31 = vld [vmem:[%s7783_s27 + $0x18] sm:$0xff] }
0x2071   :  { %5829 = vmatpush.bf16.msrb.mxu1 %v7199_v31 }
0x2072   :  { %v5542_v59 = vmul.f32 0.5, %v5541_v18  ;;  %v7198_v18 = vld [vmem:[%s7783_s27 + $0x10] sm:$0xff] }
0x2074   :  { %v5543_v55 = vsub.f32 1.5, %v5542_v59  ;;  %v7197_v59 = vld [vmem:[%s7783_s27 + $0x8] sm:$0xff] }
0x2075   :  { %v7507_v22 = vpop.eup %7506  ;;  %5830 = vmatpush.bf16.msrb.mxu1 %v7198_v18 }
0x2076   :  { %v5550_v52 = vmul.f32 %v7507_v22, %v5538_v6  ;;  %v5544_v28 = vmul.f32 %v7505_v14, %v5543_v55  ;;  %vm5556_vm8 = vweird.f32 %v7507_v22 }
0x2077   :  { %vm5557_vm10 = vmor %vm5555_vm9, %vm5556_vm8 }
0x2078   :  { %v5551_v40 = vmul.f32 %v7507_v22, %v5550_v52  ;;  %v5548_v45 = vsel %vm5547_vm13, %v7505_v14, %v5544_v28 }
0x2079   :  { %v5559_v63 = vmul.f32 %v5548_v45, %v8926_v5  ;;  %5831 = vmatpush.bf16.msrb.mxu1 %v7197_v59 }
0x207a   :  { %v5552_v19 = vmul.f32 0.5, %v5551_v40 }
0x207b   :  { %v5564_v8 = vmul.f32 %v7256_v0, %v5559_v63 }
0x207c   :  { %v5553_v60 = vsub.f32 1.5, %v5552_v19 }
0x207e   :  { %v5554_v56 = vmul.f32 %v7507_v22, %v5553_v60 }
0x2080   :  { %v5558_v25 = vsel %vm5557_vm10, %v7507_v22, %v5554_v56  ;;  %v7196_v22 = vld [vmem:[%s7783_s27] sm:$0xff]  ;;  %s5932_s27 = sshll.u32 %s7788_s29, 4  ;;  %s5933_s27 = int_to_ptr.hbm [resolvable:$true] %s5932_s27 }
0x2081   :  { %v5560_v16 = vmul.f32 %v5558_v25, %v8932_v57  ;;  %5832 = vmatpush.bf16.msrb.mxu1 %v7196_v22  ;;  %s7542_s10 = sshra.s32 %s5933_s27, 4  ;;  %s7543_s10 = int_to_ptr.hbm [resolvable:$true] %s7542_s10 }
0x2082   :  { %s7544_s11 = scalar_lea.hbm %s7543_s10, 16  ;;  %p7547_p1 = scmp.lt.s32.totalorder %s7543_s10, %s7788_s29 }
0x2083   :  { %v5565_v1 = vmul.f32 %v7256_v0, %v5560_v16  ;;  %p7545_p0 = scmp.ne.s32.totalorder %s7543_s10, %s7544_s11  ;;  %p7548_p2 = scmp.lt.s32.totalorder %s7546_s15, %s7544_s11 }
0x2085   :  { %v5566_v11 = vpack.c.bf16 %v5565_v1, %v5564_v8  ;;  %p7549_p3 = por %p7548_p2, %p7547_p1 }
0x2087   :  { %6949 = vmatmul.msk.bf16.vlgmr.msra.gmra.mxu2 %vm259_vm3, %v5566_v11  ;;  %6950 = vmatmul.msk.bf16.vlgmr.msra.gmra.mxu3 %vm259_vm3, %v5566_v11  ;;  %p7550_p4 = pnand %p7549_p3, %p7545_p0 }
0x210a   :  { %v5628_v62 = vpop.f32.mrf.mxu2  ;;  %v5642_v26 = vpop.f32.mrf.mxu3 }
0x210b   :  { %v5647_v7 = vmul.f32 %v5628_v62, %v5628_v62 }
0x210d   :  { %v5649_v29 = vmul.f32 %v5647_v7, %v5628_v62 }
0x210f   :  { %v5651_v41 = vmul.f32 0.044715, %v5649_v29  ;;  %v5841_v29 = vld [vmem:[%s9038_s13] sm:$0xff] }
0x2111   :  { %v5653_v48 = vadd.f32 %v5651_v41, %v5628_v62  ;;  %v5842_v41 = vld [vmem:[%s9038_s13 + $0x8] sm:$0xff] }
0x2112   :  { %v5630_v15 = vpop.f32.mrf.mxu2  ;;  %v5644_v42 = vpop.f32.mrf.mxu3 }
0x2113   :  { %v5655_v21 = vmul.f32 0.7978846, %v5653_v48  ;;  %v5648_v58 = vmul.f32 %v5630_v15, %v5630_v15 }
0x2115   :  { %7508 = vtanh.f32 %v5655_v21  ;;  %v5650_v49 = vmul.f32 %v5648_v58, %v5630_v15 }
0x2117   :  { %v5652_v12 = vmul.f32 0.044715, %v5650_v49 }
0x2119   :  { %v5654_v32 = vadd.f32 %v5652_v12, %v5630_v15 }
0x211b   :  { %v7509_v39 = vpop.eup %7508  ;;  %v5656_v51 = vmul.f32 0.7978846, %v5654_v32 }
0x211c   :  { %v5659_v43 = vadd.f32 1.0, %v7509_v39 }
0x211d   :  { %7510 = vtanh.f32 %v5656_v51  ;;  %v7620_v51 = vmov 0.0  }
0x211e   :  { %v5661_v27 = vmul.f32 0.5, %v5659_v43 }
0x2120   :  { %v5663_v34 = vmul.f32 %v5661_v27, %v5628_v62 }
0x2122   :  { %v5665_v44 = vmul.f32 %v5663_v34, %v5642_v26 }
0x2123   :  { %v7511_v3 = vpop.eup %7510 }
0x2124   :  { %v5660_v33 = vadd.f32 1.0, %v7511_v3 }
0x2126   :  { %v5662_v9 = vmul.f32 0.5, %v5660_v33 }
0x2128   :  { %v5664_v36 = vmul.f32 %v5662_v9, %v5630_v15 }
0x212a   :  { %v5666_v38 = vmul.f32 %v5664_v36, %v5644_v42 }
0x212c   :  { %v5684_v47 = vpack.c.bf16 %v5666_v38, %v5665_v44 }
0x212e   :  { %5741 = vmatmul.bf16.vlgmr.msra.gmra.mxu0 %v5684_v47 }
0x21ab   :  { %v5742_v53 = vpop.f32.mrf.mxu0 }
0x21ac   :  { %v5747_v61 = vadd.f32 %v5742_v53, %v8926_v5 }
0x21ae   :  { %v5750_v30 = vmul.f32 %v5747_v61, %v5747_v61 }
0x21b0   :  { %v5752_v46 = vsel %vm259_vm3, %v5750_v30, 0.0 }
0x21b1   :  { %5753 = vadd.xlane.f32.xlu1 %v5752_v46 }
0x21b3   :  { %v5744_v2 = vpop.f32.mrf.mxu0 }
0x21b4   :  { %v5748_v50 = vadd.f32 %v5744_v2, %v8932_v57 }
0x21b6   :  { %v5751_v14 = vmul.f32 %v5748_v50, %v5748_v50 }
0x21b8   :  { %v5755_v6 = vsel %vm259_vm3, %v5751_v14, 0.0 }
0x21b9   :  { %5756 = vadd.xlane.f32.xlu2 %v5755_v6 }
0x2224   :  { %v5754_v55 = vpop.xlane.xlu1 %5753 }
0x2225   :  { %v5758_v5 = vmul.f32 %v5754_v55, %v7829_v37 }
0x2227   :  { %v5760_v52 = vadd.f32 1e-06, %v5758_v5 }
0x2229   :  { %7512 = vrsqrt.f32 %v5760_v52  ;;  %vm5768_vm15 = vweird.f32 %v5760_v52 }
0x222c   :  { %v5757_v28 = vpop.xlane.xlu2 %5756 }
0x222d   :  { %v5759_v57 = vmul.f32 %v5757_v28, %v7829_v37 }
0x222f   :  { %v7513_v40 = vpop.eup %7512  ;;  %v5761_v19 = vadd.f32 1e-06, %v5759_v57 }
0x2230   :  { %v5763_v45 = vmul.f32 %v7513_v40, %v5760_v52  ;;  %vm5769_vm14 = vweird.f32 %v7513_v40 }
0x2231   :  { %7514 = vrsqrt.f32 %v5761_v19  ;;  %vm5770_vm0 = vmor %vm5768_vm15, %vm5769_vm14  ;;  %vm5778_vm2 = vweird.f32 %v5761_v19 }
0x2232   :  { %v5764_v60 = vmul.f32 %v7513_v40, %v5763_v45 }
0x2234   :  { %v5765_v56 = vmul.f32 0.5, %v5764_v60 }
0x2236   :  { %v5766_v0 = vsub.f32 1.5, %v5765_v56 }
0x2237   :  { %v7515_v63 = vpop.eup %7514 }
0x2238   :  { %v5773_v25 = vmul.f32 %v7515_v63, %v5761_v19  ;;  %v5767_v16 = vmul.f32 %v7513_v40, %v5766_v0  ;;  %vm5779_vm1 = vweird.f32 %v7515_v63 }
0x2239   :  { %vm5780_vm4 = vmor %vm5778_vm2, %vm5779_vm1 }
0x223a   :  { %v5774_v8 = vmul.f32 %v7515_v63, %v5773_v25  ;;  %v5771_v11 = vsel %vm5770_vm0, %v7513_v40, %v5767_v16 }
0x223b   :  { %v5782_v17 = vmul.f32 %v5771_v11, %v5747_v61 }
0x223c   :  { %v5775_v1 = vmul.f32 0.5, %v5774_v8 }
0x223d   :  { %v5787_v35 = vmul.f32 %v7257_v10, %v5782_v17 }
0x223e   :  { %v5776_v4 = vsub.f32 1.5, %v5775_v1 }
0x2240   :  { %v5777_v37 = vmul.f32 %v7515_v63, %v5776_v4 }
0x2242   :  { %v5781_v24 = vsel %vm5780_vm4, %v7515_v63, %v5777_v37 }
0x2243   :  { %v5783_v20 = vmul.f32 %v5781_v24, %v5748_v50 }
0x2245   :  { %v5788_v54 = vmul.f32 %v7257_v10, %v5783_v20 }
0x2247   :  { %v5797_v62 = vpack.c.bf16 %v5788_v54, %v5787_v35 }
0x2249   :  { %7015 = vmatmul.msk.bf16.vlgmr.msrb.gmra.mxu1 %vm259_vm3, %v5797_v62 }
0x22c6   :  { %v5834_v23 = vpop.f32.mrf.mxu1 }
0x22c7   :  { %5839 = vst [vmem:[#allocation2] sm:$0xff] %v5834_v23  ;;  %5843 = vmax.xlane.f32.xlu1 %v5834_v23 }
0x22ce   :  { %v5836_v7 = vpop.f32.mrf.mxu1 }
0x22cf   :  { %5840 = vst [vmem:[#allocation2 + $0x8] sm:$0xff] %v5836_v7  ;;  %5845 = vmax.xlane.f32.xlu2 %v5836_v7 }
0x22e0   :  { %5862 = vperm.xlu1 %7244, %v5841_v29  }
0x22e7   :  { %5865 = vperm.xlu2 %7245, %v5842_v41  }
0x233a   :  { %v5844_v48 = vpop.xlane.xlu1 %5843 }
0x233b   :  { %v5847_v15 = vsub.f32 %v5834_v23, %v5844_v48 }
0x233d   :  { %v5849_v21 = vmul.f32 1.442695, %v5847_v15 }
0x233f   :  { %7516 = vpow2.f32 %v5849_v21 }
0x2342   :  { %v5846_v58 = vpop.xlane.xlu2 %5845 }
0x2343   :  { %v5848_v49 = vsub.f32 %v5836_v7, %v5846_v58 }
0x2345   :  { %v7517_v12 = vpop.eup %7516  ;;  %v5851_v32 = vmul.f32 1.442695, %v5848_v49 }
0x2346   :  { %5853 = vadd.xlane.f32.xlu0 %v7517_v12 }
0x2347   :  { %7518 = vpow2.f32 %v5851_v32 }
0x234a   :  { %v5866_v39 = vpop.permute.xlu2 %5865 }
0x234b   :  { %vm5868_vm3 = vcmp.eq.s32.totalorder %v7805_v13, %v5866_v39 }
0x234c   :  { %v7017_v43 = vsel %vm5868_vm3, 1.0, %v7620_v51 }
0x234d   :  { %v7519_v26 = vpop.eup %7518  ;;  %v5874_v27 = vmul.f32 %v7017_v43, %v5848_v49 }
0x234e   :  { %5855 = vadd.xlane.f32.xlu0 %v7519_v26 }
0x234f   :  { %5877 = vadd.xlane.f32.xlu2 %v5874_v27 }
0x2352   :  { %v5863_v3 = vpop.permute.xlu1 %5862 }
0x2353   :  { %vm5867_vm5 = vcmp.eq.s32.totalorder %v7805_v13, %v5863_v3 }
0x2354   :  { %v7016_v33 = vsel %vm5867_vm5, 1.0, %v7620_v51 }
0x2355   :  { %v5873_v34 = vmul.f32 %v7016_v33, %v5847_v15 }
0x2357   :  { %5875 = vadd.xlane.f32.xlu0 %v5873_v34 }
0x2358   :  { %7553 = shalt.err (!%p7550_p4)
}
0x2359   :  { %s7622_s16 = smov 128   ;;  %s7623_s18 = smov 8   ;;  %vm5882_vm6 = vcmp.ne.s32.totalorder %v5842_v41, 4294967196  ;;  %vm5881_vm7 = vcmp.ne.s32.totalorder %v5841_v29, 4294967196  ;;  %vm5889_vm11 = vcmask 7168   ;;  %vm5924_vm10 = vcmask 0  }
0x235a   :  { %5938 = dma.vmem_to_hbm [thread:$0]  %s5931_s7, 256, %s5933_s27, [#allocation3], %s7622_s16, %s7622_s16, %s7623_s18   ;;  %v7019_v13 = vsel %vm5882_vm6, 1.0, %v7620_v51  ;;  %v7018_v9 = vsel %vm5881_vm7, 1.0, %v7620_v51 }
0x235b   :  { %v5900_v36 = vsel %vm5889_vm11, %v7019_v13, 0.0  ;;  %v5899_v42 = vsel %vm5889_vm11, %v7018_v9, 0.0  ;;  %s7624_s29 = smov [#allocation4]   ;;  %s5946_s23 = sshll.u32 %s7793_s20, 4  ;;  %s5947_s23 = int_to_ptr.hbm [resolvable:$true] %s5946_s23 }
0x235c   :  { %v5901_v44 = vadd.f32 %v5900_v36, %v5899_v42  ;;  %s5944_s22 = sshll.u32 %s7624_s29, 4  ;;  %s7566_s26 = sshra.s32 %s5947_s23, 4  ;;  %s5945_s22 = int_to_ptr.vmem [resolvable:$true] %s5944_s22  ;;  %s7567_s26 = int_to_ptr.hbm [resolvable:$true] %s7566_s26 }
0x235d   :  { %s7568_s0 = scalar_lea.hbm %s7567_s26, 1  ;;  %s7570_s5 = scalar_lea.hbm %s7793_s20, 1 }
0x235e   :  { %v5902_v38 = vrot.slane %v5901_v44, 4  ;;  %p7569_p5 = scmp.ne.s32.totalorder %s7567_s26, %s7568_s0  ;;  %p7571_p6 = scmp.lt.s32.totalorder %s7567_s26, %s7793_s20 }
0x235f   :  { %p7572_p7 = scmp.lt.s32.totalorder %s7570_s5, %s7568_s0 }
0x2360   :  { %v5903_v47 = vadd.f32 %v5902_v38, %v5901_v44 }
0x2361   :  { %p7573_p8 = por %p7572_p7, %p7571_p6 }
0x2362   :  { %v5904_v53 = vrot.slane %v5903_v47, 2 }
0x2363   :  { %p7574_p9 = pnand %p7573_p8, %p7569_p5 }
0x2364   :  { %v5905_v61 = vadd.f32 %v5904_v53, %v5903_v47 }
0x2366   :  { %v5906_v30 = vrot.slane %v5905_v61, 1 }
0x2368   :  { %v5907_v46 = vadd.f32 %v5906_v30, %v5905_v61 }
0x236a   :  { %v5908_v50 = vmax.f32 %v5907_v46, 1.0 }
0x236c   :  { %7520 = vrcp.f32 %v5908_v50  ;;  %vm5914_vm12 = vweird.f32 %v5908_v50  ;;  %v5920_v16 = vand.u32 2147483648, %v5908_v50  ;;  %v5918_v11 = vand.u32 2147483647, %v5908_v50 }
0x236e   :  { %v5921_v37 = vor.u32 1.1754944e-38, %v5920_v16  ;;  %vm5919_vm9 = vcmp.eq.f32.partialorder %v5918_v11, 8.507059e+37 }
0x2372   :  { %v7521_v6 = vpop.eup %7520 }
0x2373   :  { %v5910_v59 = vmul.f32 %v7521_v6, %v5908_v50  ;;  %vm5915_vm13 = vweird.f32 %v7521_v6 }
0x2374   :  { %vm5916_vm8 = vmor %vm5914_vm12, %vm5915_vm13 }
0x2375   :  { %v5911_v40 = vsub.f32 1.0, %v5910_v59 }
0x2377   :  { %v5912_v63 = vmul.f32 %v7521_v6, %v5911_v40 }
0x2379   :  { %v5913_v1 = vadd.f32 %v7521_v6, %v5912_v63 }
0x237b   :  { %v5917_v17 = vsel %vm5916_vm8, %v7521_v6, %v5913_v1 }
0x237c   :  { %v5922_v20 = vsel %vm5919_vm9, %v5921_v37, %v5917_v17 }
0x23b9   :  { %v5854_v2 = vpop.xlane.xlu0 %5853 }
0x23ba   :  { %7522 = vlog2.f32 %v5854_v2 }
0x23c0   :  { %v7523_v31 = vpop.eup %7522 }
0x23c1   :  { %v5856_v14 = vpop.xlane.xlu0 %5855  ;;  %v5858_v55 = vmul.f32 0.6931472, %v7523_v31 }
0x23c2   :  { %7524 = vlog2.f32 %v5856_v14  ;;  %v5878_v22 = vpop.xlane.xlu2 %5877 }
0x23c8   :  { %v7525_v18 = vpop.eup %7524 }
0x23c9   :  { %v5860_v5 = vmul.f32 0.6931472, %v7525_v18 }
0x23ca   :  { %v5876_v52 = vpop.xlane.xlu0 %5875 }
0x23cb   :  { %v5880_v28 = vsub.f32 %v5860_v5, %v5878_v22  ;;  %v5879_v57 = vsub.f32 %v5858_v55, %v5876_v52 }
0x23cd   :  { %v5888_v19 = vmul.f32 %v7019_v13, %v5880_v28  ;;  %v5887_v45 = vmul.f32 %v7018_v9, %v5879_v57 }
0x23cf   :  { %v5891_v60 = vsel %vm5889_vm11, %v5888_v19, 0.0  ;;  %v5890_v56 = vsel %vm5889_vm11, %v5887_v45, 0.0 }
0x23d0   :  { %v5892_v0 = vadd.f32 %v5891_v60, %v5890_v56 }
0x23d2   :  { %v5893_v25 = vrot.slane %v5892_v0, 4 }
0x23d4   :  { %v5894_v8 = vadd.f32 %v5893_v25, %v5892_v0 }
0x23d6   :  { %v5895_v4 = vrot.slane %v5894_v8, 2 }
0x23d8   :  { %v5896_v10 = vadd.f32 %v5895_v4, %v5894_v8 }
0x23da   :  { %v5897_v24 = vrot.slane %v5896_v10, 1 }
0x23dc   :  { %v5898_v35 = vadd.f32 %v5897_v24, %v5896_v10 }
0x23de   :  { %v5923_v54 = vmul.f32 %v5922_v20, %v5898_v35 }
0x23e0   :  { %5925 = vst.msk [vmem:[#allocation4] sm:$0x1] %vm5924_vm10, %v5923_v54 }
0x23e1   :  { %7577 = shalt.err (!%p7574_p9)
}
0x23e2   :  { %5949 = dma.vmem_to_hbm [thread:$0]  %s5945_s22, 16, %s5947_s23, [#allocation5]  }
0x23e3   :  { %7578 = dma.done.wait [#allocation3], 256  }
0x23e4   :  { %7579 = vsyncadd [#allocation3], 4294967040 }
0x23e5   :  { %7580 = dma.done.wait [#allocation5], 16  }
0x23e6   :  { %7581 = vsyncadd [#allocation5], 4294967280 }
0x23e7   :  { %5958 = vsyncpa [#allocation3], 1 }
0x23e8   :  { %5959 = vsyncpa [#allocation5], 1 }

</bundles_post_ra>
